<compile_context>
chip_gen: v7x
topology: tpu7x:2x2x1
jax: 0.10.0
libtpu: 0.0.40
codegen_flags: <defaults>
</compile_context>

<pallas_src>
import functools
import math

import jax
import jax.numpy as jnp
from jax import lax
from jax.experimental import pallas as pl
from jax.experimental.pallas import tpu as pltpu


_MM_DTYPE = jnp.bfloat16        # matmul operand / weight-storage dtype (f32 accumulate)
_SCAN_CHUNK = 16                # time steps per selective-scan chunk (sublane aligned)

_CPARAMS = pltpu.CompilerParams(
    dimension_semantics=("parallel",),
    vmem_limit_bytes=64 * 1024 * 1024,
)


def _mm(a, b):
    return jnp.dot(a.astype(_MM_DTYPE), b.astype(_MM_DTYPE),
                   preferred_element_type=jnp.float32)


def _silu(x):
    # x * sigmoid(x); reciprocal goes to the EUP slot instead of a VALU divide
    return x * pl.reciprocal(1.0 + jnp.exp(-x), approx=True)


def _softplus(x):
    return jnp.maximum(x, 0.0) + jnp.log1p(jnp.exp(-jnp.abs(x)))


def _shift_down(v, d):
    # result[t] = v[t-d], zeros for t < d   (causal / left tap)
    T, C = v.shape
    return jnp.concatenate([jnp.zeros((d, C), v.dtype), v[:T - d, :]], axis=0)


def _shift_up(v, d):
    # result[t] = v[t+d], zeros for t >= T-d   (right tap)
    T, C = v.shape
    return jnp.concatenate([v[d:, :], jnp.zeros((d, C), v.dtype)], axis=0)


# ----------------------------------------------------------------------------- #
# Kernel 1: stage core = conv_1x1 + dilated conv chain + concat + conv_1x1_output
#           (taps built with register-level sublane shifts, no pad scratch)
# ----------------------------------------------------------------------------- #
def _stage_core_kernel(x_ref, w1x1_ref, b1x1_ref,
                       w1_ref, b1_ref, w2_ref, b2_ref, w3_ref, b3_ref,
                       wc0_ref, wc1_ref, wc2_ref, wc3_ref, bc_ref, o_ref):
    x = x_ref[...]                                            # (T, dim)
    f0 = _mm(x, w1x1_ref[...]) + b1x1_ref[...]                # (T, com)

    def dilconv(v, w_ref_, b_ref_, d):
        # "same" dilated conv, k=3, padding=d, dilation=d:
        #   out[t] = b + w0*v[t-d] + w1*v[t] + w2*v[t+d]
        return (b_ref_[...]
                + _mm(_shift_down(v, d), w_ref_[0])
                + _mm(v, w_ref_[1])
                + _mm(_shift_up(v, d), w_ref_[2]))

    x1 = dilconv(f0, w1_ref, b1_ref, 2)                       # (T, base)
    x2 = dilconv(x1, w2_ref, b2_ref, 4)
    x3 = dilconv(x2, w3_ref, b3_ref, 8)

    # concat([f0,x1,x2,x3]) @ W == f0@W0 + x1@W1 + x2@W2 + x3@W3
    o_ref[...] = (_mm(f0, wc0_ref[...]) + _mm(x1, wc1_ref[...])
                  + _mm(x2, wc2_ref[...]) + _mm(x3, wc3_ref[...])
                  + bc_ref[...])


def stage_core(x, p):
    # x: (B, T, dim) -> (B, T, com)
    B, T, dim = x.shape
    com = p["conv_1x1_w"].shape[1]
    base = p["conv1_w"].shape[2]
    return pl.pallas_call(
        _stage_core_kernel,
        out_shape=jax.ShapeDtypeStruct((B, T, com), jnp.float32),
        grid=(B,),
        in_specs=[
            pl.BlockSpec((None, T, dim), lambda i: (i, 0, 0)),
            pl.BlockSpec((dim, com), lambda i: (0, 0)),
            pl.BlockSpec((1, com), lambda i: (0, 0)),
            pl.BlockSpec((3, com, base), lambda i: (0, 0, 0)),
            pl.BlockSpec((1, base), lambda i: (0, 0)),
            pl.BlockSpec((3, base, base), lambda i: (0, 0, 0)),
            pl.BlockSpec((1, base), lambda i: (0, 0)),
            pl.BlockSpec((3, base, base), lambda i: (0, 0, 0)),
            pl.BlockSpec((1, base), lambda i: (0, 0)),
            pl.BlockSpec((com, com), lambda i: (0, 0)),
            pl.BlockSpec((base, com), lambda i: (0, 0)),
            pl.BlockSpec((base, com), lambda i: (0, 0)),
            pl.BlockSpec((base, com), lambda i: (0, 0)),
            pl.BlockSpec((1, com), lambda i: (0, 0)),
        ],
        out_specs=pl.BlockSpec((None, T, com), lambda i: (i, 0, 0)),
        compiler_params=_CPARAMS,
    )(x, p["conv_1x1_w"], p["conv_1x1_b"].reshape(1, -1),
      p["conv1_w"], p["conv1_b"].reshape(1, -1),
      p["conv2_w"], p["conv2_b"].reshape(1, -1),
      p["conv3_w"], p["conv3_b"].reshape(1, -1),
      p["cat_w0"], p["cat_w1"], p["cat_w2"], p["cat_w3"],
      p["conv_1x1_out_b"].reshape(1, -1))


# ----------------------------------------------------------------------------- #
# Kernel 2: fused Mamba block + conv_out
#   in_proj -> causal depthwise conv + SiLU -> merged [dt|B|C] projection (dt_proj
#   folded) -> chunked selective scan (exp hoisted off the h chain) -> gate ->
#   out_proj -> conv_out.  One kernel per batch element; intermediates stay in VMEM.
# ----------------------------------------------------------------------------- #
def _mamba_tail_kernel(u_ref, winx_ref, winz_ref, convw_ref, convb_ref,
                       wdbc_ref, bdt_ref, At_ref, D_ref,
                       wout_ref, wco_ref, bco_ref, o_ref,
                       xc_s, z_s, dbc_s, h_s, *, T, K, Di, Ns, chunk):
    u = u_ref[...]                                            # (T, d_model)
    x_in = _mm(u, winx_ref[...])                              # (T, Di)
    z_s[...] = _mm(u, winz_ref[...])                          # raw z (gate built per chunk)

    # causal depthwise conv (kernel K, groups=Di) + SiLU, taps via sublane shifts
    conv = convb_ref[...]                                     # (1, Di)
    for k in range(K):
        s = K - 1 - k
        tap = x_in if s == 0 else _shift_down(x_in, s)
        conv = conv + tap * convw_ref[k]                      # (T, Di)
    xc = _silu(conv)
    xc_s[...] = xc

    # merged x_proj: [dt | B | C] in one matmul (scan-sensitive -> keep f32)
    dbc_s[...] = jnp.dot(xc, wdbc_ref[...], preferred_element_type=jnp.float32)

    h_s[...] = jnp.zeros_like(h_s)
    At = At_ref[...]                                          # (Ns, Di), = -exp(A_log)^T
    Dv = D_ref[...]                                           # (1, Di)
    bdt = bdt_ref[...]                                        # (1, Di)

    def scan_chunk(off, L):
        x_c = xc_s[pl.ds(off, L), :]                          # (L, Di)
        gate = _silu(z_s[pl.ds(off, L), :])                   # (L, Di)
        dbc_c = dbc_s[pl.ds(off, L), :]                       # (L, Di + 2*Ns)
        dt_c = _softplus(dbc_c[:, :Di] + bdt)                 # (L, Di)
        BcT = dbc_c[:, Di:Di + Ns].T                          # (Ns, L)
        CcT = dbc_c[:, Di + Ns:Di + 2 * Ns].T                 # (Ns, L)

        # hoist the exp off the serial h chain: all L exps stream through the EUP
        dA_all = jnp.exp(dt_c[:, None, :] * At[None, :, :])   # (L, Ns, Di)
        dxu = dt_c * x_c                                      # (L, Di)

        h = h_s[...]                                          # (Ns, Di)
        rows = []
        for t in range(L):
            h = dA_all[t] * h + BcT[:, t:t + 1] * dxu[t:t + 1, :]
            rows.append(jnp.sum(CcT[:, t:t + 1] * h, axis=0, keepdims=True))
        h_s[...] = h
        y_c = rows[0] if L == 1 else jnp.concatenate(rows, axis=0)   # (L, Di)
        # write y back in place over xc (this chunk's xc already fully consumed)
        xc_s[pl.ds(off, L), :] = (y_c + Dv * x_c) * gate

    n_full = T // chunk
    rem = T % chunk
    if n_full > 0:
        def body(c, carry):
            scan_chunk(pl.multiple_of(c * chunk, chunk), chunk)
            return carry
        lax.fori_loop(0, n_full, body, 0,
                      unroll=(2 if n_full % 2 == 0 else 1))
    if rem > 0:
        scan_chunk(n_full * chunk, rem)

    # out_proj then conv_out (1x1) fused — no HBM intermediates
    proj = _mm(xc_s[...], wout_ref[...])                      # (T, d_model)
    o_ref[...] = _mm(proj, wco_ref[...]) + bco_ref[...]       # (T, out_f)


def mamba_stage_tail(x, m, conv_out_w, conv_out_b):
    # x: (B, T, d_model) -> (B, T, out_f)
    B, T, dm = x.shape
    Di, Ns, K = m["d_inner"], m["d_state"], m["d_conv"]
    out_f = conv_out_w.shape[1]
    Ndbc = Di + 2 * Ns
    kernel = functools.partial(_mamba_tail_kernel, T=T, K=K, Di=Di, Ns=Ns,
                               chunk=_SCAN_CHUNK)
    return pl.pallas_call(
        kernel,
        out_shape=jax.ShapeDtypeStruct((B, T, out_f), jnp.float32),
        grid=(B,),
        in_specs=[
            pl.BlockSpec((None, T, dm), lambda i: (i, 0, 0)),
            pl.BlockSpec((dm, Di), lambda i: (0, 0)),          # in_proj (x half)
            pl.BlockSpec((dm, Di), lambda i: (0, 0)),          # in_proj (z half)
            pl.BlockSpec((K, 1, Di), lambda i: (0, 0, 0)),     # depthwise conv weight
            pl.BlockSpec((1, Di), lambda i: (0, 0)),           # depthwise conv bias
            pl.BlockSpec((Di, Ndbc), lambda i: (0, 0)),        # merged [dt|B|C] weight (f32)
            pl.BlockSpec((1, Di), lambda i: (0, 0)),           # dt_proj bias
            pl.BlockSpec((Ns, Di), lambda i: (0, 0)),          # A^T (negated)
            pl.BlockSpec((1, Di), lambda i: (0, 0)),           # D
            pl.BlockSpec((Di, dm), lambda i: (0, 0)),          # out_proj
            pl.BlockSpec((dm, out_f), lambda i: (0, 0)),       # conv_out weight
            pl.BlockSpec((1, out_f), lambda i: (0, 0)),        # conv_out bias
        ],
        out_specs=pl.BlockSpec((None, T, out_f), lambda i: (i, 0, 0)),
        scratch_shapes=[
            pltpu.VMEM((T, Di), jnp.float32),     # xc, then y written in place
            pltpu.VMEM((T, Di), jnp.float32),     # raw z
            pltpu.VMEM((T, Ndbc), jnp.float32),   # [dt|B|C] raw projections
            pltpu.VMEM((Ns, Di), jnp.float32),    # SSM state h
        ],
        compiler_params=_CPARAMS,
    )(x, m["in_x_w"], m["in_z_w"], m["conv_w"], m["conv_b"].reshape(1, -1),
      m["wdbc"], m["dt_b"].reshape(1, -1), m["At"], m["D"].reshape(1, -1),
      m["out_w"], conv_out_w, conv_out_b.reshape(1, -1))


# ----------------------------------------------------------------------------- #
# Kernel 3: classifier — computed transposed so T sits on the lane axis of the
#           output tile (lane-dense stores, no trailing XLA transpose)
# ----------------------------------------------------------------------------- #
def _classify_kernel(x_ref, wt_ref, b_ref, o_ref):
    # o (Cout, T) = W (Cout, Cin) contracted with x (T, Cin) over Cin
    o_ref[...] = lax.dot_general(
        wt_ref[...].astype(_MM_DTYPE), x_ref[...].astype(_MM_DTYPE),
        (((1,), (1,)), ((), ())),
        preferred_element_type=jnp.float32) + b_ref[...]


def classify(x, wt, b):
    # x: (B, T, Cin) -> (B, Cout, T)  (PyTorch NCW output layout, written directly)
    B, T, Cin = x.shape
    Cout = wt.shape[0]
    return pl.pallas_call(
        _classify_kernel,
        out_shape=jax.ShapeDtypeStruct((B, Cout, T), jnp.float32),
        grid=(B,),
        in_specs=[
            pl.BlockSpec((None, T, Cin), lambda i: (i, 0, 0)),
            pl.BlockSpec((Cout, Cin), lambda i: (0, 0)),
            pl.BlockSpec((Cout, 1), lambda i: (0, 0)),
        ],
        out_specs=pl.BlockSpec((None, Cout, T), lambda i: (i, 0, 0)),
        compiler_params=_CPARAMS,
    )(x, wt, b.reshape(-1, 1))


# ----------------------------------------------------------------------------- #
# Model forward (channels-last glue)
# ----------------------------------------------------------------------------- #
def stage_forward(x, p):
    core = stage_core(x, p)                                        # (B, T, com)
    return mamba_stage_tail(core, p["mamba"], p["conv_out_w"], p["conv_out_b"])


def multi_stage_forward(x_nct, params):
    # x_nct: (B, dim, T) — PyTorch NCW layout at the boundary
    x = jnp.transpose(x_nct, (0, 2, 1))                            # -> (B, T, dim)
    for p in params["stages"]:
        x = stage_forward(x, p)
    return classify(x, params["classify_wt"], params["classify_b"])  # (B, num_classes, T)


# ----------------------------------------------------------------------------- #
# deterministic parameter init (shapes follow the PyTorch module __init__);
# matmul weights stored in kernel-ready (transposed) layouts, bf16 where safe;
# the Mamba dt_proj is folded into x_proj and dt/B/C weights are merged (f32).
# ----------------------------------------------------------------------------- #
def _uniform(key, shape, fan_in):
    s = 1.0 / math.sqrt(max(fan_in, 1))
    return jax.random.uniform(key, shape, jnp.float32, minval=-s, maxval=s)


def _w(x):
    return x.astype(_MM_DTYPE)


def init_mamba(key, d_model, d_state=16, d_conv=4, expand=2):
    d_inner = expand * d_model
    dt_rank = math.ceil(d_model / 16)
    ks = jax.random.split(key, 8)
    in_proj_w = _uniform(ks[0], (d_model, 2 * d_inner), d_model)
    conv_w = _uniform(ks[1], (d_conv, 1, d_inner), d_conv)         # [k, 0, c] == torch[c, 0, k]
    conv_b = _uniform(ks[2], (d_inner,), d_conv)
    x_proj_w = _uniform(ks[3], (d_inner, dt_rank + 2 * d_state), d_inner)
    dt_proj_w = _uniform(ks[4], (dt_rank, d_inner), dt_rank)
    dtv = jnp.exp(
        jax.random.uniform(ks[5], (d_inner,), jnp.float32)
        * (math.log(0.1) - math.log(1e-3)) + math.log(1e-3))
    dt_proj_b = jnp.log(jnp.expm1(dtv))                            # inverse softplus
    A_log = jnp.log(jnp.broadcast_to(
        jnp.arange(1, d_state + 1, dtype=jnp.float32), (d_inner, d_state)))
    out_proj_w = _uniform(ks[6], (d_inner, d_model), d_inner)
    dt_w = x_proj_w[:, :dt_rank] @ dt_proj_w                       # fold dt_proj into x_proj
    wdbc = jnp.concatenate(
        [dt_w,
         x_proj_w[:, dt_rank:dt_rank + d_state],
         x_proj_w[:, dt_rank + d_state:]], axis=1)                 # (Di, Di + 2*Ns), f32
    return {
        "d_model": d_model, "d_inner": d_inner, "d_state": d_state,
        "d_conv": d_conv, "dt_rank": dt_rank,
        "in_x_w": _w(in_proj_w[:, :d_inner]),
        "in_z_w": _w(in_proj_w[:, d_inner:]),
        "conv_w": conv_w, "conv_b": conv_b,
        "wdbc": wdbc,                                              # scan-sensitive: f32
        "dt_b": dt_proj_b,
        "At": (-jnp.exp(A_log)).T,                                 # (d_state, d_inner), f32
        "D": jnp.ones((d_inner,), jnp.float32),
        "out_w": _w(out_proj_w),
    }


def init_stage(key, com_factor, dim, out_f):
    base = com_factor // 8
    ks = jax.random.split(key, 13)
    p = {}
    p["conv_1x1_w"] = _w(_uniform(ks[0], (dim, com_factor), dim))
    p["conv_1x1_b"] = _uniform(ks[1], (com_factor,), dim)
    p["conv1_w"] = _w(_uniform(ks[2], (3, com_factor, base), 3 * com_factor))
    p["conv1_b"] = _uniform(ks[3], (base,), 3 * com_factor)
    p["conv2_w"] = _w(_uniform(ks[4], (3, base, base), 3 * base))
    p["conv2_b"] = _uniform(ks[5], (base,), 3 * base)
    p["conv3_w"] = _w(_uniform(ks[6], (3, base, base), 3 * base))
    p["conv3_b"] = _uniform(ks[7], (base,), 3 * base)
    cat_ch = com_factor + 3 * base
    cat_w = _uniform(ks[8], (cat_ch, com_factor), cat_ch)
    p["cat_w0"] = _w(cat_w[:com_factor])
    p["cat_w1"] = _w(cat_w[com_factor:com_factor + base])
    p["cat_w2"] = _w(cat_w[com_factor + base:com_factor + 2 * base])
    p["cat_w3"] = _w(cat_w[com_factor + 2 * base:])
    p["conv_1x1_out_b"] = _uniform(ks[9], (com_factor,), cat_ch)
    p["conv_out_w"] = _w(_uniform(ks[10], (com_factor, out_f), com_factor))
    p["conv_out_b"] = _uniform(ks[11], (out_f,), com_factor)
    p["mamba"] = init_mamba(ks[12], com_factor)
    return p


def init_model(key, num_block, com_factor, dim, num_classes):
    ks = jax.random.split(key, num_block + 1)
    stages = [
        init_stage(ks[s], com_factor, int(dim // 2 ** s), int(dim // 2 ** (s + 1)))
        for s in range(num_block)
    ]
    clf_in = int(dim // 2 ** num_block)
    kw, kb = jax.random.split(ks[-1])
    return {
        "stages": stages,
        "classify_wt": _w(_uniform(kw, (num_classes, clf_in), clf_in)),  # (Cout, Cin)
        "classify_b": _uniform(kb, (num_classes,), clf_in),
    }


# ----------------------------------------------------------------------------- #
if __name__ == "__main__":
    key = jax.random.PRNGKey(0)
    B, T = 2, 16
    num_block, com_factor, dim, num_classes = 2, 32, 16, 4

    kx, kp = jax.random.split(key)
    params = init_model(kp, num_block, com_factor, dim, num_classes)
    x = jax.random.normal(kx, (B, dim, T), jnp.float32)   # PyTorch NCW: (B, dim, T)

    fwd = jax.jit(lambda xx: multi_stage_forward(xx, params))
    out = fwd(x)
    jax.block_until_ready(out)

    assert out.shape == (B, num_classes, T), out.shape
    assert bool(jnp.all(jnp.isfinite(out)))
    print("KERNEL_OK")
</pallas_src>

<mosaic_0001>
module attributes {stable_mosaic.version = 11 : i64} {
  func.func @_mamba_tail_kernel(%arg0: i32, %arg1: memref<1x16x32xf32, #tpu.memory_space<vmem>>, %arg2: memref<32x64xbf16, #tpu.memory_space<vmem>>, %arg3: memref<32x64xbf16, #tpu.memory_space<vmem>>, %arg4: memref<4x1x64xf32, #tpu.memory_space<vmem>>, %arg5: memref<1x64xf32, #tpu.memory_space<vmem>>, %arg6: memref<64x96xf32, #tpu.memory_space<vmem>>, %arg7: memref<1x64xf32, #tpu.memory_space<vmem>>, %arg8: memref<16x64xf32, #tpu.memory_space<vmem>>, %arg9: memref<1x64xf32, #tpu.memory_space<vmem>>, %arg10: memref<64x32xbf16, #tpu.memory_space<vmem>>, %arg11: memref<32x8xbf16, #tpu.memory_space<vmem>>, %arg12: memref<1x8xf32, #tpu.memory_space<vmem>>, %arg13: memref<1x16x8xf32, #tpu.memory_space<vmem>>, %arg14: memref<16x64xf32, #tpu.memory_space<vmem>>, %arg15: memref<16x64xf32, #tpu.memory_space<vmem>>, %arg16: memref<16x96xf32, #tpu.memory_space<vmem>>, %arg17: memref<16x64xf32, #tpu.memory_space<vmem>>) attributes {dimension_semantics = [#tpu.dimension_semantics<parallel>], iteration_bounds = array<i64: 2>, scalar_prefetch = 0 : i64, scratch_operands = 4 : i64, tpu.core_type = #tpu.core_type<tc>, window_params = [{transform_indices = @transform_0, window_bounds = array<i64: 1, 16, 32>}, {pipeline_mode = #tpu.pipeline_mode<synchronous>, transform_indices = @transform_1, window_bounds = array<i64: 32, 64>}, {pipeline_mode = #tpu.pipeline_mode<synchronous>, transform_indices = @transform_2, window_bounds = array<i64: 32, 64>}, {pipeline_mode = #tpu.pipeline_mode<synchronous>, transform_indices = @transform_3, window_bounds = array<i64: 4, 1, 64>}, {pipeline_mode = #tpu.pipeline_mode<synchronous>, transform_indices = @transform_4, window_bounds = array<i64: 1, 64>}, {pipeline_mode = #tpu.pipeline_mode<synchronous>, transform_indices = @transform_5, window_bounds = array<i64: 64, 96>}, {pipeline_mode = #tpu.pipeline_mode<synchronous>, transform_indices = @transform_6, window_bounds = array<i64: 1, 64>}, {pipeline_mode = #tpu.pipeline_mode<synchronous>, transform_indices = @transform_7, window_bounds = array<i64: 16, 64>}, {pipeline_mode = #tpu.pipeline_mode<synchronous>, transform_indices = @transform_8, window_bounds = array<i64: 1, 64>}, {pipeline_mode = #tpu.pipeline_mode<synchronous>, transform_indices = @transform_9, window_bounds = array<i64: 64, 32>}, {pipeline_mode = #tpu.pipeline_mode<synchronous>, transform_indices = @transform_10, window_bounds = array<i64: 32, 8>}, {pipeline_mode = #tpu.pipeline_mode<synchronous>, transform_indices = @transform_11, window_bounds = array<i64: 1, 8>}, {transform_indices = @transform_12, window_bounds = array<i64: 1, 16, 8>}]} {
    %c0 = arith.constant 0 : index
    %c0_0 = arith.constant 0 : index
    %c0_1 = arith.constant 0 : index
    %0 = vector.load %arg1[%c0, %c0_0, %c0_1] : memref<1x16x32xf32, #tpu.memory_space<vmem>>, vector<1x16x32xf32>
    %1 = vector.shape_cast %0 : vector<1x16x32xf32> to vector<16x32xf32>
    %c0_2 = arith.constant 0 : index
    %c0_3 = arith.constant 0 : index
    %2 = vector.load %arg2[%c0_2, %c0_3] : memref<32x64xbf16, #tpu.memory_space<vmem>>, vector<32x64xbf16>
    %3 = arith.truncf %1 : vector<16x32xf32> to vector<16x32xbf16>
    %cst = arith.constant dense<0.000000e+00> : vector<16x64xf32>
    %4 = tpu.matmul %3, %2, %cst {dimension_numbers = #tpu.dot_dimension_numbers<[1], [0], [0], [1], [0, 0, 1, 1], [], []>} : vector<16x32xbf16>, vector<32x64xbf16>, vector<16x64xf32> -> vector<16x64xf32>
    %c0_4 = arith.constant 0 : index
    %c0_5 = arith.constant 0 : index
    %5 = vector.load %arg3[%c0_4, %c0_5] : memref<32x64xbf16, #tpu.memory_space<vmem>>, vector<32x64xbf16>
    %6 = arith.truncf %1 : vector<16x32xf32> to vector<16x32xbf16>
    %cst_6 = arith.constant dense<0.000000e+00> : vector<16x64xf32>
    %7 = tpu.matmul %6, %5, %cst_6 {dimension_numbers = #tpu.dot_dimension_numbers<[1], [0], [0], [1], [0, 0, 1, 1], [], []>} : vector<16x32xbf16>, vector<32x64xbf16>, vector<16x64xf32> -> vector<16x64xf32>
    %c0_7 = arith.constant 0 : index
    %c0_8 = arith.constant 0 : index
    %8 = vector.load %arg15[%c0_7, %c0_8] : memref<16x64xf32, #tpu.memory_space<vmem>>, vector<16x64xf32>
    tpu.vector_store %arg15[%c0_7, %c0_8], %7 {strides = array<i32>} : memref<16x64xf32, #tpu.memory_space<vmem>>, vector<16x64xf32>,
    %c0_9 = arith.constant 0 : index
    %c0_10 = arith.constant 0 : index
    %9 = vector.load %arg5[%c0_9, %c0_10] : memref<1x64xf32, #tpu.memory_space<vmem>>, vector<1x64xf32>
    %cst_11 = arith.constant 0.000000e+00 : f32
    %10 = vector.broadcast %cst_11 : f32 to vector<3x64xf32>
    %11 = vector.extract_strided_slice %4 {offsets = [0, 0], sizes = [13, 64], strides = [1, 1]} : vector<16x64xf32> to vector<13x64xf32>
    %12 = tpu.concatenate %10, %11 in 0 : vector<3x64xf32>, vector<13x64xf32> -> vector<16x64xf32>
    %c0_12 = arith.constant 0 : index
    %c0_13 = arith.constant 0 : index
    %c0_14 = arith.constant 0 : index
    %13 = vector.load %arg4[%c0_12, %c0_13, %c0_14] : memref<4x1x64xf32, #tpu.memory_space<vmem>>, vector<1x1x64xf32>
    %14 = vector.shape_cast %13 : vector<1x1x64xf32> to vector<1x64xf32>
    %15 = vector.broadcast %14 : vector<1x64xf32> to vector<16x64xf32>
    %16 = arith.mulf %12, %15 : vector<16x64xf32>
    %17 = vector.broadcast %9 : vector<1x64xf32> to vector<16x64xf32>
    %18 = arith.addf %17, %16 : vector<16x64xf32>
    %cst_15 = arith.constant 0.000000e+00 : f32
    %19 = vector.broadcast %cst_15 : f32 to vector<2x64xf32>
    %20 = vector.extract_strided_slice %4 {offsets = [0, 0], sizes = [14, 64], strides = [1, 1]} : vector<16x64xf32> to vector<14x64xf32>
    %21 = tpu.concatenate %19, %20 in 0 : vector<2x64xf32>, vector<14x64xf32> -> vector<16x64xf32>
    %c1 = arith.constant 1 : index
    %c0_16 = arith.constant 0 : index
    %c0_17 = arith.constant 0 : index
    %22 = vector.load %arg4[%c1, %c0_16, %c0_17] : memref<4x1x64xf32, #tpu.memory_space<vmem>>, vector<1x1x64xf32>
    %23 = vector.shape_cast %22 : vector<1x1x64xf32> to vector<1x64xf32>
    %24 = vector.broadcast %23 : vector<1x64xf32> to vector<16x64xf32>
    %25 = arith.mulf %21, %24 : vector<16x64xf32>
    %26 = arith.addf %18, %25 : vector<16x64xf32>
    %cst_18 = arith.constant 0.000000e+00 : f32
    %27 = vector.broadcast %cst_18 : f32 to vector<1x64xf32>
    %28 = vector.extract_strided_slice %4 {offsets = [0, 0], sizes = [15, 64], strides = [1, 1]} : vector<16x64xf32> to vector<15x64xf32>
    %29 = tpu.concatenate %27, %28 in 0 : vector<1x64xf32>, vector<15x64xf32> -> vector<16x64xf32>
    %c2 = arith.constant 2 : index
    %c0_19 = arith.constant 0 : index
    %c0_20 = arith.constant 0 : index
    %30 = vector.load %arg4[%c2, %c0_19, %c0_20] : memref<4x1x64xf32, #tpu.memory_space<vmem>>, vector<1x1x64xf32>
    %31 = vector.shape_cast %30 : vector<1x1x64xf32> to vector<1x64xf32>
    %32 = vector.broadcast %31 : vector<1x64xf32> to vector<16x64xf32>
    %33 = arith.mulf %29, %32 : vector<16x64xf32>
    %34 = arith.addf %26, %33 : vector<16x64xf32>
    %c3 = arith.constant 3 : index
    %c0_21 = arith.constant 0 : index
    %c0_22 = arith.constant 0 : index
    %35 = vector.load %arg4[%c3, %c0_21, %c0_22] : memref<4x1x64xf32, #tpu.memory_space<vmem>>, vector<1x1x64xf32>
    %36 = vector.shape_cast %35 : vector<1x1x64xf32> to vector<1x64xf32>
    %37 = vector.broadcast %36 : vector<1x64xf32> to vector<16x64xf32>
    %38 = arith.mulf %4, %37 : vector<16x64xf32>
    %39 = arith.addf %34, %38 : vector<16x64xf32>
    %cst_23 = arith.constant 0.000000e+00 : f32
    %40 = vector.broadcast %cst_23 : f32 to vector<16x64xf32>
    %41 = arith.subf %40, %39 : vector<16x64xf32>
    %42 = math.exp %41 : vector<16x64xf32>
    %cst_24 = arith.constant 1.000000e+00 : f32
    %43 = vector.broadcast %cst_24 : f32 to vector<16x64xf32>
    %44 = arith.addf %43, %42 : vector<16x64xf32>
    %45 = tpu.reciprocal %44 {approx = true} : vector<16x64xf32> -> vector<16x64xf32>
    %46 = arith.mulf %39, %45 : vector<16x64xf32>
    %c0_25 = arith.constant 0 : index
    %c0_26 = arith.constant 0 : index
    %47 = vector.load %arg14[%c0_25, %c0_26] : memref<16x64xf32, #tpu.memory_space<vmem>>, vector<16x64xf32>
    tpu.vector_store %arg14[%c0_25, %c0_26], %46 {strides = array<i32>} : memref<16x64xf32, #tpu.memory_space<vmem>>, vector<16x64xf32>,
    %c0_27 = arith.constant 0 : index
    %c0_28 = arith.constant 0 : index
    %48 = vector.load %arg6[%c0_27, %c0_28] : memref<64x96xf32, #tpu.memory_space<vmem>>, vector<64x96xf32>
    %cst_29 = arith.constant dense<0.000000e+00> : vector<16x96xf32>
    %49 = tpu.matmul %46, %48, %cst_29 {dimension_numbers = #tpu.dot_dimension_numbers<[1], [0], [0], [1], [0, 0, 1, 1], [], []>} : vector<16x64xf32>, vector<64x96xf32>, vector<16x96xf32> -> vector<16x96xf32>
    %c0_30 = arith.constant 0 : index
    %c0_31 = arith.constant 0 : index
    %50 = vector.load %arg16[%c0_30, %c0_31] : memref<16x96xf32, #tpu.memory_space<vmem>>, vector<16x96xf32>
    tpu.vector_store %arg16[%c0_30, %c0_31], %49 {strides = array<i32>} : memref<16x96xf32, #tpu.memory_space<vmem>>, vector<16x96xf32>,
    %cst_32 = arith.constant 0.000000e+00 : f32
    %51 = vector.broadcast %cst_32 : f32 to vector<16x64xf32>
    %c0_33 = arith.constant 0 : index
    %c0_34 = arith.constant 0 : index
    %52 = vector.load %arg17[%c0_33, %c0_34] : memref<16x64xf32, #tpu.memory_space<vmem>>, vector<16x64xf32>
    tpu.vector_store %arg17[%c0_33, %c0_34], %51 {strides = array<i32>} : memref<16x64xf32, #tpu.memory_space<vmem>>, vector<16x64xf32>,
    %c0_35 = arith.constant 0 : index
    %c0_36 = arith.constant 0 : index
    %53 = vector.load %arg8[%c0_35, %c0_36] : memref<16x64xf32, #tpu.memory_space<vmem>>, vector<16x64xf32>
    %c0_37 = arith.constant 0 : index
    %c0_38 = arith.constant 0 : index
    %54 = vector.load %arg9[%c0_37, %c0_38] : memref<1x64xf32, #tpu.memory_space<vmem>>, vector<1x64xf32>
    %c0_39 = arith.constant 0 : index
    %c0_40 = arith.constant 0 : index
    %55 = vector.load %arg7[%c0_39, %c0_40] : memref<1x64xf32, #tpu.memory_space<vmem>>, vector<1x64xf32>
    %c0_i32 = arith.constant 0 : i32
    %c16_i32 = arith.constant 16 : i32
    %56 = arith.muli %c0_i32, %c16_i32 : i32
    %57 = tpu.assume_multiple %56, 16 : i32
    %58 = arith.index_cast %57 : i32 to index
    %c0_41 = arith.constant 0 : index
    %59 = vector.load %arg14[%58, %c0_41] : memref<16x64xf32, #tpu.memory_space<vmem>>, vector<16x64xf32>
    %60 = arith.index_cast %57 : i32 to index
    %c0_42 = arith.constant 0 : index
    %61 = vector.load %arg15[%60, %c0_42] : memref<16x64xf32, #tpu.memory_space<vmem>>, vector<16x64xf32>
    %cst_43 = arith.constant 0.000000e+00 : f32
    %62 = vector.broadcast %cst_43 : f32 to vector<16x64xf32>
    %63 = arith.subf %62, %61 : vector<16x64xf32>
    %64 = math.exp %63 : vector<16x64xf32>
    %cst_44 = arith.constant 1.000000e+00 : f32
    %65 = vector.broadcast %cst_44 : f32 to vector<16x64xf32>
    %66 = arith.addf %65, %64 : vector<16x64xf32>
    %67 = tpu.reciprocal %66 {approx = true} : vector<16x64xf32> -> vector<16x64xf32>
    %68 = arith.mulf %61, %67 : vector<16x64xf32>
    %69 = arith.index_cast %57 : i32 to index
    %c0_45 = arith.constant 0 : index
    %70 = vector.load %arg16[%69, %c0_45] : memref<16x96xf32, #tpu.memory_space<vmem>>, vector<16x96xf32>
    %71 = vector.extract_strided_slice %70 {offsets = [0, 0], sizes = [16, 64], strides = [1, 1]} : vector<16x96xf32> to vector<16x64xf32>
    %72 = vector.broadcast %55 : vector<1x64xf32> to vector<16x64xf32>
    %73 = arith.addf %71, %72 : vector<16x64xf32>
    %cst_46 = arith.constant 0.000000e+00 : f32
    %74 = vector.broadcast %cst_46 : f32 to vector<16x64xf32>
    %75 = arith.maximumf %73, %74 : vector<16x64xf32>
    %76 = math.absf %73 : vector<16x64xf32>
    %cst_47 = arith.constant 0.000000e+00 : f32
    %77 = vector.broadcast %cst_47 : f32 to vector<16x64xf32>
    %78 = arith.subf %77, %76 : vector<16x64xf32>
    %79 = math.exp %78 : vector<16x64xf32>
    %80 = math.log1p %79 : vector<16x64xf32>
    %81 = arith.addf %75, %80 : vector<16x64xf32>
    %82 = vector.extract_strided_slice %70 {offsets = [0, 64], sizes = [16, 16], strides = [1, 1]} : vector<16x96xf32> to vector<16x16xf32>
    %83 = tpu.transpose %82, [1, 0] : vector<16x16xf32> -> vector<16x16xf32>
    %84 = vector.extract_strided_slice %70 {offsets = [0, 80], sizes = [16, 16], strides = [1, 1]} : vector<16x96xf32> to vector<16x16xf32>
    %85 = tpu.transpose %84, [1, 0] : vector<16x16xf32> -> vector<16x16xf32>
    %86 = vector.shape_cast %81 : vector<16x64xf32> to vector<16x1x64xf32>
    %87 = vector.shape_cast %53 : vector<16x64xf32> to vector<1x16x64xf32>
    %88 = vector.broadcast %86 : vector<16x1x64xf32> to vector<16x16x64xf32>
    %89 = vector.broadcast %87 : vector<1x16x64xf32> to vector<16x16x64xf32>
    %90 = arith.mulf %88, %89 : vector<16x16x64xf32>
    %91 = math.exp %90 : vector<16x16x64xf32>
    %92 = arith.mulf %81, %59 : vector<16x64xf32>
    %c0_48 = arith.constant 0 : index
    %c0_49 = arith.constant 0 : index
    %93 = vector.load %arg17[%c0_48, %c0_49] : memref<16x64xf32, #tpu.memory_space<vmem>>, vector<16x64xf32>
    %94 = vector.extract_strided_slice %91 {offsets = [0, 0, 0], sizes = [1, 16, 64], strides = [1, 1, 1]} : vector<16x16x64xf32> to vector<1x16x64xf32>
    %95 = vector.shape_cast %94 : vector<1x16x64xf32> to vector<16x64xf32>
    %96 = arith.mulf %95, %93 : vector<16x64xf32>
    %97 = vector.extract_strided_slice %83 {offsets = [0, 0], sizes = [16, 1], strides = [1, 1]} : vector<16x16xf32> to vector<16x1xf32>
    %98 = vector.extract_strided_slice %92 {offsets = [0, 0], sizes = [1, 64], strides = [1, 1]} : vector<16x64xf32> to vector<1x64xf32>
    %99 = vector.broadcast %97 : vector<16x1xf32> to vector<16x64xf32>
    %100 = vector.broadcast %98 : vector<1x64xf32> to vector<16x64xf32>
    %101 = arith.mulf %99, %100 : vector<16x64xf32>
    %102 = arith.addf %96, %101 : vector<16x64xf32>
    %103 = vector.extract_strided_slice %85 {offsets = [0, 0], sizes = [16, 1], strides = [1, 1]} : vector<16x16xf32> to vector<16x1xf32>
    %104 = vector.broadcast %103 : vector<16x1xf32> to vector<16x64xf32>
    %105 = arith.mulf %104, %102 : vector<16x64xf32>
    %cst_50 = arith.constant dense<0.000000e+00> : vector<64xf32>
    %106 = vector.multi_reduction <add>, %105, %cst_50 [0] : vector<16x64xf32> to vector<64xf32>
    %107 = vector.shape_cast %106 : vector<64xf32> to vector<1x64xf32>
    %108 = vector.extract_strided_slice %91 {offsets = [1, 0, 0], sizes = [1, 16, 64], strides = [1, 1, 1]} : vector<16x16x64xf32> to vector<1x16x64xf32>
    %109 = vector.shape_cast %108 : vector<1x16x64xf32> to vector<16x64xf32>
    %110 = arith.mulf %109, %102 : vector<16x64xf32>
    %111 = vector.extract_strided_slice %83 {offsets = [0, 1], sizes = [16, 1], strides = [1, 1]} : vector<16x16xf32> to vector<16x1xf32>
    %112 = vector.extract_strided_slice %92 {offsets = [1, 0], sizes = [1, 64], strides = [1, 1]} : vector<16x64xf32> to vector<1x64xf32>
    %113 = vector.broadcast %111 : vector<16x1xf32> to vector<16x64xf32>
    %114 = vector.broadcast %112 : vector<1x64xf32> to vector<16x64xf32>
    %115 = arith.mulf %113, %114 : vector<16x64xf32>
    %116 = arith.addf %110, %115 : vector<16x64xf32>
    %117 = vector.extract_strided_slice %85 {offsets = [0, 1], sizes = [16, 1], strides = [1, 1]} : vector<16x16xf32> to vector<16x1xf32>
    %118 = vector.broadcast %117 : vector<16x1xf32> to vector<16x64xf32>
    %119 = arith.mulf %118, %116 : vector<16x64xf32>
    %cst_51 = arith.constant dense<0.000000e+00> : vector<64xf32>
    %120 = vector.multi_reduction <add>, %119, %cst_51 [0] : vector<16x64xf32> to vector<64xf32>
    %121 = vector.shape_cast %120 : vector<64xf32> to vector<1x64xf32>
    %122 = vector.extract_strided_slice %91 {offsets = [2, 0, 0], sizes = [1, 16, 64], strides = [1, 1, 1]} : vector<16x16x64xf32> to vector<1x16x64xf32>
    %123 = vector.shape_cast %122 : vector<1x16x64xf32> to vector<16x64xf32>
    %124 = arith.mulf %123, %116 : vector<16x64xf32>
    %125 = vector.extract_strided_slice %83 {offsets = [0, 2], sizes = [16, 1], strides = [1, 1]} : vector<16x16xf32> to vector<16x1xf32>
    %126 = vector.extract_strided_slice %92 {offsets = [2, 0], sizes = [1, 64], strides = [1, 1]} : vector<16x64xf32> to vector<1x64xf32>
    %127 = vector.broadcast %125 : vector<16x1xf32> to vector<16x64xf32>
    %128 = vector.broadcast %126 : vector<1x64xf32> to vector<16x64xf32>
    %129 = arith.mulf %127, %128 : vector<16x64xf32>
    %130 = arith.addf %124, %129 : vector<16x64xf32>
    %131 = vector.extract_strided_slice %85 {offsets = [0, 2], sizes = [16, 1], strides = [1, 1]} : vector<16x16xf32> to vector<16x1xf32>
    %132 = vector.broadcast %131 : vector<16x1xf32> to vector<16x64xf32>
    %133 = arith.mulf %132, %130 : vector<16x64xf32>
    %cst_52 = arith.constant dense<0.000000e+00> : vector<64xf32>
    %134 = vector.multi_reduction <add>, %133, %cst_52 [0] : vector<16x64xf32> to vector<64xf32>
    %135 = vector.shape_cast %134 : vector<64xf32> to vector<1x64xf32>
    %136 = vector.extract_strided_slice %91 {offsets = [3, 0, 0], sizes = [1, 16, 64], strides = [1, 1, 1]} : vector<16x16x64xf32> to vector<1x16x64xf32>
    %137 = vector.shape_cast %136 : vector<1x16x64xf32> to vector<16x64xf32>
    %138 = arith.mulf %137, %130 : vector<16x64xf32>
    %139 = vector.extract_strided_slice %83 {offsets = [0, 3], sizes = [16, 1], strides = [1, 1]} : vector<16x16xf32> to vector<16x1xf32>
    %140 = vector.extract_strided_slice %92 {offsets = [3, 0], sizes = [1, 64], strides = [1, 1]} : vector<16x64xf32> to vector<1x64xf32>
    %141 = vector.broadcast %139 : vector<16x1xf32> to vector<16x64xf32>
    %142 = vector.broadcast %140 : vector<1x64xf32> to vector<16x64xf32>
    %143 = arith.mulf %141, %142 : vector<16x64xf32>
    %144 = arith.addf %138, %143 : vector<16x64xf32>
    %145 = vector.extract_strided_slice %85 {offsets = [0, 3], sizes = [16, 1], strides = [1, 1]} : vector<16x16xf32> to vector<16x1xf32>
    %146 = vector.broadcast %145 : vector<16x1xf32> to vector<16x64xf32>
    %147 = arith.mulf %146, %144 : vector<16x64xf32>
    %cst_53 = arith.constant dense<0.000000e+00> : vector<64xf32>
    %148 = vector.multi_reduction <add>, %147, %cst_53 [0] : vector<16x64xf32> to vector<64xf32>
    %149 = vector.shape_cast %148 : vector<64xf32> to vector<1x64xf32>
    %150 = vector.extract_strided_slice %91 {offsets = [4, 0, 0], sizes = [1, 16, 64], strides = [1, 1, 1]} : vector<16x16x64xf32> to vector<1x16x64xf32>
    %151 = vector.shape_cast %150 : vector<1x16x64xf32> to vector<16x64xf32>
    %152 = arith.mulf %151, %144 : vector<16x64xf32>
    %153 = vector.extract_strided_slice %83 {offsets = [0, 4], sizes = [16, 1], strides = [1, 1]} : vector<16x16xf32> to vector<16x1xf32>
    %154 = vector.extract_strided_slice %92 {offsets = [4, 0], sizes = [1, 64], strides = [1, 1]} : vector<16x64xf32> to vector<1x64xf32>
    %155 = vector.broadcast %153 : vector<16x1xf32> to vector<16x64xf32>
    %156 = vector.broadcast %154 : vector<1x64xf32> to vector<16x64xf32>
    %157 = arith.mulf %155, %156 : vector<16x64xf32>
    %158 = arith.addf %152, %157 : vector<16x64xf32>
    %159 = vector.extract_strided_slice %85 {offsets = [0, 4], sizes = [16, 1], strides = [1, 1]} : vector<16x16xf32> to vector<16x1xf32>
    %160 = vector.broadcast %159 : vector<16x1xf32> to vector<16x64xf32>
    %161 = arith.mulf %160, %158 : vector<16x64xf32>
    %cst_54 = arith.constant dense<0.000000e+00> : vector<64xf32>
    %162 = vector.multi_reduction <add>, %161, %cst_54 [0] : vector<16x64xf32> to vector<64xf32>
    %163 = vector.shape_cast %162 : vector<64xf32> to vector<1x64xf32>
    %164 = vector.extract_strided_slice %91 {offsets = [5, 0, 0], sizes = [1, 16, 64], strides = [1, 1, 1]} : vector<16x16x64xf32> to vector<1x16x64xf32>
    %165 = vector.shape_cast %164 : vector<1x16x64xf32> to vector<16x64xf32>
    %166 = arith.mulf %165, %158 : vector<16x64xf32>
    %167 = vector.extract_strided_slice %83 {offsets = [0, 5], sizes = [16, 1], strides = [1, 1]} : vector<16x16xf32> to vector<16x1xf32>
    %168 = vector.extract_strided_slice %92 {offsets = [5, 0], sizes = [1, 64], strides = [1, 1]} : vector<16x64xf32> to vector<1x64xf32>
    %169 = vector.broadcast %167 : vector<16x1xf32> to vector<16x64xf32>
    %170 = vector.broadcast %168 : vector<1x64xf32> to vector<16x64xf32>
    %171 = arith.mulf %169, %170 : vector<16x64xf32>
    %172 = arith.addf %166, %171 : vector<16x64xf32>
    %173 = vector.extract_strided_slice %85 {offsets = [0, 5], sizes = [16, 1], strides = [1, 1]} : vector<16x16xf32> to vector<16x1xf32>
    %174 = vector.broadcast %173 : vector<16x1xf32> to vector<16x64xf32>
    %175 = arith.mulf %174, %172 : vector<16x64xf32>
    %cst_55 = arith.constant dense<0.000000e+00> : vector<64xf32>
    %176 = vector.multi_reduction <add>, %175, %cst_55 [0] : vector<16x64xf32> to vector<64xf32>
    %177 = vector.shape_cast %176 : vector<64xf32> to vector<1x64xf32>
    %178 = vector.extract_strided_slice %91 {offsets = [6, 0, 0], sizes = [1, 16, 64], strides = [1, 1, 1]} : vector<16x16x64xf32> to vector<1x16x64xf32>
    %179 = vector.shape_cast %178 : vector<1x16x64xf32> to vector<16x64xf32>
    %180 = arith.mulf %179, %172 : vector<16x64xf32>
    %181 = vector.extract_strided_slice %83 {offsets = [0, 6], sizes = [16, 1], strides = [1, 1]} : vector<16x16xf32> to vector<16x1xf32>
    %182 = vector.extract_strided_slice %92 {offsets = [6, 0], sizes = [1, 64], strides = [1, 1]} : vector<16x64xf32> to vector<1x64xf32>
    %183 = vector.broadcast %181 : vector<16x1xf32> to vector<16x64xf32>
    %184 = vector.broadcast %182 : vector<1x64xf32> to vector<16x64xf32>
    %185 = arith.mulf %183, %184 : vector<16x64xf32>
    %186 = arith.addf %180, %185 : vector<16x64xf32>
    %187 = vector.extract_strided_slice %85 {offsets = [0, 6], sizes = [16, 1], strides = [1, 1]} : vector<16x16xf32> to vector<16x1xf32>
    %188 = vector.broadcast %187 : vector<16x1xf32> to vector<16x64xf32>
    %189 = arith.mulf %188, %186 : vector<16x64xf32>
    %cst_56 = arith.constant dense<0.000000e+00> : vector<64xf32>
    %190 = vector.multi_reduction <add>, %189, %cst_56 [0] : vector<16x64xf32> to vector<64xf32>
    %191 = vector.shape_cast %190 : vector<64xf32> to vector<1x64xf32>
    %192 = vector.extract_strided_slice %91 {offsets = [7, 0, 0], sizes = [1, 16, 64], strides = [1, 1, 1]} : vector<16x16x64xf32> to vector<1x16x64xf32>
    %193 = vector.shape_cast %192 : vector<1x16x64xf32> to vector<16x64xf32>
    %194 = arith.mulf %193, %186 : vector<16x64xf32>
    %195 = vector.extract_strided_slice %83 {offsets = [0, 7], sizes = [16, 1], strides = [1, 1]} : vector<16x16xf32> to vector<16x1xf32>
    %196 = vector.extract_strided_slice %92 {offsets = [7, 0], sizes = [1, 64], strides = [1, 1]} : vector<16x64xf32> to vector<1x64xf32>
    %197 = vector.broadcast %195 : vector<16x1xf32> to vector<16x64xf32>
    %198 = vector.broadcast %196 : vector<1x64xf32> to vector<16x64xf32>
    %199 = arith.mulf %197, %198 : vector<16x64xf32>
    %200 = arith.addf %194, %199 : vector<16x64xf32>
    %201 = vector.extract_strided_slice %85 {offsets = [0, 7], sizes = [16, 1], strides = [1, 1]} : vector<16x16xf32> to vector<16x1xf32>
    %202 = vector.broadcast %201 : vector<16x1xf32> to vector<16x64xf32>
    %203 = arith.mulf %202, %200 : vector<16x64xf32>
    %cst_57 = arith.constant dense<0.000000e+00> : vector<64xf32>
    %204 = vector.multi_reduction <add>, %203, %cst_57 [0] : vector<16x64xf32> to vector<64xf32>
    %205 = vector.shape_cast %204 : vector<64xf32> to vector<1x64xf32>
    %206 = vector.extract_strided_slice %91 {offsets = [8, 0, 0], sizes = [1, 16, 64], strides = [1, 1, 1]} : vector<16x16x64xf32> to vector<1x16x64xf32>
    %207 = vector.shape_cast %206 : vector<1x16x64xf32> to vector<16x64xf32>
    %208 = arith.mulf %207, %200 : vector<16x64xf32>
    %209 = vector.extract_strided_slice %83 {offsets = [0, 8], sizes = [16, 1], strides = [1, 1]} : vector<16x16xf32> to vector<16x1xf32>
    %210 = vector.extract_strided_slice %92 {offsets = [8, 0], sizes = [1, 64], strides = [1, 1]} : vector<16x64xf32> to vector<1x64xf32>
    %211 = vector.broadcast %209 : vector<16x1xf32> to vector<16x64xf32>
    %212 = vector.broadcast %210 : vector<1x64xf32> to vector<16x64xf32>
    %213 = arith.mulf %211, %212 : vector<16x64xf32>
    %214 = arith.addf %208, %213 : vector<16x64xf32>
    %215 = vector.extract_strided_slice %85 {offsets = [0, 8], sizes = [16, 1], strides = [1, 1]} : vector<16x16xf32> to vector<16x1xf32>
    %216 = vector.broadcast %215 : vector<16x1xf32> to vector<16x64xf32>
    %217 = arith.mulf %216, %214 : vector<16x64xf32>
    %cst_58 = arith.constant dense<0.000000e+00> : vector<64xf32>
    %218 = vector.multi_reduction <add>, %217, %cst_58 [0] : vector<16x64xf32> to vector<64xf32>
    %219 = vector.shape_cast %218 : vector<64xf32> to vector<1x64xf32>
    %220 = vector.extract_strided_slice %91 {offsets = [9, 0, 0], sizes = [1, 16, 64], strides = [1, 1, 1]} : vector<16x16x64xf32> to vector<1x16x64xf32>
    %221 = vector.shape_cast %220 : vector<1x16x64xf32> to vector<16x64xf32>
    %222 = arith.mulf %221, %214 : vector<16x64xf32>
    %223 = vector.extract_strided_slice %83 {offsets = [0, 9], sizes = [16, 1], strides = [1, 1]} : vector<16x16xf32> to vector<16x1xf32>
    %224 = vector.extract_strided_slice %92 {offsets = [9, 0], sizes = [1, 64], strides = [1, 1]} : vector<16x64xf32> to vector<1x64xf32>
    %225 = vector.broadcast %223 : vector<16x1xf32> to vector<16x64xf32>
    %226 = vector.broadcast %224 : vector<1x64xf32> to vector<16x64xf32>
    %227 = arith.mulf %225, %226 : vector<16x64xf32>
    %228 = arith.addf %222, %227 : vector<16x64xf32>
    %229 = vector.extract_strided_slice %85 {offsets = [0, 9], sizes = [16, 1], strides = [1, 1]} : vector<16x16xf32> to vector<16x1xf32>
    %230 = vector.broadcast %229 : vector<16x1xf32> to vector<16x64xf32>
    %231 = arith.mulf %230, %228 : vector<16x64xf32>
    %cst_59 = arith.constant dense<0.000000e+00> : vector<64xf32>
    %232 = vector.multi_reduction <add>, %231, %cst_59 [0] : vector<16x64xf32> to vector<64xf32>
    %233 = vector.shape_cast %232 : vector<64xf32> to vector<1x64xf32>
    %234 = vector.extract_strided_slice %91 {offsets = [10, 0, 0], sizes = [1, 16, 64], strides = [1, 1, 1]} : vector<16x16x64xf32> to vector<1x16x64xf32>
    %235 = vector.shape_cast %234 : vector<1x16x64xf32> to vector<16x64xf32>
    %236 = arith.mulf %235, %228 : vector<16x64xf32>
    %237 = vector.extract_strided_slice %83 {offsets = [0, 10], sizes = [16, 1], strides = [1, 1]} : vector<16x16xf32> to vector<16x1xf32>
    %238 = vector.extract_strided_slice %92 {offsets = [10, 0], sizes = [1, 64], strides = [1, 1]} : vector<16x64xf32> to vector<1x64xf32>
    %239 = vector.broadcast %237 : vector<16x1xf32> to vector<16x64xf32>
    %240 = vector.broadcast %238 : vector<1x64xf32> to vector<16x64xf32>
    %241 = arith.mulf %239, %240 : vector<16x64xf32>
    %242 = arith.addf %236, %241 : vector<16x64xf32>
    %243 = vector.extract_strided_slice %85 {offsets = [0, 10], sizes = [16, 1], strides = [1, 1]} : vector<16x16xf32> to vector<16x1xf32>
    %244 = vector.broadcast %243 : vector<16x1xf32> to vector<16x64xf32>
    %245 = arith.mulf %244, %242 : vector<16x64xf32>
    %cst_60 = arith.constant dense<0.000000e+00> : vector<64xf32>
    %246 = vector.multi_reduction <add>, %245, %cst_60 [0] : vector<16x64xf32> to vector<64xf32>
    %247 = vector.shape_cast %246 : vector<64xf32> to vector<1x64xf32>
    %248 = vector.extract_strided_slice %91 {offsets = [11, 0, 0], sizes = [1, 16, 64], strides = [1, 1, 1]} : vector<16x16x64xf32> to vector<1x16x64xf32>
    %249 = vector.shape_cast %248 : vector<1x16x64xf32> to vector<16x64xf32>
    %250 = arith.mulf %249, %242 : vector<16x64xf32>
    %251 = vector.extract_strided_slice %83 {offsets = [0, 11], sizes = [16, 1], strides = [1, 1]} : vector<16x16xf32> to vector<16x1xf32>
    %252 = vector.extract_strided_slice %92 {offsets = [11, 0], sizes = [1, 64], strides = [1, 1]} : vector<16x64xf32> to vector<1x64xf32>
    %253 = vector.broadcast %251 : vector<16x1xf32> to vector<16x64xf32>
    %254 = vector.broadcast %252 : vector<1x64xf32> to vector<16x64xf32>
    %255 = arith.mulf %253, %254 : vector<16x64xf32>
    %256 = arith.addf %250, %255 : vector<16x64xf32>
    %257 = vector.extract_strided_slice %85 {offsets = [0, 11], sizes = [16, 1], strides = [1, 1]} : vector<16x16xf32> to vector<16x1xf32>
    %258 = vector.broadcast %257 : vector<16x1xf32> to vector<16x64xf32>
    %259 = arith.mulf %258, %256 : vector<16x64xf32>
    %cst_61 = arith.constant dense<0.000000e+00> : vector<64xf32>
    %260 = vector.multi_reduction <add>, %259, %cst_61 [0] : vector<16x64xf32> to vector<64xf32>
    %261 = vector.shape_cast %260 : vector<64xf32> to vector<1x64xf32>
    %262 = vector.extract_strided_slice %91 {offsets = [12, 0, 0], sizes = [1, 16, 64], strides = [1, 1, 1]} : vector<16x16x64xf32> to vector<1x16x64xf32>
    %263 = vector.shape_cast %262 : vector<1x16x64xf32> to vector<16x64xf32>
    %264 = arith.mulf %263, %256 : vector<16x64xf32>
    %265 = vector.extract_strided_slice %83 {offsets = [0, 12], sizes = [16, 1], strides = [1, 1]} : vector<16x16xf32> to vector<16x1xf32>
    %266 = vector.extract_strided_slice %92 {offsets = [12, 0], sizes = [1, 64], strides = [1, 1]} : vector<16x64xf32> to vector<1x64xf32>
    %267 = vector.broadcast %265 : vector<16x1xf32> to vector<16x64xf32>
    %268 = vector.broadcast %266 : vector<1x64xf32> to vector<16x64xf32>
    %269 = arith.mulf %267, %268 : vector<16x64xf32>
    %270 = arith.addf %264, %269 : vector<16x64xf32>
    %271 = vector.extract_strided_slice %85 {offsets = [0, 12], sizes = [16, 1], strides = [1, 1]} : vector<16x16xf32> to vector<16x1xf32>
    %272 = vector.broadcast %271 : vector<16x1xf32> to vector<16x64xf32>
    %273 = arith.mulf %272, %270 : vector<16x64xf32>
    %cst_62 = arith.constant dense<0.000000e+00> : vector<64xf32>
    %274 = vector.multi_reduction <add>, %273, %cst_62 [0] : vector<16x64xf32> to vector<64xf32>
    %275 = vector.shape_cast %274 : vector<64xf32> to vector<1x64xf32>
    %276 = vector.extract_strided_slice %91 {offsets = [13, 0, 0], sizes = [1, 16, 64], strides = [1, 1, 1]} : vector<16x16x64xf32> to vector<1x16x64xf32>
    %277 = vector.shape_cast %276 : vector<1x16x64xf32> to vector<16x64xf32>
    %278 = arith.mulf %277, %270 : vector<16x64xf32>
    %279 = vector.extract_strided_slice %83 {offsets = [0, 13], sizes = [16, 1], strides = [1, 1]} : vector<16x16xf32> to vector<16x1xf32>
    %280 = vector.extract_strided_slice %92 {offsets = [13, 0], sizes = [1, 64], strides = [1, 1]} : vector<16x64xf32> to vector<1x64xf32>
    %281 = vector.broadcast %279 : vector<16x1xf32> to vector<16x64xf32>
    %282 = vector.broadcast %280 : vector<1x64xf32> to vector<16x64xf32>
    %283 = arith.mulf %281, %282 : vector<16x64xf32>
    %284 = arith.addf %278, %283 : vector<16x64xf32>
    %285 = vector.extract_strided_slice %85 {offsets = [0, 13], sizes = [16, 1], strides = [1, 1]} : vector<16x16xf32> to vector<16x1xf32>
    %286 = vector.broadcast %285 : vector<16x1xf32> to vector<16x64xf32>
    %287 = arith.mulf %286, %284 : vector<16x64xf32>
    %cst_63 = arith.constant dense<0.000000e+00> : vector<64xf32>
    %288 = vector.multi_reduction <add>, %287, %cst_63 [0] : vector<16x64xf32> to vector<64xf32>
    %289 = vector.shape_cast %288 : vector<64xf32> to vector<1x64xf32>
    %290 = vector.extract_strided_slice %91 {offsets = [14, 0, 0], sizes = [1, 16, 64], strides = [1, 1, 1]} : vector<16x16x64xf32> to vector<1x16x64xf32>
    %291 = vector.shape_cast %290 : vector<1x16x64xf32> to vector<16x64xf32>
    %292 = arith.mulf %291, %284 : vector<16x64xf32>
    %293 = vector.extract_strided_slice %83 {offsets = [0, 14], sizes = [16, 1], strides = [1, 1]} : vector<16x16xf32> to vector<16x1xf32>
    %294 = vector.extract_strided_slice %92 {offsets = [14, 0], sizes = [1, 64], strides = [1, 1]} : vector<16x64xf32> to vector<1x64xf32>
    %295 = vector.broadcast %293 : vector<16x1xf32> to vector<16x64xf32>
    %296 = vector.broadcast %294 : vector<1x64xf32> to vector<16x64xf32>
    %297 = arith.mulf %295, %296 : vector<16x64xf32>
    %298 = arith.addf %292, %297 : vector<16x64xf32>
    %299 = vector.extract_strided_slice %85 {offsets = [0, 14], sizes = [16, 1], strides = [1, 1]} : vector<16x16xf32> to vector<16x1xf32>
    %300 = vector.broadcast %299 : vector<16x1xf32> to vector<16x64xf32>
    %301 = arith.mulf %300, %298 : vector<16x64xf32>
    %cst_64 = arith.constant dense<0.000000e+00> : vector<64xf32>
    %302 = vector.multi_reduction <add>, %301, %cst_64 [0] : vector<16x64xf32> to vector<64xf32>
    %303 = vector.shape_cast %302 : vector<64xf32> to vector<1x64xf32>
    %304 = vector.extract_strided_slice %91 {offsets = [15, 0, 0], sizes = [1, 16, 64], strides = [1, 1, 1]} : vector<16x16x64xf32> to vector<1x16x64xf32>
    %305 = vector.shape_cast %304 : vector<1x16x64xf32> to vector<16x64xf32>
    %306 = arith.mulf %305, %298 : vector<16x64xf32>
    %307 = vector.extract_strided_slice %83 {offsets = [0, 15], sizes = [16, 1], strides = [1, 1]} : vector<16x16xf32> to vector<16x1xf32>
    %308 = vector.extract_strided_slice %92 {offsets = [15, 0], sizes = [1, 64], strides = [1, 1]} : vector<16x64xf32> to vector<1x64xf32>
    %309 = vector.broadcast %307 : vector<16x1xf32> to vector<16x64xf32>
    %310 = vector.broadcast %308 : vector<1x64xf32> to vector<16x64xf32>
    %311 = arith.mulf %309, %310 : vector<16x64xf32>
    %312 = arith.addf %306, %311 : vector<16x64xf32>
    %313 = vector.extract_strided_slice %85 {offsets = [0, 15], sizes = [16, 1], strides = [1, 1]} : vector<16x16xf32> to vector<16x1xf32>
    %314 = vector.broadcast %313 : vector<16x1xf32> to vector<16x64xf32>
    %315 = arith.mulf %314, %312 : vector<16x64xf32>
    %cst_65 = arith.constant dense<0.000000e+00> : vector<64xf32>
    %316 = vector.multi_reduction <add>, %315, %cst_65 [0] : vector<16x64xf32> to vector<64xf32>
    %317 = vector.shape_cast %316 : vector<64xf32> to vector<1x64xf32>
    %c0_66 = arith.constant 0 : index
    %c0_67 = arith.constant 0 : index
    %318 = vector.load %arg17[%c0_66, %c0_67] : memref<16x64xf32, #tpu.memory_space<vmem>>, vector<16x64xf32>
    tpu.vector_store %arg17[%c0_66, %c0_67], %312 {strides = array<i32>} : memref<16x64xf32, #tpu.memory_space<vmem>>, vector<16x64xf32>,
    %319 = tpu.concatenate %107, %121, %135, %149, %163, %177, %191, %205, %219, %233, %247, %261, %275, %289, %303, %317 in 0 : vector<1x64xf32>, vector<1x64xf32>, vector<1x64xf32>, vector<1x64xf32>, vector<1x64xf32>, vector<1x64xf32>, vector<1x64xf32>, vector<1x64xf32>, vector<1x64xf32>, vector<1x64xf32>, vector<1x64xf32>, vector<1x64xf32>, vector<1x64xf32>, vector<1x64xf32>, vector<1x64xf32>, vector<1x64xf32> -> vector<16x64xf32>
    %320 = vector.broadcast %54 : vector<1x64xf32> to vector<16x64xf32>
    %321 = arith.mulf %320, %59 : vector<16x64xf32>
    %322 = arith.addf %319, %321 : vector<16x64xf32>
    %323 = arith.mulf %322, %68 : vector<16x64xf32>
    %324 = arith.index_cast %57 : i32 to index
    %c0_68 = arith.constant 0 : index
    %325 = vector.load %arg14[%324, %c0_68] : memref<16x64xf32, #tpu.memory_space<vmem>>, vector<16x64xf32>
    tpu.vector_store %arg14[%324, %c0_68], %323 {strides = array<i32>} : memref<16x64xf32, #tpu.memory_space<vmem>>, vector<16x64xf32>,
    %c1_i32 = arith.constant 1 : i32
    %c0_69 = arith.constant 0 : index
    %c0_70 = arith.constant 0 : index
    %326 = vector.load %arg14[%c0_69, %c0_70] : memref<16x64xf32, #tpu.memory_space<vmem>>, vector<16x64xf32>
    %c0_71 = arith.constant 0 : index
    %c0_72 = arith.constant 0 : index
    %327 = vector.load %arg10[%c0_71, %c0_72] : memref<64x32xbf16, #tpu.memory_space<vmem>>, vector<64x32xbf16>
    %328 = arith.truncf %326 : vector<16x64xf32> to vector<16x64xbf16>
    %cst_73 = arith.constant dense<0.000000e+00> : vector<16x32xf32>
    %329 = tpu.matmul %328, %327, %cst_73 {dimension_numbers = #tpu.dot_dimension_numbers<[1], [0], [0], [1], [0, 0, 1, 1], [], []>} : vector<16x64xbf16>, vector<64x32xbf16>, vector<16x32xf32> -> vector<16x32xf32>
    %c0_74 = arith.constant 0 : index
    %c0_75 = arith.constant 0 : index
    %330 = vector.load %arg11[%c0_74, %c0_75] : memref<32x8xbf16, #tpu.memory_space<vmem>>, vector<32x8xbf16>
    %331 = arith.truncf %329 : vector<16x32xf32> to vector<16x32xbf16>
    %cst_76 = arith.constant dense<0.000000e+00> : vector<16x8xf32>
    %332 = tpu.matmul %331, %330, %cst_76 {dimension_numbers = #tpu.dot_dimension_numbers<[1], [0], [0], [1], [0, 0, 1, 1], [], []>} : vector<16x32xbf16>, vector<32x8xbf16>, vector<16x8xf32> -> vector<16x8xf32>
    %c0_77 = arith.constant 0 : index
    %c0_78 = arith.constant 0 : index
    %333 = vector.load %arg12[%c0_77, %c0_78] : memref<1x8xf32, #tpu.memory_space<vmem>>, vector<1x8xf32>
    %334 = vector.broadcast %333 : vector<1x8xf32> to vector<16x8xf32>
    %335 = arith.addf %332, %334 : vector<16x8xf32>
    %c0_79 = arith.constant 0 : index
    %c0_80 = arith.constant 0 : index
    %c0_81 = arith.constant 0 : index
    %336 = vector.load %arg13[%c0_79, %c0_80, %c0_81] : memref<1x16x8xf32, #tpu.memory_space<vmem>>, vector<1x16x8xf32>
    %337 = vector.shape_cast %336 : vector<1x16x8xf32> to vector<16x8xf32>
    %338 = vector.shape_cast %335 : vector<16x8xf32> to vector<1x16x8xf32>
    tpu.vector_store %arg13[%c0_79, %c0_80, %c0_81], %338 {strides = array<i32>} : memref<1x16x8xf32, #tpu.memory_space<vmem>>, vector<1x16x8xf32>,
    return
  }
  func.func @transform_0(%arg0: i32) -> (i32, i32, i32) {
    %c0_i32 = arith.constant 0 : i32
    %c0_i32_0 = arith.constant 0 : i32
    %c0_i32_1 = arith.constant 0 : i32
    return %arg0, %c0_i32, %c0_i32_0 : i32, i32, i32
  }
  func.func @transform_1(%arg0: i32) -> (i32, i32) {
    %c0_i32 = arith.constant 0 : i32
    %c0_i32_0 = arith.constant 0 : i32
    %c0_i32_1 = arith.constant 0 : i32
    return %c0_i32, %c0_i32_0 : i32, i32
  }
  func.func @transform_2(%arg0: i32) -> (i32, i32) {
    %c0_i32 = arith.constant 0 : i32
    %c0_i32_0 = arith.constant 0 : i32
    %c0_i32_1 = arith.constant 0 : i32
    return %c0_i32, %c0_i32_0 : i32, i32
  }
  func.func @transform_3(%arg0: i32) -> (i32, i32, i32) {
    %c0_i32 = arith.constant 0 : i32
    %c0_i32_0 = arith.constant 0 : i32
    %c0_i32_1 = arith.constant 0 : i32
    %c0_i32_2 = arith.constant 0 : i32
    return %c0_i32, %c0_i32_0, %c0_i32_1 : i32, i32, i32
  }
  func.func @transform_4(%arg0: i32) -> (i32, i32) {
    %c0_i32 = arith.constant 0 : i32
    %c0_i32_0 = arith.constant 0 : i32
    %c0_i32_1 = arith.constant 0 : i32
    return %c0_i32, %c0_i32_0 : i32, i32
  }
  func.func @transform_5(%arg0: i32) -> (i32, i32) {
    %c0_i32 = arith.constant 0 : i32
    %c0_i32_0 = arith.constant 0 : i32
    %c0_i32_1 = arith.constant 0 : i32
    return %c0_i32, %c0_i32_0 : i32, i32
  }
  func.func @transform_6(%arg0: i32) -> (i32, i32) {
    %c0_i32 = arith.constant 0 : i32
    %c0_i32_0 = arith.constant 0 : i32
    %c0_i32_1 = arith.constant 0 : i32
    return %c0_i32, %c0_i32_0 : i32, i32
  }
  func.func @transform_7(%arg0: i32) -> (i32, i32) {
    %c0_i32 = arith.constant 0 : i32
    %c0_i32_0 = arith.constant 0 : i32
    %c0_i32_1 = arith.constant 0 : i32
    return %c0_i32, %c0_i32_0 : i32, i32
  }
  func.func @transform_8(%arg0: i32) -> (i32, i32) {
    %c0_i32 = arith.constant 0 : i32
    %c0_i32_0 = arith.constant 0 : i32
    %c0_i32_1 = arith.constant 0 : i32
    return %c0_i32, %c0_i32_0 : i32, i32
  }
  func.func @transform_9(%arg0: i32) -> (i32, i32) {
    %c0_i32 = arith.constant 0 : i32
    %c0_i32_0 = arith.constant 0 : i32
    %c0_i32_1 = arith.constant 0 : i32
    return %c0_i32, %c0_i32_0 : i32, i32
  }
  func.func @transform_10(%arg0: i32) -> (i32, i32) {
    %c0_i32 = arith.constant 0 : i32
    %c0_i32_0 = arith.constant 0 : i32
    %c0_i32_1 = arith.constant 0 : i32
    return %c0_i32, %c0_i32_0 : i32, i32
  }
  func.func @transform_11(%arg0: i32) -> (i32, i32) {
    %c0_i32 = arith.constant 0 : i32
    %c0_i32_0 = arith.constant 0 : i32
    %c0_i32_1 = arith.constant 0 : i32
    return %c0_i32, %c0_i32_0 : i32, i32
  }
  func.func @transform_12(%arg0: i32) -> (i32, i32, i32) {
    %c0_i32 = arith.constant 0 : i32
    %c0_i32_0 = arith.constant 0 : i32
    %c0_i32_1 = arith.constant 0 : i32
    return %arg0, %c0_i32, %c0_i32_0 : i32, i32, i32
  }
}

module attributes {stable_mosaic.version = 11 : i64} {
  func.func @_stage_core_kernel(%arg0: i32, %arg1: memref<1x16x16xf32, #tpu.memory_space<vmem>>, %arg2: memref<16x32xbf16, #tpu.memory_space<vmem>>, %arg3: memref<1x32xf32, #tpu.memory_space<vmem>>, %arg4: memref<3x32x4xbf16, #tpu.memory_space<vmem>>, %arg5: memref<1x4xf32, #tpu.memory_space<vmem>>, %arg6: memref<3x4x4xbf16, #tpu.memory_space<vmem>>, %arg7: memref<1x4xf32, #tpu.memory_space<vmem>>, %arg8: memref<3x4x4xbf16, #tpu.memory_space<vmem>>, %arg9: memref<1x4xf32, #tpu.memory_space<vmem>>, %arg10: memref<32x32xbf16, #tpu.memory_space<vmem>>, %arg11: memref<4x32xbf16, #tpu.memory_space<vmem>>, %arg12: memref<4x32xbf16, #tpu.memory_space<vmem>>, %arg13: memref<4x32xbf16, #tpu.memory_space<vmem>>, %arg14: memref<1x32xf32, #tpu.memory_space<vmem>>, %arg15: memref<1x16x32xf32, #tpu.memory_space<vmem>>) attributes {dimension_semantics = [#tpu.dimension_semantics<parallel>], iteration_bounds = array<i64: 2>, scalar_prefetch = 0 : i64, scratch_operands = 0 : i64, tpu.core_type = #tpu.core_type<tc>, window_params = [{transform_indices = @transform_0, window_bounds = array<i64: 1, 16, 16>}, {pipeline_mode = #tpu.pipeline_mode<synchronous>, transform_indices = @transform_1, window_bounds = array<i64: 16, 32>}, {pipeline_mode = #tpu.pipeline_mode<synchronous>, transform_indices = @transform_2, window_bounds = array<i64: 1, 32>}, {pipeline_mode = #tpu.pipeline_mode<synchronous>, transform_indices = @transform_3, window_bounds = array<i64: 3, 32, 4>}, {pipeline_mode = #tpu.pipeline_mode<synchronous>, transform_indices = @transform_4, window_bounds = array<i64: 1, 4>}, {pipeline_mode = #tpu.pipeline_mode<synchronous>, transform_indices = @transform_5, window_bounds = array<i64: 3, 4, 4>}, {pipeline_mode = #tpu.pipeline_mode<synchronous>, transform_indices = @transform_6, window_bounds = array<i64: 1, 4>}, {pipeline_mode = #tpu.pipeline_mode<synchronous>, transform_indices = @transform_7, window_bounds = array<i64: 3, 4, 4>}, {pipeline_mode = #tpu.pipeline_mode<synchronous>, transform_indices = @transform_8, window_bounds = array<i64: 1, 4>}, {pipeline_mode = #tpu.pipeline_mode<synchronous>, transform_indices = @transform_9, window_bounds = array<i64: 32, 32>}, {pipeline_mode = #tpu.pipeline_mode<synchronous>, transform_indices = @transform_10, window_bounds = array<i64: 4, 32>}, {pipeline_mode = #tpu.pipeline_mode<synchronous>, transform_indices = @transform_11, window_bounds = array<i64: 4, 32>}, {pipeline_mode = #tpu.pipeline_mode<synchronous>, transform_indices = @transform_12, window_bounds = array<i64: 4, 32>}, {pipeline_mode = #tpu.pipeline_mode<synchronous>, transform_indices = @transform_13, window_bounds = array<i64: 1, 32>}, {transform_indices = @transform_14, window_bounds = array<i64: 1, 16, 32>}]} {
    %c0 = arith.constant 0 : index
    %c0_0 = arith.constant 0 : index
    %c0_1 = arith.constant 0 : index
    %0 = vector.load %arg1[%c0, %c0_0, %c0_1] : memref<1x16x16xf32, #tpu.memory_space<vmem>>, vector<1x16x16xf32>
    %1 = vector.shape_cast %0 : vector<1x16x16xf32> to vector<16x16xf32>
    %c0_2 = arith.constant 0 : index
    %c0_3 = arith.constant 0 : index
    %2 = vector.load %arg2[%c0_2, %c0_3] : memref<16x32xbf16, #tpu.memory_space<vmem>>, vector<16x32xbf16>
    %3 = arith.truncf %1 : vector<16x16xf32> to vector<16x16xbf16>
    %cst = arith.constant dense<0.000000e+00> : vector<16x32xf32>
    %4 = tpu.matmul %3, %2, %cst {dimension_numbers = #tpu.dot_dimension_numbers<[1], [0], [0], [1], [0, 0, 1, 1], [], []>} : vector<16x16xbf16>, vector<16x32xbf16>, vector<16x32xf32> -> vector<16x32xf32>
    %c0_4 = arith.constant 0 : index
    %c0_5 = arith.constant 0 : index
    %5 = vector.load %arg3[%c0_4, %c0_5] : memref<1x32xf32, #tpu.memory_space<vmem>>, vector<1x32xf32>
    %6 = vector.broadcast %5 : vector<1x32xf32> to vector<16x32xf32>
    %7 = arith.addf %4, %6 : vector<16x32xf32>
    %c0_6 = arith.constant 0 : index
    %c0_7 = arith.constant 0 : index
    %8 = vector.load %arg5[%c0_6, %c0_7] : memref<1x4xf32, #tpu.memory_space<vmem>>, vector<1x4xf32>
    %cst_8 = arith.constant 0.000000e+00 : f32
    %9 = vector.broadcast %cst_8 : f32 to vector<2x32xf32>
    %10 = vector.extract_strided_slice %7 {offsets = [0, 0], sizes = [14, 32], strides = [1, 1]} : vector<16x32xf32> to vector<14x32xf32>
    %11 = tpu.concatenate %9, %10 in 0 : vector<2x32xf32>, vector<14x32xf32> -> vector<16x32xf32>
    %c0_9 = arith.constant 0 : index
    %c0_10 = arith.constant 0 : index
    %c0_11 = arith.constant 0 : index
    %12 = vector.load %arg4[%c0_9, %c0_10, %c0_11] : memref<3x32x4xbf16, #tpu.memory_space<vmem>>, vector<1x32x4xbf16>
    %13 = vector.shape_cast %12 : vector<1x32x4xbf16> to vector<32x4xbf16>
    %14 = arith.truncf %11 : vector<16x32xf32> to vector<16x32xbf16>
    %cst_12 = arith.constant dense<0.000000e+00> : vector<16x4xf32>
    %15 = tpu.matmul %14, %13, %cst_12 {dimension_numbers = #tpu.dot_dimension_numbers<[1], [0], [0], [1], [0, 0, 1, 1], [], []>} : vector<16x32xbf16>, vector<32x4xbf16>, vector<16x4xf32> -> vector<16x4xf32>
    %16 = vector.broadcast %8 : vector<1x4xf32> to vector<16x4xf32>
    %17 = arith.addf %16, %15 : vector<16x4xf32>
    %c1 = arith.constant 1 : index
    %c0_13 = arith.constant 0 : index
    %c0_14 = arith.constant 0 : index
    %18 = vector.load %arg4[%c1, %c0_13, %c0_14] : memref<3x32x4xbf16, #tpu.memory_space<vmem>>, vector<1x32x4xbf16>
    %19 = vector.shape_cast %18 : vector<1x32x4xbf16> to vector<32x4xbf16>
    %20 = arith.truncf %7 : vector<16x32xf32> to vector<16x32xbf16>
    %cst_15 = arith.constant dense<0.000000e+00> : vector<16x4xf32>
    %21 = tpu.matmul %20, %19, %cst_15 {dimension_numbers = #tpu.dot_dimension_numbers<[1], [0], [0], [1], [0, 0, 1, 1], [], []>} : vector<16x32xbf16>, vector<32x4xbf16>, vector<16x4xf32> -> vector<16x4xf32>
    %22 = arith.addf %17, %21 : vector<16x4xf32>
    %23 = vector.extract_strided_slice %7 {offsets = [2, 0], sizes = [14, 32], strides = [1, 1]} : vector<16x32xf32> to vector<14x32xf32>
    %cst_16 = arith.constant 0.000000e+00 : f32
    %24 = vector.broadcast %cst_16 : f32 to vector<2x32xf32>
    %25 = tpu.concatenate %23, %24 in 0 : vector<14x32xf32>, vector<2x32xf32> -> vector<16x32xf32>
    %c2 = arith.constant 2 : index
    %c0_17 = arith.constant 0 : index
    %c0_18 = arith.constant 0 : index
    %26 = vector.load %arg4[%c2, %c0_17, %c0_18] : memref<3x32x4xbf16, #tpu.memory_space<vmem>>, vector<1x32x4xbf16>
    %27 = vector.shape_cast %26 : vector<1x32x4xbf16> to vector<32x4xbf16>
    %28 = arith.truncf %25 : vector<16x32xf32> to vector<16x32xbf16>
    %cst_19 = arith.constant dense<0.000000e+00> : vector<16x4xf32>
    %29 = tpu.matmul %28, %27, %cst_19 {dimension_numbers = #tpu.dot_dimension_numbers<[1], [0], [0], [1], [0, 0, 1, 1], [], []>} : vector<16x32xbf16>, vector<32x4xbf16>, vector<16x4xf32> -> vector<16x4xf32>
    %30 = arith.addf %22, %29 : vector<16x4xf32>
    %c0_20 = arith.constant 0 : index
    %c0_21 = arith.constant 0 : index
    %31 = vector.load %arg7[%c0_20, %c0_21] : memref<1x4xf32, #tpu.memory_space<vmem>>, vector<1x4xf32>
    %cst_22 = arith.constant 0.000000e+00 : f32
    %32 = vector.broadcast %cst_22 : f32 to vector<4x4xf32>
    %33 = vector.extract_strided_slice %30 {offsets = [0, 0], sizes = [12, 4], strides = [1, 1]} : vector<16x4xf32> to vector<12x4xf32>
    %34 = tpu.concatenate %32, %33 in 0 : vector<4x4xf32>, vector<12x4xf32> -> vector<16x4xf32>
    %c0_23 = arith.constant 0 : index
    %c0_24 = arith.constant 0 : index
    %c0_25 = arith.constant 0 : index
    %35 = vector.load %arg6[%c0_23, %c0_24, %c0_25] : memref<3x4x4xbf16, #tpu.memory_space<vmem>>, vector<1x4x4xbf16>
    %36 = vector.shape_cast %35 : vector<1x4x4xbf16> to vector<4x4xbf16>
    %37 = arith.truncf %34 : vector<16x4xf32> to vector<16x4xbf16>
    %cst_26 = arith.constant dense<0.000000e+00> : vector<16x4xf32>
    %38 = tpu.matmul %37, %36, %cst_26 {dimension_numbers = #tpu.dot_dimension_numbers<[1], [0], [0], [1], [0, 0, 1, 1], [], []>} : vector<16x4xbf16>, vector<4x4xbf16>, vector<16x4xf32> -> vector<16x4xf32>
    %39 = vector.broadcast %31 : vector<1x4xf32> to vector<16x4xf32>
    %40 = arith.addf %39, %38 : vector<16x4xf32>
    %c1_27 = arith.constant 1 : index
    %c0_28 = arith.constant 0 : index
    %c0_29 = arith.constant 0 : index
    %41 = vector.load %arg6[%c1_27, %c0_28, %c0_29] : memref<3x4x4xbf16, #tpu.memory_space<vmem>>, vector<1x4x4xbf16>
    %42 = vector.shape_cast %41 : vector<1x4x4xbf16> to vector<4x4xbf16>
    %43 = arith.truncf %30 : vector<16x4xf32> to vector<16x4xbf16>
    %cst_30 = arith.constant dense<0.000000e+00> : vector<16x4xf32>
    %44 = tpu.matmul %43, %42, %cst_30 {dimension_numbers = #tpu.dot_dimension_numbers<[1], [0], [0], [1], [0, 0, 1, 1], [], []>} : vector<16x4xbf16>, vector<4x4xbf16>, vector<16x4xf32> -> vector<16x4xf32>
    %45 = arith.addf %40, %44 : vector<16x4xf32>
    %46 = vector.extract_strided_slice %30 {offsets = [4, 0], sizes = [12, 4], strides = [1, 1]} : vector<16x4xf32> to vector<12x4xf32>
    %cst_31 = arith.constant 0.000000e+00 : f32
    %47 = vector.broadcast %cst_31 : f32 to vector<4x4xf32>
    %48 = tpu.concatenate %46, %47 in 0 : vector<12x4xf32>, vector<4x4xf32> -> vector<16x4xf32>
    %c2_32 = arith.constant 2 : index
    %c0_33 = arith.constant 0 : index
    %c0_34 = arith.constant 0 : index
    %49 = vector.load %arg6[%c2_32, %c0_33, %c0_34] : memref<3x4x4xbf16, #tpu.memory_space<vmem>>, vector<1x4x4xbf16>
    %50 = vector.shape_cast %49 : vector<1x4x4xbf16> to vector<4x4xbf16>
    %51 = arith.truncf %48 : vector<16x4xf32> to vector<16x4xbf16>
    %cst_35 = arith.constant dense<0.000000e+00> : vector<16x4xf32>
    %52 = tpu.matmul %51, %50, %cst_35 {dimension_numbers = #tpu.dot_dimension_numbers<[1], [0], [0], [1], [0, 0, 1, 1], [], []>} : vector<16x4xbf16>, vector<4x4xbf16>, vector<16x4xf32> -> vector<16x4xf32>
    %53 = arith.addf %45, %52 : vector<16x4xf32>
    %c0_36 = arith.constant 0 : index
    %c0_37 = arith.constant 0 : index
    %54 = vector.load %arg9[%c0_36, %c0_37] : memref<1x4xf32, #tpu.memory_space<vmem>>, vector<1x4xf32>
    %cst_38 = arith.constant 0.000000e+00 : f32
    %55 = vector.broadcast %cst_38 : f32 to vector<8x4xf32>
    %56 = vector.extract_strided_slice %53 {offsets = [0, 0], sizes = [8, 4], strides = [1, 1]} : vector<16x4xf32> to vector<8x4xf32>
    %57 = tpu.concatenate %55, %56 in 0 : vector<8x4xf32>, vector<8x4xf32> -> vector<16x4xf32>
    %c0_39 = arith.constant 0 : index
    %c0_40 = arith.constant 0 : index
    %c0_41 = arith.constant 0 : index
    %58 = vector.load %arg8[%c0_39, %c0_40, %c0_41] : memref<3x4x4xbf16, #tpu.memory_space<vmem>>, vector<1x4x4xbf16>
    %59 = vector.shape_cast %58 : vector<1x4x4xbf16> to vector<4x4xbf16>
    %60 = arith.truncf %57 : vector<16x4xf32> to vector<16x4xbf16>
    %cst_42 = arith.constant dense<0.000000e+00> : vector<16x4xf32>
    %61 = tpu.matmul %60, %59, %cst_42 {dimension_numbers = #tpu.dot_dimension_numbers<[1], [0], [0], [1], [0, 0, 1, 1], [], []>} : vector<16x4xbf16>, vector<4x4xbf16>, vector<16x4xf32> -> vector<16x4xf32>
    %62 = vector.broadcast %54 : vector<1x4xf32> to vector<16x4xf32>
    %63 = arith.addf %62, %61 : vector<16x4xf32>
    %c1_43 = arith.constant 1 : index
    %c0_44 = arith.constant 0 : index
    %c0_45 = arith.constant 0 : index
    %64 = vector.load %arg8[%c1_43, %c0_44, %c0_45] : memref<3x4x4xbf16, #tpu.memory_space<vmem>>, vector<1x4x4xbf16>
    %65 = vector.shape_cast %64 : vector<1x4x4xbf16> to vector<4x4xbf16>
    %66 = arith.truncf %53 : vector<16x4xf32> to vector<16x4xbf16>
    %cst_46 = arith.constant dense<0.000000e+00> : vector<16x4xf32>
    %67 = tpu.matmul %66, %65, %cst_46 {dimension_numbers = #tpu.dot_dimension_numbers<[1], [0], [0], [1], [0, 0, 1, 1], [], []>} : vector<16x4xbf16>, vector<4x4xbf16>, vector<16x4xf32> -> vector<16x4xf32>
    %68 = arith.addf %63, %67 : vector<16x4xf32>
    %69 = vector.extract_strided_slice %53 {offsets = [8, 0], sizes = [8, 4], strides = [1, 1]} : vector<16x4xf32> to vector<8x4xf32>
    %cst_47 = arith.constant 0.000000e+00 : f32
    %70 = vector.broadcast %cst_47 : f32 to vector<8x4xf32>
    %71 = tpu.concatenate %69, %70 in 0 : vector<8x4xf32>, vector<8x4xf32> -> vector<16x4xf32>
    %c2_48 = arith.constant 2 : index
    %c0_49 = arith.constant 0 : index
    %c0_50 = arith.constant 0 : index
    %72 = vector.load %arg8[%c2_48, %c0_49, %c0_50] : memref<3x4x4xbf16, #tpu.memory_space<vmem>>, vector<1x4x4xbf16>
    %73 = vector.shape_cast %72 : vector<1x4x4xbf16> to vector<4x4xbf16>
    %74 = arith.truncf %71 : vector<16x4xf32> to vector<16x4xbf16>
    %cst_51 = arith.constant dense<0.000000e+00> : vector<16x4xf32>
    %75 = tpu.matmul %74, %73, %cst_51 {dimension_numbers = #tpu.dot_dimension_numbers<[1], [0], [0], [1], [0, 0, 1, 1], [], []>} : vector<16x4xbf16>, vector<4x4xbf16>, vector<16x4xf32> -> vector<16x4xf32>
    %76 = arith.addf %68, %75 : vector<16x4xf32>
    %c0_52 = arith.constant 0 : index
    %c0_53 = arith.constant 0 : index
    %77 = vector.load %arg10[%c0_52, %c0_53] : memref<32x32xbf16, #tpu.memory_space<vmem>>, vector<32x32xbf16>
    %78 = arith.truncf %7 : vector<16x32xf32> to vector<16x32xbf16>
    %cst_54 = arith.constant dense<0.000000e+00> : vector<16x32xf32>
    %79 = tpu.matmul %78, %77, %cst_54 {dimension_numbers = #tpu.dot_dimension_numbers<[1], [0], [0], [1], [0, 0, 1, 1], [], []>} : vector<16x32xbf16>, vector<32x32xbf16>, vector<16x32xf32> -> vector<16x32xf32>
    %c0_55 = arith.constant 0 : index
    %c0_56 = arith.constant 0 : index
    %80 = vector.load %arg11[%c0_55, %c0_56] : memref<4x32xbf16, #tpu.memory_space<vmem>>, vector<4x32xbf16>
    %81 = arith.truncf %30 : vector<16x4xf32> to vector<16x4xbf16>
    %cst_57 = arith.constant dense<0.000000e+00> : vector<16x32xf32>
    %82 = tpu.matmul %81, %80, %cst_57 {dimension_numbers = #tpu.dot_dimension_numbers<[1], [0], [0], [1], [0, 0, 1, 1], [], []>} : vector<16x4xbf16>, vector<4x32xbf16>, vector<16x32xf32> -> vector<16x32xf32>
    %83 = arith.addf %79, %82 : vector<16x32xf32>
    %c0_58 = arith.constant 0 : index
    %c0_59 = arith.constant 0 : index
    %84 = vector.load %arg12[%c0_58, %c0_59] : memref<4x32xbf16, #tpu.memory_space<vmem>>, vector<4x32xbf16>
    %85 = arith.truncf %53 : vector<16x4xf32> to vector<16x4xbf16>
    %cst_60 = arith.constant dense<0.000000e+00> : vector<16x32xf32>
    %86 = tpu.matmul %85, %84, %cst_60 {dimension_numbers = #tpu.dot_dimension_numbers<[1], [0], [0], [1], [0, 0, 1, 1], [], []>} : vector<16x4xbf16>, vector<4x32xbf16>, vector<16x32xf32> -> vector<16x32xf32>
    %87 = arith.addf %83, %86 : vector<16x32xf32>
    %c0_61 = arith.constant 0 : index
    %c0_62 = arith.constant 0 : index
    %88 = vector.load %arg13[%c0_61, %c0_62] : memref<4x32xbf16, #tpu.memory_space<vmem>>, vector<4x32xbf16>
    %89 = arith.truncf %76 : vector<16x4xf32> to vector<16x4xbf16>
    %cst_63 = arith.constant dense<0.000000e+00> : vector<16x32xf32>
    %90 = tpu.matmul %89, %88, %cst_63 {dimension_numbers = #tpu.dot_dimension_numbers<[1], [0], [0], [1], [0, 0, 1, 1], [], []>} : vector<16x4xbf16>, vector<4x32xbf16>, vector<16x32xf32> -> vector<16x32xf32>
    %91 = arith.addf %87, %90 : vector<16x32xf32>
    %c0_64 = arith.constant 0 : index
    %c0_65 = arith.constant 0 : index
    %92 = vector.load %arg14[%c0_64, %c0_65] : memref<1x32xf32, #tpu.memory_space<vmem>>, vector<1x32xf32>
    %93 = vector.broadcast %92 : vector<1x32xf32> to vector<16x32xf32>
    %94 = arith.addf %91, %93 : vector<16x32xf32>
    %c0_66 = arith.constant 0 : index
    %c0_67 = arith.constant 0 : index
    %c0_68 = arith.constant 0 : index
    %95 = vector.load %arg15[%c0_66, %c0_67, %c0_68] : memref<1x16x32xf32, #tpu.memory_space<vmem>>, vector<1x16x32xf32>
    %96 = vector.shape_cast %95 : vector<1x16x32xf32> to vector<16x32xf32>
    %97 = vector.shape_cast %94 : vector<16x32xf32> to vector<1x16x32xf32>
    tpu.vector_store %arg15[%c0_66, %c0_67, %c0_68], %97 {strides = array<i32>} : memref<1x16x32xf32, #tpu.memory_space<vmem>>, vector<1x16x32xf32>,
    return
  }
  func.func @transform_0(%arg0: i32) -> (i32, i32, i32) {
    %c0_i32 = arith.constant 0 : i32
    %c0_i32_0 = arith.constant 0 : i32
    %c0_i32_1 = arith.constant 0 : i32
    return %arg0, %c0_i32, %c0_i32_0 : i32, i32, i32
  }
  func.func @transform_1(%arg0: i32) -> (i32, i32) {
    %c0_i32 = arith.constant 0 : i32
    %c0_i32_0 = arith.constant 0 : i32
    %c0_i32_1 = arith.constant 0 : i32
    return %c0_i32, %c0_i32_0 : i32, i32
  }
  func.func @transform_2(%arg0: i32) -> (i32, i32) {
    %c0_i32 = arith.constant 0 : i32
    %c0_i32_0 = arith.constant 0 : i32
    %c0_i32_1 = arith.constant 0 : i32
    return %c0_i32, %c0_i32_0 : i32, i32
  }
  func.func @transform_3(%arg0: i32) -> (i32, i32, i32) {
    %c0_i32 = arith.constant 0 : i32
    %c0_i32_0 = arith.constant 0 : i32
    %c0_i32_1 = arith.constant 0 : i32
    %c0_i32_2 = arith.constant 0 : i32
    return %c0_i32, %c0_i32_0, %c0_i32_1 : i32, i32, i32
  }
  func.func @transform_4(%arg0: i32) -> (i32, i32) {
    %c0_i32 = arith.constant 0 : i32
    %c0_i32_0 = arith.constant 0 : i32
    %c0_i32_1 = arith.constant 0 : i32
    return %c0_i32, %c0_i32_0 : i32, i32
  }
  func.func @transform_5(%arg0: i32) -> (i32, i32, i32) {
    %c0_i32 = arith.constant 0 : i32
    %c0_i32_0 = arith.constant 0 : i32
    %c0_i32_1 = arith.constant 0 : i32
    %c0_i32_2 = arith.constant 0 : i32
    return %c0_i32, %c0_i32_0, %c0_i32_1 : i32, i32, i32
  }
  func.func @transform_6(%arg0: i32) -> (i32, i32) {
    %c0_i32 = arith.constant 0 : i32
    %c0_i32_0 = arith.constant 0 : i32
    %c0_i32_1 = arith.constant 0 : i32
    return %c0_i32, %c0_i32_0 : i32, i32
  }
  func.func @transform_7(%arg0: i32) -> (i32, i32, i32) {
    %c0_i32 = arith.constant 0 : i32
    %c0_i32_0 = arith.constant 0 : i32
    %c0_i32_1 = arith.constant 0 : i32
    %c0_i32_2 = arith.constant 0 : i32
    return %c0_i32, %c0_i32_0, %c0_i32_1 : i32, i32, i32
  }
  func.func @transform_8(%arg0: i32) -> (i32, i32) {
    %c0_i32 = arith.constant 0 : i32
    %c0_i32_0 = arith.constant 0 : i32
    %c0_i32_1 = arith.constant 0 : i32
    return %c0_i32, %c0_i32_0 : i32, i32
  }
  func.func @transform_9(%arg0: i32) -> (i32, i32) {
    %c0_i32 = arith.constant 0 : i32
    %c0_i32_0 = arith.constant 0 : i32
    %c0_i32_1 = arith.constant 0 : i32
    return %c0_i32, %c0_i32_0 : i32, i32
  }
  func.func @transform_10(%arg0: i32) -> (i32, i32) {
    %c0_i32 = arith.constant 0 : i32
    %c0_i32_0 = arith.constant 0 : i32
    %c0_i32_1 = arith.constant 0 : i32
    return %c0_i32, %c0_i32_0 : i32, i32
  }
  func.func @transform_11(%arg0: i32) -> (i32, i32) {
    %c0_i32 = arith.constant 0 : i32
    %c0_i32_0 = arith.constant 0 : i32
    %c0_i32_1 = arith.constant 0 : i32
    return %c0_i32, %c0_i32_0 : i32, i32
  }
  func.func @transform_12(%arg0: i32) -> (i32, i32) {
    %c0_i32 = arith.constant 0 : i32
    %c0_i32_0 = arith.constant 0 : i32
    %c0_i32_1 = arith.constant 0 : i32
    return %c0_i32, %c0_i32_0 : i32, i32
  }
  func.func @transform_13(%arg0: i32) -> (i32, i32) {
    %c0_i32 = arith.constant 0 : i32
    %c0_i32_0 = arith.constant 0 : i32
    %c0_i32_1 = arith.constant 0 : i32
    return %c0_i32, %c0_i32_0 : i32, i32
  }
  func.func @transform_14(%arg0: i32) -> (i32, i32, i32) {
    %c0_i32 = arith.constant 0 : i32
    %c0_i32_0 = arith.constant 0 : i32
    %c0_i32_1 = arith.constant 0 : i32
    return %arg0, %c0_i32, %c0_i32_0 : i32, i32, i32
  }
}

module attributes {stable_mosaic.version = 11 : i64} {
  func.func @_stage_core_kernel(%arg0: i32, %arg1: memref<1x16x8xf32, #tpu.memory_space<vmem>>, %arg2: memref<8x32xbf16, #tpu.memory_space<vmem>>, %arg3: memref<1x32xf32, #tpu.memory_space<vmem>>, %arg4: memref<3x32x4xbf16, #tpu.memory_space<vmem>>, %arg5: memref<1x4xf32, #tpu.memory_space<vmem>>, %arg6: memref<3x4x4xbf16, #tpu.memory_space<vmem>>, %arg7: memref<1x4xf32, #tpu.memory_space<vmem>>, %arg8: memref<3x4x4xbf16, #tpu.memory_space<vmem>>, %arg9: memref<1x4xf32, #tpu.memory_space<vmem>>, %arg10: memref<32x32xbf16, #tpu.memory_space<vmem>>, %arg11: memref<4x32xbf16, #tpu.memory_space<vmem>>, %arg12: memref<4x32xbf16, #tpu.memory_space<vmem>>, %arg13: memref<4x32xbf16, #tpu.memory_space<vmem>>, %arg14: memref<1x32xf32, #tpu.memory_space<vmem>>, %arg15: memref<1x16x32xf32, #tpu.memory_space<vmem>>) attributes {dimension_semantics = [#tpu.dimension_semantics<parallel>], iteration_bounds = array<i64: 2>, scalar_prefetch = 0 : i64, scratch_operands = 0 : i64, tpu.core_type = #tpu.core_type<tc>, window_params = [{transform_indices = @transform_0, window_bounds = array<i64: 1, 16, 8>}, {pipeline_mode = #tpu.pipeline_mode<synchronous>, transform_indices = @transform_1, window_bounds = array<i64: 8, 32>}, {pipeline_mode = #tpu.pipeline_mode<synchronous>, transform_indices = @transform_2, window_bounds = array<i64: 1, 32>}, {pipeline_mode = #tpu.pipeline_mode<synchronous>, transform_indices = @transform_3, window_bounds = array<i64: 3, 32, 4>}, {pipeline_mode = #tpu.pipeline_mode<synchronous>, transform_indices = @transform_4, window_bounds = array<i64: 1, 4>}, {pipeline_mode = #tpu.pipeline_mode<synchronous>, transform_indices = @transform_5, window_bounds = array<i64: 3, 4, 4>}, {pipeline_mode = #tpu.pipeline_mode<synchronous>, transform_indices = @transform_6, window_bounds = array<i64: 1, 4>}, {pipeline_mode = #tpu.pipeline_mode<synchronous>, transform_indices = @transform_7, window_bounds = array<i64: 3, 4, 4>}, {pipeline_mode = #tpu.pipeline_mode<synchronous>, transform_indices = @transform_8, window_bounds = array<i64: 1, 4>}, {pipeline_mode = #tpu.pipeline_mode<synchronous>, transform_indices = @transform_9, window_bounds = array<i64: 32, 32>}, {pipeline_mode = #tpu.pipeline_mode<synchronous>, transform_indices = @transform_10, window_bounds = array<i64: 4, 32>}, {pipeline_mode = #tpu.pipeline_mode<synchronous>, transform_indices = @transform_11, window_bounds = array<i64: 4, 32>}, {pipeline_mode = #tpu.pipeline_mode<synchronous>, transform_indices = @transform_12, window_bounds = array<i64: 4, 32>}, {pipeline_mode = #tpu.pipeline_mode<synchronous>, transform_indices = @transform_13, window_bounds = array<i64: 1, 32>}, {transform_indices = @transform_14, window_bounds = array<i64: 1, 16, 32>}]} {
    %c0 = arith.constant 0 : index
    %c0_0 = arith.constant 0 : index
    %c0_1 = arith.constant 0 : index
    %0 = vector.load %arg1[%c0, %c0_0, %c0_1] : memref<1x16x8xf32, #tpu.memory_space<vmem>>, vector<1x16x8xf32>
    %1 = vector.shape_cast %0 : vector<1x16x8xf32> to vector<16x8xf32>
    %c0_2 = arith.constant 0 : index
    %c0_3 = arith.constant 0 : index
    %2 = vector.load %arg2[%c0_2, %c0_3] : memref<8x32xbf16, #tpu.memory_space<vmem>>, vector<8x32xbf16>
    %3 = arith.truncf %1 : vector<16x8xf32> to vector<16x8xbf16>
    %cst = arith.constant dense<0.000000e+00> : vector<16x32xf32>
    %4 = tpu.matmul %3, %2, %cst {dimension_numbers = #tpu.dot_dimension_numbers<[1], [0], [0], [1], [0, 0, 1, 1], [], []>} : vector<16x8xbf16>, vector<8x32xbf16>, vector<16x32xf32> -> vector<16x32xf32>
    %c0_4 = arith.constant 0 : index
    %c0_5 = arith.constant 0 : index
    %5 = vector.load %arg3[%c0_4, %c0_5] : memref<1x32xf32, #tpu.memory_space<vmem>>, vector<1x32xf32>
    %6 = vector.broadcast %5 : vector<1x32xf32> to vector<16x32xf32>
    %7 = arith.addf %4, %6 : vector<16x32xf32>
    %c0_6 = arith.constant 0 : index
    %c0_7 = arith.constant 0 : index
    %8 = vector.load %arg5[%c0_6, %c0_7] : memref<1x4xf32, #tpu.memory_space<vmem>>, vector<1x4xf32>
    %cst_8 = arith.constant 0.000000e+00 : f32
    %9 = vector.broadcast %cst_8 : f32 to vector<2x32xf32>
    %10 = vector.extract_strided_slice %7 {offsets = [0, 0], sizes = [14, 32], strides = [1, 1]} : vector<16x32xf32> to vector<14x32xf32>
    %11 = tpu.concatenate %9, %10 in 0 : vector<2x32xf32>, vector<14x32xf32> -> vector<16x32xf32>
    %c0_9 = arith.constant 0 : index
    %c0_10 = arith.constant 0 : index
    %c0_11 = arith.constant 0 : index
    %12 = vector.load %arg4[%c0_9, %c0_10, %c0_11] : memref<3x32x4xbf16, #tpu.memory_space<vmem>>, vector<1x32x4xbf16>
    %13 = vector.shape_cast %12 : vector<1x32x4xbf16> to vector<32x4xbf16>
    %14 = arith.truncf %11 : vector<16x32xf32> to vector<16x32xbf16>
    %cst_12 = arith.constant dense<0.000000e+00> : vector<16x4xf32>
    %15 = tpu.matmul %14, %13, %cst_12 {dimension_numbers = #tpu.dot_dimension_numbers<[1], [0], [0], [1], [0, 0, 1, 1], [], []>} : vector<16x32xbf16>, vector<32x4xbf16>, vector<16x4xf32> -> vector<16x4xf32>
    %16 = vector.broadcast %8 : vector<1x4xf32> to vector<16x4xf32>
    %17 = arith.addf %16, %15 : vector<16x4xf32>
    %c1 = arith.constant 1 : index
    %c0_13 = arith.constant 0 : index
    %c0_14 = arith.constant 0 : index
    %18 = vector.load %arg4[%c1, %c0_13, %c0_14] : memref<3x32x4xbf16, #tpu.memory_space<vmem>>, vector<1x32x4xbf16>
    %19 = vector.shape_cast %18 : vector<1x32x4xbf16> to vector<32x4xbf16>
    %20 = arith.truncf %7 : vector<16x32xf32> to vector<16x32xbf16>
    %cst_15 = arith.constant dense<0.000000e+00> : vector<16x4xf32>
    %21 = tpu.matmul %20, %19, %cst_15 {dimension_numbers = #tpu.dot_dimension_numbers<[1], [0], [0], [1], [0, 0, 1, 1], [], []>} : vector<16x32xbf16>, vector<32x4xbf16>, vector<16x4xf32> -> vector<16x4xf32>
    %22 = arith.addf %17, %21 : vector<16x4xf32>
    %23 = vector.extract_strided_slice %7 {offsets = [2, 0], sizes = [14, 32], strides = [1, 1]} : vector<16x32xf32> to vector<14x32xf32>
    %cst_16 = arith.constant 0.000000e+00 : f32
    %24 = vector.broadcast %cst_16 : f32 to vector<2x32xf32>
    %25 = tpu.concatenate %23, %24 in 0 : vector<14x32xf32>, vector<2x32xf32> -> vector<16x32xf32>
    %c2 = arith.constant 2 : index
    %c0_17 = arith.constant 0 : index
    %c0_18 = arith.constant 0 : index
    %26 = vector.load %arg4[%c2, %c0_17, %c0_18] : memref<3x32x4xbf16, #tpu.memory_space<vmem>>, vector<1x32x4xbf16>
    %27 = vector.shape_cast %26 : vector<1x32x4xbf16> to vector<32x4xbf16>
    %28 = arith.truncf %25 : vector<16x32xf32> to vector<16x32xbf16>
    %cst_19 = arith.constant dense<0.000000e+00> : vector<16x4xf32>
    %29 = tpu.matmul %28, %27, %cst_19 {dimension_numbers = #tpu.dot_dimension_numbers<[1], [0], [0], [1], [0, 0, 1, 1], [], []>} : vector<16x32xbf16>, vector<32x4xbf16>, vector<16x4xf32> -> vector<16x4xf32>
    %30 = arith.addf %22, %29 : vector<16x4xf32>
    %c0_20 = arith.constant 0 : index
    %c0_21 = arith.constant 0 : index
    %31 = vector.load %arg7[%c0_20, %c0_21] : memref<1x4xf32, #tpu.memory_space<vmem>>, vector<1x4xf32>
    %cst_22 = arith.constant 0.000000e+00 : f32
    %32 = vector.broadcast %cst_22 : f32 to vector<4x4xf32>
    %33 = vector.extract_strided_slice %30 {offsets = [0, 0], sizes = [12, 4], strides = [1, 1]} : vector<16x4xf32> to vector<12x4xf32>
    %34 = tpu.concatenate %32, %33 in 0 : vector<4x4xf32>, vector<12x4xf32> -> vector<16x4xf32>
    %c0_23 = arith.constant 0 : index
    %c0_24 = arith.constant 0 : index
    %c0_25 = arith.constant 0 : index
    %35 = vector.load %arg6[%c0_23, %c0_24, %c0_25] : memref<3x4x4xbf16, #tpu.memory_space<vmem>>, vector<1x4x4xbf16>
    %36 = vector.shape_cast %35 : vector<1x4x4xbf16> to vector<4x4xbf16>
    %37 = arith.truncf %34 : vector<16x4xf32> to vector<16x4xbf16>
    %cst_26 = arith.constant dense<0.000000e+00> : vector<16x4xf32>
    %38 = tpu.matmul %37, %36, %cst_26 {dimension_numbers = #tpu.dot_dimension_numbers<[1], [0], [0], [1], [0, 0, 1, 1], [], []>} : vector<16x4xbf16>, vector<4x4xbf16>, vector<16x4xf32> -> vector<16x4xf32>
    %39 = vector.broadcast %31 : vector<1x4xf32> to vector<16x4xf32>
    %40 = arith.addf %39, %38 : vector<16x4xf32>
    %c1_27 = arith.constant 1 : index
    %c0_28 = arith.constant 0 : index
    %c0_29 = arith.constant 0 : index
    %41 = vector.load %arg6[%c1_27, %c0_28, %c0_29] : memref<3x4x4xbf16, #tpu.memory_space<vmem>>, vector<1x4x4xbf16>
    %42 = vector.shape_cast %41 : vector<1x4x4xbf16> to vector<4x4xbf16>
    %43 = arith.truncf %30 : vector<16x4xf32> to vector<16x4xbf16>
    %cst_30 = arith.constant dense<0.000000e+00> : vector<16x4xf32>
    %44 = tpu.matmul %43, %42, %cst_30 {dimension_numbers = #tpu.dot_dimension_numbers<[1], [0], [0], [1], [0, 0, 1, 1], [], []>} : vector<16x4xbf16>, vector<4x4xbf16>, vector<16x4xf32> -> vector<16x4xf32>
    %45 = arith.addf %40, %44 : vector<16x4xf32>
    %46 = vector.extract_strided_slice %30 {offsets = [4, 0], sizes = [12, 4], strides = [1, 1]} : vector<16x4xf32> to vector<12x4xf32>
    %cst_31 = arith.constant 0.000000e+00 : f32
    %47 = vector.broadcast %cst_31 : f32 to vector<4x4xf32>
    %48 = tpu.concatenate %46, %47 in 0 : vector<12x4xf32>, vector<4x4xf32> -> vector<16x4xf32>
    %c2_32 = arith.constant 2 : index
    %c0_33 = arith.constant 0 : index
    %c0_34 = arith.constant 0 : index
    %49 = vector.load %arg6[%c2_32, %c0_33, %c0_34] : memref<3x4x4xbf16, #tpu.memory_space<vmem>>, vector<1x4x4xbf16>
    %50 = vector.shape_cast %49 : vector<1x4x4xbf16> to vector<4x4xbf16>
    %51 = arith.truncf %48 : vector<16x4xf32> to vector<16x4xbf16>
    %cst_35 = arith.constant dense<0.000000e+00> : vector<16x4xf32>
    %52 = tpu.matmul %51, %50, %cst_35 {dimension_numbers = #tpu.dot_dimension_numbers<[1], [0], [0], [1], [0, 0, 1, 1], [], []>} : vector<16x4xbf16>, vector<4x4xbf16>, vector<16x4xf32> -> vector<16x4xf32>
    %53 = arith.addf %45, %52 : vector<16x4xf32>
    %c0_36 = arith.constant 0 : index
    %c0_37 = arith.constant 0 : index
    %54 = vector.load %arg9[%c0_36, %c0_37] : memref<1x4xf32, #tpu.memory_space<vmem>>, vector<1x4xf32>
    %cst_38 = arith.constant 0.000000e+00 : f32
    %55 = vector.broadcast %cst_38 : f32 to vector<8x4xf32>
    %56 = vector.extract_strided_slice %53 {offsets = [0, 0], sizes = [8, 4], strides = [1, 1]} : vector<16x4xf32> to vector<8x4xf32>
    %57 = tpu.concatenate %55, %56 in 0 : vector<8x4xf32>, vector<8x4xf32> -> vector<16x4xf32>
    %c0_39 = arith.constant 0 : index
    %c0_40 = arith.constant 0 : index
    %c0_41 = arith.constant 0 : index
    %58 = vector.load %arg8[%c0_39, %c0_40, %c0_41] : memref<3x4x4xbf16, #tpu.memory_space<vmem>>, vector<1x4x4xbf16>
    %59 = vector.shape_cast %58 : vector<1x4x4xbf16> to vector<4x4xbf16>
    %60 = arith.truncf %57 : vector<16x4xf32> to vector<16x4xbf16>
    %cst_42 = arith.constant dense<0.000000e+00> : vector<16x4xf32>
    %61 = tpu.matmul %60, %59, %cst_42 {dimension_numbers = #tpu.dot_dimension_numbers<[1], [0], [0], [1], [0, 0, 1, 1], [], []>} : vector<16x4xbf16>, vector<4x4xbf16>, vector<16x4xf32> -> vector<16x4xf32>
    %62 = vector.broadcast %54 : vector<1x4xf32> to vector<16x4xf32>
    %63 = arith.addf %62, %61 : vector<16x4xf32>
    %c1_43 = arith.constant 1 : index
    %c0_44 = arith.constant 0 : index
    %c0_45 = arith.constant 0 : index
    %64 = vector.load %arg8[%c1_43, %c0_44, %c0_45] : memref<3x4x4xbf16, #tpu.memory_space<vmem>>, vector<1x4x4xbf16>
    %65 = vector.shape_cast %64 : vector<1x4x4xbf16> to vector<4x4xbf16>
    %66 = arith.truncf %53 : vector<16x4xf32> to vector<16x4xbf16>
    %cst_46 = arith.constant dense<0.000000e+00> : vector<16x4xf32>
    %67 = tpu.matmul %66, %65, %cst_46 {dimension_numbers = #tpu.dot_dimension_numbers<[1], [0], [0], [1], [0, 0, 1, 1], [], []>} : vector<16x4xbf16>, vector<4x4xbf16>, vector<16x4xf32> -> vector<16x4xf32>
    %68 = arith.addf %63, %67 : vector<16x4xf32>
    %69 = vector.extract_strided_slice %53 {offsets = [8, 0], sizes = [8, 4], strides = [1, 1]} : vector<16x4xf32> to vector<8x4xf32>
    %cst_47 = arith.constant 0.000000e+00 : f32
    %70 = vector.broadcast %cst_47 : f32 to vector<8x4xf32>
    %71 = tpu.concatenate %69, %70 in 0 : vector<8x4xf32>, vector<8x4xf32> -> vector<16x4xf32>
    %c2_48 = arith.constant 2 : index
    %c0_49 = arith.constant 0 : index
    %c0_50 = arith.constant 0 : index
    %72 = vector.load %arg8[%c2_48, %c0_49, %c0_50] : memref<3x4x4xbf16, #tpu.memory_space<vmem>>, vector<1x4x4xbf16>
    %73 = vector.shape_cast %72 : vector<1x4x4xbf16> to vector<4x4xbf16>
    %74 = arith.truncf %71 : vector<16x4xf32> to vector<16x4xbf16>
    %cst_51 = arith.constant dense<0.000000e+00> : vector<16x4xf32>
    %75 = tpu.matmul %74, %73, %cst_51 {dimension_numbers = #tpu.dot_dimension_numbers<[1], [0], [0], [1], [0, 0, 1, 1], [], []>} : vector<16x4xbf16>, vector<4x4xbf16>, vector<16x4xf32> -> vector<16x4xf32>
    %76 = arith.addf %68, %75 : vector<16x4xf32>
    %c0_52 = arith.constant 0 : index
    %c0_53 = arith.constant 0 : index
    %77 = vector.load %arg10[%c0_52, %c0_53] : memref<32x32xbf16, #tpu.memory_space<vmem>>, vector<32x32xbf16>
    %78 = arith.truncf %7 : vector<16x32xf32> to vector<16x32xbf16>
    %cst_54 = arith.constant dense<0.000000e+00> : vector<16x32xf32>
    %79 = tpu.matmul %78, %77, %cst_54 {dimension_numbers = #tpu.dot_dimension_numbers<[1], [0], [0], [1], [0, 0, 1, 1], [], []>} : vector<16x32xbf16>, vector<32x32xbf16>, vector<16x32xf32> -> vector<16x32xf32>
    %c0_55 = arith.constant 0 : index
    %c0_56 = arith.constant 0 : index
    %80 = vector.load %arg11[%c0_55, %c0_56] : memref<4x32xbf16, #tpu.memory_space<vmem>>, vector<4x32xbf16>
    %81 = arith.truncf %30 : vector<16x4xf32> to vector<16x4xbf16>
    %cst_57 = arith.constant dense<0.000000e+00> : vector<16x32xf32>
    %82 = tpu.matmul %81, %80, %cst_57 {dimension_numbers = #tpu.dot_dimension_numbers<[1], [0], [0], [1], [0, 0, 1, 1], [], []>} : vector<16x4xbf16>, vector<4x32xbf16>, vector<16x32xf32> -> vector<16x32xf32>
    %83 = arith.addf %79, %82 : vector<16x32xf32>
    %c0_58 = arith.constant 0 : index
    %c0_59 = arith.constant 0 : index
    %84 = vector.load %arg12[%c0_58, %c0_59] : memref<4x32xbf16, #tpu.memory_space<vmem>>, vector<4x32xbf16>
    %85 = arith.truncf %53 : vector<16x4xf32> to vector<16x4xbf16>
    %cst_60 = arith.constant dense<0.000000e+00> : vector<16x32xf32>
    %86 = tpu.matmul %85, %84, %cst_60 {dimension_numbers = #tpu.dot_dimension_numbers<[1], [0], [0], [1], [0, 0, 1, 1], [], []>} : vector<16x4xbf16>, vector<4x32xbf16>, vector<16x32xf32> -> vector<16x32xf32>
    %87 = arith.addf %83, %86 : vector<16x32xf32>
    %c0_61 = arith.constant 0 : index
    %c0_62 = arith.constant 0 : index
    %88 = vector.load %arg13[%c0_61, %c0_62] : memref<4x32xbf16, #tpu.memory_space<vmem>>, vector<4x32xbf16>
    %89 = arith.truncf %76 : vector<16x4xf32> to vector<16x4xbf16>
    %cst_63 = arith.constant dense<0.000000e+00> : vector<16x32xf32>
    %90 = tpu.matmul %89, %88, %cst_63 {dimension_numbers = #tpu.dot_dimension_numbers<[1], [0], [0], [1], [0, 0, 1, 1], [], []>} : vector<16x4xbf16>, vector<4x32xbf16>, vector<16x32xf32> -> vector<16x32xf32>
    %91 = arith.addf %87, %90 : vector<16x32xf32>
    %c0_64 = arith.constant 0 : index
    %c0_65 = arith.constant 0 : index
    %92 = vector.load %arg14[%c0_64, %c0_65] : memref<1x32xf32, #tpu.memory_space<vmem>>, vector<1x32xf32>
    %93 = vector.broadcast %92 : vector<1x32xf32> to vector<16x32xf32>
    %94 = arith.addf %91, %93 : vector<16x32xf32>
    %c0_66 = arith.constant 0 : index
    %c0_67 = arith.constant 0 : index
    %c0_68 = arith.constant 0 : index
    %95 = vector.load %arg15[%c0_66, %c0_67, %c0_68] : memref<1x16x32xf32, #tpu.memory_space<vmem>>, vector<1x16x32xf32>
    %96 = vector.shape_cast %95 : vector<1x16x32xf32> to vector<16x32xf32>
    %97 = vector.shape_cast %94 : vector<16x32xf32> to vector<1x16x32xf32>
    tpu.vector_store %arg15[%c0_66, %c0_67, %c0_68], %97 {strides = array<i32>} : memref<1x16x32xf32, #tpu.memory_space<vmem>>, vector<1x16x32xf32>,
    return
  }
  func.func @transform_0(%arg0: i32) -> (i32, i32, i32) {
    %c0_i32 = arith.constant 0 : i32
    %c0_i32_0 = arith.constant 0 : i32
    %c0_i32_1 = arith.constant 0 : i32
    return %arg0, %c0_i32, %c0_i32_0 : i32, i32, i32
  }
  func.func @transform_1(%arg0: i32) -> (i32, i32) {
    %c0_i32 = arith.constant 0 : i32
    %c0_i32_0 = arith.constant 0 : i32
    %c0_i32_1 = arith.constant 0 : i32
    return %c0_i32, %c0_i32_0 : i32, i32
  }
  func.func @transform_2(%arg0: i32) -> (i32, i32) {
    %c0_i32 = arith.constant 0 : i32
    %c0_i32_0 = arith.constant 0 : i32
    %c0_i32_1 = arith.constant 0 : i32
    return %c0_i32, %c0_i32_0 : i32, i32
  }
  func.func @transform_3(%arg0: i32) -> (i32, i32, i32) {
    %c0_i32 = arith.constant 0 : i32
    %c0_i32_0 = arith.constant 0 : i32
    %c0_i32_1 = arith.constant 0 : i32
    %c0_i32_2 = arith.constant 0 : i32
    return %c0_i32, %c0_i32_0, %c0_i32_1 : i32, i32, i32
  }
  func.func @transform_4(%arg0: i32) -> (i32, i32) {
    %c0_i32 = arith.constant 0 : i32
    %c0_i32_0 = arith.constant 0 : i32
    %c0_i32_1 = arith.constant 0 : i32
    return %c0_i32, %c0_i32_0 : i32, i32
  }
  func.func @transform_5(%arg0: i32) -> (i32, i32, i32) {
    %c0_i32 = arith.constant 0 : i32
    %c0_i32_0 = arith.constant 0 : i32
    %c0_i32_1 = arith.constant 0 : i32
    %c0_i32_2 = arith.constant 0 : i32
    return %c0_i32, %c0_i32_0, %c0_i32_1 : i32, i32, i32
  }
  func.func @transform_6(%arg0: i32) -> (i32, i32) {
    %c0_i32 = arith.constant 0 : i32
    %c0_i32_0 = arith.constant 0 : i32
    %c0_i32_1 = arith.constant 0 : i32
    return %c0_i32, %c0_i32_0 : i32, i32
  }
  func.func @transform_7(%arg0: i32) -> (i32, i32, i32) {
    %c0_i32 = arith.constant 0 : i32
    %c0_i32_0 = arith.constant 0 : i32
    %c0_i32_1 = arith.constant 0 : i32
    %c0_i32_2 = arith.constant 0 : i32
    return %c0_i32, %c0_i32_0, %c0_i32_1 : i32, i32, i32
  }
  func.func @transform_8(%arg0: i32) -> (i32, i32) {
    %c0_i32 = arith.constant 0 : i32
    %c0_i32_0 = arith.constant 0 : i32
    %c0_i32_1 = arith.constant 0 : i32
    return %c0_i32, %c0_i32_0 : i32, i32
  }
  func.func @transform_9(%arg0: i32) -> (i32, i32) {
    %c0_i32 = arith.constant 0 : i32
    %c0_i32_0 = arith.constant 0 : i32
    %c0_i32_1 = arith.constant 0 : i32
    return %c0_i32, %c0_i32_0 : i32, i32
  }
  func.func @transform_10(%arg0: i32) -> (i32, i32) {
    %c0_i32 = arith.constant 0 : i32
    %c0_i32_0 = arith.constant 0 : i32
    %c0_i32_1 = arith.constant 0 : i32
    return %c0_i32, %c0_i32_0 : i32, i32
  }
  func.func @transform_11(%arg0: i32) -> (i32, i32) {
    %c0_i32 = arith.constant 0 : i32
    %c0_i32_0 = arith.constant 0 : i32
    %c0_i32_1 = arith.constant 0 : i32
    return %c0_i32, %c0_i32_0 : i32, i32
  }
  func.func @transform_12(%arg0: i32) -> (i32, i32) {
    %c0_i32 = arith.constant 0 : i32
    %c0_i32_0 = arith.constant 0 : i32
    %c0_i32_1 = arith.constant 0 : i32
    return %c0_i32, %c0_i32_0 : i32, i32
  }
  func.func @transform_13(%arg0: i32) -> (i32, i32) {
    %c0_i32 = arith.constant 0 : i32
    %c0_i32_0 = arith.constant 0 : i32
    %c0_i32_1 = arith.constant 0 : i32
    return %c0_i32, %c0_i32_0 : i32, i32
  }
  func.func @transform_14(%arg0: i32) -> (i32, i32, i32) {
    %c0_i32 = arith.constant 0 : i32
    %c0_i32_0 = arith.constant 0 : i32
    %c0_i32_1 = arith.constant 0 : i32
    return %arg0, %c0_i32, %c0_i32_0 : i32, i32, i32
  }
}

module attributes {stable_mosaic.version = 11 : i64} {
  func.func @_mamba_tail_kernel(%arg0: i32, %arg1: memref<1x16x32xf32, #tpu.memory_space<vmem>>, %arg2: memref<32x64xbf16, #tpu.memory_space<vmem>>, %arg3: memref<32x64xbf16, #tpu.memory_space<vmem>>, %arg4: memref<4x1x64xf32, #tpu.memory_space<vmem>>, %arg5: memref<1x64xf32, #tpu.memory_space<vmem>>, %arg6: memref<64x96xf32, #tpu.memory_space<vmem>>, %arg7: memref<1x64xf32, #tpu.memory_space<vmem>>, %arg8: memref<16x64xf32, #tpu.memory_space<vmem>>, %arg9: memref<1x64xf32, #tpu.memory_space<vmem>>, %arg10: memref<64x32xbf16, #tpu.memory_space<vmem>>, %arg11: memref<32x4xbf16, #tpu.memory_space<vmem>>, %arg12: memref<1x4xf32, #tpu.memory_space<vmem>>, %arg13: memref<1x16x4xf32, #tpu.memory_space<vmem>>, %arg14: memref<16x64xf32, #tpu.memory_space<vmem>>, %arg15: memref<16x64xf32, #tpu.memory_space<vmem>>, %arg16: memref<16x96xf32, #tpu.memory_space<vmem>>, %arg17: memref<16x64xf32, #tpu.memory_space<vmem>>) attributes {dimension_semantics = [#tpu.dimension_semantics<parallel>], iteration_bounds = array<i64: 2>, scalar_prefetch = 0 : i64, scratch_operands = 4 : i64, tpu.core_type = #tpu.core_type<tc>, window_params = [{transform_indices = @transform_0, window_bounds = array<i64: 1, 16, 32>}, {pipeline_mode = #tpu.pipeline_mode<synchronous>, transform_indices = @transform_1, window_bounds = array<i64: 32, 64>}, {pipeline_mode = #tpu.pipeline_mode<synchronous>, transform_indices = @transform_2, window_bounds = array<i64: 32, 64>}, {pipeline_mode = #tpu.pipeline_mode<synchronous>, transform_indices = @transform_3, window_bounds = array<i64: 4, 1, 64>}, {pipeline_mode = #tpu.pipeline_mode<synchronous>, transform_indices = @transform_4, window_bounds = array<i64: 1, 64>}, {pipeline_mode = #tpu.pipeline_mode<synchronous>, transform_indices = @transform_5, window_bounds = array<i64: 64, 96>}, {pipeline_mode = #tpu.pipeline_mode<synchronous>, transform_indices = @transform_6, window_bounds = array<i64: 1, 64>}, {pipeline_mode = #tpu.pipeline_mode<synchronous>, transform_indices = @transform_7, window_bounds = array<i64: 16, 64>}, {pipeline_mode = #tpu.pipeline_mode<synchronous>, transform_indices = @transform_8, window_bounds = array<i64: 1, 64>}, {pipeline_mode = #tpu.pipeline_mode<synchronous>, transform_indices = @transform_9, window_bounds = array<i64: 64, 32>}, {pipeline_mode = #tpu.pipeline_mode<synchronous>, transform_indices = @transform_10, window_bounds = array<i64: 32, 4>}, {pipeline_mode = #tpu.pipeline_mode<synchronous>, transform_indices = @transform_11, window_bounds = array<i64: 1, 4>}, {transform_indices = @transform_12, window_bounds = array<i64: 1, 16, 4>}]} {
    %c0 = arith.constant 0 : index
    %c0_0 = arith.constant 0 : index
    %c0_1 = arith.constant 0 : index
    %0 = vector.load %arg1[%c0, %c0_0, %c0_1] : memref<1x16x32xf32, #tpu.memory_space<vmem>>, vector<1x16x32xf32>
    %1 = vector.shape_cast %0 : vector<1x16x32xf32> to vector<16x32xf32>
    %c0_2 = arith.constant 0 : index
    %c0_3 = arith.constant 0 : index
    %2 = vector.load %arg2[%c0_2, %c0_3] : memref<32x64xbf16, #tpu.memory_space<vmem>>, vector<32x64xbf16>
    %3 = arith.truncf %1 : vector<16x32xf32> to vector<16x32xbf16>
    %cst = arith.constant dense<0.000000e+00> : vector<16x64xf32>
    %4 = tpu.matmul %3, %2, %cst {dimension_numbers = #tpu.dot_dimension_numbers<[1], [0], [0], [1], [0, 0, 1, 1], [], []>} : vector<16x32xbf16>, vector<32x64xbf16>, vector<16x64xf32> -> vector<16x64xf32>
    %c0_4 = arith.constant 0 : index
    %c0_5 = arith.constant 0 : index
    %5 = vector.load %arg3[%c0_4, %c0_5] : memref<32x64xbf16, #tpu.memory_space<vmem>>, vector<32x64xbf16>
    %6 = arith.truncf %1 : vector<16x32xf32> to vector<16x32xbf16>
    %cst_6 = arith.constant dense<0.000000e+00> : vector<16x64xf32>
    %7 = tpu.matmul %6, %5, %cst_6 {dimension_numbers = #tpu.dot_dimension_numbers<[1], [0], [0], [1], [0, 0, 1, 1], [], []>} : vector<16x32xbf16>, vector<32x64xbf16>, vector<16x64xf32> -> vector<16x64xf32>
    %c0_7 = arith.constant 0 : index
    %c0_8 = arith.constant 0 : index
    %8 = vector.load %arg15[%c0_7, %c0_8] : memref<16x64xf32, #tpu.memory_space<vmem>>, vector<16x64xf32>
    tpu.vector_store %arg15[%c0_7, %c0_8], %7 {strides = array<i32>} : memref<16x64xf32, #tpu.memory_space<vmem>>, vector<16x64xf32>,
    %c0_9 = arith.constant 0 : index
    %c0_10 = arith.constant 0 : index
    %9 = vector.load %arg5[%c0_9, %c0_10] : memref<1x64xf32, #tpu.memory_space<vmem>>, vector<1x64xf32>
    %cst_11 = arith.constant 0.000000e+00 : f32
    %10 = vector.broadcast %cst_11 : f32 to vector<3x64xf32>
    %11 = vector.extract_strided_slice %4 {offsets = [0, 0], sizes = [13, 64], strides = [1, 1]} : vector<16x64xf32> to vector<13x64xf32>
    %12 = tpu.concatenate %10, %11 in 0 : vector<3x64xf32>, vector<13x64xf32> -> vector<16x64xf32>
    %c0_12 = arith.constant 0 : index
    %c0_13 = arith.constant 0 : index
    %c0_14 = arith.constant 0 : index
    %13 = vector.load %arg4[%c0_12, %c0_13, %c0_14] : memref<4x1x64xf32, #tpu.memory_space<vmem>>, vector<1x1x64xf32>
    %14 = vector.shape_cast %13 : vector<1x1x64xf32> to vector<1x64xf32>
    %15 = vector.broadcast %14 : vector<1x64xf32> to vector<16x64xf32>
    %16 = arith.mulf %12, %15 : vector<16x64xf32>
    %17 = vector.broadcast %9 : vector<1x64xf32> to vector<16x64xf32>
    %18 = arith.addf %17, %16 : vector<16x64xf32>
    %cst_15 = arith.constant 0.000000e+00 : f32
    %19 = vector.broadcast %cst_15 : f32 to vector<2x64xf32>
    %20 = vector.extract_strided_slice %4 {offsets = [0, 0], sizes = [14, 64], strides = [1, 1]} : vector<16x64xf32> to vector<14x64xf32>
    %21 = tpu.concatenate %19, %20 in 0 : vector<2x64xf32>, vector<14x64xf32> -> vector<16x64xf32>
    %c1 = arith.constant 1 : index
    %c0_16 = arith.constant 0 : index
    %c0_17 = arith.constant 0 : index
    %22 = vector.load %arg4[%c1, %c0_16, %c0_17] : memref<4x1x64xf32, #tpu.memory_space<vmem>>, vector<1x1x64xf32>
    %23 = vector.shape_cast %22 : vector<1x1x64xf32> to vector<1x64xf32>
    %24 = vector.broadcast %23 : vector<1x64xf32> to vector<16x64xf32>
    %25 = arith.mulf %21, %24 : vector<16x64xf32>
    %26 = arith.addf %18, %25 : vector<16x64xf32>
    %cst_18 = arith.constant 0.000000e+00 : f32
    %27 = vector.broadcast %cst_18 : f32 to vector<1x64xf32>
    %28 = vector.extract_strided_slice %4 {offsets = [0, 0], sizes = [15, 64], strides = [1, 1]} : vector<16x64xf32> to vector<15x64xf32>
    %29 = tpu.concatenate %27, %28 in 0 : vector<1x64xf32>, vector<15x64xf32> -> vector<16x64xf32>
    %c2 = arith.constant 2 : index
    %c0_19 = arith.constant 0 : index
    %c0_20 = arith.constant 0 : index
    %30 = vector.load %arg4[%c2, %c0_19, %c0_20] : memref<4x1x64xf32, #tpu.memory_space<vmem>>, vector<1x1x64xf32>
    %31 = vector.shape_cast %30 : vector<1x1x64xf32> to vector<1x64xf32>
    %32 = vector.broadcast %31 : vector<1x64xf32> to vector<16x64xf32>
    %33 = arith.mulf %29, %32 : vector<16x64xf32>
    %34 = arith.addf %26, %33 : vector<16x64xf32>
    %c3 = arith.constant 3 : index
    %c0_21 = arith.constant 0 : index
    %c0_22 = arith.constant 0 : index
    %35 = vector.load %arg4[%c3, %c0_21, %c0_22] : memref<4x1x64xf32, #tpu.memory_space<vmem>>, vector<1x1x64xf32>
    %36 = vector.shape_cast %35 : vector<1x1x64xf32> to vector<1x64xf32>
    %37 = vector.broadcast %36 : vector<1x64xf32> to vector<16x64xf32>
    %38 = arith.mulf %4, %37 : vector<16x64xf32>
    %39 = arith.addf %34, %38 : vector<16x64xf32>
    %cst_23 = arith.constant 0.000000e+00 : f32
    %40 = vector.broadcast %cst_23 : f32 to vector<16x64xf32>
    %41 = arith.subf %40, %39 : vector<16x64xf32>
    %42 = math.exp %41 : vector<16x64xf32>
    %cst_24 = arith.constant 1.000000e+00 : f32
    %43 = vector.broadcast %cst_24 : f32 to vector<16x64xf32>
    %44 = arith.addf %43, %42 : vector<16x64xf32>
    %45 = tpu.reciprocal %44 {approx = true} : vector<16x64xf32> -> vector<16x64xf32>
    %46 = arith.mulf %39, %45 : vector<16x64xf32>
    %c0_25 = arith.constant 0 : index
    %c0_26 = arith.constant 0 : index
    %47 = vector.load %arg14[%c0_25, %c0_26] : memref<16x64xf32, #tpu.memory_space<vmem>>, vector<16x64xf32>
    tpu.vector_store %arg14[%c0_25, %c0_26], %46 {strides = array<i32>} : memref<16x64xf32, #tpu.memory_space<vmem>>, vector<16x64xf32>,
    %c0_27 = arith.constant 0 : index
    %c0_28 = arith.constant 0 : index
    %48 = vector.load %arg6[%c0_27, %c0_28] : memref<64x96xf32, #tpu.memory_space<vmem>>, vector<64x96xf32>
    %cst_29 = arith.constant dense<0.000000e+00> : vector<16x96xf32>
    %49 = tpu.matmul %46, %48, %cst_29 {dimension_numbers = #tpu.dot_dimension_numbers<[1], [0], [0], [1], [0, 0, 1, 1], [], []>} : vector<16x64xf32>, vector<64x96xf32>, vector<16x96xf32> -> vector<16x96xf32>
    %c0_30 = arith.constant 0 : index
    %c0_31 = arith.constant 0 : index
    %50 = vector.load %arg16[%c0_30, %c0_31] : memref<16x96xf32, #tpu.memory_space<vmem>>, vector<16x96xf32>
    tpu.vector_store %arg16[%c0_30, %c0_31], %49 {strides = array<i32>} : memref<16x96xf32, #tpu.memory_space<vmem>>, vector<16x96xf32>,
    %cst_32 = arith.constant 0.000000e+00 : f32
    %51 = vector.broadcast %cst_32 : f32 to vector<16x64xf32>
    %c0_33 = arith.constant 0 : index
    %c0_34 = arith.constant 0 : index
    %52 = vector.load %arg17[%c0_33, %c0_34] : memref<16x64xf32, #tpu.memory_space<vmem>>, vector<16x64xf32>
    tpu.vector_store %arg17[%c0_33, %c0_34], %51 {strides = array<i32>} : memref<16x64xf32, #tpu.memory_space<vmem>>, vector<16x64xf32>,
    %c0_35 = arith.constant 0 : index
    %c0_36 = arith.constant 0 : index
    %53 = vector.load %arg8[%c0_35, %c0_36] : memref<16x64xf32, #tpu.memory_space<vmem>>, vector<16x64xf32>
    %c0_37 = arith.constant 0 : index
    %c0_38 = arith.constant 0 : index
    %54 = vector.load %arg9[%c0_37, %c0_38] : memref<1x64xf32, #tpu.memory_space<vmem>>, vector<1x64xf32>
    %c0_39 = arith.constant 0 : index
    %c0_40 = arith.constant 0 : index
    %55 = vector.load %arg7[%c0_39, %c0_40] : memref<1x64xf32, #tpu.memory_space<vmem>>, vector<1x64xf32>
    %c0_i32 = arith.constant 0 : i32
    %c16_i32 = arith.constant 16 : i32
    %56 = arith.muli %c0_i32, %c16_i32 : i32
    %57 = tpu.assume_multiple %56, 16 : i32
    %58 = arith.index_cast %57 : i32 to index
    %c0_41 = arith.constant 0 : index
    %59 = vector.load %arg14[%58, %c0_41] : memref<16x64xf32, #tpu.memory_space<vmem>>, vector<16x64xf32>
    %60 = arith.index_cast %57 : i32 to index
    %c0_42 = arith.constant 0 : index
    %61 = vector.load %arg15[%60, %c0_42] : memref<16x64xf32, #tpu.memory_space<vmem>>, vector<16x64xf32>
    %cst_43 = arith.constant 0.000000e+00 : f32
    %62 = vector.broadcast %cst_43 : f32 to vector<16x64xf32>
    %63 = arith.subf %62, %61 : vector<16x64xf32>
    %64 = math.exp %63 : vector<16x64xf32>
    %cst_44 = arith.constant 1.000000e+00 : f32
    %65 = vector.broadcast %cst_44 : f32 to vector<16x64xf32>
    %66 = arith.addf %65, %64 : vector<16x64xf32>
    %67 = tpu.reciprocal %66 {approx = true} : vector<16x64xf32> -> vector<16x64xf32>
    %68 = arith.mulf %61, %67 : vector<16x64xf32>
    %69 = arith.index_cast %57 : i32 to index
    %c0_45 = arith.constant 0 : index
    %70 = vector.load %arg16[%69, %c0_45] : memref<16x96xf32, #tpu.memory_space<vmem>>, vector<16x96xf32>
    %71 = vector.extract_strided_slice %70 {offsets = [0, 0], sizes = [16, 64], strides = [1, 1]} : vector<16x96xf32> to vector<16x64xf32>
    %72 = vector.broadcast %55 : vector<1x64xf32> to vector<16x64xf32>
    %73 = arith.addf %71, %72 : vector<16x64xf32>
    %cst_46 = arith.constant 0.000000e+00 : f32
    %74 = vector.broadcast %cst_46 : f32 to vector<16x64xf32>
    %75 = arith.maximumf %73, %74 : vector<16x64xf32>
    %76 = math.absf %73 : vector<16x64xf32>
    %cst_47 = arith.constant 0.000000e+00 : f32
    %77 = vector.broadcast %cst_47 : f32 to vector<16x64xf32>
    %78 = arith.subf %77, %76 : vector<16x64xf32>
    %79 = math.exp %78 : vector<16x64xf32>
    %80 = math.log1p %79 : vector<16x64xf32>
    %81 = arith.addf %75, %80 : vector<16x64xf32>
    %82 = vector.extract_strided_slice %70 {offsets = [0, 64], sizes = [16, 16], strides = [1, 1]} : vector<16x96xf32> to vector<16x16xf32>
    %83 = tpu.transpose %82, [1, 0] : vector<16x16xf32> -> vector<16x16xf32>
    %84 = vector.extract_strided_slice %70 {offsets = [0, 80], sizes = [16, 16], strides = [1, 1]} : vector<16x96xf32> to vector<16x16xf32>
    %85 = tpu.transpose %84, [1, 0] : vector<16x16xf32> -> vector<16x16xf32>
    %86 = vector.shape_cast %81 : vector<16x64xf32> to vector<16x1x64xf32>
    %87 = vector.shape_cast %53 : vector<16x64xf32> to vector<1x16x64xf32>
    %88 = vector.broadcast %86 : vector<16x1x64xf32> to vector<16x16x64xf32>
    %89 = vector.broadcast %87 : vector<1x16x64xf32> to vector<16x16x64xf32>
    %90 = arith.mulf %88, %89 : vector<16x16x64xf32>
    %91 = math.exp %90 : vector<16x16x64xf32>
    %92 = arith.mulf %81, %59 : vector<16x64xf32>
    %c0_48 = arith.constant 0 : index
    %c0_49 = arith.constant 0 : index
    %93 = vector.load %arg17[%c0_48, %c0_49] : memref<16x64xf32, #tpu.memory_space<vmem>>, vector<16x64xf32>
    %94 = vector.extract_strided_slice %91 {offsets = [0, 0, 0], sizes = [1, 16, 64], strides = [1, 1, 1]} : vector<16x16x64xf32> to vector<1x16x64xf32>
    %95 = vector.shape_cast %94 : vector<1x16x64xf32> to vector<16x64xf32>
    %96 = arith.mulf %95, %93 : vector<16x64xf32>
    %97 = vector.extract_strided_slice %83 {offsets = [0, 0], sizes = [16, 1], strides = [1, 1]} : vector<16x16xf32> to vector<16x1xf32>
    %98 = vector.extract_strided_slice %92 {offsets = [0, 0], sizes = [1, 64], strides = [1, 1]} : vector<16x64xf32> to vector<1x64xf32>
    %99 = vector.broadcast %97 : vector<16x1xf32> to vector<16x64xf32>
    %100 = vector.broadcast %98 : vector<1x64xf32> to vector<16x64xf32>
    %101 = arith.mulf %99, %100 : vector<16x64xf32>
    %102 = arith.addf %96, %101 : vector<16x64xf32>
    %103 = vector.extract_strided_slice %85 {offsets = [0, 0], sizes = [16, 1], strides = [1, 1]} : vector<16x16xf32> to vector<16x1xf32>
    %104 = vector.broadcast %103 : vector<16x1xf32> to vector<16x64xf32>
    %105 = arith.mulf %104, %102 : vector<16x64xf32>
    %cst_50 = arith.constant dense<0.000000e+00> : vector<64xf32>
    %106 = vector.multi_reduction <add>, %105, %cst_50 [0] : vector<16x64xf32> to vector<64xf32>
    %107 = vector.shape_cast %106 : vector<64xf32> to vector<1x64xf32>
    %108 = vector.extract_strided_slice %91 {offsets = [1, 0, 0], sizes = [1, 16, 64], strides = [1, 1, 1]} : vector<16x16x64xf32> to vector<1x16x64xf32>
    %109 = vector.shape_cast %108 : vector<1x16x64xf32> to vector<16x64xf32>
    %110 = arith.mulf %109, %102 : vector<16x64xf32>
    %111 = vector.extract_strided_slice %83 {offsets = [0, 1], sizes = [16, 1], strides = [1, 1]} : vector<16x16xf32> to vector<16x1xf32>
    %112 = vector.extract_strided_slice %92 {offsets = [1, 0], sizes = [1, 64], strides = [1, 1]} : vector<16x64xf32> to vector<1x64xf32>
    %113 = vector.broadcast %111 : vector<16x1xf32> to vector<16x64xf32>
    %114 = vector.broadcast %112 : vector<1x64xf32> to vector<16x64xf32>
    %115 = arith.mulf %113, %114 : vector<16x64xf32>
    %116 = arith.addf %110, %115 : vector<16x64xf32>
    %117 = vector.extract_strided_slice %85 {offsets = [0, 1], sizes = [16, 1], strides = [1, 1]} : vector<16x16xf32> to vector<16x1xf32>
    %118 = vector.broadcast %117 : vector<16x1xf32> to vector<16x64xf32>
    %119 = arith.mulf %118, %116 : vector<16x64xf32>
    %cst_51 = arith.constant dense<0.000000e+00> : vector<64xf32>
    %120 = vector.multi_reduction <add>, %119, %cst_51 [0] : vector<16x64xf32> to vector<64xf32>
    %121 = vector.shape_cast %120 : vector<64xf32> to vector<1x64xf32>
    %122 = vector.extract_strided_slice %91 {offsets = [2, 0, 0], sizes = [1, 16, 64], strides = [1, 1, 1]} : vector<16x16x64xf32> to vector<1x16x64xf32>
    %123 = vector.shape_cast %122 : vector<1x16x64xf32> to vector<16x64xf32>
    %124 = arith.mulf %123, %116 : vector<16x64xf32>
    %125 = vector.extract_strided_slice %83 {offsets = [0, 2], sizes = [16, 1], strides = [1, 1]} : vector<16x16xf32> to vector<16x1xf32>
    %126 = vector.extract_strided_slice %92 {offsets = [2, 0], sizes = [1, 64], strides = [1, 1]} : vector<16x64xf32> to vector<1x64xf32>
    %127 = vector.broadcast %125 : vector<16x1xf32> to vector<16x64xf32>
    %128 = vector.broadcast %126 : vector<1x64xf32> to vector<16x64xf32>
    %129 = arith.mulf %127, %128 : vector<16x64xf32>
    %130 = arith.addf %124, %129 : vector<16x64xf32>
    %131 = vector.extract_strided_slice %85 {offsets = [0, 2], sizes = [16, 1], strides = [1, 1]} : vector<16x16xf32> to vector<16x1xf32>
    %132 = vector.broadcast %131 : vector<16x1xf32> to vector<16x64xf32>
    %133 = arith.mulf %132, %130 : vector<16x64xf32>
    %cst_52 = arith.constant dense<0.000000e+00> : vector<64xf32>
    %134 = vector.multi_reduction <add>, %133, %cst_52 [0] : vector<16x64xf32> to vector<64xf32>
    %135 = vector.shape_cast %134 : vector<64xf32> to vector<1x64xf32>
    %136 = vector.extract_strided_slice %91 {offsets = [3, 0, 0], sizes = [1, 16, 64], strides = [1, 1, 1]} : vector<16x16x64xf32> to vector<1x16x64xf32>
    %137 = vector.shape_cast %136 : vector<1x16x64xf32> to vector<16x64xf32>
    %138 = arith.mulf %137, %130 : vector<16x64xf32>
    %139 = vector.extract_strided_slice %83 {offsets = [0, 3], sizes = [16, 1], strides = [1, 1]} : vector<16x16xf32> to vector<16x1xf32>
    %140 = vector.extract_strided_slice %92 {offsets = [3, 0], sizes = [1, 64], strides = [1, 1]} : vector<16x64xf32> to vector<1x64xf32>
    %141 = vector.broadcast %139 : vector<16x1xf32> to vector<16x64xf32>
    %142 = vector.broadcast %140 : vector<1x64xf32> to vector<16x64xf32>
    %143 = arith.mulf %141, %142 : vector<16x64xf32>
    %144 = arith.addf %138, %143 : vector<16x64xf32>
    %145 = vector.extract_strided_slice %85 {offsets = [0, 3], sizes = [16, 1], strides = [1, 1]} : vector<16x16xf32> to vector<16x1xf32>
    %146 = vector.broadcast %145 : vector<16x1xf32> to vector<16x64xf32>
    %147 = arith.mulf %146, %144 : vector<16x64xf32>
    %cst_53 = arith.constant dense<0.000000e+00> : vector<64xf32>
    %148 = vector.multi_reduction <add>, %147, %cst_53 [0] : vector<16x64xf32> to vector<64xf32>
    %149 = vector.shape_cast %148 : vector<64xf32> to vector<1x64xf32>
    %150 = vector.extract_strided_slice %91 {offsets = [4, 0, 0], sizes = [1, 16, 64], strides = [1, 1, 1]} : vector<16x16x64xf32> to vector<1x16x64xf32>
    %151 = vector.shape_cast %150 : vector<1x16x64xf32> to vector<16x64xf32>
    %152 = arith.mulf %151, %144 : vector<16x64xf32>
    %153 = vector.extract_strided_slice %83 {offsets = [0, 4], sizes = [16, 1], strides = [1, 1]} : vector<16x16xf32> to vector<16x1xf32>
    %154 = vector.extract_strided_slice %92 {offsets = [4, 0], sizes = [1, 64], strides = [1, 1]} : vector<16x64xf32> to vector<1x64xf32>
    %155 = vector.broadcast %153 : vector<16x1xf32> to vector<16x64xf32>
    %156 = vector.broadcast %154 : vector<1x64xf32> to vector<16x64xf32>
    %157 = arith.mulf %155, %156 : vector<16x64xf32>
    %158 = arith.addf %152, %157 : vector<16x64xf32>
    %159 = vector.extract_strided_slice %85 {offsets = [0, 4], sizes = [16, 1], strides = [1, 1]} : vector<16x16xf32> to vector<16x1xf32>
    %160 = vector.broadcast %159 : vector<16x1xf32> to vector<16x64xf32>
    %161 = arith.mulf %160, %158 : vector<16x64xf32>
    %cst_54 = arith.constant dense<0.000000e+00> : vector<64xf32>
    %162 = vector.multi_reduction <add>, %161, %cst_54 [0] : vector<16x64xf32> to vector<64xf32>
    %163 = vector.shape_cast %162 : vector<64xf32> to vector<1x64xf32>
    %164 = vector.extract_strided_slice %91 {offsets = [5, 0, 0], sizes = [1, 16, 64], strides = [1, 1, 1]} : vector<16x16x64xf32> to vector<1x16x64xf32>
    %165 = vector.shape_cast %164 : vector<1x16x64xf32> to vector<16x64xf32>
    %166 = arith.mulf %165, %158 : vector<16x64xf32>
    %167 = vector.extract_strided_slice %83 {offsets = [0, 5], sizes = [16, 1], strides = [1, 1]} : vector<16x16xf32> to vector<16x1xf32>
    %168 = vector.extract_strided_slice %92 {offsets = [5, 0], sizes = [1, 64], strides = [1, 1]} : vector<16x64xf32> to vector<1x64xf32>
    %169 = vector.broadcast %167 : vector<16x1xf32> to vector<16x64xf32>
    %170 = vector.broadcast %168 : vector<1x64xf32> to vector<16x64xf32>
    %171 = arith.mulf %169, %170 : vector<16x64xf32>
    %172 = arith.addf %166, %171 : vector<16x64xf32>
    %173 = vector.extract_strided_slice %85 {offsets = [0, 5], sizes = [16, 1], strides = [1, 1]} : vector<16x16xf32> to vector<16x1xf32>
    %174 = vector.broadcast %173 : vector<16x1xf32> to vector<16x64xf32>
    %175 = arith.mulf %174, %172 : vector<16x64xf32>
    %cst_55 = arith.constant dense<0.000000e+00> : vector<64xf32>
    %176 = vector.multi_reduction <add>, %175, %cst_55 [0] : vector<16x64xf32> to vector<64xf32>
    %177 = vector.shape_cast %176 : vector<64xf32> to vector<1x64xf32>
    %178 = vector.extract_strided_slice %91 {offsets = [6, 0, 0], sizes = [1, 16, 64], strides = [1, 1, 1]} : vector<16x16x64xf32> to vector<1x16x64xf32>
    %179 = vector.shape_cast %178 : vector<1x16x64xf32> to vector<16x64xf32>
    %180 = arith.mulf %179, %172 : vector<16x64xf32>
    %181 = vector.extract_strided_slice %83 {offsets = [0, 6], sizes = [16, 1], strides = [1, 1]} : vector<16x16xf32> to vector<16x1xf32>
    %182 = vector.extract_strided_slice %92 {offsets = [6, 0], sizes = [1, 64], strides = [1, 1]} : vector<16x64xf32> to vector<1x64xf32>
    %183 = vector.broadcast %181 : vector<16x1xf32> to vector<16x64xf32>
    %184 = vector.broadcast %182 : vector<1x64xf32> to vector<16x64xf32>
    %185 = arith.mulf %183, %184 : vector<16x64xf32>
    %186 = arith.addf %180, %185 : vector<16x64xf32>
    %187 = vector.extract_strided_slice %85 {offsets = [0, 6], sizes = [16, 1], strides = [1, 1]} : vector<16x16xf32> to vector<16x1xf32>
    %188 = vector.broadcast %187 : vector<16x1xf32> to vector<16x64xf32>
    %189 = arith.mulf %188, %186 : vector<16x64xf32>
    %cst_56 = arith.constant dense<0.000000e+00> : vector<64xf32>
    %190 = vector.multi_reduction <add>, %189, %cst_56 [0] : vector<16x64xf32> to vector<64xf32>
    %191 = vector.shape_cast %190 : vector<64xf32> to vector<1x64xf32>
    %192 = vector.extract_strided_slice %91 {offsets = [7, 0, 0], sizes = [1, 16, 64], strides = [1, 1, 1]} : vector<16x16x64xf32> to vector<1x16x64xf32>
    %193 = vector.shape_cast %192 : vector<1x16x64xf32> to vector<16x64xf32>
    %194 = arith.mulf %193, %186 : vector<16x64xf32>
    %195 = vector.extract_strided_slice %83 {offsets = [0, 7], sizes = [16, 1], strides = [1, 1]} : vector<16x16xf32> to vector<16x1xf32>
    %196 = vector.extract_strided_slice %92 {offsets = [7, 0], sizes = [1, 64], strides = [1, 1]} : vector<16x64xf32> to vector<1x64xf32>
    %197 = vector.broadcast %195 : vector<16x1xf32> to vector<16x64xf32>
    %198 = vector.broadcast %196 : vector<1x64xf32> to vector<16x64xf32>
    %199 = arith.mulf %197, %198 : vector<16x64xf32>
    %200 = arith.addf %194, %199 : vector<16x64xf32>
    %201 = vector.extract_strided_slice %85 {offsets = [0, 7], sizes = [16, 1], strides = [1, 1]} : vector<16x16xf32> to vector<16x1xf32>
    %202 = vector.broadcast %201 : vector<16x1xf32> to vector<16x64xf32>
    %203 = arith.mulf %202, %200 : vector<16x64xf32>
    %cst_57 = arith.constant dense<0.000000e+00> : vector<64xf32>
    %204 = vector.multi_reduction <add>, %203, %cst_57 [0] : vector<16x64xf32> to vector<64xf32>
    %205 = vector.shape_cast %204 : vector<64xf32> to vector<1x64xf32>
    %206 = vector.extract_strided_slice %91 {offsets = [8, 0, 0], sizes = [1, 16, 64], strides = [1, 1, 1]} : vector<16x16x64xf32> to vector<1x16x64xf32>
    %207 = vector.shape_cast %206 : vector<1x16x64xf32> to vector<16x64xf32>
    %208 = arith.mulf %207, %200 : vector<16x64xf32>
    %209 = vector.extract_strided_slice %83 {offsets = [0, 8], sizes = [16, 1], strides = [1, 1]} : vector<16x16xf32> to vector<16x1xf32>
    %210 = vector.extract_strided_slice %92 {offsets = [8, 0], sizes = [1, 64], strides = [1, 1]} : vector<16x64xf32> to vector<1x64xf32>
    %211 = vector.broadcast %209 : vector<16x1xf32> to vector<16x64xf32>
    %212 = vector.broadcast %210 : vector<1x64xf32> to vector<16x64xf32>
    %213 = arith.mulf %211, %212 : vector<16x64xf32>
    %214 = arith.addf %208, %213 : vector<16x64xf32>
    %215 = vector.extract_strided_slice %85 {offsets = [0, 8], sizes = [16, 1], strides = [1, 1]} : vector<16x16xf32> to vector<16x1xf32>
    %216 = vector.broadcast %215 : vector<16x1xf32> to vector<16x64xf32>
    %217 = arith.mulf %216, %214 : vector<16x64xf32>
    %cst_58 = arith.constant dense<0.000000e+00> : vector<64xf32>
    %218 = vector.multi_reduction <add>, %217, %cst_58 [0] : vector<16x64xf32> to vector<64xf32>
    %219 = vector.shape_cast %218 : vector<64xf32> to vector<1x64xf32>
    %220 = vector.extract_strided_slice %91 {offsets = [9, 0, 0], sizes = [1, 16, 64], strides = [1, 1, 1]} : vector<16x16x64xf32> to vector<1x16x64xf32>
    %221 = vector.shape_cast %220 : vector<1x16x64xf32> to vector<16x64xf32>
    %222 = arith.mulf %221, %214 : vector<16x64xf32>
    %223 = vector.extract_strided_slice %83 {offsets = [0, 9], sizes = [16, 1], strides = [1, 1]} : vector<16x16xf32> to vector<16x1xf32>
    %224 = vector.extract_strided_slice %92 {offsets = [9, 0], sizes = [1, 64], strides = [1, 1]} : vector<16x64xf32> to vector<1x64xf32>
    %225 = vector.broadcast %223 : vector<16x1xf32> to vector<16x64xf32>
    %226 = vector.broadcast %224 : vector<1x64xf32> to vector<16x64xf32>
    %227 = arith.mulf %225, %226 : vector<16x64xf32>
    %228 = arith.addf %222, %227 : vector<16x64xf32>
    %229 = vector.extract_strided_slice %85 {offsets = [0, 9], sizes = [16, 1], strides = [1, 1]} : vector<16x16xf32> to vector<16x1xf32>
    %230 = vector.broadcast %229 : vector<16x1xf32> to vector<16x64xf32>
    %231 = arith.mulf %230, %228 : vector<16x64xf32>
    %cst_59 = arith.constant dense<0.000000e+00> : vector<64xf32>
    %232 = vector.multi_reduction <add>, %231, %cst_59 [0] : vector<16x64xf32> to vector<64xf32>
    %233 = vector.shape_cast %232 : vector<64xf32> to vector<1x64xf32>
    %234 = vector.extract_strided_slice %91 {offsets = [10, 0, 0], sizes = [1, 16, 64], strides = [1, 1, 1]} : vector<16x16x64xf32> to vector<1x16x64xf32>
    %235 = vector.shape_cast %234 : vector<1x16x64xf32> to vector<16x64xf32>
    %236 = arith.mulf %235, %228 : vector<16x64xf32>
    %237 = vector.extract_strided_slice %83 {offsets = [0, 10], sizes = [16, 1], strides = [1, 1]} : vector<16x16xf32> to vector<16x1xf32>
    %238 = vector.extract_strided_slice %92 {offsets = [10, 0], sizes = [1, 64], strides = [1, 1]} : vector<16x64xf32> to vector<1x64xf32>
    %239 = vector.broadcast %237 : vector<16x1xf32> to vector<16x64xf32>
    %240 = vector.broadcast %238 : vector<1x64xf32> to vector<16x64xf32>
    %241 = arith.mulf %239, %240 : vector<16x64xf32>
    %242 = arith.addf %236, %241 : vector<16x64xf32>
    %243 = vector.extract_strided_slice %85 {offsets = [0, 10], sizes = [16, 1], strides = [1, 1]} : vector<16x16xf32> to vector<16x1xf32>
    %244 = vector.broadcast %243 : vector<16x1xf32> to vector<16x64xf32>
    %245 = arith.mulf %244, %242 : vector<16x64xf32>
    %cst_60 = arith.constant dense<0.000000e+00> : vector<64xf32>
    %246 = vector.multi_reduction <add>, %245, %cst_60 [0] : vector<16x64xf32> to vector<64xf32>
    %247 = vector.shape_cast %246 : vector<64xf32> to vector<1x64xf32>
    %248 = vector.extract_strided_slice %91 {offsets = [11, 0, 0], sizes = [1, 16, 64], strides = [1, 1, 1]} : vector<16x16x64xf32> to vector<1x16x64xf32>
    %249 = vector.shape_cast %248 : vector<1x16x64xf32> to vector<16x64xf32>
    %250 = arith.mulf %249, %242 : vector<16x64xf32>
    %251 = vector.extract_strided_slice %83 {offsets = [0, 11], sizes = [16, 1], strides = [1, 1]} : vector<16x16xf32> to vector<16x1xf32>
    %252 = vector.extract_strided_slice %92 {offsets = [11, 0], sizes = [1, 64], strides = [1, 1]} : vector<16x64xf32> to vector<1x64xf32>
    %253 = vector.broadcast %251 : vector<16x1xf32> to vector<16x64xf32>
    %254 = vector.broadcast %252 : vector<1x64xf32> to vector<16x64xf32>
    %255 = arith.mulf %253, %254 : vector<16x64xf32>
    %256 = arith.addf %250, %255 : vector<16x64xf32>
    %257 = vector.extract_strided_slice %85 {offsets = [0, 11], sizes = [16, 1], strides = [1, 1]} : vector<16x16xf32> to vector<16x1xf32>
    %258 = vector.broadcast %257 : vector<16x1xf32> to vector<16x64xf32>
    %259 = arith.mulf %258, %256 : vector<16x64xf32>
    %cst_61 = arith.constant dense<0.000000e+00> : vector<64xf32>
    %260 = vector.multi_reduction <add>, %259, %cst_61 [0] : vector<16x64xf32> to vector<64xf32>
    %261 = vector.shape_cast %260 : vector<64xf32> to vector<1x64xf32>
    %262 = vector.extract_strided_slice %91 {offsets = [12, 0, 0], sizes = [1, 16, 64], strides = [1, 1, 1]} : vector<16x16x64xf32> to vector<1x16x64xf32>
    %263 = vector.shape_cast %262 : vector<1x16x64xf32> to vector<16x64xf32>
    %264 = arith.mulf %263, %256 : vector<16x64xf32>
    %265 = vector.extract_strided_slice %83 {offsets = [0, 12], sizes = [16, 1], strides = [1, 1]} : vector<16x16xf32> to vector<16x1xf32>
    %266 = vector.extract_strided_slice %92 {offsets = [12, 0], sizes = [1, 64], strides = [1, 1]} : vector<16x64xf32> to vector<1x64xf32>
    %267 = vector.broadcast %265 : vector<16x1xf32> to vector<16x64xf32>
    %268 = vector.broadcast %266 : vector<1x64xf32> to vector<16x64xf32>
    %269 = arith.mulf %267, %268 : vector<16x64xf32>
    %270 = arith.addf %264, %269 : vector<16x64xf32>
    %271 = vector.extract_strided_slice %85 {offsets = [0, 12], sizes = [16, 1], strides = [1, 1]} : vector<16x16xf32> to vector<16x1xf32>
    %272 = vector.broadcast %271 : vector<16x1xf32> to vector<16x64xf32>
    %273 = arith.mulf %272, %270 : vector<16x64xf32>
    %cst_62 = arith.constant dense<0.000000e+00> : vector<64xf32>
    %274 = vector.multi_reduction <add>, %273, %cst_62 [0] : vector<16x64xf32> to vector<64xf32>
    %275 = vector.shape_cast %274 : vector<64xf32> to vector<1x64xf32>
    %276 = vector.extract_strided_slice %91 {offsets = [13, 0, 0], sizes = [1, 16, 64], strides = [1, 1, 1]} : vector<16x16x64xf32> to vector<1x16x64xf32>
    %277 = vector.shape_cast %276 : vector<1x16x64xf32> to vector<16x64xf32>
    %278 = arith.mulf %277, %270 : vector<16x64xf32>
    %279 = vector.extract_strided_slice %83 {offsets = [0, 13], sizes = [16, 1], strides = [1, 1]} : vector<16x16xf32> to vector<16x1xf32>
    %280 = vector.extract_strided_slice %92 {offsets = [13, 0], sizes = [1, 64], strides = [1, 1]} : vector<16x64xf32> to vector<1x64xf32>
    %281 = vector.broadcast %279 : vector<16x1xf32> to vector<16x64xf32>
    %282 = vector.broadcast %280 : vector<1x64xf32> to vector<16x64xf32>
    %283 = arith.mulf %281, %282 : vector<16x64xf32>
    %284 = arith.addf %278, %283 : vector<16x64xf32>
    %285 = vector.extract_strided_slice %85 {offsets = [0, 13], sizes = [16, 1], strides = [1, 1]} : vector<16x16xf32> to vector<16x1xf32>
    %286 = vector.broadcast %285 : vector<16x1xf32> to vector<16x64xf32>
    %287 = arith.mulf %286, %284 : vector<16x64xf32>
    %cst_63 = arith.constant dense<0.000000e+00> : vector<64xf32>
    %288 = vector.multi_reduction <add>, %287, %cst_63 [0] : vector<16x64xf32> to vector<64xf32>
    %289 = vector.shape_cast %288 : vector<64xf32> to vector<1x64xf32>
    %290 = vector.extract_strided_slice %91 {offsets = [14, 0, 0], sizes = [1, 16, 64], strides = [1, 1, 1]} : vector<16x16x64xf32> to vector<1x16x64xf32>
    %291 = vector.shape_cast %290 : vector<1x16x64xf32> to vector<16x64xf32>
    %292 = arith.mulf %291, %284 : vector<16x64xf32>
    %293 = vector.extract_strided_slice %83 {offsets = [0, 14], sizes = [16, 1], strides = [1, 1]} : vector<16x16xf32> to vector<16x1xf32>
    %294 = vector.extract_strided_slice %92 {offsets = [14, 0], sizes = [1, 64], strides = [1, 1]} : vector<16x64xf32> to vector<1x64xf32>
    %295 = vector.broadcast %293 : vector<16x1xf32> to vector<16x64xf32>
    %296 = vector.broadcast %294 : vector<1x64xf32> to vector<16x64xf32>
    %297 = arith.mulf %295, %296 : vector<16x64xf32>
    %298 = arith.addf %292, %297 : vector<16x64xf32>
    %299 = vector.extract_strided_slice %85 {offsets = [0, 14], sizes = [16, 1], strides = [1, 1]} : vector<16x16xf32> to vector<16x1xf32>
    %300 = vector.broadcast %299 : vector<16x1xf32> to vector<16x64xf32>
    %301 = arith.mulf %300, %298 : vector<16x64xf32>
    %cst_64 = arith.constant dense<0.000000e+00> : vector<64xf32>
    %302 = vector.multi_reduction <add>, %301, %cst_64 [0] : vector<16x64xf32> to vector<64xf32>
    %303 = vector.shape_cast %302 : vector<64xf32> to vector<1x64xf32>
    %304 = vector.extract_strided_slice %91 {offsets = [15, 0, 0], sizes = [1, 16, 64], strides = [1, 1, 1]} : vector<16x16x64xf32> to vector<1x16x64xf32>
    %305 = vector.shape_cast %304 : vector<1x16x64xf32> to vector<16x64xf32>
    %306 = arith.mulf %305, %298 : vector<16x64xf32>
    %307 = vector.extract_strided_slice %83 {offsets = [0, 15], sizes = [16, 1], strides = [1, 1]} : vector<16x16xf32> to vector<16x1xf32>
    %308 = vector.extract_strided_slice %92 {offsets = [15, 0], sizes = [1, 64], strides = [1, 1]} : vector<16x64xf32> to vector<1x64xf32>
    %309 = vector.broadcast %307 : vector<16x1xf32> to vector<16x64xf32>
    %310 = vector.broadcast %308 : vector<1x64xf32> to vector<16x64xf32>
    %311 = arith.mulf %309, %310 : vector<16x64xf32>
    %312 = arith.addf %306, %311 : vector<16x64xf32>
    %313 = vector.extract_strided_slice %85 {offsets = [0, 15], sizes = [16, 1], strides = [1, 1]} : vector<16x16xf32> to vector<16x1xf32>
    %314 = vector.broadcast %313 : vector<16x1xf32> to vector<16x64xf32>
    %315 = arith.mulf %314, %312 : vector<16x64xf32>
    %cst_65 = arith.constant dense<0.000000e+00> : vector<64xf32>
    %316 = vector.multi_reduction <add>, %315, %cst_65 [0] : vector<16x64xf32> to vector<64xf32>
    %317 = vector.shape_cast %316 : vector<64xf32> to vector<1x64xf32>
    %c0_66 = arith.constant 0 : index
    %c0_67 = arith.constant 0 : index
    %318 = vector.load %arg17[%c0_66, %c0_67] : memref<16x64xf32, #tpu.memory_space<vmem>>, vector<16x64xf32>
    tpu.vector_store %arg17[%c0_66, %c0_67], %312 {strides = array<i32>} : memref<16x64xf32, #tpu.memory_space<vmem>>, vector<16x64xf32>,
    %319 = tpu.concatenate %107, %121, %135, %149, %163, %177, %191, %205, %219, %233, %247, %261, %275, %289, %303, %317 in 0 : vector<1x64xf32>, vector<1x64xf32>, vector<1x64xf32>, vector<1x64xf32>, vector<1x64xf32>, vector<1x64xf32>, vector<1x64xf32>, vector<1x64xf32>, vector<1x64xf32>, vector<1x64xf32>, vector<1x64xf32>, vector<1x64xf32>, vector<1x64xf32>, vector<1x64xf32>, vector<1x64xf32>, vector<1x64xf32> -> vector<16x64xf32>
    %320 = vector.broadcast %54 : vector<1x64xf32> to vector<16x64xf32>
    %321 = arith.mulf %320, %59 : vector<16x64xf32>
    %322 = arith.addf %319, %321 : vector<16x64xf32>
    %323 = arith.mulf %322, %68 : vector<16x64xf32>
    %324 = arith.index_cast %57 : i32 to index
    %c0_68 = arith.constant 0 : index
    %325 = vector.load %arg14[%324, %c0_68] : memref<16x64xf32, #tpu.memory_space<vmem>>, vector<16x64xf32>
    tpu.vector_store %arg14[%324, %c0_68], %323 {strides = array<i32>} : memref<16x64xf32, #tpu.memory_space<vmem>>, vector<16x64xf32>,
    %c1_i32 = arith.constant 1 : i32
    %c0_69 = arith.constant 0 : index
    %c0_70 = arith.constant 0 : index
    %326 = vector.load %arg14[%c0_69, %c0_70] : memref<16x64xf32, #tpu.memory_space<vmem>>, vector<16x64xf32>
    %c0_71 = arith.constant 0 : index
    %c0_72 = arith.constant 0 : index
    %327 = vector.load %arg10[%c0_71, %c0_72] : memref<64x32xbf16, #tpu.memory_space<vmem>>, vector<64x32xbf16>
    %328 = arith.truncf %326 : vector<16x64xf32> to vector<16x64xbf16>
    %cst_73 = arith.constant dense<0.000000e+00> : vector<16x32xf32>
    %329 = tpu.matmul %328, %327, %cst_73 {dimension_numbers = #tpu.dot_dimension_numbers<[1], [0], [0], [1], [0, 0, 1, 1], [], []>} : vector<16x64xbf16>, vector<64x32xbf16>, vector<16x32xf32> -> vector<16x32xf32>
    %c0_74 = arith.constant 0 : index
    %c0_75 = arith.constant 0 : index
    %330 = vector.load %arg11[%c0_74, %c0_75] : memref<32x4xbf16, #tpu.memory_space<vmem>>, vector<32x4xbf16>
    %331 = arith.truncf %329 : vector<16x32xf32> to vector<16x32xbf16>
    %cst_76 = arith.constant dense<0.000000e+00> : vector<16x4xf32>
    %332 = tpu.matmul %331, %330, %cst_76 {dimension_numbers = #tpu.dot_dimension_numbers<[1], [0], [0], [1], [0, 0, 1, 1], [], []>} : vector<16x32xbf16>, vector<32x4xbf16>, vector<16x4xf32> -> vector<16x4xf32>
    %c0_77 = arith.constant 0 : index
    %c0_78 = arith.constant 0 : index
    %333 = vector.load %arg12[%c0_77, %c0_78] : memref<1x4xf32, #tpu.memory_space<vmem>>, vector<1x4xf32>
    %334 = vector.broadcast %333 : vector<1x4xf32> to vector<16x4xf32>
    %335 = arith.addf %332, %334 : vector<16x4xf32>
    %c0_79 = arith.constant 0 : index
    %c0_80 = arith.constant 0 : index
    %c0_81 = arith.constant 0 : index
    %336 = vector.load %arg13[%c0_79, %c0_80, %c0_81] : memref<1x16x4xf32, #tpu.memory_space<vmem>>, vector<1x16x4xf32>
    %337 = vector.shape_cast %336 : vector<1x16x4xf32> to vector<16x4xf32>
    %338 = vector.shape_cast %335 : vector<16x4xf32> to vector<1x16x4xf32>
    tpu.vector_store %arg13[%c0_79, %c0_80, %c0_81], %338 {strides = array<i32>} : memref<1x16x4xf32, #tpu.memory_space<vmem>>, vector<1x16x4xf32>,
    return
  }
  func.func @transform_0(%arg0: i32) -> (i32, i32, i32) {
    %c0_i32 = arith.constant 0 : i32
    %c0_i32_0 = arith.constant 0 : i32
    %c0_i32_1 = arith.constant 0 : i32
    return %arg0, %c0_i32, %c0_i32_0 : i32, i32, i32
  }
  func.func @transform_1(%arg0: i32) -> (i32, i32) {
    %c0_i32 = arith.constant 0 : i32
    %c0_i32_0 = arith.constant 0 : i32
    %c0_i32_1 = arith.constant 0 : i32
    return %c0_i32, %c0_i32_0 : i32, i32
  }
  func.func @transform_2(%arg0: i32) -> (i32, i32) {
    %c0_i32 = arith.constant 0 : i32
    %c0_i32_0 = arith.constant 0 : i32
    %c0_i32_1 = arith.constant 0 : i32
    return %c0_i32, %c0_i32_0 : i32, i32
  }
  func.func @transform_3(%arg0: i32) -> (i32, i32, i32) {
    %c0_i32 = arith.constant 0 : i32
    %c0_i32_0 = arith.constant 0 : i32
    %c0_i32_1 = arith.constant 0 : i32
    %c0_i32_2 = arith.constant 0 : i32
    return %c0_i32, %c0_i32_0, %c0_i32_1 : i32, i32, i32
  }
  func.func @transform_4(%arg0: i32) -> (i32, i32) {
    %c0_i32 = arith.constant 0 : i32
    %c0_i32_0 = arith.constant 0 : i32
    %c0_i32_1 = arith.constant 0 : i32
    return %c0_i32, %c0_i32_0 : i32, i32
  }
  func.func @transform_5(%arg0: i32) -> (i32, i32) {
    %c0_i32 = arith.constant 0 : i32
    %c0_i32_0 = arith.constant 0 : i32
    %c0_i32_1 = arith.constant 0 : i32
    return %c0_i32, %c0_i32_0 : i32, i32
  }
  func.func @transform_6(%arg0: i32) -> (i32, i32) {
    %c0_i32 = arith.constant 0 : i32
    %c0_i32_0 = arith.constant 0 : i32
    %c0_i32_1 = arith.constant 0 : i32
    return %c0_i32, %c0_i32_0 : i32, i32
  }
  func.func @transform_7(%arg0: i32) -> (i32, i32) {
    %c0_i32 = arith.constant 0 : i32
    %c0_i32_0 = arith.constant 0 : i32
    %c0_i32_1 = arith.constant 0 : i32
    return %c0_i32, %c0_i32_0 : i32, i32
  }
  func.func @transform_8(%arg0: i32) -> (i32, i32) {
    %c0_i32 = arith.constant 0 : i32
    %c0_i32_0 = arith.constant 0 : i32
    %c0_i32_1 = arith.constant 0 : i32
    return %c0_i32, %c0_i32_0 : i32, i32
  }
  func.func @transform_9(%arg0: i32) -> (i32, i32) {
    %c0_i32 = arith.constant 0 : i32
    %c0_i32_0 = arith.constant 0 : i32
    %c0_i32_1 = arith.constant 0 : i32
    return %c0_i32, %c0_i32_0 : i32, i32
  }
  func.func @transform_10(%arg0: i32) -> (i32, i32) {
    %c0_i32 = arith.constant 0 : i32
    %c0_i32_0 = arith.constant 0 : i32
    %c0_i32_1 = arith.constant 0 : i32
    return %c0_i32, %c0_i32_0 : i32, i32
  }
  func.func @transform_11(%arg0: i32) -> (i32, i32) {
    %c0_i32 = arith.constant 0 : i32
    %c0_i32_0 = arith.constant 0 : i32
    %c0_i32_1 = arith.constant 0 : i32
    return %c0_i32, %c0_i32_0 : i32, i32
  }
  func.func @transform_12(%arg0: i32) -> (i32, i32, i32) {
    %c0_i32 = arith.constant 0 : i32
    %c0_i32_0 = arith.constant 0 : i32
    %c0_i32_1 = arith.constant 0 : i32
    return %arg0, %c0_i32, %c0_i32_0 : i32, i32, i32
  }
}

module attributes {stable_mosaic.version = 11 : i64} {
  func.func @_classify_kernel(%arg0: i32, %arg1: memref<1x16x4xf32, #tpu.memory_space<vmem>>, %arg2: memref<4x4xbf16, #tpu.memory_space<vmem>>, %arg3: memref<4x1xf32, #tpu.memory_space<vmem>>, %arg4: memref<1x4x16xf32, #tpu.memory_space<vmem>>) attributes {dimension_semantics = [#tpu.dimension_semantics<parallel>], iteration_bounds = array<i64: 2>, scalar_prefetch = 0 : i64, scratch_operands = 0 : i64, tpu.core_type = #tpu.core_type<tc>, window_params = [{transform_indices = @transform_0, window_bounds = array<i64: 1, 16, 4>}, {pipeline_mode = #tpu.pipeline_mode<synchronous>, transform_indices = @transform_1, window_bounds = array<i64: 4, 4>}, {pipeline_mode = #tpu.pipeline_mode<synchronous>, transform_indices = @transform_2, window_bounds = array<i64: 4, 1>}, {transform_indices = @transform_3, window_bounds = array<i64: 1, 4, 16>}]} {
    %c0 = arith.constant 0 : index
    %c0_0 = arith.constant 0 : index
    %0 = vector.load %arg2[%c0, %c0_0] : memref<4x4xbf16, #tpu.memory_space<vmem>>, vector<4x4xbf16>
    %c0_1 = arith.constant 0 : index
    %c0_2 = arith.constant 0 : index
    %c0_3 = arith.constant 0 : index
    %1 = vector.load %arg1[%c0_1, %c0_2, %c0_3] : memref<1x16x4xf32, #tpu.memory_space<vmem>>, vector<1x16x4xf32>
    %2 = vector.shape_cast %1 : vector<1x16x4xf32> to vector<16x4xf32>
    %3 = arith.truncf %2 : vector<16x4xf32> to vector<16x4xbf16>
    %cst = arith.constant dense<0.000000e+00> : vector<4x16xf32>
    %4 = tpu.matmul %0, %3, %cst {dimension_numbers = #tpu.dot_dimension_numbers<[1], [1], [0], [0], [0, 0, 1, 0], [], []>} : vector<4x4xbf16>, vector<16x4xbf16>, vector<4x16xf32> -> vector<4x16xf32>
    %c0_4 = arith.constant 0 : index
    %c0_5 = arith.constant 0 : index
    %5 = vector.load %arg3[%c0_4, %c0_5] : memref<4x1xf32, #tpu.memory_space<vmem>>, vector<4x1xf32>
    %6 = vector.broadcast %5 : vector<4x1xf32> to vector<4x16xf32>
    %7 = arith.addf %4, %6 : vector<4x16xf32>
    %c0_6 = arith.constant 0 : index
    %c0_7 = arith.constant 0 : index
    %c0_8 = arith.constant 0 : index
    %8 = vector.load %arg4[%c0_6, %c0_7, %c0_8] : memref<1x4x16xf32, #tpu.memory_space<vmem>>, vector<1x4x16xf32>
    %9 = vector.shape_cast %8 : vector<1x4x16xf32> to vector<4x16xf32>
    %10 = vector.shape_cast %7 : vector<4x16xf32> to vector<1x4x16xf32>
    tpu.vector_store %arg4[%c0_6, %c0_7, %c0_8], %10 {strides = array<i32>} : memref<1x4x16xf32, #tpu.memory_space<vmem>>, vector<1x4x16xf32>,
    return
  }
  func.func @transform_0(%arg0: i32) -> (i32, i32, i32) {
    %c0_i32 = arith.constant 0 : i32
    %c0_i32_0 = arith.constant 0 : i32
    %c0_i32_1 = arith.constant 0 : i32
    return %arg0, %c0_i32, %c0_i32_0 : i32, i32, i32
  }
  func.func @transform_1(%arg0: i32) -> (i32, i32) {
    %c0_i32 = arith.constant 0 : i32
    %c0_i32_0 = arith.constant 0 : i32
    %c0_i32_1 = arith.constant 0 : i32
    return %c0_i32, %c0_i32_0 : i32, i32
  }
  func.func @transform_2(%arg0: i32) -> (i32, i32) {
    %c0_i32 = arith.constant 0 : i32
    %c0_i32_0 = arith.constant 0 : i32
    %c0_i32_1 = arith.constant 0 : i32
    return %c0_i32, %c0_i32_0 : i32, i32
  }
  func.func @transform_3(%arg0: i32) -> (i32, i32, i32) {
    %c0_i32 = arith.constant 0 : i32
    %c0_i32_0 = arith.constant 0 : i32
    %c0_i32_1 = arith.constant 0 : i32
    return %arg0, %c0_i32, %c0_i32_0 : i32, i32, i32
  }
}

</mosaic_0001>

<bundles_post_ra>
// kernel: _lambda_.5
= control target key start
LH: loop header
LB: loop body
LE: loop exit
PB: predicated region body
PF: predicated region fallthrough
CT: control target
= control target key end

     0   :  { %s3258_s0 = inlined_call_operand.hbm [shape: f32[2,16,16], index: 0, kind: input, shape index: {}]   ;;  %s3259_s1 = inlined_call_operand.hbm [shape: bf16[16,32], index: 1, kind: input, shape index: {}]   ;;  %s3260_s2 = inlined_call_operand.hbm [shape: f32[1,32], index: 2, kind: input, shape index: {}]   ;;  %s3261_s3 = inlined_call_operand.hbm [shape: bf16[3,32,4], index: 3, kind: input, shape index: {}]   ;;  %s3262_s4 = inlined_call_operand.hbm [shape: f32[1,4], index: 4, kind: input, shape index: {}]   ;;  %s3263_s5 = inlined_call_operand.hbm [shape: bf16[3,4,4], index: 5, kind: input, shape index: {}]   ;;  %s3264_s6 = inlined_call_operand.hbm [shape: f32[1,4], index: 6, kind: input, shape index: {}]   ;;  %s3265_s7 = inlined_call_operand.hbm [shape: bf16[3,4,4], index: 7, kind: input, shape index: {}]   ;;  %s3266_s8 = inlined_call_operand.hbm [shape: f32[1,4], index: 8, kind: input, shape index: {}]   ;;  %s3267_s9 = inlined_call_operand.hbm [shape: bf16[32,32], index: 9, kind: input, shape index: {}]   ;;  %s3268_s10 = inlined_call_operand.hbm [shape: bf16[4,32], index: 10, kind: input, shape index: {}]   ;;  %s3269_s11 = inlined_call_operand.hbm [shape: bf16[4,32], index: 11, kind: input, shape index: {}]   ;;  %s3270_s12 = inlined_call_operand.hbm [shape: bf16[4,32], index: 12, kind: input, shape index: {}]   ;;  %s3271_s13 = inlined_call_operand.hbm [shape: f32[1,32], index: 13, kind: input, shape index: {}]   ;;  %s3272_s14 = inlined_call_operand.hbm [shape: f32[2,16,32], index: 14, kind: output, shape index: {}]  }
   0x1   :  { %3285 = sst [smem:[#allocation39_spill]] %s3258_s0 }
   0x2   :  { %3286 = sst [smem:[#allocation40_spill]] %s3259_s1 }
   0x3   :  { %3287 = sst [smem:[#allocation41_spill]] %s3261_s3 }
   0x4   :  { %3288 = sst [smem:[#allocation42_spill]] %s3272_s14 }
   0x5   :  { %19 = vsyncpa [#allocation3], 0 }
   0x6   :  { %21 = vsyncpa [#allocation3 + $0x1], 0 }
   0x7   :  { %22 = vsyncpa [#allocation6], 0 }
   0x8   :  { %23 = vsyncpa [#allocation9], 0 }
   0x9   :  { %24 = vsyncpa [#allocation12], 0 }
   0xa   :  { %25 = vsyncpa [#allocation15], 0 }
   0xb   :  { %26 = vsyncpa [#allocation18], 0 }
   0xc   :  { %27 = vsyncpa [#allocation21], 0 }
   0xd   :  { %28 = vsyncpa [#allocation24], 0 }
   0xe   :  { %29 = vsyncpa [#allocation4], 0 }
   0xf   :  { %31 = vsyncpa [#allocation4 + $0x1], 0  ;;  %s2706_s29 = smov 0   ;;  %s2708_s30 = smov 0  }
  0x10   :  { %s2710_s15 = smov 0   ;;  %s2712_s16 = smov 0  }
  0x11 LB: > { %3289 = sst [smem:[#allocation35_spill]] %s2592_s29  ;;  %s2606_s17 = smov [#allocation5]   ;;  %s2604_s16 = sphi %s2712_s16, %s3335_s16   ;;  %s2600_s15 = sphi %s2710_s15, %s3334_s15   ;;  %s2596_s30 = sphi %s2708_s30, %s3333_s30   ;;  %s2592_s29 = sphi %s2706_s29, %s3332_s29  }
  0x12   : > { %3290 = sst [smem:[#allocation36_spill]] %s2596_s30  ;;  %s379_s18 = sshll.u32 %s2606_s17, 4  ;;  %s2732_s18 = int_to_ptr.vmem [resolvable:$true] %s379_s18 }
  0x13   : > { %s2727_s19 = sadd.s32 4294967295, %s2604_s16   ;;  %p1697_p0 = scmp.ge.s32.totalorder %s2604_s16, 1 }
  0x14   : > { %3291 = sst [smem:[#allocation37_spill]] %s2727_s19  ;;  %p3282_p1 = scmp.eq.s32.totalorder %s2727_s19, 0 }
  0x15   : > { %p367_p2 = scmp.lt.s32.totalorder %s2604_s16, 3  ;;  %s2607_s21 = smov [#allocation8]  }
  0x16   : > { %s403_s22 = sshll.u32 %s2607_s21, 4  ;;  %s2608_s24 = smov [#allocation11]   ;;  %s2747_s22 = int_to_ptr.vmem [resolvable:$true] %s403_s22 }
  0x17   : > { %p2734_p3 = pnand %p1697_p0, %p367_p2  ;;  %s427_s25 = sshll.u32 %s2608_s24, 4  ;;  %s2749_s25 = int_to_ptr.vmem [resolvable:$true] %s427_s25 }
  0x18   : > { %s3295_s1 = sld [smem:[#allocation40_spill]] }
  0x19   : > { %s3292_s20 = scalar_select %p2734_p3, 1, 0 }
  0x1a   : > { %p1976_p5 = pneg %p2734_p3 }
  0x1b   : > { %3293 = sst [smem:[#allocation38_spill]] %s3292_s20 }
  0x1c   : > { %p2743_p6 = pnand %p1976_p5, %p3282_p1 }
  0x1e   : > { %s2116_s28 = scalar_lea.hbm %s3295_s1, 128  ;;  %p2759_p8 = pneg %p2743_p6 }
  0x1f   : > { %p2117_p7 = scmp.ne.s32.totalorder %s3295_s1, %s2116_s28  ;;  %p2123_p11 = scmp.lt.u32.totalorder %s2116_s28, %s3295_s1 }
  0x21   : > { %p2119_p9 = pnand %p2759_p8, %p2117_p7 }
  0x23   : > { %p2120_p10 = pneg %p2119_p9 }
  0x25   : > { %p2125_p12 = pnand %p2123_p11, %p2120_p10 }
  0x27   : > { %2128 = shalt.err (!%p2125_p12)
}
  0x28   : > { %s2129_s14 = scalar_lea.vmem %s2732_s18, 128  ;;  %p2137_p5 = scmp.lt.s32.totalorder %s2732_s18, %s2732_s18 }
  0x29   : > { %p2130_p13 = scmp.ne.s32.totalorder %s2732_s18, %s2129_s14  ;;  %p2138_p4 = scmp.lt.s32.totalorder %s2129_s14, %s2129_s14 }
  0x2b   : > { %p2132_p0 = pnand %p2130_p13, %p2759_p8  ;;  %p2139_p7 = por %p2138_p4, %p2137_p5 }
  0x2d   : > { %p2133_p2 = pneg %p2132_p0 }
  0x2f   : > { %p2140_p9 = pnand %p2139_p7, %p2133_p2 }
  0x31   : > { %2143 = shalt.err (!%p2140_p9)
}
  0x32   : > { %s3280_s26 = smov 64   ;;  %s3281_s20 = smov 4  }
  0x33   : > { %1979 = dma.hbm_to_vmem [thread:$0]  (!%p2743_p6), %s3295_s1, 128, %s2732_s18, [#allocation6], %s3280_s26, %s3280_s26, %s3281_s20  }
  0x34   : > { %s3297_s3 = sld [smem:[#allocation41_spill]] }
  0x3a   : > { %s2144_s14 = scalar_lea.hbm %s3297_s3, 768 }
  0x3b   : > { %p2145_p4 = scmp.ne.s32.totalorder %s3297_s3, %s2144_s14  ;;  %p2151_p12 = scmp.lt.u32.totalorder %s2144_s14, %s3297_s3 }
  0x3d   : > { %p2147_p10 = pnand %p2145_p4, %p2759_p8 }
  0x3f   : > { %p2148_p11 = pneg %p2147_p10 }
  0x41   : > { %p2153_p13 = pnand %p2151_p12, %p2148_p11 }
  0x43   : > { %2156 = shalt.err (!%p2153_p13)
}
  0x44   : > { %s2157_s18 = scalar_lea.vmem %s2747_s22, 768  ;;  %p2165_p7 = scmp.lt.s32.totalorder %s2747_s22, %s2747_s22 }
  0x45   : > { %p2158_p0 = scmp.ne.s32.totalorder %s2747_s22, %s2157_s18  ;;  %p2166_p9 = scmp.lt.s32.totalorder %s2157_s18, %s2157_s18 }
  0x47   : > { %p2160_p2 = pnand %p2158_p0, %p2759_p8  ;;  %p2167_p4 = por %p2166_p9, %p2165_p7 }
  0x49   : > { %p2161_p5 = pneg %p2160_p2 }
  0x4b   : > { %p2168_p10 = pnand %p2167_p4, %p2161_p5 }
  0x4d   : > { %2171 = shalt.err (!%p2168_p10)
}
  0x4e   : > { %1985 = dma.hbm_to_vmem [thread:$0]  (!%p2743_p6), %s3297_s3, 768, %s2747_s22, [#allocation9], %s3280_s26, %s3280_s26, %s3281_s20  }
  0x4f   : > { %s2172_s27 = scalar_lea.hbm %s3263_s5, 96 }
  0x50   : > { %p2173_p11 = scmp.ne.s32.totalorder %s3263_s5, %s2172_s27  ;;  %p2179_p0 = scmp.lt.u32.totalorder %s2172_s27, %s3263_s5 }
  0x52   : > { %p2175_p12 = pnand %p2173_p11, %p2759_p8 }
  0x54   : > { %p2176_p13 = pneg %p2175_p12 }
  0x56   : > { %p2181_p2 = pnand %p2179_p0, %p2176_p13 }
  0x58   : > { %2184 = shalt.err (!%p2181_p2)
}
  0x59   : > { %s2185_s22 = scalar_lea.vmem %s2749_s25, 96  ;;  %p2193_p4 = scmp.lt.s32.totalorder %s2749_s25, %s2749_s25 }
  0x5a   : > { %p2186_p5 = scmp.ne.s32.totalorder %s2749_s25, %s2185_s22  ;;  %p2194_p10 = scmp.lt.s32.totalorder %s2185_s22, %s2185_s22 }
  0x5c   : > { %p2188_p7 = pnand %p2186_p5, %p2759_p8  ;;  %p2195_p11 = por %p2194_p10, %p2193_p4 }
  0x5e   : > { %p2189_p9 = pneg %p2188_p7 }
  0x60   : > { %p2196_p12 = pnand %p2195_p11, %p2189_p9 }
  0x62   : > { %2199 = shalt.err (!%p2196_p12)
}
  0x63   : > { %s2611_s18 = smov 32   ;;  %s2612_s0 = smov 2  }
  0x64   : > { %1991 = dma.hbm_to_vmem [thread:$0]  (!%p2743_p6), %s3263_s5, 96, %s2749_s25, [#allocation12], %s2611_s18, %s2611_s18, %s2612_s0  }
  0x65   : > { %s2613_s19 = smov [#allocation14]   ;;  %s2614_s28 = smov [#allocation17]  }
  0x66   : > { %s451_s27 = sshll.u32 %s2613_s19, 4  ;;  %s475_s17 = sshll.u32 %s2614_s28, 4  ;;  %s452_s27 = int_to_ptr.vmem [resolvable:$true] %s451_s27  ;;  %s476_s17 = int_to_ptr.vmem [resolvable:$true] %s475_s17 }
  0x67   : > { %s2200_s22 = scalar_lea.hbm %s3265_s7, 96 }
  0x68   : > { %p2201_p13 = scmp.ne.s32.totalorder %s3265_s7, %s2200_s22  ;;  %p2207_p5 = scmp.lt.u32.totalorder %s2200_s22, %s3265_s7 }
  0x6a   : > { %p2203_p0 = pnand %p2201_p13, %p2759_p8 }
  0x6c   : > { %p2204_p2 = pneg %p2203_p0 }
  0x6e   : > { %p2209_p7 = pnand %p2207_p5, %p2204_p2 }
  0x70   : > { %2212 = shalt.err (!%p2209_p7)
}
  0x71   : > { %s2213_s25 = scalar_lea.vmem %s452_s27, 96  ;;  %p2221_p11 = scmp.lt.s32.totalorder %s452_s27, %s452_s27 }
  0x72   : > { %p2214_p9 = scmp.ne.s32.totalorder %s452_s27, %s2213_s25  ;;  %p2222_p12 = scmp.lt.s32.totalorder %s2213_s25, %s2213_s25 }
  0x74   : > { %p2216_p4 = pnand %p2214_p9, %p2759_p8  ;;  %p2223_p1 = por %p2222_p12, %p2221_p11 }
  0x76   : > { %p2217_p10 = pneg %p2216_p4 }
  0x78   : > { %p2224_p3 = pnand %p2223_p1, %p2217_p10 }
  0x7a   : > { %2227 = shalt.err (!%p2224_p3)
}
  0x7b   : > { %1997 = dma.hbm_to_vmem [thread:$0]  (!%p2743_p6), %s3265_s7, 96, %s452_s27, [#allocation15], %s2611_s18, %s2611_s18, %s2612_s0  }
  0x7c   : > { %s2228_s29 = scalar_lea.hbm %s3267_s9, 256 }
  0x7d   : > { %p2229_p13 = scmp.ne.s32.totalorder %s3267_s9, %s2228_s29  ;;  %p2235_p3 = scmp.lt.u32.totalorder %s2228_s29, %s3267_s9 }
  0x7f   : > { %p2231_p0 = pnand %p2229_p13, %p2759_p8 }
  0x81   : > { %p2232_p1 = pneg %p2231_p0 }
  0x83   : > { %p2237_p2 = pnand %p2235_p3, %p2232_p1 }
  0x85   : > { %2240 = shalt.err (!%p2237_p2)
}
  0x86   : > { %s2241_s14 = scalar_lea.vmem %s476_s17, 256  ;;  %p2249_p4 = scmp.lt.s32.totalorder %s476_s17, %s476_s17 }
  0x87   : > { %p2242_p5 = scmp.ne.s32.totalorder %s476_s17, %s2241_s14  ;;  %p2250_p10 = scmp.lt.s32.totalorder %s2241_s14, %s2241_s14 }
  0x89   : > { %p2244_p7 = pnand %p2242_p5, %p2759_p8  ;;  %p2251_p11 = por %p2250_p10, %p2249_p4 }
  0x8b   : > { %p2245_p9 = pneg %p2244_p7 }
  0x8d   : > { %p2252_p12 = pnand %p2251_p11, %p2245_p9 }
  0x8f   : > { %2255 = shalt.err (!%p2252_p12)
}
  0x90   : > { %s3298_s18 = smov 4   ;;  %s3299_s0 = smov 64  }
  0x91   : > { %2003 = dma.hbm_to_vmem [thread:$0]  (!%p2743_p6), %s3267_s9, 256, %s476_s17, [#allocation18], %s3299_s0, %s3299_s0, %s3298_s18  }
  0x92   : > { %s2615_s25 = smov [#allocation20]   ;;  %s2616_s20 = smov [#allocation7]  }
  0x93   : > { %s500_s26 = sshll.u32 %s2615_s25, 4  ;;  %s393_s1 = sshll.u32 %s2616_s20, 4  ;;  %s501_s26 = int_to_ptr.vmem [resolvable:$true] %s500_s26  ;;  %s394_s1 = int_to_ptr.vmem [resolvable:$true] %s393_s1 }
  0x94   : > { %s2256_s30 = scalar_lea.hbm %s3269_s11, 32 }
  0x95   : > { %p2257_p13 = scmp.ne.s32.totalorder %s3269_s11, %s2256_s30  ;;  %p2263_p3 = scmp.lt.u32.totalorder %s2256_s30, %s3269_s11 }
  0x97   : > { %p2259_p0 = pnand %p2257_p13, %p2759_p8 }
  0x99   : > { %p2260_p1 = pneg %p2259_p0 }
  0x9b   : > { %p2265_p2 = pnand %p2263_p3, %p2260_p1 }
  0x9d   : > { %2268 = shalt.err (!%p2265_p2)
}
  0x9e   : > { %s2269_s17 = scalar_lea.vmem %s501_s26, 32  ;;  %p2277_p4 = scmp.lt.s32.totalorder %s501_s26, %s501_s26 }
  0x9f   : > { %p2270_p5 = scmp.ne.s32.totalorder %s501_s26, %s2269_s17  ;;  %p2278_p10 = scmp.lt.s32.totalorder %s2269_s17, %s2269_s17 }
  0xa1   : > { %p2272_p7 = pnand %p2270_p5, %p2759_p8  ;;  %p2279_p11 = por %p2278_p10, %p2277_p4 }
  0xa3   : > { %p2273_p9 = pneg %p2272_p7 }
  0xa5   : > { %p2280_p12 = pnand %p2279_p11, %p2273_p9 }
  0xa7   : > { %2283 = shalt.err (!%p2280_p12)
}
  0xa8   : > { %2009 = dma.hbm_to_vmem [thread:$0]  (!%p2743_p6), %s3269_s11, 32, %s501_s26, [#allocation21]  }
  0xa9   : > { %s2284_s25 = scalar_lea.hbm %s3260_s2, 16 }
  0xaa   : > { %p2285_p13 = scmp.ne.s32.totalorder %s3260_s2, %s2284_s25  ;;  %p2291_p3 = scmp.lt.u32.totalorder %s2284_s25, %s3260_s2 }
  0xac   : > { %p2287_p0 = pnand %p2285_p13, %p2759_p8 }
  0xae   : > { %p2288_p1 = pneg %p2287_p0 }
  0xb0   : > { %p2293_p2 = pnand %p2291_p3, %p2288_p1 }
  0xb2   : > { %2296 = shalt.err (!%p2293_p2)
}
  0xb3   : > { %s2297_s19 = scalar_lea.vmem %s394_s1, 16  ;;  %s2304_s26 = scalar_lea.vmem %s394_s1, 32 }
  0xb4   : > { %p2298_p5 = scmp.ne.s32.totalorder %s394_s1, %s2297_s19  ;;  %p2305_p4 = scmp.lt.s32.totalorder %s394_s1, %s394_s1 }
  0xb5   : > { %p2306_p10 = scmp.lt.s32.totalorder %s2304_s26, %s2297_s19 }
  0xb6   : > { %p2300_p7 = pnand %p2298_p5, %p2759_p8 }
  0xb7   : > { %p2307_p11 = por %p2306_p10, %p2305_p4 }
  0xb8   : > { %p2301_p9 = pneg %p2300_p7 }
  0xba   : > { %p2308_p12 = pnand %p2307_p11, %p2301_p9 }
  0xbc   : > { %2311 = shalt.err (!%p2308_p12)
}
  0xbd   : > { %1982 = dma.hbm_to_vmem [thread:$0]  (!%p2743_p6), %s3260_s2, 16, %s394_s1, [#allocation6]  }
  0xbe   : > { %s2617_s14 = smov [#allocation10]   ;;  %s2618_s18 = smov [#allocation13]  }
  0xbf   : > { %s417_s17 = sshll.u32 %s2617_s14, 4  ;;  %s441_s0 = sshll.u32 %s2618_s18, 4  ;;  %s418_s17 = int_to_ptr.vmem [resolvable:$true] %s417_s17  ;;  %s442_s0 = int_to_ptr.vmem [resolvable:$true] %s441_s0 }
  0xc0   : > { %s2312_s25 = scalar_lea.hbm %s3262_s4, 16 }
  0xc1   : > { %p2313_p13 = scmp.ne.s32.totalorder %s3262_s4, %s2312_s25  ;;  %p2319_p3 = scmp.lt.u32.totalorder %s2312_s25, %s3262_s4 }
  0xc3   : > { %p2315_p0 = pnand %p2313_p13, %p2759_p8 }
  0xc5   : > { %p2316_p1 = pneg %p2315_p0 }
  0xc7   : > { %p2321_p2 = pnand %p2319_p3, %p2316_p1 }
  0xc9   : > { %2324 = shalt.err (!%p2321_p2)
}
  0xca   : > { %s2325_s1 = scalar_lea.vmem %s418_s17, 16  ;;  %s2332_s19 = scalar_lea.vmem %s418_s17, 32 }
  0xcb   : > { %p2326_p5 = scmp.ne.s32.totalorder %s418_s17, %s2325_s1  ;;  %p2333_p4 = scmp.lt.s32.totalorder %s418_s17, %s418_s17 }
  0xcc   : > { %p2334_p10 = scmp.lt.s32.totalorder %s2332_s19, %s2325_s1 }
  0xcd   : > { %p2328_p7 = pnand %p2326_p5, %p2759_p8 }
  0xce   : > { %p2335_p11 = por %p2334_p10, %p2333_p4 }
  0xcf   : > { %p2329_p9 = pneg %p2328_p7 }
  0xd1   : > { %p2336_p12 = pnand %p2335_p11, %p2329_p9 }
  0xd3   : > { %2339 = shalt.err (!%p2336_p12)
}
  0xd4   : > { %1988 = dma.hbm_to_vmem [thread:$0]  (!%p2743_p6), %s3262_s4, 16, %s418_s17, [#allocation9]  }
  0xd5   : > { %s2340_s18 = scalar_lea.hbm %s3264_s6, 16 }
  0xd6   : > { %p2341_p13 = scmp.ne.s32.totalorder %s3264_s6, %s2340_s18  ;;  %p2347_p3 = scmp.lt.u32.totalorder %s2340_s18, %s3264_s6 }
  0xd8   : > { %p2343_p0 = pnand %p2341_p13, %p2759_p8 }
  0xda   : > { %p2344_p1 = pneg %p2343_p0 }
  0xdc   : > { %p2349_p2 = pnand %p2347_p3, %p2344_p1 }
  0xde   : > { %2352 = shalt.err (!%p2349_p2)
}
  0xdf   : > { %s2353_s3 = scalar_lea.vmem %s442_s0, 16  ;;  %s2360_s17 = scalar_lea.vmem %s442_s0, 32 }
  0xe0   : > { %p2354_p5 = scmp.ne.s32.totalorder %s442_s0, %s2353_s3  ;;  %p2361_p4 = scmp.lt.s32.totalorder %s442_s0, %s442_s0 }
  0xe1   : > { %p2362_p10 = scmp.lt.s32.totalorder %s2360_s17, %s2353_s3 }
  0xe2   : > { %p2356_p7 = pnand %p2354_p5, %p2759_p8 }
  0xe3   : > { %p2363_p11 = por %p2362_p10, %p2361_p4 }
  0xe4   : > { %p2357_p9 = pneg %p2356_p7 }
  0xe6   : > { %p2364_p12 = pnand %p2363_p11, %p2357_p9 }
  0xe8   : > { %2367 = shalt.err (!%p2364_p12)
}
  0xe9   : > { %1994 = dma.hbm_to_vmem [thread:$0]  (!%p2743_p6), %s3264_s6, 16, %s442_s0, [#allocation12]  }
  0xea   : > { %s2619_s1 = smov [#allocation16]   ;;  %s2620_s26 = smov [#allocation19]  }
  0xeb   : > { %s465_s19 = sshll.u32 %s2619_s1, 4  ;;  %s489_s28 = sshll.u32 %s2620_s26, 4  ;;  %s466_s19 = int_to_ptr.vmem [resolvable:$true] %s465_s19  ;;  %s490_s28 = int_to_ptr.vmem [resolvable:$true] %s489_s28 }
  0xec   : > { %s2368_s18 = scalar_lea.hbm %s3266_s8, 16 }
  0xed   : > { %p2369_p13 = scmp.ne.s32.totalorder %s3266_s8, %s2368_s18  ;;  %p2375_p3 = scmp.lt.u32.totalorder %s2368_s18, %s3266_s8 }
  0xef   : > { %p2371_p0 = pnand %p2369_p13, %p2759_p8 }
  0xf1   : > { %p2372_p1 = pneg %p2371_p0 }
  0xf3   : > { %p2377_p2 = pnand %p2375_p3, %p2372_p1 }
  0xf5   : > { %2380 = shalt.err (!%p2377_p2)
}
  0xf6   : > { %s2381_s0 = scalar_lea.vmem %s466_s19, 16  ;;  %s2388_s3 = scalar_lea.vmem %s466_s19, 32 }
  0xf7   : > { %p2382_p5 = scmp.ne.s32.totalorder %s466_s19, %s2381_s0  ;;  %p2389_p4 = scmp.lt.s32.totalorder %s466_s19, %s466_s19 }
  0xf8   : > { %p2390_p10 = scmp.lt.s32.totalorder %s2388_s3, %s2381_s0 }
  0xf9   : > { %p2384_p7 = pnand %p2382_p5, %p2759_p8 }
  0xfa   : > { %p2391_p11 = por %p2390_p10, %p2389_p4 }
  0xfb   : > { %p2385_p9 = pneg %p2384_p7 }
  0xfd   : > { %p2392_p12 = pnand %p2391_p11, %p2385_p9 }
  0xff   : > { %2395 = shalt.err (!%p2392_p12)
}
 0x100   : > { %2000 = dma.hbm_to_vmem [thread:$0]  (!%p2743_p6), %s3266_s8, 16, %s466_s19, [#allocation15]  }
 0x101   : > { %s2396_s26 = scalar_lea.hbm %s3268_s10, 32 }
 0x102   : > { %p2397_p13 = scmp.ne.s32.totalorder %s3268_s10, %s2396_s26  ;;  %p2403_p3 = scmp.lt.u32.totalorder %s2396_s26, %s3268_s10 }
 0x104   : > { %p2399_p0 = pnand %p2397_p13, %p2759_p8 }
 0x106   : > { %p2400_p1 = pneg %p2399_p0 }
 0x108   : > { %p2405_p2 = pnand %p2403_p3, %p2400_p1 }
 0x10a   : > { %2408 = shalt.err (!%p2405_p2)
}
 0x10b   : > { %s2409_s22 = scalar_lea.vmem %s490_s28, 32  ;;  %p2417_p4 = scmp.lt.s32.totalorder %s490_s28, %s490_s28 }
 0x10c   : > { %p2410_p5 = scmp.ne.s32.totalorder %s490_s28, %s2409_s22  ;;  %p2418_p10 = scmp.lt.s32.totalorder %s2409_s22, %s2409_s22 }
 0x10e   : > { %p2412_p7 = pnand %p2410_p5, %p2759_p8  ;;  %p2419_p11 = por %p2418_p10, %p2417_p4 }
 0x110   : > { %p2413_p9 = pneg %p2412_p7 }
 0x112   : > { %p2420_p12 = pnand %p2419_p11, %p2413_p9 }
 0x114   : > { %2423 = shalt.err (!%p2420_p12)
}
 0x115   : > { %2006 = dma.hbm_to_vmem [thread:$0]  (!%p2743_p6), %s3268_s10, 32, %s490_s28, [#allocation18]  }
 0x116   : > { %s2621_s20 = smov [#allocation22]   ;;  %s2622_s3 = smov [#allocation23]  }
 0x117   : > { %s511_s0 = sshll.u32 %s2621_s20, 4  ;;  %s522_s17 = sshll.u32 %s2622_s3, 4  ;;  %s512_s0 = int_to_ptr.vmem [resolvable:$true] %s511_s0  ;;  %s523_s17 = int_to_ptr.vmem [resolvable:$true] %s522_s17 }
 0x118   : > { %s2424_s1 = scalar_lea.hbm %s3270_s12, 32 }
 0x119   : > { %p2425_p13 = scmp.ne.s32.totalorder %s3270_s12, %s2424_s1  ;;  %p2431_p3 = scmp.lt.u32.totalorder %s2424_s1, %s3270_s12 }
 0x11b   : > { %p2427_p0 = pnand %p2425_p13, %p2759_p8 }
 0x11d   : > { %p2428_p1 = pneg %p2427_p0 }
 0x11f   : > { %p2433_p2 = pnand %p2431_p3, %p2428_p1 }
 0x121   : > { %2436 = shalt.err (!%p2433_p2)
}
 0x122   : > { %s2437_s28 = scalar_lea.vmem %s512_s0, 32  ;;  %p2445_p4 = scmp.lt.s32.totalorder %s512_s0, %s512_s0 }
 0x123   : > { %p2438_p5 = scmp.ne.s32.totalorder %s512_s0, %s2437_s28  ;;  %p2446_p10 = scmp.lt.s32.totalorder %s2437_s28, %s2437_s28 }
 0x125   : > { %p2440_p7 = pnand %p2438_p5, %p2759_p8  ;;  %p2447_p11 = por %p2446_p10, %p2445_p4 }
 0x127   : > { %p2441_p9 = pneg %p2440_p7 }
 0x129   : > { %p2448_p12 = pnand %p2447_p11, %p2441_p9 }
 0x12b   : > { %2451 = shalt.err (!%p2448_p12)
}
 0x12c   : > { %2012 = dma.hbm_to_vmem [thread:$0]  (!%p2743_p6), %s3270_s12, 32, %s512_s0, [#allocation21]  }
 0x12d   : > { %s2452_s20 = scalar_lea.hbm %s3271_s13, 16 }
 0x12e   : > { %p2453_p13 = scmp.ne.s32.totalorder %s3271_s13, %s2452_s20  ;;  %p2459_p3 = scmp.lt.u32.totalorder %s2452_s20, %s3271_s13 }
 0x130   : > { %p2455_p0 = pnand %p2453_p13, %p2759_p8 }
 0x132   : > { %p2456_p1 = pneg %p2455_p0 }
 0x134   : > { %p2461_p2 = pnand %p2459_p3, %p2456_p1 }
 0x136   : > { %2464 = shalt.err (!%p2461_p2)
}
 0x137   : > { %s2465_s26 = scalar_lea.vmem %s523_s17, 16  ;;  %s2472_s0 = scalar_lea.vmem %s523_s17, 32 }
 0x138   : > { %p2466_p5 = scmp.ne.s32.totalorder %s523_s17, %s2465_s26  ;;  %p2473_p4 = scmp.lt.s32.totalorder %s523_s17, %s523_s17 }
 0x139   : > { %p2474_p10 = scmp.lt.s32.totalorder %s2472_s0, %s2465_s26 }
 0x13a   : > { %p2468_p7 = pnand %p2466_p5, %p2759_p8 }
 0x13b   : > { %p2475_p11 = por %p2474_p10, %p2473_p4 }
 0x13c   : > { %p2469_p9 = pneg %p2468_p7 }
 0x13e   : > { %p2476_p12 = pnand %p2475_p11, %p2469_p9 }
 0x140   : > { %2479 = shalt.err (!%p2476_p12)
}
 0x141   : > { %s3300_s18 = sld [smem:[#allocation36_spill]]  ;;  %s3301_s21 = sld [smem:[#allocation35_spill]] }
 0x142   : > { %s3302_s28 = sld [smem:[#allocation37_spill]]  ;;  %s1696_s27 = sadd.s32 4294967294, %s2604_s16  }
 0x143   : > { %2015 = dma.hbm_to_vmem [thread:$0]  (!%p2743_p6), %s3271_s13, 16, %s523_s17, [#allocation24]  }
 0x144   : > { %s3017_s23 = sadd.s32 1, %s2604_s16   ;;  %s44_s22 = sadd.s32 1, %s2600_s15 }
 0x145   : > { %s41_s19 = ssub.s32 %s2604_s16, %s3017_s23  ;;  %p52_p0 = scmp.eq.s32.totalorder %s2604_s16, 0 }
 0x146   : > { %p42_p13 = scmp.eq.s32.totalorder %s41_s19, 0  ;;  %p360_p9 = scmp.eq.s32.totalorder %s1696_s27, 1 }
 0x147   : > { %p51_p8 = scmp.ne.s32.totalorder %s2600_s15, %s3300_s18  ;;  %p57_p1 = scmp.ne.s32.totalorder %s3300_s18, %s3301_s21 }
 0x148   : > { %p354_p3 = scmp.eq.s32.totalorder %s3302_s28, 1  ;;  %p3303_p5 = scmp.eq.s32.totalorder %s3302_s28, 0 }
 0x149   : > { %s3029_s25 = scalar_select %p42_p13, %s2600_s15, %s44_s22  }
 0x14a   : > { %p53_p2 = por %p52_p0, %p51_p8  ;;  %p3033_p7 = por %p3303_p5, %p57_p1 }
 0x14b   : > { %p3037_p6 = por %p354_p3, %p51_p8  ;;  %p2037_p4 = scmp.lt.s32.totalorder %s2604_s16, 2 }
 0x14c   : > { %s533_s3 = sand.u32 1, %s2600_s15   ;;  %p3043_p10 = por %p360_p9, %p57_p1 }
 0x14d   : > { %s3305_s17 = scalar_select %p3037_p6, 1, 0 }
 0x14e   : > { %s3306_s29 = scalar_select %p3043_p10, 1, 0 }
 0x14f   : > { %s1712_s30 = sshll.u32 %s533_s3, 4  ;;  %s1764_s1 = sshll.u32 %s2604_s16, 8 }
 0x150   : > { %s3307_s24 = sld [smem:[#allocation39_spill]]  ;;  %s537_s18 = scalar_lea.vmem [#allocation2], %s1712_s30 }
 0x151   : > { %s544_s21 = sshll.u32 %s537_s18, 4  ;;  %p3053_p11 = pnand %p2037_p4, %p53_p2  ;;  %s3057_s21 = int_to_ptr.vmem [resolvable:$true] %s544_s21 }
 0x152   : > { %s3059_s27 = scalar_lea.sflag [#allocation3], %s533_s3 }
 0x153   : > { %p2482_p8 = pneg %p3053_p11 }
 0x156   : > { %s3051_s14 = scalar_lea.hbm %s3307_s24, %s1764_s1  ;;  %s2485_s1 = scalar_lea.hbm %s3307_s24, 512 }
 0x157   : > { %s2480_s22 = scalar_lea.hbm %s3051_s14, 256  ;;  %p2486_p1 = scmp.lt.u32.totalorder %s3051_s14, %s3307_s24 }
 0x158   : > { %p2481_p12 = scmp.ne.s32.totalorder %s3051_s14, %s2480_s22  ;;  %p2487_p3 = scmp.lt.u32.totalorder %s2485_s1, %s2480_s22 }
 0x159   : > { %p2489_p5 = scmp.lt.u32.totalorder %s2480_s22, %s3051_s14 }
 0x15a   : > { %p2483_p13 = pnand %p2482_p8, %p2481_p12  ;;  %p2488_p2 = por %p2487_p3, %p2486_p1 }
 0x15c   : > { %p2484_p0 = pneg %p2483_p13  ;;  %p2490_p9 = por %p2489_p5, %p2488_p2 }
 0x15e   : > { %p2491_p4 = pnand %p2490_p9, %p2484_p0 }
 0x160   : > { %2494 = shalt.err (!%p2491_p4)
}
 0x161   : > { %s2495_s3 = scalar_lea.vmem %s3057_s21, 256  ;;  %s2623_s18 = smov [#allocation2]  }
 0x162   : > { %p2496_p12 = scmp.ne.s32.totalorder %s3057_s21, %s2495_s3  ;;  %s2500_s19 = sshll.u32 %s2623_s18, 4  ;;  %s2501_s19 = int_to_ptr.vmem [resolvable:$false] %s2500_s19 }
 0x163   : > { %s2502_s30 = scalar_lea.vmem %s2501_s19, 512  ;;  %p2503_p6 = scmp.lt.s32.totalorder %s3057_s21, %s2501_s19 }
 0x164   : > { %p2498_p13 = pnand %p2496_p12, %p2482_p8  ;;  %p2504_p1 = scmp.lt.s32.totalorder %s2502_s30, %s2495_s3 }
 0x166   : > { %p2499_p10 = pneg %p2498_p13  ;;  %p2505_p3 = por %p2504_p1, %p2503_p6 }
 0x168   : > { %p2506_p2 = pnand %p2505_p3, %p2499_p10 }
 0x16a   : > { %2509 = shalt.err (!%p2506_p2)
}
 0x16b   : > { %s2624_s22 = smov 128   ;;  %s2625_s1 = smov 8  }
 0x16c   : > { %2019 = dma.hbm_to_vmem [thread:$0]  (!%p3053_p11), %s3051_s14, 256, %s3057_s21, %s3059_s27, %s2624_s22, %s2624_s22, %s2625_s1  }
 0x16d   : > { %s3309_s26 = sld [smem:[#allocation38_spill]] }
 0x173   : > { %p3310_p8 = scmp.ne.s32.totalorder %s3309_s26, 0 }
 0x174   : > { %s3311_s0 = sld [smem:[#allocation36_spill]] (!%p3310_p8) }
 0x175   : > { %556 = sbr.rel (%p3310_p8) target bundleno = 1597 (0x63d), region = 76 }
 0x17a   : > { %s3090_s18 = sand.u32 (!%p3310_p8), 1, %s3311_s0  }
 0x17b   : > { %s1716_s3 = sshll.u32 (!%p3310_p8), %s3090_s18, 4  ;;  %s559_s19 = scalar_lea.sflag (!%p3310_p8), [#allocation3], %s3090_s18 }
 0x17c   : > { %s562_s30 = scalar_lea.vmem [#allocation2], %s1716_s3 }
 0x17d   : > { %2555 = dma.done.wait (%p3033_p7), %s559_s19, 256  }
 0x17e   : > { %2557 = vsyncadd (%p3033_p7), %s559_s19, 4294967040  ;;  %s3312_s14 = sld [smem:[#allocation37_spill]] }
 0x184   : > { %p3313_p6 = scmp.eq.s32.totalorder %s3312_s14, 0 }
 0x186   : > { %2559 = dma.done.wait (%p3313_p6), [#allocation6], 144   ;;  %p3314_p10 = pmov %p3313_p6 }
 0x187   : > { %p3315_p11 = pmov %p3313_p6 }
 0x188   : > { %2561 = vsyncadd (%p3314_p10), [#allocation6], 4294967152 }
 0x189   : > { %2563 = dma.done.wait (%p3315_p11), [#allocation9], 784   ;;  %p3316_p0 = pmov %p3313_p6 }
 0x18b   : > { %2565 = vsyncadd (%p3316_p0), [#allocation9], 4294966512  ;;  %p3317_p5 = pmov %p3316_p0 }
 0x18c   : > { %p3318_p9 = pmov %p3316_p0 }
 0x18d   : > { %2567 = dma.done.wait (%p3317_p5), [#allocation12], 112  }
 0x18e   : > { %2569 = vsyncadd (%p3318_p9), [#allocation12], 4294967184  ;;  %p3319_p7 = pmov %p3316_p0 }
 0x18f   : > { %p3320_p4 = pmov %p3316_p0 }
 0x190   : > { %2571 = dma.done.wait (%p3319_p7), [#allocation15], 112  }
 0x191   : > { %2573 = vsyncadd (%p3320_p4), [#allocation15], 4294967184  ;;  %p3321_p12 = pmov %p3316_p0 }
 0x192   : > { %p3322_p13 = pmov %p3316_p0 }
 0x193   : > { %2575 = dma.done.wait (%p3321_p12), [#allocation18], 288  }
 0x194   : > { %2577 = vsyncadd (%p3322_p13), [#allocation18], 4294967008  ;;  %p3323_p1 = pmov %p3316_p0 }
 0x195   : > { %p3324_p3 = pmov %p3316_p0 }
 0x196   : > { %2579 = dma.done.wait (%p3323_p1), [#allocation21], 64  }
 0x197   : > { %2581 = vsyncadd (%p3324_p3), [#allocation21], 4294967232  ;;  %p3325_p2 = pmov %p3316_p0 }
 0x198   : > { %p3326_p8 = pmov %p3316_p0 }
 0x199   : > { %2583 = dma.done.wait (%p3325_p2), [#allocation24], 16  }
 0x19a   : > { %2585 = vsyncadd (%p3326_p8), [#allocation24], 4294967280  ;;  %v2626_v0 = vmov 0.0   ;;  %vm2627_vm0 = vmmov 0   ;;  %v2107_v1 = vld [vmem:[#allocation5] sm:$0xff]   ;;  %v661_v3 = vld [vmem:[%s562_s30 + $0x8] sm:$0xff] }
 0x19b   : > { %1798 = vmatprep.subr.bf16.mxu0 %v2626_v0  ;;  %1800 = vmatprep.mubr.msk.bf16.mxu0 %vm2627_vm0, %v2626_v0  ;;  %v660_v2 = vld [vmem:[%s562_s30] sm:$0xff]  ;;  %vm678_vm1 = vcmask 130048   ;;  %v1731_v7 = vld [vmem:[#allocation7] ss:$0 sm:$0xff]  ;;  %vm726_vm2 = vcmask 1041408   ;;  %vm867_vm3 = vcmask 1045504  }
 0x19c   : > { %1804 = vmatprep.subr.bf16.mxu1 %v2626_v0  ;;  %1808 = vmatprep.mubr.msk.bf16.mxu1 %vm2627_vm0, %v2626_v0  ;;  %v664_v4 = vpack.c.bf16 %v661_v3, %v660_v2  ;;  %v2108_v5 = vld [vmem:[#allocation8] sm:$0xff]   ;;  %v2109_v6 = vld [vmem:[#allocation8 + $0x8] sm:$0xff]   ;;  %vm750_vm4 = vcmask 261120   ;;  %v2110_v23 = vld [vmem:[#allocation8 + $0x10] sm:$0xff]   ;;  %vm941_vm5 = vcmask 1043456   ;;  %vm950_vm6 = vcmask 31744  }
 0x19d   : > { %1799 = vmatpush3.bf16.msra.mxu0 %v2107_v1  ;;  %1805 = vmatpush3.bf16.msra.mxu1 %v2108_v5  ;;  %v2111_v26 = vld [vmem:[#allocation8 + $0x18] sm:$0xff]   ;;  %v2112_v27 = vld [vmem:[#allocation8 + $0x20] sm:$0xff]   ;;  %v2113_v28 = vld [vmem:[#allocation8 + $0x28] sm:$0xff]   ;;  %s1765_s20 = sshll.u32 %s3312_s14, 8  ;;  %s658_s21 = scalar_lea.vmem [#allocation25], %s1716_s3 }
 0x19e   : > { %1828 = vmatprep.subr.bf16.mxu0 %v2626_v0  ;;  %1806 = vmatprep.subr.bf16.mxu1 %v2626_v0  ;;  %v948_v29 = vld [vmem:[#allocation11] sm:$0x3]  ;;  %v1113_v31 = vld [vmem:[#allocation14] sm:$0x3]  ;;  %v1737_v33 = vld [vmem:[#allocation10] ss:$0 sm:$0xff] }
 0x19f   : > { %v955_v30 = vsel %vm726_vm2, %v948_v29, 0  ;;  %v1119_v32 = vsel %vm726_vm2, %v1113_v31, 0  ;;  %v1007_v43 = vld [vmem:[#allocation11 + $0x2] sm:$0x3]  ;;  %v1061_v50 = vld [vmem:[#allocation11 + $0x4] sm:$0x3] }
 0x1a0   : > { %1801 = vmatmul.mubr.msk.bf16.vlgmr.msra.gmra.mrb[0].mxu0 %vm678_vm1, %v664_v4  ;;  %v1013_v49 = vsel %vm726_vm2, %v1007_v43, 0  ;;  %v1067_v51 = vsel %vm726_vm2, %v1061_v50, 0  ;;  %v1278_v52 = vld [vmem:[#allocation19] sm:$0x3]  ;;  %v2114_v54 = vld [vmem:[#allocation17] sm:$0xff]   ;;  %v2115_v55 = vld [vmem:[#allocation17 + $0x8] sm:$0xff]  }
 0x1a1   : > { %1830 = vmatprep.mubr.msk.bf16.mxu0 %vm2627_vm0, %v2626_v0  ;;  %1807 = vmatpush3.bf16.msra.mxu1 %v2109_v6  ;;  %v1280_v53 = vsel %vm726_vm2, %v1278_v52, 0  ;;  %v1376_v56 = vld [vmem:[#allocation20] sm:$0x3]  ;;  %v1745_v58 = vld [vmem:[#allocation13] ss:$0 sm:$0xff]  ;;  %s1499_s28 = sshll.u32 %s658_s21, 4  ;;  %s3212_s28 = int_to_ptr.vmem [resolvable:$true] %s1499_s28 }
 0x1a2   : > { %1812 = vmatprep.subr.bf16.mxu1 %v2626_v0  ;;  %1829 = vmatpush3.bf16.msra.mxu0 %v955_v30  ;;  %v1378_v57 = vsel %vm726_vm2, %v1376_v56, 0  ;;  %v1171_v60 = vld [vmem:[#allocation14 + $0x2] sm:$0x3]  ;;  %s3327_s1 = sld [smem:[#allocation42_spill]]  ;;  %s1486_s0 = scalar_lea.sflag [#allocation4], %s3090_s18 }
 0x1a3   : > { %1834 = vmatprep.subr.bf16.mxu0 %v2626_v0  ;;  %v1177_v4 = vsel %vm726_vm2, %v1171_v60, 0  ;;  %s2510_s3 = scalar_lea.vmem %s3212_s28, 256  ;;  %p3328_p10 = scmp.ne.s32.totalorder %s3305_s17, 0 }
 0x1a4   : > { %p2511_p6 = scmp.ne.s32.totalorder %s3212_s28, %s2510_s3  ;;  %s2628_s19 = smov [#allocation25]  }
 0x1a5   : > { %s2514_s30 = sshll.u32 %s2628_s19, 4  ;;  %s2515_s30 = int_to_ptr.vmem [resolvable:$false] %s2514_s30 }
 0x1a6   : > { %p2512_p11 = pnand %p2511_p6, %p3328_p10  ;;  %s2516_s14 = scalar_lea.vmem %s2515_s30, 512 }
 0x1a7   : > { %p2517_p5 = scmp.lt.s32.totalorder %s3212_s28, %s2515_s30  ;;  %p2518_p9 = scmp.lt.s32.totalorder %s2516_s14, %s2510_s3 }
 0x1a8   : > { %s3210_s26 = scalar_lea.hbm %s3327_s1, %s1765_s20  ;;  %p2513_p0 = pneg %p2512_p11 }
 0x1a9   : > { %p2519_p7 = por %p2518_p9, %p2517_p5 }
 0x1ab   : > { %p2520_p4 = pnand %p2519_p7, %p2513_p0 }
 0x273   : > { %v716_v8 = vpop.f32.mrb[0].mxu0 }
 0x274   : > { %v717_v9 = vadd.f32 %v1731_v7, %v716_v8  ;;  %v1802_v10 = vpop.f32.mrb[1].mxu0 }
 0x275   : > { %v719_v11 = vpop.f32.mrb[2].mxu0  ;;  %v1223_v10 = vld [vmem:[#allocation14 + $0x4] sm:$0x3] }
 0x276   : > { %v727_v12 = vrot.slane %v717_v9, 6  ;;  %v720_v13 = vadd.f32 %v1731_v7, %v719_v11  ;;  %v1803_v14 = vpop.f32.mrb[3].mxu0  ;;  %v868_v15 = vrot.slane %v717_v9, 2  ;;  %v1229_v11 = vsel %vm726_vm2, %v1223_v10, 0 }
 0x278   : > { %v728_v16 = vrot.slane %v720_v13, 6  ;;  %v3139_v17 = vpack.c.bf16 %v720_v13, %v717_v9  ;;  %v869_v18 = vrot.slane %v720_v13, 2  ;;  %v732_v19 = vsel %vm726_vm2, 0.0, %v727_v12 }
 0x27a   : > { %v870_v20 = vsel %vm867_vm3, %v868_v15, %v869_v18  ;;  %v873_v21 = vsel %vm867_vm3, %v869_v18, 0.0  ;;  %v729_v22 = vsel %vm726_vm2, %v727_v12, %v728_v16 }
 0x27b   : > { %v879_v24 = vpack.c.bf16 %v873_v21, %v870_v20  ;;  %v737_v25 = vpack.c.bf16 %v729_v22, %v732_v19  ;;  %v1423_v19 = vld [vmem:[#allocation22] sm:$0x3] }
 0x27c   : > { %v1429_v20 = vsel %vm726_vm2, %v1423_v19, 0 }
 0x27d   : > { %1809 = vmatmul.mubr.msk.bf16.vlgmr.msra.gmra.mrb[0].mxu1 %vm750_vm4, %v737_v25 }
 0x27e   : > { %1813 = vmatpush3.bf16.msra.mxu1 %v2110_v23  ;;  %1816 = vmatprep.mubr.msk.bf16.mxu1 %vm2627_vm0, %v2626_v0 }
 0x27f   : > { %1814 = vmatprep.subr.bf16.mxu1 %v2626_v0 }
 0x282   : > { %1815 = vmatpush3.bf16.msra.mxu1 %v2111_v26 }
 0x283   : > { %1820 = vmatprep.subr.bf16.mxu1 %v2626_v0 }
 0x289   : > { %1817 = vmatmul.mubr.msk.bf16.vlgmr.msra.gmra.mrb[0].mxu1 %vm750_vm4, %v3139_v17 }
 0x28a   : > { %1821 = vmatpush3.bf16.msra.mxu1 %v2112_v27  ;;  %1824 = vmatprep.mubr.msk.bf16.mxu1 %vm2627_vm0, %v2626_v0  ;;  %v1749_v27 = vld [vmem:[#allocation16] ss:$0 sm:$0xff] }
 0x28b   : > { %1822 = vmatprep.subr.bf16.mxu1 %v2626_v0 }
 0x28e   : > { %1823 = vmatpush3.bf16.msra.mxu1 %v2113_v28 }
 0x28f   : > { %1846 = vmatprep.subr.bf16.mxu1 %v2626_v0 }
 0x295   : > { %1825 = vmatmul.mubr.msk.bf16.vlgmr.msra.gmra.mrb[0].mxu1 %vm750_vm4, %v879_v24 }
 0x296   : > { %1848 = vmatprep.mubr.msk.bf16.mxu1 %vm2627_vm0, %v2626_v0  ;;  %1847 = vmatpush3.bf16.msra.mxu1 %v1119_v32 }
 0x297   : > { %1852 = vmatprep.subr.bf16.mxu1 %v2626_v0 }
 0x368   : > { %v929_v34 = vpop.f32.mrb[0].mxu1 }
 0x369   : > { %v1890_v35 = vadd.f32 %v1737_v33, %v929_v34  ;;  %v1826_v36 = vpop.f32.mrb[1].mxu1 }
 0x36a   : > { %v932_v37 = vpop.f32.mrb[2].mxu1 }
 0x36b   : > { %v942_v38 = vrot.slane %v1890_v35, 4  ;;  %v1891_v39 = vadd.f32 %v1737_v33, %v932_v37  ;;  %v1827_v40 = vpop.f32.mrb[3].mxu1 }
 0x36d   : > { %v943_v41 = vrot.slane %v1891_v39, 4  ;;  %v1008_v42 = vpack.c.bf16 %v1891_v39, %v1890_v35  ;;  %v947_v44 = vsel %vm941_vm5, 0.0, %v942_v38  ;;  %v1758_v35 = vld [vmem:[#allocation23] ss:$0 sm:$0xff] }
 0x36f   : > { %v944_v45 = vsel %vm941_vm5, %v942_v38, %v943_v41  ;;  %v1059_v46 = vsel %vm941_vm5, %v943_v41, 0.0 }
 0x370   : > { %v949_v47 = vpack.c.bf16 %v944_v45, %v947_v44  ;;  %v1062_v48 = vpack.c.bf16 %v1059_v46, %v944_v45 }
 0x372   : > { %1831 = vmatmul.mubr.msk.bf16.vlgmr.msra.gmra.mrb[4].mxu0 %vm950_vm6, %v949_v47 }
 0x373   : > { %1835 = vmatpush3.bf16.msra.mxu0 %v1013_v49  ;;  %1836 = vmatprep.mubr.msk.bf16.mxu0 %vm2627_vm0, %v2626_v0 }
 0x374   : > { %1840 = vmatprep.subr.bf16.mxu0 %v2626_v0 }
 0x37e   : > { %1837 = vmatmul.mubr.msk.bf16.vlgmr.msra.gmra.mrb[4].mxu0 %vm950_vm6, %v1008_v42 }
 0x37f   : > { %1841 = vmatpush3.bf16.msra.mxu0 %v1067_v51  ;;  %1842 = vmatprep.mubr.msk.bf16.mxu0 %vm2627_vm0, %v2626_v0 }
 0x380   : > { %1864 = vmatprep.subr.bf16.mxu0 %v2626_v0 }
 0x38a   : > { %1843 = vmatmul.mubr.msk.bf16.vlgmr.msra.gmra.mrb[4].mxu0 %vm950_vm6, %v1062_v48 }
 0x38b   : > { %1865 = vmatpush3.bf16.msra.mxu0 %v1280_v53  ;;  %1866 = vmatprep.mubr.msk.bf16.mxu0 %vm2627_vm0, %v2626_v0 }
 0x38c   : > { %1870 = vmatprep.subr.bf16.mxu0 %v2626_v0 }
 0x392   : > { %1867 = vmatmul.mubr.msk.bf16.vlgmr.msra.gmra.mrb[8].mxu0 %vm950_vm6, %v1008_v42 }
 0x393   : > { %1871 = vmatpush3.bf16.msra.mxu0 %v2114_v54  ;;  %1874 = vmatprep.mubr.msk.bf16.mxu0 %vm2627_vm0, %v2626_v0 }
 0x394   : > { %1872 = vmatprep.subr.bf16.mxu0 %v2626_v0 }
 0x397   : > { %1873 = vmatpush3.bf16.msra.mxu0 %v2115_v55 }
 0x398   : > { %1878 = vmatprep.subr.bf16.mxu0 %v2626_v0 }
 0x39a   : > { %1875 = vmatmul.mubr.msk.bf16.vlgmr.msra.gmra.mrb[12].mxu0 %vm750_vm4, %v3139_v17 }
 0x39b   : > { %1880 = vmatprep.mubr.msk.bf16.mxu0 %vm2627_vm0, %v2626_v0  ;;  %1879 = vmatpush3.bf16.msra.mxu0 %v1378_v57 }
 0x45d   : > { %v1103_v59 = vpop.f32.mrb[4].mxu0 }
 0x45e   : > { %v1892_v61 = vadd.f32 %v1745_v58, %v1103_v59  ;;  %v1844_v62 = vpop.f32.mrb[5].mxu0 }
 0x45f   : > { %v1106_v63 = vpop.f32.mrb[6].mxu0 }
 0x460   : > { %v1114_v1 = vpack.c.bf16 %v1892_v61, %v2626_v0  ;;  %v1893_v2 = vadd.f32 %v1745_v58, %v1106_v63  ;;  %v1845_v3 = vpop.f32.mrb[7].mxu0 }
 0x462   : > { %v1172_v5 = vpack.c.bf16 %v1893_v2, %v1892_v61  ;;  %1849 = vmatmul.mubr.msk.bf16.vlgmr.msra.gmra.mrb[4].mxu1 %vm950_vm6, %v1114_v1  ;;  %v1224_v18 = vpack.c.bf16 %v2626_v0, %v1893_v2 }
 0x463   : > { %1853 = vmatpush3.bf16.msra.mxu1 %v1177_v4  ;;  %1854 = vmatprep.mubr.msk.bf16.mxu1 %vm2627_vm0, %v2626_v0 }
 0x464   : > { %1881 = vmatmul.mubr.msk.bf16.vlgmr.msra.gmra.mrb[16].mxu0 %vm950_vm6, %v1172_v5  ;;  %1858 = vmatprep.subr.bf16.mxu1 %v2626_v0 }
 0x465   : > { %v1316_v6 = vpop.f32.mrb[8].mxu0 }
 0x466   : > { %v1868_v7 = vpop.f32.mrb[9].mxu0 }
 0x467   : > { %v1319_v8 = vpop.f32.mrb[10].mxu0 }
 0x468   : > { %v1869_v9 = vpop.f32.mrb[11].mxu0 }
 0x46d   : > { %v1369_v12 = vpop.f32.mrb[12].mxu0 }
 0x46e   : > { %v1370_v13 = vadd.f32 %v1369_v12, %v1316_v6  ;;  %1855 = vmatmul.mubr.msk.bf16.vlgmr.msra.gmra.mrb[4].mxu1 %vm950_vm6, %v1172_v5  ;;  %v1876_v14 = vpop.f32.mrb[13].mxu0 }
 0x46f   : > { %1859 = vmatpush3.bf16.msra.mxu1 %v1229_v11  ;;  %v1372_v15 = vpop.f32.mrb[14].mxu0  ;;  %1860 = vmatprep.mubr.msk.bf16.mxu1 %vm2627_vm0, %v2626_v0 }
 0x470   : > { %v1373_v16 = vadd.f32 %v1372_v15, %v1319_v8  ;;  %v1877_v17 = vpop.f32.mrb[15].mxu0  ;;  %1884 = vmatprep.subr.bf16.mxu1 %v2626_v0 }
 0x47a   : > { %1861 = vmatmul.mubr.msk.bf16.vlgmr.msra.gmra.mrb[4].mxu1 %vm950_vm6, %v1224_v18 }
 0x47b   : > { %1886 = vmatprep.mubr.msk.bf16.mxu1 %vm2627_vm0, %v2626_v0  ;;  %1885 = vmatpush3.bf16.msra.mxu1 %v1429_v20 }
 0x537   : > { %v1414_v21 = vpop.f32.mrb[16].mxu0 }
 0x538   : > { %v1421_v22 = vadd.f32 %v1414_v21, %v1370_v13  ;;  %v1882_v23 = vpop.f32.mrb[17].mxu0 }
 0x539   : > { %v1417_v24 = vpop.f32.mrb[18].mxu0 }
 0x53a   : > { %v1422_v25 = vadd.f32 %v1417_v24, %v1373_v16  ;;  %v1883_v26 = vpop.f32.mrb[19].mxu0 }
 0x54d   : > { %v1265_v28 = vpop.f32.mrb[4].mxu1 }
 0x54e   : > { %v1862_v29 = vpop.f32.mrb[5].mxu1  ;;  %v1894_v31 = vadd.f32 %v1749_v27, %v1265_v28 }
 0x54f   : > { %v1268_v30 = vpop.f32.mrb[6].mxu1 }
 0x550   : > { %v1895_v32 = vadd.f32 %v1749_v27, %v1268_v30  ;;  %v1863_v33 = vpop.f32.mrb[7].mxu1 }
 0x552   : > { %v1424_v0 = vpack.c.bf16 %v1895_v32, %v1894_v31 }
 0x554   : > { %1887 = vmatmul.mubr.msk.bf16.vlgmr.msra.gmra.mrb[8].mxu1 %vm950_vm6, %v1424_v0 }
 0x627   : > { %v1465_v34 = vpop.f32.mrb[8].mxu1 }
 0x628   : > { %v1472_v36 = vadd.f32 %v1465_v34, %v1421_v22  ;;  %v1888_v37 = vpop.f32.mrb[9].mxu1 }
 0x629   : > { %v1468_v38 = vpop.f32.mrb[10].mxu1 }
 0x62a   : > { %v1481_v39 = vadd.f32 %v1758_v35, %v1472_v36  ;;  %v1473_v40 = vadd.f32 %v1468_v38, %v1422_v25  ;;  %v1889_v41 = vpop.f32.mrb[11].mxu1 }
 0x62c   : > { %1483 = vst.msk [vmem:[%s658_s21] sm:$0xff] %vm750_vm4, %v1481_v39  ;;  %v1482_v42 = vadd.f32 %v1758_v35, %v1473_v40 }
 0x62e   : > { %1484 = vst.msk [vmem:[%s658_s21 + $0x8] sm:$0xff] %vm750_vm4, %v1482_v42 }
 0x62f   : > { %2523 = shalt.err (!%p2520_p4)
}
 0x630   : > { %s2524_s20 = scalar_lea.hbm %s3210_s26, 256  ;;  %s2528_s22 = scalar_lea.hbm %s3327_s1, 512 }
 0x631   : > { %p2525_p12 = scmp.ne.s32.totalorder %s3210_s26, %s2524_s20  ;;  %p2529_p3 = scmp.lt.u32.totalorder %s3210_s26, %s3327_s1 }
 0x632   : > { %p2530_p2 = scmp.lt.u32.totalorder %s2528_s22, %s2524_s20  ;;  %p2532_p6 = scmp.lt.u32.totalorder %s2524_s20, %s3210_s26 }
 0x633   : > { %p2526_p13 = pnand %p2525_p12, %p3328_p10 }
 0x634   : > { %p2531_p8 = por %p2530_p2, %p2529_p3 }
 0x635   : > { %p2527_p1 = pneg %p2526_p13 }
 0x636   : > { %p2533_p11 = por %p2532_p6, %p2531_p8 }
 0x638   : > { %p2534_p0 = pnand %p2533_p11, %p2527_p1 }
 0x63a   : > { %2537 = shalt.err (!%p2534_p0)
}
 0x63b   : > { %s2629_s3 = smov 128   ;;  %s2630_s14 = smov 8  }
 0x63c   : > { %1974 = dma.vmem_to_hbm [thread:$0]  (%p3328_p10), %s3212_s28, 256, %s3210_s26, %s1486_s0, %s2629_s3, %s2629_s3, %s2630_s14  }
 0x63d PF: > { %s3329_s21 = sld [smem:[#allocation35_spill]]  ;;  %p3330_p5 = scmp.ne.s32.totalorder %s3306_s29, 0 }
 0x63e   : > { %p3331_p9 = scmp.ge.s32.totalorder %s2604_s16, 2 }
 0x640   : > { %p2021_p7 = pnand %p3331_p9, %p3330_p5 }
 0x643   : > { %s1514_s27 = sand.u32 1, %s3329_s21  }
 0x644   : > { %s1515_s20 = scalar_lea.sflag [#allocation4], %s1514_s27 }
 0x645   : > { %2587 = dma.done.wait (!%p2021_p7), %s1515_s20, 256  }
 0x646   : > { %2589 = vsyncadd (!%p2021_p7), %s1515_s20, 4294967040  ;;  %s3332_s29 = sld [smem:[#allocation36_spill]]  ;;  %p34_p4 = scmp.ge.s32.totalorder %s3017_s23, 4  }
 0x647   : > { %s3333_s30 = smov %s2600_s15  ;;  %s3334_s15 = smov %s3029_s25 }
 0x648   : > { %s3335_s16 = smov %s3017_s23  ;;  %36 = sbr.rel (!%p34_p4) target bundleno = 17 (0x11), region = 179 }
 0x64f   :  { %1520 = vsyncpa [#allocation3], 1 }
 0x650   :  { %1522 = vsyncpa [#allocation3 + $0x1], 1 }
 0x651   :  { %1523 = vsyncpa [#allocation6], 1 }
 0x652   :  { %1524 = vsyncpa [#allocation9], 1 }
 0x653   :  { %1525 = vsyncpa [#allocation12], 1 }
 0x654   :  { %1526 = vsyncpa [#allocation15], 1 }
 0x655   :  { %1527 = vsyncpa [#allocation18], 1 }
 0x656   :  { %1528 = vsyncpa [#allocation21], 1 }
 0x657   :  { %1529 = vsyncpa [#allocation24], 1 }
 0x658   :  { %1530 = vsyncpa [#allocation4], 1 }
 0x659   :  { %1532 = vsyncpa [#allocation4 + $0x1], 1 }

// kernel: _lambda_.7
= control target key start
LH: loop header
LB: loop body
LE: loop exit
PB: predicated region body
PF: predicated region fallthrough
CT: control target
= control target key end

     0   :  { %s3244_s0 = inlined_call_operand.hbm [shape: f32[2,16,8], index: 0, kind: input, shape index: {}]   ;;  %s3245_s1 = inlined_call_operand.hbm [shape: bf16[8,32], index: 1, kind: input, shape index: {}]   ;;  %s3246_s2 = inlined_call_operand.hbm [shape: f32[1,32], index: 2, kind: input, shape index: {}]   ;;  %s3247_s3 = inlined_call_operand.hbm [shape: bf16[3,32,4], index: 3, kind: input, shape index: {}]   ;;  %s3248_s4 = inlined_call_operand.hbm [shape: f32[1,4], index: 4, kind: input, shape index: {}]   ;;  %s3249_s5 = inlined_call_operand.hbm [shape: bf16[3,4,4], index: 5, kind: input, shape index: {}]   ;;  %s3250_s6 = inlined_call_operand.hbm [shape: f32[1,4], index: 6, kind: input, shape index: {}]   ;;  %s3251_s7 = inlined_call_operand.hbm [shape: bf16[3,4,4], index: 7, kind: input, shape index: {}]   ;;  %s3252_s8 = inlined_call_operand.hbm [shape: f32[1,4], index: 8, kind: input, shape index: {}]   ;;  %s3253_s9 = inlined_call_operand.hbm [shape: bf16[32,32], index: 9, kind: input, shape index: {}]   ;;  %s3254_s10 = inlined_call_operand.hbm [shape: bf16[4,32], index: 10, kind: input, shape index: {}]   ;;  %s3255_s11 = inlined_call_operand.hbm [shape: bf16[4,32], index: 11, kind: input, shape index: {}]   ;;  %s3256_s12 = inlined_call_operand.hbm [shape: bf16[4,32], index: 12, kind: input, shape index: {}]   ;;  %s3257_s13 = inlined_call_operand.hbm [shape: f32[1,32], index: 13, kind: input, shape index: {}]   ;;  %s3258_s14 = inlined_call_operand.hbm [shape: f32[2,16,32], index: 14, kind: output, shape index: {}]  }
   0x1   :  { %3271 = sst [smem:[#allocation39_spill]] %s3244_s0 }
   0x2   :  { %3272 = sst [smem:[#allocation40_spill]] %s3245_s1 }
   0x3   :  { %3273 = sst [smem:[#allocation41_spill]] %s3247_s3 }
   0x4   :  { %3274 = sst [smem:[#allocation42_spill]] %s3258_s14 }
   0x5   :  { %19 = vsyncpa [#allocation3], 0 }
   0x6   :  { %21 = vsyncpa [#allocation3 + $0x1], 0 }
   0x7   :  { %22 = vsyncpa [#allocation6], 0 }
   0x8   :  { %23 = vsyncpa [#allocation9], 0 }
   0x9   :  { %24 = vsyncpa [#allocation12], 0 }
   0xa   :  { %25 = vsyncpa [#allocation15], 0 }
   0xb   :  { %26 = vsyncpa [#allocation18], 0 }
   0xc   :  { %27 = vsyncpa [#allocation21], 0 }
   0xd   :  { %28 = vsyncpa [#allocation24], 0 }
   0xe   :  { %29 = vsyncpa [#allocation4], 0 }
   0xf   :  { %31 = vsyncpa [#allocation4 + $0x1], 0  ;;  %s2698_s29 = smov 0   ;;  %s2700_s30 = smov 0  }
  0x10   :  { %s2702_s15 = smov 0   ;;  %s2704_s16 = smov 0  }
  0x11 LB: > { %3275 = sst [smem:[#allocation35_spill]] %s2584_s29  ;;  %s2598_s17 = smov [#allocation5]   ;;  %s2596_s16 = sphi %s2704_s16, %s3322_s16   ;;  %s2592_s15 = sphi %s2702_s15, %s3321_s15   ;;  %s2588_s30 = sphi %s2700_s30, %s3320_s30   ;;  %s2584_s29 = sphi %s2698_s29, %s3319_s29  }
  0x12   : > { %3276 = sst [smem:[#allocation36_spill]] %s2588_s30  ;;  %s380_s18 = sshll.u32 %s2598_s17, 4  ;;  %s381_s18 = int_to_ptr.vmem [resolvable:$true] %s380_s18 }
  0x13   : > { %s2719_s19 = sadd.s32 4294967295, %s2596_s16   ;;  %p1691_p0 = scmp.ge.s32.totalorder %s2596_s16, 1 }
  0x14   : > { %3277 = sst [smem:[#allocation37_spill]] %s2719_s19  ;;  %p3261_p1 = scmp.eq.s32.totalorder %s2719_s19, 0 }
  0x15   : > { %p367_p2 = scmp.lt.s32.totalorder %s2596_s16, 3  ;;  %s2599_s21 = smov [#allocation8]  }
  0x16   : > { %s401_s22 = sshll.u32 %s2599_s21, 4  ;;  %s2600_s24 = smov [#allocation11]   ;;  %s2731_s22 = int_to_ptr.vmem [resolvable:$true] %s401_s22 }
  0x17   : > { %p2724_p3 = pnand %p1691_p0, %p367_p2  ;;  %s425_s25 = sshll.u32 %s2600_s24, 4  ;;  %s2739_s25 = int_to_ptr.vmem [resolvable:$true] %s425_s25 }
  0x18   : > { %s3281_s1 = sld [smem:[#allocation40_spill]] }
  0x19   : > { %s3278_s20 = scalar_select %p2724_p3, 1, 0 }
  0x1a   : > { %p1969_p5 = pneg %p2724_p3 }
  0x1b   : > { %3279 = sst [smem:[#allocation38_spill]] %s3278_s20 }
  0x1c   : > { %p2735_p6 = pnand %p1969_p5, %p3261_p1 }
  0x1e   : > { %s2108_s28 = scalar_lea.hbm %s3281_s1, 64  ;;  %p2749_p8 = pneg %p2735_p6 }
  0x1f   : > { %p2109_p7 = scmp.ne.s32.totalorder %s3281_s1, %s2108_s28  ;;  %p2115_p11 = scmp.lt.u32.totalorder %s2108_s28, %s3281_s1 }
  0x21   : > { %p2111_p9 = pnand %p2749_p8, %p2109_p7 }
  0x23   : > { %p2112_p10 = pneg %p2111_p9 }
  0x25   : > { %p2117_p12 = pnand %p2115_p11, %p2112_p10 }
  0x27   : > { %2120 = shalt.err (!%p2117_p12)
}
  0x28   : > { %s2121_s26 = scalar_lea.vmem %s381_s18, 64  ;;  %p2129_p5 = scmp.lt.s32.totalorder %s381_s18, %s381_s18 }
  0x29   : > { %p2122_p13 = scmp.ne.s32.totalorder %s381_s18, %s2121_s26  ;;  %p2130_p4 = scmp.lt.s32.totalorder %s2121_s26, %s2121_s26 }
  0x2b   : > { %p2124_p0 = pnand %p2122_p13, %p2749_p8  ;;  %p2131_p1 = por %p2130_p4, %p2129_p5 }
  0x2d   : > { %p2125_p2 = pneg %p2124_p0 }
  0x2f   : > { %p2132_p3 = pnand %p2131_p1, %p2125_p2 }
  0x31   : > { %2135 = shalt.err (!%p2132_p3)
}
  0x32   : > { %1972 = dma.hbm_to_vmem [thread:$0]  (!%p2735_p6), %s3281_s1, 64, %s381_s18, [#allocation6]  }
  0x33   : > { %s3283_s3 = sld [smem:[#allocation41_spill]] }
  0x39   : > { %s2136_s17 = scalar_lea.hbm %s3283_s3, 768 }
  0x3a   : > { %p2137_p7 = scmp.ne.s32.totalorder %s3283_s3, %s2136_s17  ;;  %p2143_p1 = scmp.lt.u32.totalorder %s2136_s17, %s3283_s3 }
  0x3c   : > { %p2139_p9 = pnand %p2137_p7, %p2749_p8 }
  0x3e   : > { %p2140_p4 = pneg %p2139_p9 }
  0x40   : > { %p2145_p3 = pnand %p2143_p1, %p2140_p4 }
  0x42   : > { %2148 = shalt.err (!%p2145_p3)
}
  0x43   : > { %s2149_s18 = scalar_lea.vmem %s2731_s22, 768  ;;  %p2157_p13 = scmp.lt.s32.totalorder %s2731_s22, %s2731_s22 }
  0x44   : > { %p2150_p10 = scmp.ne.s32.totalorder %s2731_s22, %s2149_s18  ;;  %p2158_p0 = scmp.lt.s32.totalorder %s2149_s18, %s2149_s18 }
  0x46   : > { %p2152_p11 = pnand %p2150_p10, %p2749_p8  ;;  %p2159_p2 = por %p2158_p0, %p2157_p13 }
  0x48   : > { %p2153_p12 = pneg %p2152_p11 }
  0x4a   : > { %p2160_p5 = pnand %p2159_p2, %p2153_p12 }
  0x4c   : > { %2163 = shalt.err (!%p2160_p5)
}
  0x4d   : > { %s3267_s0 = smov 64   ;;  %s3268_s19 = smov 4  }
  0x4e   : > { %1978 = dma.hbm_to_vmem [thread:$0]  (!%p2735_p6), %s3283_s3, 768, %s2731_s22, [#allocation9], %s3267_s0, %s3267_s0, %s3268_s19  }
  0x4f   : > { %s2164_s17 = scalar_lea.hbm %s3249_s5, 96 }
  0x50   : > { %p2165_p7 = scmp.ne.s32.totalorder %s3249_s5, %s2164_s17  ;;  %p2171_p1 = scmp.lt.u32.totalorder %s2164_s17, %s3249_s5 }
  0x52   : > { %p2167_p9 = pnand %p2165_p7, %p2749_p8 }
  0x54   : > { %p2168_p4 = pneg %p2167_p9 }
  0x56   : > { %p2173_p3 = pnand %p2171_p1, %p2168_p4 }
  0x58   : > { %2176 = shalt.err (!%p2173_p3)
}
  0x59   : > { %s2177_s22 = scalar_lea.vmem %s2739_s25, 96  ;;  %p2185_p13 = scmp.lt.s32.totalorder %s2739_s25, %s2739_s25 }
  0x5a   : > { %p2178_p10 = scmp.ne.s32.totalorder %s2739_s25, %s2177_s22  ;;  %p2186_p0 = scmp.lt.s32.totalorder %s2177_s22, %s2177_s22 }
  0x5c   : > { %p2180_p11 = pnand %p2178_p10, %p2749_p8  ;;  %p2187_p2 = por %p2186_p0, %p2185_p13 }
  0x5e   : > { %p2181_p12 = pneg %p2180_p11 }
  0x60   : > { %p2188_p5 = pnand %p2187_p2, %p2181_p12 }
  0x62   : > { %2191 = shalt.err (!%p2188_p5)
}
  0x63   : > { %s2603_s14 = smov 32   ;;  %s2604_s1 = smov 2  }
  0x64   : > { %1984 = dma.hbm_to_vmem [thread:$0]  (!%p2735_p6), %s3249_s5, 96, %s2739_s25, [#allocation12], %s2603_s14, %s2603_s14, %s2604_s1  }
  0x65   : > { %s2605_s28 = smov [#allocation14]   ;;  %s2606_s24 = smov [#allocation17]  }
  0x66   : > { %s449_s17 = sshll.u32 %s2605_s28, 4  ;;  %s473_s26 = sshll.u32 %s2606_s24, 4  ;;  %s450_s17 = int_to_ptr.vmem [resolvable:$true] %s449_s17  ;;  %s474_s26 = int_to_ptr.vmem [resolvable:$true] %s473_s26 }
  0x67   : > { %s2192_s0 = scalar_lea.hbm %s3251_s7, 96 }
  0x68   : > { %p2193_p7 = scmp.ne.s32.totalorder %s3251_s7, %s2192_s0  ;;  %p2199_p1 = scmp.lt.u32.totalorder %s2192_s0, %s3251_s7 }
  0x6a   : > { %p2195_p9 = pnand %p2193_p7, %p2749_p8 }
  0x6c   : > { %p2196_p4 = pneg %p2195_p9 }
  0x6e   : > { %p2201_p3 = pnand %p2199_p1, %p2196_p4 }
  0x70   : > { %2204 = shalt.err (!%p2201_p3)
}
  0x71   : > { %s2205_s25 = scalar_lea.vmem %s450_s17, 96  ;;  %p2213_p13 = scmp.lt.s32.totalorder %s450_s17, %s450_s17 }
  0x72   : > { %p2206_p10 = scmp.ne.s32.totalorder %s450_s17, %s2205_s25  ;;  %p2214_p0 = scmp.lt.s32.totalorder %s2205_s25, %s2205_s25 }
  0x74   : > { %p2208_p11 = pnand %p2206_p10, %p2749_p8  ;;  %p2215_p2 = por %p2214_p0, %p2213_p13 }
  0x76   : > { %p2209_p12 = pneg %p2208_p11 }
  0x78   : > { %p2216_p5 = pnand %p2215_p2, %p2209_p12 }
  0x7a   : > { %2219 = shalt.err (!%p2216_p5)
}
  0x7b   : > { %1990 = dma.hbm_to_vmem [thread:$0]  (!%p2735_p6), %s3251_s7, 96, %s450_s17, [#allocation15], %s2603_s14, %s2603_s14, %s2604_s1  }
  0x7c   : > { %s2220_s0 = scalar_lea.hbm %s3253_s9, 256 }
  0x7d   : > { %p2221_p7 = scmp.ne.s32.totalorder %s3253_s9, %s2220_s0  ;;  %p2227_p1 = scmp.lt.u32.totalorder %s2220_s0, %s3253_s9 }
  0x7f   : > { %p2223_p9 = pnand %p2221_p7, %p2749_p8 }
  0x81   : > { %p2224_p4 = pneg %p2223_p9 }
  0x83   : > { %p2229_p3 = pnand %p2227_p1, %p2224_p4 }
  0x85   : > { %2232 = shalt.err (!%p2229_p3)
}
  0x86   : > { %s2233_s18 = scalar_lea.vmem %s474_s26, 256  ;;  %p2241_p13 = scmp.lt.s32.totalorder %s474_s26, %s474_s26 }
  0x87   : > { %p2234_p10 = scmp.ne.s32.totalorder %s474_s26, %s2233_s18  ;;  %p2242_p0 = scmp.lt.s32.totalorder %s2233_s18, %s2233_s18 }
  0x89   : > { %p2236_p11 = pnand %p2234_p10, %p2749_p8  ;;  %p2243_p2 = por %p2242_p0, %p2241_p13 }
  0x8b   : > { %p2237_p12 = pneg %p2236_p11 }
  0x8d   : > { %p2244_p5 = pnand %p2243_p2, %p2237_p12 }
  0x8f   : > { %2247 = shalt.err (!%p2244_p5)
}
  0x90   : > { %s3284_s14 = smov 4   ;;  %s3285_s1 = smov 64  }
  0x91   : > { %1996 = dma.hbm_to_vmem [thread:$0]  (!%p2735_p6), %s3253_s9, 256, %s474_s26, [#allocation18], %s3285_s1, %s3285_s1, %s3284_s14  }
  0x92   : > { %s2607_s25 = smov [#allocation20]   ;;  %s2608_s19 = smov [#allocation7]  }
  0x93   : > { %s498_s3 = sshll.u32 %s2607_s25, 4  ;;  %s391_s29 = sshll.u32 %s2608_s19, 4  ;;  %s499_s3 = int_to_ptr.vmem [resolvable:$true] %s498_s3  ;;  %s392_s29 = int_to_ptr.vmem [resolvable:$true] %s391_s29 }
  0x94   : > { %s2248_s27 = scalar_lea.hbm %s3255_s11, 32 }
  0x95   : > { %p2249_p7 = scmp.ne.s32.totalorder %s3255_s11, %s2248_s27  ;;  %p2255_p1 = scmp.lt.u32.totalorder %s2248_s27, %s3255_s11 }
  0x97   : > { %p2251_p9 = pnand %p2249_p7, %p2749_p8 }
  0x99   : > { %p2252_p4 = pneg %p2251_p9 }
  0x9b   : > { %p2257_p3 = pnand %p2255_p1, %p2252_p4 }
  0x9d   : > { %2260 = shalt.err (!%p2257_p3)
}
  0x9e   : > { %s2261_s26 = scalar_lea.vmem %s499_s3, 32  ;;  %p2269_p13 = scmp.lt.s32.totalorder %s499_s3, %s499_s3 }
  0x9f   : > { %p2262_p10 = scmp.ne.s32.totalorder %s499_s3, %s2261_s26  ;;  %p2270_p0 = scmp.lt.s32.totalorder %s2261_s26, %s2261_s26 }
  0xa1   : > { %p2264_p11 = pnand %p2262_p10, %p2749_p8  ;;  %p2271_p2 = por %p2270_p0, %p2269_p13 }
  0xa3   : > { %p2265_p12 = pneg %p2264_p11 }
  0xa5   : > { %p2272_p5 = pnand %p2271_p2, %p2265_p12 }
  0xa7   : > { %2275 = shalt.err (!%p2272_p5)
}
  0xa8   : > { %2002 = dma.hbm_to_vmem [thread:$0]  (!%p2735_p6), %s3255_s11, 32, %s499_s3, [#allocation21]  }
  0xa9   : > { %s2276_s25 = scalar_lea.hbm %s3246_s2, 16 }
  0xaa   : > { %p2277_p7 = scmp.ne.s32.totalorder %s3246_s2, %s2276_s25  ;;  %p2283_p1 = scmp.lt.u32.totalorder %s2276_s25, %s3246_s2 }
  0xac   : > { %p2279_p9 = pnand %p2277_p7, %p2749_p8 }
  0xae   : > { %p2280_p4 = pneg %p2279_p9 }
  0xb0   : > { %p2285_p3 = pnand %p2283_p1, %p2280_p4 }
  0xb2   : > { %2288 = shalt.err (!%p2285_p3)
}
  0xb3   : > { %s2289_s20 = scalar_lea.vmem %s392_s29, 16  ;;  %s2296_s3 = scalar_lea.vmem %s392_s29, 32 }
  0xb4   : > { %p2290_p10 = scmp.ne.s32.totalorder %s392_s29, %s2289_s20  ;;  %p2297_p13 = scmp.lt.s32.totalorder %s392_s29, %s392_s29 }
  0xb5   : > { %p2298_p0 = scmp.lt.s32.totalorder %s2296_s3, %s2289_s20 }
  0xb6   : > { %p2292_p11 = pnand %p2290_p10, %p2749_p8 }
  0xb7   : > { %p2299_p2 = por %p2298_p0, %p2297_p13 }
  0xb8   : > { %p2293_p12 = pneg %p2292_p11 }
  0xba   : > { %p2300_p5 = pnand %p2299_p2, %p2293_p12 }
  0xbc   : > { %2303 = shalt.err (!%p2300_p5)
}
  0xbd   : > { %1975 = dma.hbm_to_vmem [thread:$0]  (!%p2735_p6), %s3246_s2, 16, %s392_s29, [#allocation6]  }
  0xbe   : > { %s2609_s18 = smov [#allocation10]   ;;  %s2610_s14 = smov [#allocation13]  }
  0xbf   : > { %s415_s26 = sshll.u32 %s2609_s18, 4  ;;  %s439_s1 = sshll.u32 %s2610_s14, 4  ;;  %s416_s26 = int_to_ptr.vmem [resolvable:$true] %s415_s26  ;;  %s440_s1 = int_to_ptr.vmem [resolvable:$true] %s439_s1 }
  0xc0   : > { %s2304_s25 = scalar_lea.hbm %s3248_s4, 16 }
  0xc1   : > { %p2305_p7 = scmp.ne.s32.totalorder %s3248_s4, %s2304_s25  ;;  %p2311_p1 = scmp.lt.u32.totalorder %s2304_s25, %s3248_s4 }
  0xc3   : > { %p2307_p9 = pnand %p2305_p7, %p2749_p8 }
  0xc5   : > { %p2308_p4 = pneg %p2307_p9 }
  0xc7   : > { %p2313_p3 = pnand %p2311_p1, %p2308_p4 }
  0xc9   : > { %2316 = shalt.err (!%p2313_p3)
}
  0xca   : > { %s2317_s29 = scalar_lea.vmem %s416_s26, 16  ;;  %s2324_s20 = scalar_lea.vmem %s416_s26, 32 }
  0xcb   : > { %p2318_p10 = scmp.ne.s32.totalorder %s416_s26, %s2317_s29  ;;  %p2325_p13 = scmp.lt.s32.totalorder %s416_s26, %s416_s26 }
  0xcc   : > { %p2326_p0 = scmp.lt.s32.totalorder %s2324_s20, %s2317_s29 }
  0xcd   : > { %p2320_p11 = pnand %p2318_p10, %p2749_p8 }
  0xce   : > { %p2327_p2 = por %p2326_p0, %p2325_p13 }
  0xcf   : > { %p2321_p12 = pneg %p2320_p11 }
  0xd1   : > { %p2328_p5 = pnand %p2327_p2, %p2321_p12 }
  0xd3   : > { %2331 = shalt.err (!%p2328_p5)
}
  0xd4   : > { %1981 = dma.hbm_to_vmem [thread:$0]  (!%p2735_p6), %s3248_s4, 16, %s416_s26, [#allocation9]  }
  0xd5   : > { %s2332_s14 = scalar_lea.hbm %s3250_s6, 16 }
  0xd6   : > { %p2333_p7 = scmp.ne.s32.totalorder %s3250_s6, %s2332_s14  ;;  %p2339_p1 = scmp.lt.u32.totalorder %s2332_s14, %s3250_s6 }
  0xd8   : > { %p2335_p9 = pnand %p2333_p7, %p2749_p8 }
  0xda   : > { %p2336_p4 = pneg %p2335_p9 }
  0xdc   : > { %p2341_p3 = pnand %p2339_p1, %p2336_p4 }
  0xde   : > { %2344 = shalt.err (!%p2341_p3)
}
  0xdf   : > { %s2345_s30 = scalar_lea.vmem %s440_s1, 16  ;;  %s2352_s26 = scalar_lea.vmem %s440_s1, 32 }
  0xe0   : > { %p2346_p10 = scmp.ne.s32.totalorder %s440_s1, %s2345_s30  ;;  %p2353_p13 = scmp.lt.s32.totalorder %s440_s1, %s440_s1 }
  0xe1   : > { %p2354_p0 = scmp.lt.s32.totalorder %s2352_s26, %s2345_s30 }
  0xe2   : > { %p2348_p11 = pnand %p2346_p10, %p2749_p8 }
  0xe3   : > { %p2355_p2 = por %p2354_p0, %p2353_p13 }
  0xe4   : > { %p2349_p12 = pneg %p2348_p11 }
  0xe6   : > { %p2356_p5 = pnand %p2355_p2, %p2349_p12 }
  0xe8   : > { %2359 = shalt.err (!%p2356_p5)
}
  0xe9   : > { %1987 = dma.hbm_to_vmem [thread:$0]  (!%p2735_p6), %s3250_s6, 16, %s440_s1, [#allocation12]  }
  0xea   : > { %s2611_s29 = smov [#allocation16]   ;;  %s2612_s3 = smov [#allocation19]  }
  0xeb   : > { %s463_s20 = sshll.u32 %s2611_s29, 4  ;;  %s487_s28 = sshll.u32 %s2612_s3, 4  ;;  %s464_s20 = int_to_ptr.vmem [resolvable:$true] %s463_s20  ;;  %s488_s28 = int_to_ptr.vmem [resolvable:$true] %s487_s28 }
  0xec   : > { %s2360_s14 = scalar_lea.hbm %s3252_s8, 16 }
  0xed   : > { %p2361_p7 = scmp.ne.s32.totalorder %s3252_s8, %s2360_s14  ;;  %p2367_p1 = scmp.lt.u32.totalorder %s2360_s14, %s3252_s8 }
  0xef   : > { %p2363_p9 = pnand %p2361_p7, %p2749_p8 }
  0xf1   : > { %p2364_p4 = pneg %p2363_p9 }
  0xf3   : > { %p2369_p3 = pnand %p2367_p1, %p2364_p4 }
  0xf5   : > { %2372 = shalt.err (!%p2369_p3)
}
  0xf6   : > { %s2373_s1 = scalar_lea.vmem %s464_s20, 16  ;;  %s2380_s30 = scalar_lea.vmem %s464_s20, 32 }
  0xf7   : > { %p2374_p10 = scmp.ne.s32.totalorder %s464_s20, %s2373_s1  ;;  %p2381_p13 = scmp.lt.s32.totalorder %s464_s20, %s464_s20 }
  0xf8   : > { %p2382_p0 = scmp.lt.s32.totalorder %s2380_s30, %s2373_s1 }
  0xf9   : > { %p2376_p11 = pnand %p2374_p10, %p2749_p8 }
  0xfa   : > { %p2383_p2 = por %p2382_p0, %p2381_p13 }
  0xfb   : > { %p2377_p12 = pneg %p2376_p11 }
  0xfd   : > { %p2384_p5 = pnand %p2383_p2, %p2377_p12 }
  0xff   : > { %2387 = shalt.err (!%p2384_p5)
}
 0x100   : > { %1993 = dma.hbm_to_vmem [thread:$0]  (!%p2735_p6), %s3252_s8, 16, %s464_s20, [#allocation15]  }
 0x101   : > { %s2388_s3 = scalar_lea.hbm %s3254_s10, 32 }
 0x102   : > { %p2389_p7 = scmp.ne.s32.totalorder %s3254_s10, %s2388_s3  ;;  %p2395_p1 = scmp.lt.u32.totalorder %s2388_s3, %s3254_s10 }
 0x104   : > { %p2391_p9 = pnand %p2389_p7, %p2749_p8 }
 0x106   : > { %p2392_p4 = pneg %p2391_p9 }
 0x108   : > { %p2397_p3 = pnand %p2395_p1, %p2392_p4 }
 0x10a   : > { %2400 = shalt.err (!%p2397_p3)
}
 0x10b   : > { %s2401_s22 = scalar_lea.vmem %s488_s28, 32  ;;  %p2409_p13 = scmp.lt.s32.totalorder %s488_s28, %s488_s28 }
 0x10c   : > { %p2402_p10 = scmp.ne.s32.totalorder %s488_s28, %s2401_s22  ;;  %p2410_p0 = scmp.lt.s32.totalorder %s2401_s22, %s2401_s22 }
 0x10e   : > { %p2404_p11 = pnand %p2402_p10, %p2749_p8  ;;  %p2411_p2 = por %p2410_p0, %p2409_p13 }
 0x110   : > { %p2405_p12 = pneg %p2404_p11 }
 0x112   : > { %p2412_p5 = pnand %p2411_p2, %p2405_p12 }
 0x114   : > { %2415 = shalt.err (!%p2412_p5)
}
 0x115   : > { %1999 = dma.hbm_to_vmem [thread:$0]  (!%p2735_p6), %s3254_s10, 32, %s488_s28, [#allocation18]  }
 0x116   : > { %s2613_s19 = smov [#allocation22]   ;;  %s2614_s30 = smov [#allocation23]  }
 0x117   : > { %s509_s1 = sshll.u32 %s2613_s19, 4  ;;  %s520_s26 = sshll.u32 %s2614_s30, 4  ;;  %s510_s1 = int_to_ptr.vmem [resolvable:$true] %s509_s1  ;;  %s521_s26 = int_to_ptr.vmem [resolvable:$true] %s520_s26 }
 0x118   : > { %s2416_s29 = scalar_lea.hbm %s3256_s12, 32 }
 0x119   : > { %p2417_p7 = scmp.ne.s32.totalorder %s3256_s12, %s2416_s29  ;;  %p2423_p1 = scmp.lt.u32.totalorder %s2416_s29, %s3256_s12 }
 0x11b   : > { %p2419_p9 = pnand %p2417_p7, %p2749_p8 }
 0x11d   : > { %p2420_p4 = pneg %p2419_p9 }
 0x11f   : > { %p2425_p3 = pnand %p2423_p1, %p2420_p4 }
 0x121   : > { %2428 = shalt.err (!%p2425_p3)
}
 0x122   : > { %s2429_s28 = scalar_lea.vmem %s510_s1, 32  ;;  %p2437_p13 = scmp.lt.s32.totalorder %s510_s1, %s510_s1 }
 0x123   : > { %p2430_p10 = scmp.ne.s32.totalorder %s510_s1, %s2429_s28  ;;  %p2438_p0 = scmp.lt.s32.totalorder %s2429_s28, %s2429_s28 }
 0x125   : > { %p2432_p11 = pnand %p2430_p10, %p2749_p8  ;;  %p2439_p2 = por %p2438_p0, %p2437_p13 }
 0x127   : > { %p2433_p12 = pneg %p2432_p11 }
 0x129   : > { %p2440_p5 = pnand %p2439_p2, %p2433_p12 }
 0x12b   : > { %2443 = shalt.err (!%p2440_p5)
}
 0x12c   : > { %2005 = dma.hbm_to_vmem [thread:$0]  (!%p2735_p6), %s3256_s12, 32, %s510_s1, [#allocation21]  }
 0x12d   : > { %s2444_s19 = scalar_lea.hbm %s3257_s13, 16 }
 0x12e   : > { %p2445_p7 = scmp.ne.s32.totalorder %s3257_s13, %s2444_s19  ;;  %p2451_p1 = scmp.lt.u32.totalorder %s2444_s19, %s3257_s13 }
 0x130   : > { %p2447_p9 = pnand %p2445_p7, %p2749_p8 }
 0x132   : > { %p2448_p4 = pneg %p2447_p9 }
 0x134   : > { %p2453_p3 = pnand %p2451_p1, %p2448_p4 }
 0x136   : > { %2456 = shalt.err (!%p2453_p3)
}
 0x137   : > { %s2457_s3 = scalar_lea.vmem %s521_s26, 16  ;;  %s2464_s1 = scalar_lea.vmem %s521_s26, 32 }
 0x138   : > { %p2458_p10 = scmp.ne.s32.totalorder %s521_s26, %s2457_s3  ;;  %p2465_p13 = scmp.lt.s32.totalorder %s521_s26, %s521_s26 }
 0x139   : > { %p2466_p0 = scmp.lt.s32.totalorder %s2464_s1, %s2457_s3 }
 0x13a   : > { %p2460_p11 = pnand %p2458_p10, %p2749_p8 }
 0x13b   : > { %p2467_p2 = por %p2466_p0, %p2465_p13 }
 0x13c   : > { %p2461_p12 = pneg %p2460_p11 }
 0x13e   : > { %p2468_p5 = pnand %p2467_p2, %p2461_p12 }
 0x140   : > { %2471 = shalt.err (!%p2468_p5)
}
 0x141   : > { %s3286_s14 = sld [smem:[#allocation36_spill]]  ;;  %s3287_s21 = sld [smem:[#allocation35_spill]] }
 0x142   : > { %s3288_s28 = sld [smem:[#allocation37_spill]]  ;;  %s1690_s17 = sadd.s32 4294967294, %s2596_s16  }
 0x143   : > { %2008 = dma.hbm_to_vmem [thread:$0]  (!%p2735_p6), %s3257_s13, 16, %s521_s26, [#allocation24]  }
 0x144   : > { %s2999_s23 = sadd.s32 1, %s2596_s16   ;;  %s44_s22 = sadd.s32 1, %s2592_s15 }
 0x145   : > { %s41_s20 = ssub.s32 %s2596_s16, %s2999_s23  ;;  %p52_p9 = scmp.eq.s32.totalorder %s2596_s16, 0 }
 0x146   : > { %p42_p7 = scmp.eq.s32.totalorder %s41_s20, 0  ;;  %p360_p12 = scmp.eq.s32.totalorder %s1690_s17, 1 }
 0x147   : > { %p51_p8 = scmp.ne.s32.totalorder %s2592_s15, %s3286_s14  ;;  %p57_p4 = scmp.ne.s32.totalorder %s3286_s14, %s3287_s21 }
 0x148   : > { %p354_p1 = scmp.eq.s32.totalorder %s3288_s28, 1  ;;  %p3289_p10 = scmp.eq.s32.totalorder %s3288_s28, 0 }
 0x149   : > { %s3011_s25 = scalar_select %p42_p7, %s2592_s15, %s44_s22  }
 0x14a   : > { %p53_p3 = por %p52_p9, %p51_p8  ;;  %p3015_p11 = por %p3289_p10, %p57_p4 }
 0x14b   : > { %p3019_p6 = por %p354_p1, %p51_p8  ;;  %p2030_p13 = scmp.lt.s32.totalorder %s2596_s16, 2 }
 0x14c   : > { %s531_s30 = sand.u32 1, %s2592_s15   ;;  %p3025_p0 = por %p360_p12, %p57_p4 }
 0x14d   : > { %s3291_s26 = scalar_select %p3019_p6, 1, 0 }
 0x14e   : > { %s3292_s0 = scalar_select %p3025_p0, 1, 0 }
 0x14f   : > { %s1706_s27 = sshll.u32 %s531_s30, 4  ;;  %s1757_s29 = sshll.u32 %s2596_s16, 8 }
 0x150   : > { %s3293_s24 = sld [smem:[#allocation39_spill]]  ;;  %s535_s14 = scalar_lea.vmem [#allocation2], %s1706_s27 }
 0x151   : > { %s542_s21 = sshll.u32 %s535_s14, 4  ;;  %p3035_p2 = pnand %p2030_p13, %p53_p3  ;;  %s3039_s21 = int_to_ptr.vmem [resolvable:$true] %s542_s21 }
 0x152   : > { %s3041_s17 = scalar_lea.sflag [#allocation3], %s531_s30 }
 0x153   : > { %p2474_p8 = pneg %p3035_p2 }
 0x156   : > { %s3033_s18 = scalar_lea.hbm %s3293_s24, %s1757_s29  ;;  %s2477_s29 = scalar_lea.hbm %s3293_s24, 512 }
 0x157   : > { %s2472_s22 = scalar_lea.hbm %s3033_s18, 256  ;;  %p2478_p4 = scmp.lt.u32.totalorder %s3033_s18, %s3293_s24 }
 0x158   : > { %p2473_p5 = scmp.ne.s32.totalorder %s3033_s18, %s2472_s22  ;;  %p2479_p1 = scmp.lt.u32.totalorder %s2477_s29, %s2472_s22 }
 0x159   : > { %p2481_p10 = scmp.lt.u32.totalorder %s2472_s22, %s3033_s18 }
 0x15a   : > { %p2475_p7 = pnand %p2474_p8, %p2473_p5  ;;  %p2480_p3 = por %p2479_p1, %p2478_p4 }
 0x15c   : > { %p2476_p9 = pneg %p2475_p7  ;;  %p2482_p12 = por %p2481_p10, %p2480_p3 }
 0x15e   : > { %p2483_p13 = pnand %p2482_p12, %p2476_p9 }
 0x160   : > { %2486 = shalt.err (!%p2483_p13)
}
 0x161   : > { %s2487_s30 = scalar_lea.vmem %s3039_s21, 256  ;;  %s2615_s14 = smov [#allocation2]  }
 0x162   : > { %p2488_p5 = scmp.ne.s32.totalorder %s3039_s21, %s2487_s30  ;;  %s2492_s20 = sshll.u32 %s2615_s14, 4  ;;  %s2493_s20 = int_to_ptr.vmem [resolvable:$false] %s2492_s20 }
 0x163   : > { %s2494_s27 = scalar_lea.vmem %s2493_s20, 512  ;;  %p2495_p6 = scmp.lt.s32.totalorder %s3039_s21, %s2493_s20 }
 0x164   : > { %p2490_p7 = pnand %p2488_p5, %p2474_p8  ;;  %p2496_p4 = scmp.lt.s32.totalorder %s2494_s27, %s2487_s30 }
 0x166   : > { %p2491_p0 = pneg %p2490_p7  ;;  %p2497_p1 = por %p2496_p4, %p2495_p6 }
 0x168   : > { %p2498_p3 = pnand %p2497_p1, %p2491_p0 }
 0x16a   : > { %2501 = shalt.err (!%p2498_p3)
}
 0x16b   : > { %s2616_s22 = smov 128   ;;  %s2617_s29 = smov 8  }
 0x16c   : > { %2012 = dma.hbm_to_vmem [thread:$0]  (!%p3035_p2), %s3033_s18, 256, %s3039_s21, %s3041_s17, %s2616_s22, %s2616_s22, %s2617_s29  }
 0x16d   : > { %s3295_s3 = sld [smem:[#allocation38_spill]] }
 0x173   : > { %p3296_p8 = scmp.ne.s32.totalorder %s3295_s3, 0 }
 0x174   : > { %s3297_s1 = sld [smem:[#allocation36_spill]] (!%p3296_p8) }
 0x175   : > { %554 = sbr.rel (%p3296_p8) target bundleno = 1597 (0x63d), region = 76 }
 0x17a   : > { %s3072_s14 = sand.u32 (!%p3296_p8), 1, %s3297_s1  }
 0x17b   : > { %s1710_s30 = sshll.u32 (!%p3296_p8), %s3072_s14, 4  ;;  %s557_s20 = scalar_lea.sflag (!%p3296_p8), [#allocation3], %s3072_s14 }
 0x17c   : > { %s560_s27 = scalar_lea.vmem [#allocation2], %s1710_s30 }
 0x17d   : > { %2547 = dma.done.wait (%p3015_p11), %s557_s20, 256  }
 0x17e   : > { %2549 = vsyncadd (%p3015_p11), %s557_s20, 4294967040  ;;  %s3298_s18 = sld [smem:[#allocation37_spill]] }
 0x184   : > { %p3299_p6 = scmp.eq.s32.totalorder %s3298_s18, 0 }
 0x186   : > { %2551 = dma.done.wait (%p3299_p6), [#allocation6], 80   ;;  %p3300_p0 = pmov %p3299_p6 }
 0x188   : > { %2553 = vsyncadd (%p3300_p0), [#allocation6], 4294967216  ;;  %p3301_p2 = pmov %p3300_p0 }
 0x189   : > { %p3302_p9 = pmov %p3300_p0 }
 0x18a   : > { %2555 = dma.done.wait (%p3301_p2), [#allocation9], 784  }
 0x18b   : > { %2557 = vsyncadd (%p3302_p9), [#allocation9], 4294966512  ;;  %p3303_p10 = pmov %p3300_p0 }
 0x18c   : > { %p3304_p12 = pmov %p3300_p0 }
 0x18d   : > { %2559 = dma.done.wait (%p3303_p10), [#allocation12], 112  }
 0x18e   : > { %2561 = vsyncadd (%p3304_p12), [#allocation12], 4294967184  ;;  %p3305_p11 = pmov %p3300_p0 }
 0x18f   : > { %p3306_p13 = pmov %p3300_p0 }
 0x190   : > { %2563 = dma.done.wait (%p3305_p11), [#allocation15], 112  }
 0x191   : > { %2565 = vsyncadd (%p3306_p13), [#allocation15], 4294967184  ;;  %p3307_p5 = pmov %p3300_p0 }
 0x192   : > { %p3308_p7 = pmov %p3300_p0 }
 0x193   : > { %2567 = dma.done.wait (%p3307_p5), [#allocation18], 288  }
 0x194   : > { %2569 = vsyncadd (%p3308_p7), [#allocation18], 4294967008  ;;  %p3309_p4 = pmov %p3300_p0 }
 0x195   : > { %p3310_p1 = pmov %p3300_p0 }
 0x196   : > { %2571 = dma.done.wait (%p3309_p4), [#allocation21], 64  }
 0x197   : > { %2573 = vsyncadd (%p3310_p1), [#allocation21], 4294967232  ;;  %p3311_p3 = pmov %p3300_p0 }
 0x198   : > { %p3312_p8 = pmov %p3300_p0 }
 0x199   : > { %2575 = dma.done.wait (%p3311_p3), [#allocation24], 16  }
 0x19a   : > { %2577 = vsyncadd (%p3312_p8), [#allocation24], 4294967280  ;;  %v2618_v0 = vmov 0.0   ;;  %vm2619_vm0 = vmmov 0   ;;  %vm673_vm1 = vcmask 1043456   ;;  %v658_v2 = vld [vmem:[%s560_s27] sm:$0xff] }
 0x19b   : > { %1791 = vmatprep.subr.bf16.mxu0 %v2618_v0  ;;  %1793 = vmatprep.mubr.msk.bf16.mxu0 %vm2619_vm0, %v2618_v0  ;;  %v660_v1 = vld [vmem:[#allocation5] sm:$0xf]  ;;  %v659_v3 = vld [vmem:[%s560_s27 + $0x8] sm:$0xff]  ;;  %vm669_vm2 = vcmask 64512   ;;  %v1725_v8 = vld [vmem:[#allocation7] ss:$0 sm:$0xff] }
 0x19c   : > { %1797 = vmatprep.subr.bf16.mxu1 %v2618_v0  ;;  %1801 = vmatprep.mubr.msk.bf16.mxu1 %vm2619_vm0, %v2618_v0  ;;  %v675_v4 = vsel %vm673_vm1, %v660_v1, 0  ;;  %v661_v5 = vpack.c.bf16 %v659_v3, %v658_v2  ;;  %v2100_v6 = vld [vmem:[#allocation8] sm:$0xff]   ;;  %v2101_v7 = vld [vmem:[#allocation8 + $0x8] sm:$0xff]   ;;  %vm721_vm3 = vcmask 1041408   ;;  %vm862_vm4 = vcmask 1045504   ;;  %v2102_v24 = vld [vmem:[#allocation8 + $0x10] sm:$0xff]  }
 0x19d   : > { %1792 = vmatpush3.bf16.msra.mxu0 %v675_v4  ;;  %1798 = vmatpush3.bf16.msra.mxu1 %v2100_v6  ;;  %vm745_vm5 = vcmask 261120   ;;  %v2103_v27 = vld [vmem:[#allocation8 + $0x18] sm:$0xff]   ;;  %v2104_v28 = vld [vmem:[#allocation8 + $0x20] sm:$0xff]   ;;  %v2105_v29 = vld [vmem:[#allocation8 + $0x28] sm:$0xff]   ;;  %vm944_vm6 = vcmask 31744   ;;  %s1758_s19 = sshll.u32 %s3298_s18, 8 }
 0x19e   : > { %1821 = vmatprep.subr.bf16.mxu0 %v2618_v0  ;;  %1799 = vmatprep.subr.bf16.mxu1 %v2618_v0  ;;  %v942_v30 = vld [vmem:[#allocation11] sm:$0x3]  ;;  %v1107_v32 = vld [vmem:[#allocation14] sm:$0x3]  ;;  %v1730_v34 = vld [vmem:[#allocation10] ss:$0 sm:$0xff] }
 0x19f   : > { %v949_v31 = vsel %vm721_vm3, %v942_v30, 0  ;;  %v1113_v33 = vsel %vm721_vm3, %v1107_v32, 0  ;;  %v1001_v44 = vld [vmem:[#allocation11 + $0x2] sm:$0x3]  ;;  %v1055_v51 = vld [vmem:[#allocation11 + $0x4] sm:$0x3] }
 0x1a0   : > { %1794 = vmatmul.mubr.msk.bf16.vlgmr.msra.gmra.mrb[0].mxu0 %vm669_vm2, %v661_v5  ;;  %v1007_v50 = vsel %vm721_vm3, %v1001_v44, 0  ;;  %v1061_v52 = vsel %vm721_vm3, %v1055_v51, 0  ;;  %v1272_v53 = vld [vmem:[#allocation19] sm:$0x3]  ;;  %v2106_v55 = vld [vmem:[#allocation17] sm:$0xff]   ;;  %v2107_v56 = vld [vmem:[#allocation17 + $0x8] sm:$0xff]  }
 0x1a1   : > { %1823 = vmatprep.mubr.msk.bf16.mxu0 %vm2619_vm0, %v2618_v0  ;;  %1800 = vmatpush3.bf16.msra.mxu1 %v2101_v7  ;;  %v1274_v54 = vsel %vm721_vm3, %v1272_v53, 0  ;;  %v1370_v57 = vld [vmem:[#allocation20] sm:$0x3]  ;;  %v1738_v59 = vld [vmem:[#allocation13] ss:$0 sm:$0xff]  ;;  %s656_s21 = scalar_lea.vmem [#allocation25], %s1710_s30 }
 0x1a2   : > { %1805 = vmatprep.subr.bf16.mxu1 %v2618_v0  ;;  %1822 = vmatpush3.bf16.msra.mxu0 %v949_v31  ;;  %v1372_v58 = vsel %vm721_vm3, %v1370_v57, 0  ;;  %v1165_v61 = vld [vmem:[#allocation14 + $0x2] sm:$0x3]  ;;  %s1493_s28 = sshll.u32 %s656_s21, 4  ;;  %s3313_s29 = sld [smem:[#allocation42_spill]]  ;;  %s3198_s28 = int_to_ptr.vmem [resolvable:$true] %s1493_s28 }
 0x1a3   : > { %1827 = vmatprep.subr.bf16.mxu0 %v2618_v0  ;;  %v1171_v5 = vsel %vm721_vm3, %v1165_v61, 0  ;;  %s1480_s30 = scalar_lea.sflag [#allocation4], %s3072_s14  ;;  %s2502_s20 = scalar_lea.vmem %s3198_s28, 256 }
 0x1a4   : > { %p2503_p6 = scmp.ne.s32.totalorder %s3198_s28, %s2502_s20  ;;  %p3315_p0 = scmp.ne.s32.totalorder %s3291_s26, 0 }
 0x1a5   : > { %s2620_s27 = smov [#allocation25]  }
 0x1a6   : > { %p2504_p2 = pnand %p2503_p6, %p3315_p0  ;;  %s2506_s18 = sshll.u32 %s2620_s27, 4  ;;  %s2507_s18 = int_to_ptr.vmem [resolvable:$false] %s2506_s18 }
 0x1a7   : > { %p2509_p10 = scmp.lt.s32.totalorder %s3198_s28, %s2507_s18 }
 0x1a8   : > { %s3314_s3 = smov %s3313_s29  ;;  %s3196_s1 = scalar_lea.hbm %s3313_s29, %s1758_s19 }
 0x1a9   : > { %p2505_p9 = pneg %p2504_p2  ;;  %s2508_s19 = scalar_lea.vmem %s2507_s18, 512 }
 0x1aa   : > { %p2510_p12 = scmp.lt.s32.totalorder %s2508_s19, %s2502_s20 }
 0x1ac   : > { %p2511_p11 = por %p2510_p12, %p2509_p10 }
 0x1ae   : > { %p2512_p13 = pnand %p2511_p11, %p2505_p9 }
 0x273   : > { %v711_v9 = vpop.f32.mrb[0].mxu0 }
 0x274   : > { %v712_v10 = vadd.f32 %v1725_v8, %v711_v9  ;;  %v1795_v11 = vpop.f32.mrb[1].mxu0 }
 0x275   : > { %v714_v12 = vpop.f32.mrb[2].mxu0  ;;  %v1217_v11 = vld [vmem:[#allocation14 + $0x4] sm:$0x3] }
 0x276   : > { %v722_v13 = vrot.slane %v712_v10, 6  ;;  %v715_v14 = vadd.f32 %v1725_v8, %v714_v12  ;;  %v1796_v15 = vpop.f32.mrb[3].mxu0  ;;  %v863_v16 = vrot.slane %v712_v10, 2  ;;  %v1223_v12 = vsel %vm721_vm3, %v1217_v11, 0 }
 0x278   : > { %v723_v17 = vrot.slane %v715_v14, 6  ;;  %v3122_v18 = vpack.c.bf16 %v715_v14, %v712_v10  ;;  %v864_v19 = vrot.slane %v715_v14, 2  ;;  %v727_v20 = vsel %vm721_vm3, 0.0, %v722_v13 }
 0x27a   : > { %v865_v21 = vsel %vm862_vm4, %v863_v16, %v864_v19  ;;  %v868_v22 = vsel %vm862_vm4, %v864_v19, 0.0  ;;  %v724_v23 = vsel %vm721_vm3, %v722_v13, %v723_v17 }
 0x27b   : > { %v874_v25 = vpack.c.bf16 %v868_v22, %v865_v21  ;;  %v732_v26 = vpack.c.bf16 %v724_v23, %v727_v20  ;;  %v1417_v20 = vld [vmem:[#allocation22] sm:$0x3] }
 0x27c   : > { %v1423_v21 = vsel %vm721_vm3, %v1417_v20, 0 }
 0x27d   : > { %1802 = vmatmul.mubr.msk.bf16.vlgmr.msra.gmra.mrb[0].mxu1 %vm745_vm5, %v732_v26 }
 0x27e   : > { %1806 = vmatpush3.bf16.msra.mxu1 %v2102_v24  ;;  %1809 = vmatprep.mubr.msk.bf16.mxu1 %vm2619_vm0, %v2618_v0 }
 0x27f   : > { %1807 = vmatprep.subr.bf16.mxu1 %v2618_v0 }
 0x282   : > { %1808 = vmatpush3.bf16.msra.mxu1 %v2103_v27 }
 0x283   : > { %1813 = vmatprep.subr.bf16.mxu1 %v2618_v0 }
 0x289   : > { %1810 = vmatmul.mubr.msk.bf16.vlgmr.msra.gmra.mrb[0].mxu1 %vm745_vm5, %v3122_v18 }
 0x28a   : > { %1814 = vmatpush3.bf16.msra.mxu1 %v2104_v28  ;;  %1817 = vmatprep.mubr.msk.bf16.mxu1 %vm2619_vm0, %v2618_v0  ;;  %v1742_v28 = vld [vmem:[#allocation16] ss:$0 sm:$0xff] }
 0x28b   : > { %1815 = vmatprep.subr.bf16.mxu1 %v2618_v0 }
 0x28e   : > { %1816 = vmatpush3.bf16.msra.mxu1 %v2105_v29 }
 0x28f   : > { %1839 = vmatprep.subr.bf16.mxu1 %v2618_v0 }
 0x295   : > { %1818 = vmatmul.mubr.msk.bf16.vlgmr.msra.gmra.mrb[0].mxu1 %vm745_vm5, %v874_v25 }
 0x296   : > { %1841 = vmatprep.mubr.msk.bf16.mxu1 %vm2619_vm0, %v2618_v0  ;;  %1840 = vmatpush3.bf16.msra.mxu1 %v1113_v33 }
 0x297   : > { %1845 = vmatprep.subr.bf16.mxu1 %v2618_v0 }
 0x368   : > { %v924_v35 = vpop.f32.mrb[0].mxu1 }
 0x369   : > { %v1883_v36 = vadd.f32 %v1730_v34, %v924_v35  ;;  %v1819_v37 = vpop.f32.mrb[1].mxu1 }
 0x36a   : > { %v927_v38 = vpop.f32.mrb[2].mxu1 }
 0x36b   : > { %v936_v39 = vrot.slane %v1883_v36, 4  ;;  %v1884_v40 = vadd.f32 %v1730_v34, %v927_v38  ;;  %v1820_v41 = vpop.f32.mrb[3].mxu1 }
 0x36d   : > { %v937_v42 = vrot.slane %v1884_v40, 4  ;;  %v1002_v43 = vpack.c.bf16 %v1884_v40, %v1883_v36  ;;  %v941_v45 = vsel %vm673_vm1, 0.0, %v936_v39  ;;  %v1751_v36 = vld [vmem:[#allocation23] ss:$0 sm:$0xff] }
 0x36f   : > { %v938_v46 = vsel %vm673_vm1, %v936_v39, %v937_v42  ;;  %v1053_v47 = vsel %vm673_vm1, %v937_v42, 0.0 }
 0x370   : > { %v943_v48 = vpack.c.bf16 %v938_v46, %v941_v45  ;;  %v1056_v49 = vpack.c.bf16 %v1053_v47, %v938_v46 }
 0x372   : > { %1824 = vmatmul.mubr.msk.bf16.vlgmr.msra.gmra.mrb[4].mxu0 %vm944_vm6, %v943_v48 }
 0x373   : > { %1828 = vmatpush3.bf16.msra.mxu0 %v1007_v50  ;;  %1829 = vmatprep.mubr.msk.bf16.mxu0 %vm2619_vm0, %v2618_v0 }
 0x374   : > { %1833 = vmatprep.subr.bf16.mxu0 %v2618_v0 }
 0x37e   : > { %1830 = vmatmul.mubr.msk.bf16.vlgmr.msra.gmra.mrb[4].mxu0 %vm944_vm6, %v1002_v43 }
 0x37f   : > { %1834 = vmatpush3.bf16.msra.mxu0 %v1061_v52  ;;  %1835 = vmatprep.mubr.msk.bf16.mxu0 %vm2619_vm0, %v2618_v0 }
 0x380   : > { %1857 = vmatprep.subr.bf16.mxu0 %v2618_v0 }
 0x38a   : > { %1836 = vmatmul.mubr.msk.bf16.vlgmr.msra.gmra.mrb[4].mxu0 %vm944_vm6, %v1056_v49 }
 0x38b   : > { %1858 = vmatpush3.bf16.msra.mxu0 %v1274_v54  ;;  %1859 = vmatprep.mubr.msk.bf16.mxu0 %vm2619_vm0, %v2618_v0 }
 0x38c   : > { %1863 = vmatprep.subr.bf16.mxu0 %v2618_v0 }
 0x392   : > { %1860 = vmatmul.mubr.msk.bf16.vlgmr.msra.gmra.mrb[8].mxu0 %vm944_vm6, %v1002_v43 }
 0x393   : > { %1864 = vmatpush3.bf16.msra.mxu0 %v2106_v55  ;;  %1867 = vmatprep.mubr.msk.bf16.mxu0 %vm2619_vm0, %v2618_v0 }
 0x394   : > { %1865 = vmatprep.subr.bf16.mxu0 %v2618_v0 }
 0x397   : > { %1866 = vmatpush3.bf16.msra.mxu0 %v2107_v56 }
 0x398   : > { %1871 = vmatprep.subr.bf16.mxu0 %v2618_v0 }
 0x39a   : > { %1868 = vmatmul.mubr.msk.bf16.vlgmr.msra.gmra.mrb[12].mxu0 %vm745_vm5, %v3122_v18 }
 0x39b   : > { %1873 = vmatprep.mubr.msk.bf16.mxu0 %vm2619_vm0, %v2618_v0  ;;  %1872 = vmatpush3.bf16.msra.mxu0 %v1372_v58 }
 0x45d   : > { %v1097_v60 = vpop.f32.mrb[4].mxu0 }
 0x45e   : > { %v1885_v62 = vadd.f32 %v1738_v59, %v1097_v60  ;;  %v1837_v63 = vpop.f32.mrb[5].mxu0 }
 0x45f   : > { %v1100_v1 = vpop.f32.mrb[6].mxu0 }
 0x460   : > { %v1108_v2 = vpack.c.bf16 %v1885_v62, %v2618_v0  ;;  %v1886_v3 = vadd.f32 %v1738_v59, %v1100_v1  ;;  %v1838_v4 = vpop.f32.mrb[7].mxu0 }
 0x462   : > { %v1166_v6 = vpack.c.bf16 %v1886_v3, %v1885_v62  ;;  %1842 = vmatmul.mubr.msk.bf16.vlgmr.msra.gmra.mrb[4].mxu1 %vm944_vm6, %v1108_v2  ;;  %v1218_v19 = vpack.c.bf16 %v2618_v0, %v1886_v3 }
 0x463   : > { %1846 = vmatpush3.bf16.msra.mxu1 %v1171_v5  ;;  %1847 = vmatprep.mubr.msk.bf16.mxu1 %vm2619_vm0, %v2618_v0 }
 0x464   : > { %1874 = vmatmul.mubr.msk.bf16.vlgmr.msra.gmra.mrb[16].mxu0 %vm944_vm6, %v1166_v6  ;;  %1851 = vmatprep.subr.bf16.mxu1 %v2618_v0 }
 0x465   : > { %v1310_v7 = vpop.f32.mrb[8].mxu0 }
 0x466   : > { %v1861_v8 = vpop.f32.mrb[9].mxu0 }
 0x467   : > { %v1313_v9 = vpop.f32.mrb[10].mxu0 }
 0x468   : > { %v1862_v10 = vpop.f32.mrb[11].mxu0 }
 0x46d   : > { %v1363_v13 = vpop.f32.mrb[12].mxu0 }
 0x46e   : > { %v1364_v14 = vadd.f32 %v1363_v13, %v1310_v7  ;;  %1848 = vmatmul.mubr.msk.bf16.vlgmr.msra.gmra.mrb[4].mxu1 %vm944_vm6, %v1166_v6  ;;  %v1869_v15 = vpop.f32.mrb[13].mxu0 }
 0x46f   : > { %1852 = vmatpush3.bf16.msra.mxu1 %v1223_v12  ;;  %v1366_v16 = vpop.f32.mrb[14].mxu0  ;;  %1853 = vmatprep.mubr.msk.bf16.mxu1 %vm2619_vm0, %v2618_v0 }
 0x470   : > { %v1367_v17 = vadd.f32 %v1366_v16, %v1313_v9  ;;  %v1870_v18 = vpop.f32.mrb[15].mxu0  ;;  %1877 = vmatprep.subr.bf16.mxu1 %v2618_v0 }
 0x47a   : > { %1854 = vmatmul.mubr.msk.bf16.vlgmr.msra.gmra.mrb[4].mxu1 %vm944_vm6, %v1218_v19 }
 0x47b   : > { %1879 = vmatprep.mubr.msk.bf16.mxu1 %vm2619_vm0, %v2618_v0  ;;  %1878 = vmatpush3.bf16.msra.mxu1 %v1423_v21 }
 0x537   : > { %v1408_v22 = vpop.f32.mrb[16].mxu0 }
 0x538   : > { %v1415_v23 = vadd.f32 %v1408_v22, %v1364_v14  ;;  %v1875_v24 = vpop.f32.mrb[17].mxu0 }
 0x539   : > { %v1411_v25 = vpop.f32.mrb[18].mxu0 }
 0x53a   : > { %v1416_v26 = vadd.f32 %v1411_v25, %v1367_v17  ;;  %v1876_v27 = vpop.f32.mrb[19].mxu0 }
 0x54d   : > { %v1259_v29 = vpop.f32.mrb[4].mxu1 }
 0x54e   : > { %v1855_v30 = vpop.f32.mrb[5].mxu1  ;;  %v1887_v32 = vadd.f32 %v1742_v28, %v1259_v29 }
 0x54f   : > { %v1262_v31 = vpop.f32.mrb[6].mxu1 }
 0x550   : > { %v1888_v33 = vadd.f32 %v1742_v28, %v1262_v31  ;;  %v1856_v34 = vpop.f32.mrb[7].mxu1 }
 0x552   : > { %v1418_v0 = vpack.c.bf16 %v1888_v33, %v1887_v32 }
 0x554   : > { %1880 = vmatmul.mubr.msk.bf16.vlgmr.msra.gmra.mrb[8].mxu1 %vm944_vm6, %v1418_v0 }
 0x627   : > { %v1459_v35 = vpop.f32.mrb[8].mxu1 }
 0x628   : > { %v1466_v37 = vadd.f32 %v1459_v35, %v1415_v23  ;;  %v1881_v38 = vpop.f32.mrb[9].mxu1 }
 0x629   : > { %v1462_v39 = vpop.f32.mrb[10].mxu1 }
 0x62a   : > { %v1475_v40 = vadd.f32 %v1751_v36, %v1466_v37  ;;  %v1467_v41 = vadd.f32 %v1462_v39, %v1416_v26  ;;  %v1882_v42 = vpop.f32.mrb[11].mxu1 }
 0x62c   : > { %1477 = vst.msk [vmem:[%s656_s21] sm:$0xff] %vm745_vm5, %v1475_v40  ;;  %v1476_v43 = vadd.f32 %v1751_v36, %v1467_v41 }
 0x62e   : > { %1478 = vst.msk [vmem:[%s656_s21 + $0x8] sm:$0xff] %vm745_vm5, %v1476_v43 }
 0x62f   : > { %2515 = shalt.err (!%p2512_p13)
}
 0x630   : > { %s2516_s21 = scalar_lea.hbm %s3196_s1, 256  ;;  %s2520_s29 = scalar_lea.hbm %s3314_s3, 512 }
 0x631   : > { %p2517_p5 = scmp.ne.s32.totalorder %s3196_s1, %s2516_s21  ;;  %p2521_p1 = scmp.lt.u32.totalorder %s3196_s1, %s3314_s3 }
 0x632   : > { %p2522_p3 = scmp.lt.u32.totalorder %s2520_s29, %s2516_s21  ;;  %p2524_p6 = scmp.lt.u32.totalorder %s2516_s21, %s3196_s1 }
 0x633   : > { %p2518_p7 = pnand %p2517_p5, %p3315_p0 }
 0x634   : > { %p2523_p8 = por %p2522_p3, %p2521_p1 }
 0x635   : > { %p2519_p4 = pneg %p2518_p7 }
 0x636   : > { %p2525_p2 = por %p2524_p6, %p2523_p8 }
 0x638   : > { %p2526_p9 = pnand %p2525_p2, %p2519_p4 }
 0x63a   : > { %2529 = shalt.err (!%p2526_p9)
}
 0x63b   : > { %s2621_s20 = smov 128   ;;  %s2622_s19 = smov 8  }
 0x63c   : > { %1967 = dma.vmem_to_hbm [thread:$0]  (%p3315_p0), %s3198_s28, 256, %s3196_s1, %s1480_s30, %s2621_s20, %s2621_s20, %s2622_s19  }
 0x63d PF: > { %s3316_s17 = sld [smem:[#allocation35_spill]]  ;;  %p3317_p10 = scmp.ne.s32.totalorder %s3292_s0, 0 }
 0x63e   : > { %p3318_p12 = scmp.ge.s32.totalorder %s2596_s16, 2 }
 0x640   : > { %p2014_p11 = pnand %p3318_p12, %p3317_p10 }
 0x643   : > { %s1508_s22 = sand.u32 1, %s3316_s17  }
 0x644   : > { %s1509_s21 = scalar_lea.sflag [#allocation4], %s1508_s22 }
 0x645   : > { %2579 = dma.done.wait (!%p2014_p11), %s1509_s21, 256  }
 0x646   : > { %2581 = vsyncadd (!%p2014_p11), %s1509_s21, 4294967040  ;;  %s3319_s29 = sld [smem:[#allocation36_spill]]  ;;  %p34_p13 = scmp.ge.s32.totalorder %s2999_s23, 4  }
 0x647   : > { %s3320_s30 = smov %s2592_s15  ;;  %s3321_s15 = smov %s3011_s25 }
 0x648   : > { %s3322_s16 = smov %s2999_s23  ;;  %36 = sbr.rel (!%p34_p13) target bundleno = 17 (0x11), region = 179 }
 0x64f   :  { %1514 = vsyncpa [#allocation3], 1 }
 0x650   :  { %1516 = vsyncpa [#allocation3 + $0x1], 1 }
 0x651   :  { %1517 = vsyncpa [#allocation6], 1 }
 0x652   :  { %1518 = vsyncpa [#allocation9], 1 }
 0x653   :  { %1519 = vsyncpa [#allocation12], 1 }
 0x654   :  { %1520 = vsyncpa [#allocation15], 1 }
 0x655   :  { %1521 = vsyncpa [#allocation18], 1 }
 0x656   :  { %1522 = vsyncpa [#allocation21], 1 }
 0x657   :  { %1523 = vsyncpa [#allocation24], 1 }
 0x658   :  { %1524 = vsyncpa [#allocation4], 1 }
 0x659   :  { %1526 = vsyncpa [#allocation4 + $0x1], 1 }

// kernel: _lambda_.6
= control target key start
LH: loop header
LB: loop body
LE: loop exit
PB: predicated region body
PF: predicated region fallthrough
CT: control target
= control target key end

     0   :  { %s4419_s0 = inlined_call_operand.hbm [shape: f32[2,16,32], index: 0, kind: input, shape index: {}]   ;;  %s4420_s1 = inlined_call_operand.hbm [shape: bf16[32,64], index: 1, kind: input, shape index: {}]   ;;  %s4421_s2 = inlined_call_operand.hbm [shape: bf16[32,64], index: 2, kind: input, shape index: {}]   ;;  %s4422_s3 = inlined_call_operand.hbm [shape: f32[4,1,64], index: 3, kind: input, shape index: {}]   ;;  %s4423_s4 = inlined_call_operand.hbm [shape: f32[1,64], index: 4, kind: input, shape index: {}]   ;;  %s4424_s5 = inlined_call_operand.hbm [shape: f32[64,96], index: 5, kind: input, shape index: {}]   ;;  %s4425_s6 = inlined_call_operand.hbm [shape: f32[1,64], index: 6, kind: input, shape index: {}]   ;;  %s4426_s7 = inlined_call_operand.hbm [shape: f32[16,64], index: 7, kind: input, shape index: {}]   ;;  %s4427_s8 = inlined_call_operand.hbm [shape: f32[1,64], index: 8, kind: input, shape index: {}]   ;;  %s4428_s9 = inlined_call_operand.hbm [shape: bf16[64,32], index: 9, kind: input, shape index: {}]   ;;  %s4429_s10 = inlined_call_operand.hbm [shape: bf16[32,8], index: 10, kind: input, shape index: {}]   ;;  %s4430_s11 = inlined_call_operand.hbm [shape: f32[1,8], index: 11, kind: input, shape index: {}]   ;;  %s4431_s12 = inlined_call_operand.hbm [shape: f32[2,16,8], index: 12, kind: output, shape index: {}]  }
   0x1   :  { %4455 = sst [smem:[#allocation43_spill]] %s4419_s0 }
   0x2   :  { %4456 = sst [smem:[#allocation44_spill]] %s4420_s1 }
   0x3   :  { %4457 = sst [smem:[#allocation45_spill]] %s4422_s3 }
   0x4   :  { %4458 = sst [smem:[#allocation46_spill]] %s4431_s12 }
   0x5   :  { %17 = vsyncpa [#allocation7], 0 }
   0x6   :  { %19 = vsyncpa [#allocation7 + $0x1], 0 }
   0x7   :  { %20 = vsyncpa [#allocation10], 0 }
   0x8   :  { %21 = vsyncpa [#allocation13], 0 }
   0x9   :  { %22 = vsyncpa [#allocation16], 0 }
   0xa   :  { %23 = vsyncpa [#allocation19], 0 }
   0xb   :  { %24 = vsyncpa [#allocation22], 0 }
   0xc   :  { %25 = vsyncpa [#allocation25], 0 }
   0xd   :  { %26 = vsyncpa [#allocation8], 0 }
   0xe   :  { %28 = vsyncpa [#allocation8 + $0x1], 0  ;;  %s3327_s21 = smov 0   ;;  %s3329_s22 = smov 0  }
   0xf   :  { %s3331_s23 = smov 0   ;;  %s3333_s24 = smov 0  }
  0x10 LB: > { %s3220_s25 = smov [#allocation9]   ;;  %s3348_s27 = sadd.s32 4294967295, %s3218_s24   ;;  %s3218_s24 = sphi %s3333_s24, %s4517_s24   ;;  %s3214_s23 = sphi %s3331_s23, %s4516_s23   ;;  %s3210_s22 = sphi %s3329_s22, %s4515_s22   ;;  %s3206_s21 = sphi %s3327_s21, %s4514_s21  }
  0x11   : > { %s334_s26 = sshll.u32 %s3220_s25, 4  ;;  %4459 = sst [smem:[#allocation35_spill]] %s3348_s27  ;;  %s3353_s26 = int_to_ptr.vmem [resolvable:$true] %s334_s26 }
  0x12   : > { %p2285_p0 = scmp.ge.s32.totalorder %s3218_s24, 1  ;;  %p4440_p1 = scmp.eq.s32.totalorder %s3348_s27, 0 }
  0x13   : > { %p322_p2 = scmp.lt.s32.totalorder %s3218_s24, 3  ;;  %s3221_s29 = smov [#allocation12]  }
  0x14   : > { %s360_s30 = sshll.u32 %s3221_s29, 4  ;;  %s3222_s14 = smov [#allocation15]   ;;  %s3368_s30 = int_to_ptr.vmem [resolvable:$true] %s360_s30 }
  0x15   : > { %p3355_p3 = pnand %p2285_p0, %p322_p2  ;;  %s3370_s15 = sshll.u32 %s3222_s14, 4  ;;  %s385_s15 = int_to_ptr.vmem [resolvable:$true] %s3370_s15 }
  0x16   : > { %s4463_s1 = sld [smem:[#allocation44_spill]] }
  0x17   : > { %s4460_s28 = scalar_select %p3355_p3, 1, 0 }
  0x18   : > { %p2489_p5 = pneg %p3355_p3 }
  0x19   : > { %4461 = sst [smem:[#allocation36_spill]] %s4460_s28 }
  0x1a   : > { %p3364_p6 = pnand %p2489_p5, %p4440_p1 }
  0x1c   : > { %s2790_s18 = scalar_lea.hbm %s4463_s1, 256  ;;  %p3380_p8 = pneg %p3364_p6 }
  0x1d   : > { %p2791_p7 = scmp.ne.s32.totalorder %s4463_s1, %s2790_s18  ;;  %p2797_p11 = scmp.lt.u32.totalorder %s2790_s18, %s4463_s1 }
  0x1f   : > { %p2793_p9 = pnand %p3380_p8, %p2791_p7 }
  0x21   : > { %p2794_p10 = pneg %p2793_p9 }
  0x23   : > { %p2799_p12 = pnand %p2797_p11, %p2794_p10 }
  0x25   : > { %2802 = shalt.err (!%p2799_p12)
}
  0x26   : > { %s2803_s16 = scalar_lea.vmem %s3353_s26, 256  ;;  %p2811_p5 = scmp.lt.s32.totalorder %s3353_s26, %s3353_s26 }
  0x27   : > { %p2804_p13 = scmp.ne.s32.totalorder %s3353_s26, %s2803_s16  ;;  %p2812_p4 = scmp.lt.s32.totalorder %s2803_s16, %s2803_s16 }
  0x29   : > { %p2806_p0 = pnand %p2804_p13, %p3380_p8  ;;  %p2813_p7 = por %p2812_p4, %p2811_p5 }
  0x2b   : > { %p2807_p2 = pneg %p2806_p0 }
  0x2d   : > { %p2814_p9 = pnand %p2813_p7, %p2807_p2 }
  0x2f   : > { %2817 = shalt.err (!%p2814_p9)
}
  0x30   : > { %s4438_s17 = smov 64   ;;  %s4442_s18 = smov 4  }
  0x31   : > { %2492 = dma.hbm_to_vmem [thread:$0]  (!%p3364_p6), %s4463_s1, 256, %s3353_s26, [#allocation10], %s4438_s17, %s4438_s17, %s4442_s18  }
  0x32   : > { %s4465_s3 = sld [smem:[#allocation45_spill]] }
  0x38   : > { %s2818_s16 = scalar_lea.hbm %s4465_s3, 64 }
  0x39   : > { %p2819_p4 = scmp.ne.s32.totalorder %s4465_s3, %s2818_s16  ;;  %p2825_p12 = scmp.lt.u32.totalorder %s2818_s16, %s4465_s3 }
  0x3b   : > { %p2821_p10 = pnand %p2819_p4, %p3380_p8 }
  0x3d   : > { %p2822_p11 = pneg %p2821_p10 }
  0x3f   : > { %p2827_p13 = pnand %p2825_p12, %p2822_p11 }
  0x41   : > { %2830 = shalt.err (!%p2827_p13)
}
  0x42   : > { %s2831_s26 = scalar_lea.vmem %s3368_s30, 64  ;;  %p2839_p7 = scmp.lt.s32.totalorder %s3368_s30, %s3368_s30 }
  0x43   : > { %p2832_p0 = scmp.ne.s32.totalorder %s3368_s30, %s2831_s26  ;;  %p2840_p9 = scmp.lt.s32.totalorder %s2831_s26, %s2831_s26 }
  0x45   : > { %p2834_p2 = pnand %p2832_p0, %p3380_p8  ;;  %p2841_p4 = por %p2840_p9, %p2839_p7 }
  0x47   : > { %p2835_p5 = pneg %p2834_p2 }
  0x49   : > { %p2842_p10 = pnand %p2841_p4, %p2835_p5 }
  0x4b   : > { %2845 = shalt.err (!%p2842_p10)
}
  0x4c   : > { %s3225_s12 = smov 16   ;;  %s3226_s0 = smov 1  }
  0x4d   : > { %2498 = dma.hbm_to_vmem [thread:$0]  (!%p3364_p6), %s4465_s3, 64, %s3368_s30, [#allocation13], %s3225_s12, %s3225_s12, %s3226_s0  }
  0x4e   : > { %s2846_s29 = scalar_lea.hbm %s4424_s5, 1024 }
  0x4f   : > { %p2847_p11 = scmp.ne.s32.totalorder %s4424_s5, %s2846_s29  ;;  %p2853_p0 = scmp.lt.u32.totalorder %s2846_s29, %s4424_s5 }
  0x51   : > { %p2849_p12 = pnand %p2847_p11, %p3380_p8 }
  0x53   : > { %p2850_p13 = pneg %p2849_p12 }
  0x55   : > { %p2855_p2 = pnand %p2853_p0, %p2850_p13 }
  0x57   : > { %2858 = shalt.err (!%p2855_p2)
}
  0x58   : > { %s2859_s27 = scalar_lea.vmem %s385_s15, 1024  ;;  %p2867_p4 = scmp.lt.s32.totalorder %s385_s15, %s385_s15 }
  0x59   : > { %p2860_p5 = scmp.ne.s32.totalorder %s385_s15, %s2859_s27  ;;  %p2868_p10 = scmp.lt.s32.totalorder %s2859_s27, %s2859_s27 }
  0x5b   : > { %p2862_p7 = pnand %p2860_p5, %p3380_p8  ;;  %p2869_p1 = por %p2868_p10, %p2867_p4 }
  0x5d   : > { %p2863_p9 = pneg %p2862_p7 }
  0x5f   : > { %p2870_p3 = pnand %p2869_p1, %p2863_p9 }
  0x61   : > { %2873 = shalt.err (!%p2870_p3)
}
  0x62   : > { %s4444_s30 = smov 128   ;;  %s3228_s12 = smov 8  }
  0x63   : > { %2504 = dma.hbm_to_vmem [thread:$0]  (!%p3364_p6), %s4424_s5, 1024, %s385_s15, [#allocation16], %s4444_s30, %s4444_s30, %s3228_s12  }
  0x64   : > { %s3229_s28 = smov [#allocation18]   ;;  %s3230_s20 = smov [#allocation21]  }
  0x65   : > { %s408_s19 = sshll.u32 %s3229_s28, 4  ;;  %s432_s29 = sshll.u32 %s3230_s20, 4  ;;  %s409_s19 = int_to_ptr.vmem [resolvable:$true] %s408_s19  ;;  %s433_s29 = int_to_ptr.vmem [resolvable:$true] %s432_s29 }
  0x66   : > { %s2874_s26 = scalar_lea.hbm %s4426_s7, 256 }
  0x67   : > { %p2875_p1 = scmp.ne.s32.totalorder %s4426_s7, %s2874_s26  ;;  %p2881_p12 = scmp.lt.u32.totalorder %s2874_s26, %s4426_s7 }
  0x69   : > { %p2877_p3 = pnand %p2875_p1, %p3380_p8 }
  0x6b   : > { %p2878_p11 = pneg %p2877_p3 }
  0x6d   : > { %p2883_p13 = pnand %p2881_p12, %p2878_p11 }
  0x6f   : > { %2886 = shalt.err (!%p2883_p13)
}
  0x70   : > { %s2887_s15 = scalar_lea.vmem %s409_s19, 256  ;;  %p2895_p7 = scmp.lt.s32.totalorder %s409_s19, %s409_s19 }
  0x71   : > { %p2888_p0 = scmp.ne.s32.totalorder %s409_s19, %s2887_s15  ;;  %p2896_p9 = scmp.lt.s32.totalorder %s2887_s15, %s2887_s15 }
  0x73   : > { %p2890_p2 = pnand %p2888_p0, %p3380_p8  ;;  %p2897_p4 = por %p2896_p9, %p2895_p7 }
  0x75   : > { %p2891_p5 = pneg %p2890_p2 }
  0x77   : > { %p2898_p10 = pnand %p2897_p4, %p2891_p5 }
  0x79   : > { %2901 = shalt.err (!%p2898_p10)
}
  0x7a   : > { %2510 = dma.hbm_to_vmem [thread:$0]  (!%p3364_p6), %s4426_s7, 256, %s409_s19, [#allocation19], %s4444_s30, %s4444_s30, %s3228_s12  }
  0x7b   : > { %s2902_s0 = scalar_lea.hbm %s4428_s9, 512 }
  0x7c   : > { %p2903_p1 = scmp.ne.s32.totalorder %s4428_s9, %s2902_s0  ;;  %p2909_p12 = scmp.lt.u32.totalorder %s2902_s0, %s4428_s9 }
  0x7e   : > { %p2905_p3 = pnand %p2903_p1, %p3380_p8 }
  0x80   : > { %p2906_p11 = pneg %p2905_p3 }
  0x82   : > { %p2911_p13 = pnand %p2909_p12, %p2906_p11 }
  0x84   : > { %2914 = shalt.err (!%p2911_p13)
}
  0x85   : > { %s2915_s26 = scalar_lea.vmem %s433_s29, 512  ;;  %p2923_p7 = scmp.lt.s32.totalorder %s433_s29, %s433_s29 }
  0x86   : > { %p2916_p0 = scmp.ne.s32.totalorder %s433_s29, %s2915_s26  ;;  %p2924_p9 = scmp.lt.s32.totalorder %s2915_s26, %s2915_s26 }
  0x88   : > { %p2918_p2 = pnand %p2916_p0, %p3380_p8  ;;  %p2925_p4 = por %p2924_p9, %p2923_p7 }
  0x8a   : > { %p2919_p5 = pneg %p2918_p2 }
  0x8c   : > { %p2926_p10 = pnand %p2925_p4, %p2919_p5 }
  0x8e   : > { %2929 = shalt.err (!%p2926_p10)
}
  0x8f   : > { %s4466_s19 = smov 4   ;;  %s4467_s27 = smov 64  }
  0x90   : > { %2516 = dma.hbm_to_vmem [thread:$0]  (!%p3364_p6), %s4428_s9, 512, %s433_s29, [#allocation22], %s4467_s27, %s4467_s27, %s4466_s19  }
  0x91   : > { %s3231_s3 = smov [#allocation11]   ;;  %s3232_s17 = smov [#allocation14]  }
  0x92   : > { %s347_s18 = sshll.u32 %s3231_s3, 4  ;;  %s374_s0 = sshll.u32 %s3232_s17, 4  ;;  %s348_s18 = int_to_ptr.vmem [resolvable:$true] %s347_s18  ;;  %s375_s0 = int_to_ptr.vmem [resolvable:$true] %s374_s0 }
  0x93   : > { %s2930_s14 = scalar_lea.hbm %s4421_s2, 256 }
  0x94   : > { %p2931_p1 = scmp.ne.s32.totalorder %s4421_s2, %s2930_s14  ;;  %p2937_p12 = scmp.lt.u32.totalorder %s2930_s14, %s4421_s2 }
  0x96   : > { %p2933_p3 = pnand %p2931_p1, %p3380_p8 }
  0x98   : > { %p2934_p11 = pneg %p2933_p3 }
  0x9a   : > { %p2939_p13 = pnand %p2937_p12, %p2934_p11 }
  0x9c   : > { %2942 = shalt.err (!%p2939_p13)
}
  0x9d   : > { %s2943_s29 = scalar_lea.vmem %s348_s18, 256  ;;  %p2951_p7 = scmp.lt.s32.totalorder %s348_s18, %s348_s18 }
  0x9e   : > { %p2944_p0 = scmp.ne.s32.totalorder %s348_s18, %s2943_s29  ;;  %p2952_p9 = scmp.lt.s32.totalorder %s2943_s29, %s2943_s29 }
  0xa0   : > { %p2946_p2 = pnand %p2944_p0, %p3380_p8  ;;  %p2953_p4 = por %p2952_p9, %p2951_p7 }
  0xa2   : > { %p2947_p5 = pneg %p2946_p2 }
  0xa4   : > { %p2954_p10 = pnand %p2953_p4, %p2947_p5 }
  0xa6   : > { %2957 = shalt.err (!%p2954_p10)
}
  0xa7   : > { %2495 = dma.hbm_to_vmem [thread:$0]  (!%p3364_p6), %s4421_s2, 256, %s348_s18, [#allocation10], %s4467_s27, %s4467_s27, %s4466_s19  }
  0xa8   : > { %s2958_s28 = scalar_lea.hbm %s4423_s4, 16 }
  0xa9   : > { %p2959_p1 = scmp.ne.s32.totalorder %s4423_s4, %s2958_s28  ;;  %p2965_p12 = scmp.lt.u32.totalorder %s2958_s28, %s4423_s4 }
  0xab   : > { %p2961_p3 = pnand %p2959_p1, %p3380_p8 }
  0xad   : > { %p2962_p11 = pneg %p2961_p3 }
  0xaf   : > { %p2967_p13 = pnand %p2965_p12, %p2962_p11 }
  0xb1   : > { %2970 = shalt.err (!%p2967_p13)
}
  0xb2   : > { %s2971_s15 = scalar_lea.vmem %s375_s0, 16  ;;  %s2978_s18 = scalar_lea.vmem %s375_s0, 32 }
  0xb3   : > { %p2972_p0 = scmp.ne.s32.totalorder %s375_s0, %s2971_s15  ;;  %p2979_p7 = scmp.lt.s32.totalorder %s375_s0, %s375_s0 }
  0xb4   : > { %p2980_p9 = scmp.lt.s32.totalorder %s2978_s18, %s2971_s15 }
  0xb5   : > { %p2974_p2 = pnand %p2972_p0, %p3380_p8 }
  0xb6   : > { %p2981_p4 = por %p2980_p9, %p2979_p7 }
  0xb7   : > { %p2975_p5 = pneg %p2974_p2 }
  0xb9   : > { %p2982_p10 = pnand %p2981_p4, %p2975_p5 }
  0xbb   : > { %2985 = shalt.err (!%p2982_p10)
}
  0xbc   : > { %2501 = dma.hbm_to_vmem [thread:$0]  (!%p3364_p6), %s4423_s4, 16, %s375_s0, [#allocation13]  }
  0xbd   : > { %s3233_s1 = smov [#allocation17]   ;;  %s3234_s17 = smov [#allocation20]  }
  0xbe   : > { %s398_s3 = sshll.u32 %s3233_s1, 4  ;;  %s422_s28 = sshll.u32 %s3234_s17, 4  ;;  %s399_s3 = int_to_ptr.vmem [resolvable:$true] %s398_s3  ;;  %s423_s28 = int_to_ptr.vmem [resolvable:$true] %s422_s28 }
  0xbf   : > { %s2986_s16 = scalar_lea.hbm %s4425_s6, 16 }
  0xc0   : > { %p2987_p1 = scmp.ne.s32.totalorder %s4425_s6, %s2986_s16  ;;  %p2993_p12 = scmp.lt.u32.totalorder %s2986_s16, %s4425_s6 }
  0xc2   : > { %p2989_p3 = pnand %p2987_p1, %p3380_p8 }
  0xc4   : > { %p2990_p11 = pneg %p2989_p3 }
  0xc6   : > { %p2995_p13 = pnand %p2993_p12, %p2990_p11 }
  0xc8   : > { %2998 = shalt.err (!%p2995_p13)
}
  0xc9   : > { %s2999_s0 = scalar_lea.vmem %s399_s3, 16  ;;  %s3006_s30 = scalar_lea.vmem %s399_s3, 32 }
  0xca   : > { %p3000_p0 = scmp.ne.s32.totalorder %s399_s3, %s2999_s0  ;;  %p3007_p7 = scmp.lt.s32.totalorder %s399_s3, %s399_s3 }
  0xcb   : > { %p3008_p9 = scmp.lt.s32.totalorder %s3006_s30, %s2999_s0 }
  0xcc   : > { %p3002_p2 = pnand %p3000_p0, %p3380_p8 }
  0xcd   : > { %p3009_p4 = por %p3008_p9, %p3007_p7 }
  0xce   : > { %p3003_p5 = pneg %p3002_p2 }
  0xd0   : > { %p3010_p10 = pnand %p3009_p4, %p3003_p5 }
  0xd2   : > { %3013 = shalt.err (!%p3010_p10)
}
  0xd3   : > { %2507 = dma.hbm_to_vmem [thread:$0]  (!%p3364_p6), %s4425_s6, 16, %s399_s3, [#allocation16]  }
  0xd4   : > { %s3014_s16 = scalar_lea.hbm %s4427_s8, 16 }
  0xd5   : > { %p3015_p1 = scmp.ne.s32.totalorder %s4427_s8, %s3014_s16  ;;  %p3021_p12 = scmp.lt.u32.totalorder %s3014_s16, %s4427_s8 }
  0xd7   : > { %p3017_p3 = pnand %p3015_p1, %p3380_p8 }
  0xd9   : > { %p3018_p11 = pneg %p3017_p3 }
  0xdb   : > { %p3023_p13 = pnand %p3021_p12, %p3018_p11 }
  0xdd   : > { %3026 = shalt.err (!%p3023_p13)
}
  0xde   : > { %s3027_s0 = scalar_lea.vmem %s423_s28, 16  ;;  %s3034_s3 = scalar_lea.vmem %s423_s28, 32 }
  0xdf   : > { %p3028_p0 = scmp.ne.s32.totalorder %s423_s28, %s3027_s0  ;;  %p3035_p7 = scmp.lt.s32.totalorder %s423_s28, %s423_s28 }
  0xe0   : > { %p3036_p9 = scmp.lt.s32.totalorder %s3034_s3, %s3027_s0 }
  0xe1   : > { %p3030_p2 = pnand %p3028_p0, %p3380_p8 }
  0xe2   : > { %p3037_p4 = por %p3036_p9, %p3035_p7 }
  0xe3   : > { %p3031_p5 = pneg %p3030_p2 }
  0xe5   : > { %p3038_p10 = pnand %p3037_p4, %p3031_p5 }
  0xe7   : > { %3041 = shalt.err (!%p3038_p10)
}
  0xe8   : > { %2513 = dma.hbm_to_vmem [thread:$0]  (!%p3364_p6), %s4427_s8, 16, %s423_s28, [#allocation19]  }
  0xe9   : > { %s3235_s17 = smov [#allocation23]   ;;  %s3236_s14 = smov [#allocation24]  }
  0xea   : > { %s445_s20 = sshll.u32 %s3235_s17, 4  ;;  %s459_s16 = sshll.u32 %s3236_s14, 4  ;;  %s446_s20 = int_to_ptr.vmem [resolvable:$true] %s445_s20  ;;  %s460_s16 = int_to_ptr.vmem [resolvable:$true] %s459_s16 }
  0xeb   : > { %s3042_s18 = scalar_lea.hbm %s4429_s10, 256 }
  0xec   : > { %p3043_p1 = scmp.ne.s32.totalorder %s4429_s10, %s3042_s18  ;;  %p3049_p12 = scmp.lt.u32.totalorder %s3042_s18, %s4429_s10 }
  0xee   : > { %p3045_p3 = pnand %p3043_p1, %p3380_p8 }
  0xf0   : > { %p3046_p11 = pneg %p3045_p3 }
  0xf2   : > { %p3051_p13 = pnand %p3049_p12, %p3046_p11 }
  0xf4   : > { %3054 = shalt.err (!%p3051_p13)
}
  0xf5   : > { %s3055_s28 = scalar_lea.vmem %s446_s20, 256  ;;  %p3063_p7 = scmp.lt.s32.totalorder %s446_s20, %s446_s20 }
  0xf6   : > { %p3056_p0 = scmp.ne.s32.totalorder %s446_s20, %s3055_s28  ;;  %p3064_p9 = scmp.lt.s32.totalorder %s3055_s28, %s3055_s28 }
  0xf8   : > { %p3058_p2 = pnand %p3056_p0, %p3380_p8  ;;  %p3065_p4 = por %p3064_p9, %p3063_p7 }
  0xfa   : > { %p3059_p5 = pneg %p3058_p2 }
  0xfc   : > { %p3066_p10 = pnand %p3065_p4, %p3059_p5 }
  0xfe   : > { %3069 = shalt.err (!%p3066_p10)
}
  0xff   : > { %2519 = dma.hbm_to_vmem [thread:$0]  (!%p3364_p6), %s4429_s10, 256, %s446_s20, [#allocation22], %s4467_s27, %s4467_s27, %s4466_s19  }
 0x100   : > { %s3070_s15 = scalar_lea.hbm %s4430_s11, 16 }
 0x101   : > { %p3071_p1 = scmp.ne.s32.totalorder %s4430_s11, %s3070_s15  ;;  %p3077_p12 = scmp.lt.u32.totalorder %s3070_s15, %s4430_s11 }
 0x103   : > { %p3073_p3 = pnand %p3071_p1, %p3380_p8 }
 0x105   : > { %p3074_p11 = pneg %p3073_p3 }
 0x107   : > { %p3079_p13 = pnand %p3077_p12, %p3074_p11 }
 0x109   : > { %3082 = shalt.err (!%p3079_p13)
}
 0x10a   : > { %s3083_s30 = scalar_lea.vmem %s460_s16, 16  ;;  %s3090_s19 = scalar_lea.vmem %s460_s16, 32 }
 0x10b   : > { %p3084_p0 = scmp.ne.s32.totalorder %s460_s16, %s3083_s30  ;;  %p3091_p7 = scmp.lt.s32.totalorder %s460_s16, %s460_s16 }
 0x10c   : > { %p3092_p9 = scmp.lt.s32.totalorder %s3090_s19, %s3083_s30 }
 0x10d   : > { %p3086_p2 = pnand %p3084_p0, %p3380_p8 }
 0x10e   : > { %p3093_p4 = por %p3092_p9, %p3091_p7 }
 0x10f   : > { %p3087_p5 = pneg %p3086_p2 }
 0x111   : > { %p3094_p10 = pnand %p3093_p4, %p3087_p5 }
 0x113   : > { %3097 = shalt.err (!%p3094_p10)
}
 0x114   : > { %s4468_s25 = sld [smem:[#allocation35_spill]]  ;;  %s2284_s28 = sadd.s32 4294967294, %s3218_s24  }
 0x115   : > { %2522 = dma.hbm_to_vmem [thread:$0]  (!%p3364_p6), %s4430_s11, 16, %s460_s16, [#allocation25]  }
 0x116   : > { %s3607_s13 = sadd.s32 1, %s3218_s24   ;;  %s41_s1 = sadd.s32 1, %s3214_s23 }
 0x117   : > { %s38_s17 = ssub.s32 %s3218_s24, %s3607_s13  ;;  %p48_p8 = scmp.ne.s32.totalorder %s3214_s23, %s3210_s22 }
 0x118   : > { %p39_p1 = scmp.eq.s32.totalorder %s38_s17, 0  ;;  %p49_p3 = scmp.eq.s32.totalorder %s3218_s24, 0 }
 0x119   : > { %p54_p11 = scmp.ne.s32.totalorder %s3210_s22, %s3206_s21  ;;  %p315_p5 = scmp.eq.s32.totalorder %s2284_s28, 1 }
 0x11a   : > { %p309_p12 = scmp.eq.s32.totalorder %s4468_s25, 1  ;;  %p50_p13 = por %p49_p3, %p48_p8 }
 0x11b   : > { %s3619_s14 = scalar_select %p39_p1, %s3214_s23, %s41_s1  }
 0x11c   : > { %p4469_p0 = scmp.eq.s32.totalorder %s4468_s25, 0  ;;  %p3627_p6 = por %p309_p12, %p48_p8 }
 0x11d   : > { %p2542_p7 = scmp.lt.s32.totalorder %s3218_s24, 2  ;;  %s470_s15 = sand.u32 1, %s3214_s23  }
 0x11e   : > { %p3623_p2 = por %p4469_p0, %p54_p11  ;;  %p3633_p9 = por %p315_p5, %p54_p11 }
 0x11f   : > { %s4471_s16 = scalar_select %p3627_p6, 1, 0 }
 0x120   : > { %s4472_s18 = scalar_select %p3633_p9, 1, 0 }
 0x121   : > { %s2298_s29 = sshll.u32 %s470_s15, 4  ;;  %s2344_s0 = sshll.u32 %s3218_s24, 8 }
 0x122   : > { %s4473_s19 = sld [smem:[#allocation43_spill]]  ;;  %s474_s20 = scalar_lea.vmem [#allocation6], %s2298_s29 }
 0x123   : > { %s481_s25 = sshll.u32 %s474_s20, 4  ;;  %p3643_p4 = pnand %p2542_p7, %p50_p13  ;;  %s3647_s25 = int_to_ptr.vmem [resolvable:$true] %s481_s25 }
 0x124   : > { %s3649_s1 = scalar_lea.sflag [#allocation7], %s470_s15 }
 0x125   : > { %p3100_p8 = pneg %p3643_p4 }
 0x128   : > { %s3641_s27 = scalar_lea.hbm %s4473_s19, %s2344_s0  ;;  %s3103_s3 = scalar_lea.hbm %s4473_s19, 512 }
 0x129   : > { %s3098_s17 = scalar_lea.hbm %s3641_s27, 256  ;;  %p3104_p11 = scmp.lt.u32.totalorder %s3641_s27, %s4473_s19 }
 0x12a   : > { %p3099_p10 = scmp.ne.s32.totalorder %s3641_s27, %s3098_s17  ;;  %p3105_p12 = scmp.lt.u32.totalorder %s3103_s3, %s3098_s17 }
 0x12b   : > { %p3107_p0 = scmp.lt.u32.totalorder %s3098_s17, %s3641_s27 }
 0x12c   : > { %p3101_p1 = pnand %p3100_p8, %p3099_p10  ;;  %p3106_p13 = por %p3105_p12, %p3104_p11 }
 0x12e   : > { %p3102_p3 = pneg %p3101_p1  ;;  %p3108_p5 = por %p3107_p0, %p3106_p13 }
 0x130   : > { %p3109_p7 = pnand %p3108_p5, %p3102_p3 }
 0x132   : > { %3112 = shalt.err (!%p3109_p7)
}
 0x133   : > { %s3113_s15 = scalar_lea.vmem %s3647_s25, 256  ;;  %s3237_s29 = smov [#allocation6]  }
 0x134   : > { %p3114_p10 = scmp.ne.s32.totalorder %s3647_s25, %s3113_s15  ;;  %s3118_s0 = sshll.u32 %s3237_s29, 4  ;;  %s3119_s0 = int_to_ptr.vmem [resolvable:$false] %s3118_s0 }
 0x135   : > { %s3120_s30 = scalar_lea.vmem %s3119_s0, 512  ;;  %p3121_p6 = scmp.lt.s32.totalorder %s3647_s25, %s3119_s0 }
 0x136   : > { %p3116_p1 = pnand %p3114_p10, %p3100_p8  ;;  %p3122_p11 = scmp.lt.s32.totalorder %s3120_s30, %s3113_s15 }
 0x138   : > { %p3117_p9 = pneg %p3116_p1  ;;  %p3123_p12 = por %p3122_p11, %p3121_p6 }
 0x13a   : > { %p3124_p13 = pnand %p3123_p12, %p3117_p9 }
 0x13c   : > { %3127 = shalt.err (!%p3124_p13)
}
 0x13d   : > { %s4475_s17 = smov 128   ;;  %s4476_s3 = sld [smem:[#allocation36_spill]] }
 0x13e   : > { %2526 = dma.hbm_to_vmem [thread:$0]  (!%p3643_p4), %s3641_s27, 256, %s3647_s25, %s3649_s1, %s4475_s17, %s4475_s17, %s3228_s12  }
 0x143   : > { %p4477_p8 = scmp.ne.s32.totalorder %s4476_s3, 0 }
 0x145   : > { %493 = sbr.rel (%p4477_p8) target bundleno = 1882 (0x75a), region = 68 }
 0x14c   : > { %s3683_s20 = sand.u32 1, %s3210_s22  }
 0x14d   : > { %s2302_s15 = sshll.u32 %s3683_s20, 4  ;;  %s496_s29 = scalar_lea.sflag [#allocation7], %s3683_s20 }
 0x14e   : > { %s499_s28 = scalar_lea.vmem [#allocation6], %s2302_s15 }
 0x14f   : > { %3173 = dma.done.wait (%p3623_p2), %s496_s29, 256  }
 0x150   : > { %3175 = vsyncadd (%p3623_p2), %s496_s29, 4294967040  ;;  %s4478_s12 = sld [smem:[#allocation35_spill]] }
 0x156   : > { %p4479_p6 = scmp.eq.s32.totalorder %s4478_s12, 0 }
 0x158   : > { %3177 = dma.done.wait (%p4479_p6), [#allocation10], 512   ;;  %p4480_p9 = pmov %p4479_p6 }
 0x159   : > { %p4481_p4 = pmov %p4479_p6 }
 0x15a   : > { %3179 = vsyncadd (%p4480_p9), [#allocation10], 4294966784 }
 0x15b   : > { %3181 = dma.done.wait (%p4481_p4), [#allocation13], 80   ;;  %p4482_p3 = pmov %p4481_p4 }
 0x15d   : > { %3183 = vsyncadd (%p4482_p3), [#allocation13], 4294967216  ;;  %p4483_p0 = pmov %p4482_p3 }
 0x15f   : > { %3185 = dma.done.wait (%p4483_p0), [#allocation16], 1040   ;;  %p4484_p5 = pmov %p4483_p0 }
 0x160   : > { %p4485_p2 = pmov %p4483_p0 }
 0x161   : > { %3187 = vsyncadd (%p4484_p5), [#allocation16], 4294966256 }
 0x162   : > { %3189 = dma.done.wait (%p4485_p2), [#allocation19], 272   ;;  %p4486_p7 = pmov %p4483_p0 }
 0x163   : > { %p4487_p10 = pmov %p4483_p0 }
 0x164   : > { %3191 = vsyncadd (%p4486_p7), [#allocation19], 4294967024 }
 0x165   : > { %3193 = dma.done.wait (%p4487_p10), [#allocation22], 768   ;;  %p4488_p1 = pmov %p4483_p0 }
 0x166   : > { %p4489_p11 = pmov %p4483_p0 }
 0x167   : > { %3195 = vsyncadd (%p4488_p1), [#allocation22], 4294966528 }
 0x168   : > { %3197 = dma.done.wait (%p4489_p11), [#allocation25], 16   ;;  %p4490_p12 = pmov %p4483_p0 }
 0x169   : > { %v4446_v0 = vmov 0.0   ;;  %vm3239_vm0 = vmmov 0   ;;  %v2691_v1 = vld [vmem:[#allocation9] sm:$0xff]   ;;  %v2692_v2 = vld [vmem:[#allocation9 + $0x8] sm:$0xff]   ;;  %vm604_vm1 = vcmask 261120   ;;  %vm706_vm2 = vcmask 523264  }
 0x16a   : > { %3199 = vsyncadd (%p4490_p12), [#allocation25], 4294967280  ;;  %2370 = vmatprep.subr.bf16.mxu0 %v4446_v0  ;;  %2374 = vmatprep.mubr.msk.bf16.mxu0 %vm3239_vm0, %v4446_v0  ;;  %v585_v3 = vld [vmem:[%s499_s28] sm:$0xff]  ;;  %v586_v4 = vld [vmem:[%s499_s28 + $0x8] sm:$0xff]  ;;  %892 = vst.msk [vmem:[#allocation5] sm:$0xff] %vm706_vm2, %v4446_v0  ;;  %vm712_vm3 = vcmask 1042432  }
 0x16b   : > { %2378 = vmatprep.subr.bf16.mxu1 %v4446_v0  ;;  %2382 = vmatprep.mubr.msk.bf16.mxu1 %vm3239_vm0, %v4446_v0  ;;  %v3724_v5 = vpack.c.bf16 %v586_v4, %v585_v3  ;;  %v800_v6 = vld [vmem:[#allocation15] sm:$0xff]  ;;  %v801_v7 = vld [vmem:[#allocation15 + $0x8] sm:$0xff]  ;;  %893 = vst.msk [vmem:[#allocation5 + $0x8] sm:$0xff] %vm706_vm2, %v4446_v0  ;;  %v802_v9 = vld [vmem:[#allocation15 + $0x10] sm:$0xff]  ;;  %vm736_vm4 = vcmask 1041408   ;;  %vm755_vm5 = vcmask 1040384  }
 0x16c   : > { %2371 = vmatpush3.bf16.msra.mxu0 %v2691_v1  ;;  %v2425_v8 = vpack.c.bf16 %v801_v7, %v800_v6  ;;  %v803_v10 = vld [vmem:[#allocation15 + $0x18] sm:$0xff]  ;;  %v804_v12 = vld [vmem:[#allocation15 + $0x20] sm:$0xff]  ;;  %v805_v13 = vld [vmem:[#allocation15 + $0x28] sm:$0xff]  ;;  %vm889_vm6 = vcmask 785408   ;;  %s3240_s26 = smov 64   ;;  %s3241_s27 = smov 48  }
 0x16d   : > { %2372 = vmatprep.subr.bf16.mxu0 %v4446_v0  ;;  %v2429_v11 = vpack.c.bf16 %v803_v10, %v802_v9  ;;  %v2433_v14 = vpack.c.bf16 %v805_v13, %v804_v12  ;;  %v806_v15 = vld [vmem:[#allocation15 + $0x30] sm:$0xff]  ;;  %v807_v16 = vld [vmem:[#allocation15 + $0x38] sm:$0xff]  ;;  %v3242_v9 = vmov 0   ;;  %vm1913_vm9 = vcmask 1043456   ;;  %s583_s25 = scalar_lea.vmem [#allocation26], %s2302_s15  ;;  %s2345_s0 = sshll.u32 %s4478_s12, 8 }
 0x16e   : > { %v2437_v17 = vpack.c.bf16 %v807_v16, %v806_v15  ;;  %v2321_v20 = vld [vmem:[#allocation12] ss:$0 sm:$0xff]  ;;  %v2322_v24 = vld [vmem:[#allocation14] ss:$0 sm:$0xff]  ;;  %v2323_v28 = vld [vmem:[#allocation12 + $0x1] ss:$0 sm:$0xff]  ;;  %2627 = vset.pattern.permute.xlu0 %v3242_v9 }
 0x16f   : > { %v2324_v34 = vld [vmem:[#allocation12 + $0x2] ss:$0 sm:$0xff]  ;;  %v2325_v41 = vld [vmem:[#allocation12 + $0x3] ss:$0 sm:$0xff]  ;;  %v2694_v15 = vld [vmem:[#allocation11 + $0x8] sm:$0xff]   ;;  %v3243_v16 = vmov 10  }
 0x170   : > { %2373 = vmatpush3.bf16.msra.mxu0 %v2692_v2  ;;  %vm1915_vm10 = vcmask 1044480   ;;  %vm1917_vm11 = vcmask 1045504   ;;  %vm1919_vm12 = vcmask 1046528   ;;  %s2106_s1 = sshll.u32 %s583_s25, 4  ;;  %vm2089_vm13 = vcmask 64512   ;;  %s4510_s3 = sld [smem:[#allocation46_spill]]  ;;  %s4370_s1 = int_to_ptr.vmem [resolvable:$true] %s2106_s1 }
 0x171   : > { %2426 = vmatprep.subr.bf16.mxu0 %v2425_v8  ;;  %s2093_s15 = scalar_lea.sflag [#allocation8], %s3683_s20  ;;  %s3128_s28 = scalar_lea.vmem %s4370_s1, 256 }
 0x172   : > { %p3129_p13 = scmp.ne.s32.totalorder %s4370_s1, %s3128_s28  ;;  %p4511_p8 = scmp.ne.s32.totalorder %s4471_s16, 0 }
 0x173   : > { %2375 = vmatmul.mubr.msk.bf16.vlgmr.msra.gmra.mrb[0].mxu0 %vm604_vm1, %v3724_v5  ;;  %s3259_s12 = smov [#allocation26]  }
 0x174   : > { %2428 = vmatpush3.bf16.msra.mxu0 %v2425_v8  ;;  %p3130_p6 = pnand %p3129_p13, %p4511_p8 }
 0x175   : > { %2430 = vmatprep.subr.bf16.mxu0 %v2429_v11 }
 0x176   : > { %s4375_s29 = scalar_lea.hbm %s4510_s3, %s2345_s0  ;;  %p3131_p9 = pneg %p3130_p6 }
 0x178   : > { %2432 = vmatpush3.bf16.msra.mxu0 %v2429_v11 }
 0x179   : > { %2434 = vmatprep.subr.bf16.mxu0 %v2433_v14 }
 0x17c   : > { %2436 = vmatpush3.bf16.msra.mxu0 %v2433_v14  ;;  %v2693_v14 = vld [vmem:[#allocation11] sm:$0xff]  }
 0x17d   : > { %2438 = vmatprep.subr.bf16.mxu0 %v2437_v17  ;;  %2379 = vmatpush3.bf16.msra.mxu1 %v2693_v14 }
 0x17e   : > { %2380 = vmatprep.subr.bf16.mxu1 %v4446_v0 }
 0x180   : > { %2440 = vmatpush3.bf16.msra.mxu0 %v2437_v17 }
 0x181   : > { %2417 = vmatprep.subr.bf16.mxu0 %v4446_v0  ;;  %2381 = vmatpush3.bf16.msra.mxu1 %v2694_v15 }
 0x182   : > { %2405 = vmatprep.subr.bf16.mxu1 %v4446_v0 }
 0x184   : > { %2383 = vmatmul.mubr.msk.bf16.vlgmr.msra.gmra.mrb[0].mxu1 %vm604_vm1, %v3724_v5 }
 0x185   : > { %2413 = vmatprep.mubr.msk.bf16.mxu1 %vm3239_vm0, %v4446_v0 }
 0x246   : > { %v642_v18 = vpop.f32.mrb[0].mxu0 }
 0x247   : > { %v713_v19 = vrot.slane %v642_v18, 5  ;;  %v737_v21 = vrot.slane %v642_v18, 6  ;;  %v756_v22 = vrot.slane %v642_v18, 7  ;;  %v2376_v23 = vpop.f32.mrb[1].mxu0  ;;  %v782_v48 = vmul.f32 %v2325_v41, %v642_v18 }
 0x248   : > { %v645_v25 = vpop.f32.mrb[2].mxu0  ;;  %v3248_v23 = vmov 8  }
 0x249   : > { %v718_v26 = vsel %vm712_vm3, 0.0, %v713_v19  ;;  %v742_v27 = vsel %vm736_vm4, 0.0, %v737_v21  ;;  %v714_v29 = vrot.slane %v645_v25, 5  ;;  %v2377_v30 = vpop.f32.mrb[3].mxu0  ;;  %v738_v32 = vrot.slane %v645_v25, 6 }
 0x24a   : > { %v726_v31 = vmul.f32 %v2321_v20, %v718_v26  ;;  %v761_v33 = vsel %vm755_vm5, 0.0, %v756_v22  ;;  %v757_v36 = vrot.slane %v645_v25, 7  ;;  %v751_v38 = vmul.f32 %v2323_v28, %v742_v27  ;;  %v2328_v30 = vld [vmem:[#allocation17] ss:$0 sm:$0xff] }
 0x24b   : > { %v715_v35 = vsel %vm712_vm3, %v713_v19, %v714_v29  ;;  %v739_v40 = vsel %vm736_vm4, %v737_v21, %v738_v32  ;;  %v770_v44 = vmul.f32 %v2324_v34, %v761_v33  ;;  %v783_v53 = vmul.f32 %v2325_v41, %v645_v25 }
 0x24c   : > { %v734_v37 = vadd.f32 %v2322_v24, %v726_v31  ;;  %v727_v39 = vmul.f32 %v2321_v20, %v715_v35  ;;  %v758_v42 = vsel %vm755_vm5, %v756_v22, %v757_v36  ;;  %v752_v46 = vmul.f32 %v2323_v28, %v739_v40 }
 0x24d   : > { %v771_v50 = vmul.f32 %v2324_v34, %v758_v42  ;;  %v3244_v19 = vmov 14   ;;  %v3245_v20 = vmov 1   ;;  %v3246_v21 = vmov 2  }
 0x24e   : > { %v753_v43 = vadd.f32 %v751_v38, %v734_v37  ;;  %v735_v45 = vadd.f32 %v2322_v24, %v727_v39  ;;  %v3247_v22 = vmov 3   ;;  %v3249_v24 = vmov 4  }
 0x24f   : > { %v3250_v25 = vmov 9   ;;  %v3251_v26 = vmov 5   ;;  %v3252_v27 = vmov 6   ;;  %v3253_v28 = vmov 7  }
 0x250   : > { %v772_v47 = vadd.f32 %v770_v44, %v753_v43  ;;  %v754_v49 = vadd.f32 %v752_v46, %v735_v45  ;;  %v3254_v29 = vmov 15   ;;  %v3255_v34 = vmov 11  }
 0x251   : > { %v3256_v35 = vmov 13   ;;  %v3257_v37 = vmov 12   ;;  %v3258_v45 = vmov 1966171168  }
 0x252   : > { %v784_v51 = vadd.f32 %v782_v48, %v772_v47  ;;  %v773_v52 = vadd.f32 %v771_v50, %v754_v49  ;;  %v1036_v46 = vunpack.c.l.s4 %v3258_v45  ;;  %v1038_v47 = vlaneseq  ;;  %v1310_v45 = vld [vmem:[#allocation5] sm:$0xff] }
 0x254   : > { %v786_v54 = vsub.f32 0.0, %v784_v51  ;;  %v785_v55 = vadd.f32 %v783_v53, %v773_v52  ;;  %v1037_v52 = vunpack.c.0.s8 %v1036_v46  ;;  %v3847_v53 = vshrl.u32 %v1038_v47, 7 }
 0x256   : > { %v788_v56 = vmul.f32 1.442695, %v786_v54  ;;  %v787_v57 = vsub.f32 0.0, %v785_v55 }
 0x258   : > { %2701 = vpow2.f32 %v788_v56  ;;  %v790_v58 = vmul.f32 1.442695, %v787_v57  ;;  %v3855_v57 = vsub.s32 %v1037_v52, %v3847_v53 }
 0x25a   : > { %2703 = vpow2.f32 %v790_v58 }
 0x262   : > { %v2702_v59 = vpop.eup %2701 }
 0x263   : > { %v792_v60 = vadd.f32 1.0, %v2702_v59 }
 0x264   : > { %v2704_v61 = vpop.eup %2703 }
 0x265   : > { %2705 = vrcp.f32 %v792_v60  ;;  %v793_v62 = vadd.f32 1.0, %v2704_v61 }
 0x267   : > { %2707 = vrcp.f32 %v793_v62  ;;  %v3868_v62 = vsub.s32 0, %v3847_v53 }
 0x26f   : > { %v2706_v63 = vpop.eup %2705 }
 0x270   : > { %v796_v1 = vmul.f32 %v2706_v63, %v784_v51 }
 0x271   : > { %v2708_v2 = vpop.eup %2707 }
 0x272   : > { %v797_v3 = vmul.f32 %v2708_v2, %v785_v55  ;;  %798 = vst.msk [vmem:[#allocation2] sm:$0xff] %vm706_vm2, %v796_v1  ;;  %2402 = vmatprep.mubr.msk.f32.mxu0 %vm706_vm2, %v796_v1  ;;  %v3875_v2 = vld [vmem:[#allocation18] sm:$0xff] }
 0x274   : > { %799 = vst.msk [vmem:[#allocation2 + $0x8] sm:$0xff] %vm706_vm2, %v797_v3  ;;  %2403 = vmatmul.mubr.msk.f32.vlgmr.msra.gmra.mrb[4].mxu0 %vm706_vm2, %v797_v3 }
 0x275   : > { %2421 = vmatprep.mubr.msk.bf16.mxu0 %vm3239_vm0, %v4446_v0 }
 0x347   : > { %v2404_v4 = vpop.f32.mrb[4].mxu0 }
 0x348   : > { %891 = vst.msk [vmem:[#allocation4 + $0x8] sm:$0xff] %vm889_vm6, %v2404_v4  ;;  %v880_v6 = vpop.f32.mrb[5].mxu0 }
 0x349   : > { %890 = vst.msk [vmem:[#allocation4] sm:$0xff] %vm889_vm6, %v880_v6 }
 0x34f   : > { %v3745_v7 = vld [vmem:[#allocation4 + $0x8] sm:$0xff] }
 0x350   : > { %958 = vrot.lane.b32.xlu0 %v3745_v7, %s3240_s26  ;;  %v3748_v8 = vld [vmem:[#allocation4] sm:$0xff]  ;;  %v3836_v42 = vadd.f32 %v2328_v30, %v3745_v7 }
 0x351   : > { %994 = vrot.lane.b32.xlu1 %v3748_v8, %s3241_s27  ;;  %v3798_v31 = vadd.f32 %v2328_v30, %v3748_v8  ;;  %v898_v30 = vld [vmem:[#allocation2] sm:$0xff] }
 0x352   : > { %v927_v48 = vand.u32 2147483647, %v3836_v42 }
 0x353   : > { %v926_v32 = vand.u32 2147483647, %v3798_v31  ;;  %v924_v56 = vmax.f32 %v3798_v31, 0.0 }
 0x354   : > { %996 = vrot.lane.b32.xlu0 %v3745_v7, %s3241_s27  ;;  %v929_v54 = vsub.f32 0.0, %v927_v48 }
 0x355   : > { %v928_v33 = vsub.f32 0.0, %v926_v32 }
 0x356   : > { %v932_v58 = vmul.f32 1.442695, %v929_v54 }
 0x357   : > { %v930_v36 = vmul.f32 1.442695, %v928_v33 }
 0x358   : > { %956 = vrot.lane.b32.xlu0 %v3748_v8, %s3240_s26  ;;  %s3132_s26 = sshll.u32 %s3259_s12, 4  ;;  %s3133_s26 = int_to_ptr.vmem [resolvable:$false] %s3132_s26 }
 0x359   : > { %2709 = vpow2.f32 %v930_v36  ;;  %s3134_s27 = scalar_lea.vmem %s3133_s26, 512  ;;  %p3135_p4 = scmp.lt.s32.totalorder %s4370_s1, %s3133_s26 }
 0x35a   : > { %p3136_p3 = scmp.lt.s32.totalorder %s3134_s27, %s3128_s28 }
 0x35c   : > { %p3137_p0 = por %p3136_p3, %p3135_p4 }
 0x35e   : > { %p3138_p5 = pnand %p3137_p0, %p3131_p9 }
 0x363   : > { %v2710_v38 = vpop.eup %2709 }
 0x364   : > { %v934_v39 = vadd.f32 1.0, %v2710_v38  ;;  %v937_v41 = vmul.f32 -0.5, %v2710_v38  ;;  %v940_v49 = vand.u32 2147483647, %v2710_v38 }
 0x366   : > { %2711 = vlog2.f32 %v934_v39  ;;  %v938_v44 = vadd.f32 1.0, %v937_v41  ;;  %vm941_vm7 = vcmp.lt.f32.partialorder %v940_v49, 0.0004427343  ;;  %v1365_v49 = vsub.s32 1, %v3847_v53 }
 0x367   : > { %2713 = vpow2.f32 %v932_v58 }
 0x368   : > { %v939_v51 = vmul.f32 %v2710_v38, %v938_v44 }
 0x370   : > { %v2712_v43 = vpop.eup %2711 }
 0x371   : > { %v936_v50 = vmul.f32 0.6931472, %v2712_v43  ;;  %v2714_v3 = vpop.eup %2713 }
 0x372   : > { %v943_v7 = vadd.f32 1.0, %v2714_v3  ;;  %v949_v38 = vand.u32 2147483647, %v2714_v3 }
 0x373   : > { %v942_v55 = vsel %vm941_vm7, %v939_v51, %v936_v50 }
 0x374   : > { %v952_v59 = vadd.f32 %v942_v55, %v924_v56  ;;  %2715 = vlog2.f32 %v943_v7  ;;  %vm3928_vm8 = vcmp.lt.f32.partialorder %v949_v38, 0.0004427343 }
 0x376   : > { %v1041_v60 = vrot.slane %v952_v59, %v3855_v57  ;;  %v3909_v33 = vmul.f32 %v952_v59, %v898_v30 }
 0x378   : > { %v1057_v61 = vrot.slane %v1041_v60, %v3855_v57  ;;  %v1049_v63 = vcombine.high %v1041_v60, %v1041_v60  ;;  %v3923_v46 = vrot.slane %v3909_v33, %v3868_v62  ;;  %v925_v60 = vmax.f32 %v3836_v42, 0.0 }
 0x379   : > { %v1402_v42 = vsub.s32 2, %v3847_v53 }
 0x37a   : > { %v3871_v1 = vrot.slane %v1057_v61, %v3868_v62  ;;  %v1071_v4 = vrot.slane %v1049_v63, %v3855_v57 }
 0x37c   : > { %v1212_v6 = vmul.f32 %v3871_v1, %v3875_v2  ;;  %v3885_v8 = vrot.slane %v1071_v4, %v3868_v62  ;;  %v1081_v14 = vcombine.high %v1071_v4, %v1071_v4 }
 0x37e   : > { %v2716_v32 = vpop.eup %2715 }
 0x37f   : > { %v945_v43 = vmul.f32 0.6931472, %v2716_v32 }
 0x3c2   : > { %v959_v10 = vpop.permute.xlu0 %958 }
 0x3c3   : > { %v995_v13 = vpop.permute.xlu1 %994 }
 0x3c6   : > { %v997_v11 = vpop.permute.xlu0 %996 }
 0x3ca   : > { %v957_v12 = vpop.permute.xlu0 %956 }
 0x3cb   : > { %962 = vxpose.xlu1.b32.start [1/2] (short) (narrow) %v957_v12, 16  ;;  %v1214_v12 = vmul.f32 %v3885_v8, %v3875_v2 }
 0x3cf   : > { %963 = vxpose.xlu1.b32.end [2/2] (short) (narrow) %v959_v10, 16  ;;  %v1244_v10 = vmul.f32 1.442695, %v1212_v6 }
 0x3d1   : > { %2717 = vpow2.f32 %v1244_v10 }
 0x3d3   : > { %1000 = vxpose.xlu1.b32.start [1/2] (short) (narrow) %v995_v13, 16 }
 0x3d7   : > { %1001 = vxpose.xlu1.b32.end [2/2] (short) (narrow) %v997_v11, 16  ;;  %v1034_v11 = vcombine.high %v952_v59, %v952_v59  ;;  %v699_v59 = vpop.f32.mrb[0].mxu1 }
 0x3d8   : > { %707 = vst.msk [vmem:[#allocation3] sm:$0xff] %vm706_vm2, %v699_v59 }
 0x3d9   : > { %v1048_v15 = vrot.slane %v1034_v11, %v3855_v57 }
 0x3db   : > { %v1050_v31 = vcombine.high %v1048_v15, %v1048_v15  ;;  %v2718_v41 = vpop.eup %2717 }
 0x3dc   : > { %v1312_v52 = vmul.f32 %v2718_v41, %v1310_v45 }
 0x3dd   : > { %v1078_v44 = vrot.slane %v1050_v31, %v3855_v57 }
 0x3df   : > { %v3940_v58 = vrot.slane %v1078_v44, %v3868_v62 }
 0x3f5   : > { %2637 = vset.pattern.permute.xlu1 %v3243_v16 }
 0x44b   : > { %v3761_v17 = vpop.trf.xlu1 }
 0x44c   : > { %1689 = vperm.xlu1 %2637, %v3761_v17   ;;  %1316 = vperm.xlu0 %2627, %v3761_v17  }
 0x44f   : > { %v3765_v18 = vpop.trf.xlu1 }
 0x450   : > { %2641 = vset.pattern.permute.xlu1 %v3244_v19  ;;  %2628 = vset.pattern.permute.xlu0 %v3245_v20 }
 0x451   : > { %1837 = vperm.xlu1 %2641, %v3761_v17   ;;  %1356 = vperm.xlu0 %2628, %v3761_v17  }
 0x453   : > { %v3771_v5 = vpop.trf.xlu1 }
 0x455   : > { %2642 = vset.pattern.permute.xlu1 %v3242_v9  ;;  %2629 = vset.pattern.permute.xlu0 %v3246_v21 }
 0x456   : > { %1393 = vperm.xlu0 %2629, %v3761_v17   ;;  %1334 = vperm.xlu1 %2642, %v3771_v5  }
 0x457   : > { %v3833_v40 = vpop.trf.xlu1 }
 0x45a   : > { %2630 = vset.pattern.permute.xlu0 %v3247_v22  ;;  %2644 = vset.pattern.permute.xlu1 %v3248_v23 }
 0x45b   : > { %1430 = vperm.xlu0 %2630, %v3761_v17   ;;  %1631 = vperm.xlu1 %2644, %v3771_v5  }
 0x45f   : > { %2631 = vset.pattern.permute.xlu0 %v3249_v24  ;;  %2645 = vset.pattern.permute.xlu1 %v3250_v25 }
 0x460   : > { %1467 = vperm.xlu0 %2631, %v3761_v17   ;;  %1668 = vperm.xlu1 %2645, %v3771_v5  }
 0x464   : > { %2632 = vset.pattern.permute.xlu0 %v3251_v26  ;;  %2647 = vset.pattern.permute.xlu1 %v3243_v16 }
 0x465   : > { %1504 = vperm.xlu0 %2632, %v3761_v17   ;;  %1705 = vperm.xlu1 %2647, %v3771_v5  }
 0x469   : > { %2633 = vset.pattern.permute.xlu0 %v3252_v27  ;;  %2648 = vset.pattern.permute.xlu1 %v3247_v22 }
 0x46a   : > { %1541 = vperm.xlu0 %2633, %v3761_v17   ;;  %1446 = vperm.xlu1 %2648, %v3771_v5  }
 0x46e   : > { %2634 = vset.pattern.permute.xlu0 %v3253_v28  ;;  %2650 = vset.pattern.permute.xlu1 %v3254_v29 }
 0x46f   : > { %1578 = vperm.xlu0 %2634, %v3761_v17   ;;  %1874 = vperm.xlu1 %2650, %v3761_v17  }
 0x473   : > { %2635 = vset.pattern.permute.xlu0 %v3248_v23  ;;  %2651 = vset.pattern.permute.xlu1 %v3249_v24 }
 0x474   : > { %1615 = vperm.xlu0 %2635, %v3761_v17   ;;  %1483 = vperm.xlu1 %2651, %v3771_v5  }
 0x478   : > { %2636 = vset.pattern.permute.xlu0 %v3250_v25  ;;  %2653 = vset.pattern.permute.xlu1 %v3251_v26 }
 0x479   : > { %1652 = vperm.xlu0 %2636, %v3761_v17   ;;  %1520 = vperm.xlu1 %2653, %v3771_v5  }
 0x47d   : > { %2638 = vset.pattern.permute.xlu0 %v3255_v34  ;;  %2654 = vset.pattern.permute.xlu1 %v3256_v35 }
 0x47e   : > { %1726 = vperm.xlu0 %2638, %v3761_v17   ;;  %1816 = vperm.xlu1 %2654, %v3771_v5  }
 0x482   : > { %2639 = vset.pattern.permute.xlu0 %v3257_v37  ;;  %2656 = vset.pattern.permute.xlu1 %v3244_v19 }
 0x483   : > { %1763 = vperm.xlu0 %2639, %v3761_v17   ;;  %1853 = vperm.xlu1 %2656, %v3771_v5  }
 0x487   : > { %2640 = vset.pattern.permute.xlu0 %v3256_v35  ;;  %2657 = vset.pattern.permute.xlu1 %v3253_v28 }
 0x488   : > { %1800 = vperm.xlu0 %2640, %v3761_v17   ;;  %1594 = vperm.xlu1 %2657, %v3771_v5   ;;  %v1248_v17 = vmul.f32 1.442695, %v1214_v12  ;;  %v1222_v12 = vmul.f32 %v3940_v58, %v3875_v2 }
 0x48a   : > { %2719 = vpow2.f32 %v1248_v17  ;;  %v1082_v17 = vcombine.high %v1078_v44, %v1078_v44 }
 0x48c   : > { %2643 = vset.pattern.permute.xlu0 %v3245_v20  ;;  %2661 = vset.pattern.permute.xlu1 %v3247_v22 }
 0x48d   : > { %1372 = vperm.xlu0 %2643, %v3771_v5   ;;  %1434 = vperm.xlu1 %2661, %v3765_v18  }
 0x491   : > { %2646 = vset.pattern.permute.xlu0 %v3246_v21  ;;  %2670 = vset.pattern.permute.xlu1 %v3257_v37 }
 0x492   : > { %1409 = vperm.xlu0 %2646, %v3771_v5   ;;  %1767 = vperm.xlu1 %2670, %v3765_v18  }
 0x494   : > { %v2720_v4 = vpop.eup %2719 }
 0x496   : > { %2649 = vset.pattern.permute.xlu0 %v3255_v34  ;;  %2671 = vset.pattern.permute.xlu1 %v3256_v35 }
 0x497   : > { %1742 = vperm.xlu0 %2649, %v3771_v5   ;;  %1804 = vperm.xlu1 %2671, %v3765_v18  }
 0x49b   : > { %2652 = vset.pattern.permute.xlu0 %v3257_v37  ;;  %2673 = vset.pattern.permute.xlu1 %v3242_v9 }
 0x49c   : > { %1779 = vperm.xlu0 %2652, %v3771_v5   ;;  %1339 = vperm.xlu1 %2673, %v3833_v40  }
 0x4a0   : > { %2655 = vset.pattern.permute.xlu0 %v3252_v27  ;;  %2674 = vset.pattern.permute.xlu1 %v3245_v20 }
 0x4a1   : > { %1557 = vperm.xlu0 %2655, %v3771_v5   ;;  %1376 = vperm.xlu1 %2674, %v3833_v40  }
 0x4a5   : > { %2658 = vset.pattern.permute.xlu0 %v3242_v9  ;;  %2676 = vset.pattern.permute.xlu1 %v3250_v25  ;;  %v1079_v9 = vcombine.high %v1057_v61, %v1057_v61 }
 0x4a6   : > { %1321 = vperm.xlu0 %2658, %v3765_v18   ;;  %1672 = vperm.xlu1 %2676, %v3833_v40  }
 0x4a7   : > { %v3894_v13 = vrot.slane %v1079_v9, %v3868_v62 }
 0x4aa   : > { %2659 = vset.pattern.permute.xlu0 %v3245_v20  ;;  %2677 = vset.pattern.permute.xlu1 %v3246_v21  ;;  %v1216_v20 = vmul.f32 %v3894_v13, %v3875_v2 }
 0x4ab   : > { %1360 = vperm.xlu0 %2659, %v3765_v18   ;;  %1413 = vperm.xlu1 %2677, %v3833_v40  }
 0x4ac   : > { %v1252_v36 = vmul.f32 1.442695, %v1216_v20 }
 0x4ae   : > { %2721 = vpow2.f32 %v1252_v36  ;;  %v1439_v36 = vsub.s32 3, %v3847_v53 }
 0x4af   : > { %2660 = vset.pattern.permute.xlu0 %v3246_v21  ;;  %2679 = vset.pattern.permute.xlu1 %v3247_v22  ;;  %v946_v21 = vmul.f32 -0.5, %v2714_v3  ;;  %v3904_v22 = vrot.slane %v1081_v14, %v3868_v62 }
 0x4b0   : > { %1397 = vperm.xlu0 %2660, %v3765_v18   ;;  %1450 = vperm.xlu1 %2679, %v3833_v40   ;;  %v3993_v51 = vrot.slane %v3909_v33, %v1439_v36 }
 0x4b4   : > { %2662 = vset.pattern.permute.xlu0 %v3249_v24  ;;  %2680 = vset.pattern.permute.xlu1 %v3255_v34 }
 0x4b5   : > { %1471 = vperm.xlu0 %2662, %v3765_v18   ;;  %1746 = vperm.xlu1 %2680, %v3833_v40  }
 0x4b8   : > { %v2722_v20 = vpop.eup %2721 }
 0x4b9   : > { %2663 = vset.pattern.permute.xlu0 %v3251_v26  ;;  %2682 = vset.pattern.permute.xlu1 %v3249_v24  ;;  %v1064_v24 = vrot.slane %v1048_v15, %v3855_v57 }
 0x4ba   : > { %1508 = vperm.xlu0 %2663, %v3765_v18   ;;  %1487 = vperm.xlu1 %2682, %v3833_v40  }
 0x4bb   : > { %v3916_v39 = vrot.slane %v1064_v24, %v3868_v62  ;;  %v1080_v61 = vcombine.high %v1064_v24, %v1064_v24  ;;  %v3973_v24 = vrot.slane %v3909_v33, %v1402_v42 }
 0x4bd   : > { %v1220_v55 = vmul.f32 %v3916_v39, %v3875_v2  ;;  %v3962_v14 = vrot.slane %v1080_v61, %v3868_v62 }
 0x4be   : > { %2664 = vset.pattern.permute.xlu0 %v3252_v27  ;;  %2683 = vset.pattern.permute.xlu1 %v3257_v37  ;;  %v947_v37 = vadd.f32 1.0, %v946_v21 }
 0x4bf   : > { %1545 = vperm.xlu0 %2664, %v3765_v18   ;;  %1783 = vperm.xlu1 %2683, %v3833_v40   ;;  %v1260_v10 = vmul.f32 1.442695, %v1220_v55  ;;  %v1224_v41 = vmul.f32 %v3962_v14, %v3875_v2 }
 0x4c0   : > { %v948_v47 = vmul.f32 %v2714_v3, %v947_v37  ;;  %v2384_v3 = vpop.f32.mrb[1].mxu1  ;;  %v1264_v37 = vmul.f32 1.442695, %v1222_v12 }
 0x4c1   : > { %v1268_v59 = vmul.f32 1.442695, %v1224_v41 }
 0x4c2   : > { %v951_v56 = vsel %vm3928_vm8, %v948_v47, %v945_v43  ;;  %v3984_v43 = vrot.slane %v1082_v17, %v3868_v62  ;;  %v702_v47 = vpop.f32.mrb[2].mxu1  ;;  %v4450_v17 = vsub.s32 5, %v3847_v53 }
 0x4c3   : > { %2665 = vset.pattern.permute.xlu0 %v3253_v28  ;;  %2685 = vset.pattern.permute.xlu1 %v3256_v35  ;;  %v1218_v35 = vmul.f32 %v3904_v22, %v3875_v2  ;;  %708 = vst.msk [vmem:[#allocation3 + $0x8] sm:$0xff] %vm706_vm2, %v702_v47 }
 0x4c4   : > { %1582 = vperm.xlu0 %2665, %v3765_v18   ;;  %1820 = vperm.xlu1 %2685, %v3833_v40   ;;  %v1226_v61 = vmul.f32 %v3984_v43, %v3875_v2  ;;  %v4030_v47 = vrot.slane %v3909_v33, %v4450_v17 }
 0x4c5   : > { %v1256_v50 = vmul.f32 1.442695, %v1218_v35 }
 0x4c7   : > { %2723 = vpow2.f32 %v1256_v50 }
 0x4c8   : > { %2666 = vset.pattern.permute.xlu0 %v3248_v23  ;;  %2686 = vset.pattern.permute.xlu1 %v3252_v27  ;;  %2725 = vpow2.f32 %v1260_v10 }
 0x4c9   : > { %1619 = vperm.xlu0 %2666, %v3765_v18   ;;  %1561 = vperm.xlu1 %2686, %v3833_v40   ;;  %2727 = vpow2.f32 %v1264_v37 }
 0x4ca   : > { %2729 = vpow2.f32 %v1268_v59 }
 0x4cb   : > { %v1317_v48 = vpop.permute.xlu0 %1316  ;;  %v3925_v27 = vpop.permute.xlu1 %1689 }
 0x4cc   : > { %v1328_v54 = vmul.f32 %v3923_v46, %v1317_v48 }
 0x4cd   : > { %2667 = vset.pattern.permute.xlu0 %v3250_v25  ;;  %2688 = vset.pattern.permute.xlu1 %v3253_v28  ;;  %v3949_v25 = vrot.slane %v3909_v33, %v1365_v49  ;;  %v3951_v28 = vadd.f32 %v951_v56, %v925_v60  ;;  %v4451_v56 = vsub.s32 4, %v3847_v53 }
 0x4ce   : > { %v1330_v63 = vadd.f32 %v1328_v54, %v1312_v52  ;;  %1656 = vperm.xlu0 %2667, %v3765_v18   ;;  %1598 = vperm.xlu1 %2688, %v3833_v40  }
 0x4cf   : > { %v1090_v21 = vrot.slane %v3951_v28, %v3855_v57 }
 0x4d0   : > { %v1357_v6 = vpop.permute.xlu0 %1356  ;;  %v1353_v7 = vmul.f32 %v2720_v4, %v1330_v63  ;;  %v3954_v9 = vpop.permute.xlu1 %1837 }
 0x4d1   : > { %v1367_v11 = vmul.f32 %v3949_v25, %v1357_v6  ;;  %v1106_v44 = vrot.slane %v1090_v21, %v3855_v57  ;;  %v2724_v48 = vpop.eup %2723  ;;  %v1098_v50 = vcombine.high %v1090_v21, %v1090_v21 }
 0x4d2   : > { %2668 = vset.pattern.permute.xlu0 %v3243_v16  ;;  %2690 = vset.pattern.permute.xlu1 %v3254_v29  ;;  %v2726_v6 = vpop.eup %2725 }
 0x4d3   : > { %v3964_v15 = vadd.f32 %v1367_v11, %v1353_v7  ;;  %1693 = vperm.xlu0 %2668, %v3765_v18   ;;  %1894 = vperm.xlu1 %2690, %v3833_v40   ;;  %v1120_v3 = vrot.slane %v1098_v50, %v3855_v57  ;;  %v4012_v7 = vrot.slane %v3909_v33, %v4451_v56  ;;  %v2728_v41 = vpop.eup %2727 }
 0x4d4   : > { %v1128_v37 = vcombine.high %v1106_v44, %v1106_v44 }
 0x4d5   : > { %v1394_v30 = vpop.permute.xlu0 %1393  ;;  %v1390_v31 = vmul.f32 %v2722_v20, %v3964_v15  ;;  %v1335_v32 = vpop.permute.xlu1 %1334  ;;  %v1272_v20 = vmul.f32 1.442695, %v1226_v61 }
 0x4d6   : > { %v1404_v35 = vmul.f32 %v3973_v24, %v1394_v30  ;;  %v3978_v38 = vmul.f32 %v1335_v32, %v1330_v63  ;;  %v4004_v63 = vrot.slane %v1106_v44, %v3868_v62  ;;  %v4024_v32 = vrot.slane %v1120_v3, %v3868_v62 }
 0x4d7   : > { %2669 = vset.pattern.permute.xlu0 %v3255_v34  ;;  %v2385_v34 = vpop.f32.mrb[3].mxu1  ;;  %2731 = vpow2.f32 %v1272_v20  ;;  %v4041_v61 = vrot.slane %v1128_v37, %v3868_v62  ;;  %v4448_v20 = vsub.s32 7, %v3847_v53 }
 0x4d8   : > { %v3987_v45 = vadd.f32 %v1404_v35, %v1390_v31  ;;  %1730 = vperm.xlu0 %2669, %v3765_v18   ;;  %v1228_v30 = vmul.f32 %v4004_v63, %v3875_v2  ;;  %v1083_v31 = vcombine.high %v3951_v28, %v3951_v28  ;;  %v1230_v59 = vmul.f32 %v4024_v32, %v3875_v2 }
 0x4da   : > { %v1431_v52 = vpop.permute.xlu0 %1430  ;;  %v1427_v54 = vmul.f32 %v2724_v48, %v3987_v45  ;;  %v3997_v55 = vpop.permute.xlu1 %1631  ;;  %v4449_v48 = vsub.s32 6, %v3847_v53  ;;  %v1280_v37 = vmul.f32 1.442695, %v1230_v59 }
 0x4db   : > { %v1441_v60 = vmul.f32 %v3993_v51, %v1431_v52 }
 0x4dc   : > { %2672 = vset.pattern.permute.xlu0 %v3244_v19 }
 0x4dd   : > { %v1443_v4 = vadd.f32 %v1441_v60, %v1427_v54  ;;  %1841 = vperm.xlu0 %2672, %v3765_v18   ;;  %v1097_v54 = vrot.slane %v1083_v31, %v3855_v57  ;;  %v1130_v60 = vcombine.high %v1120_v3, %v1120_v3 }
 0x4df   : > { %v1468_v10 = vpop.permute.xlu0 %1467  ;;  %v1464_v11 = vmul.f32 %v2726_v6, %v1443_v4  ;;  %v4014_v12 = vpop.permute.xlu1 %1668  ;;  %v1113_v3 = vrot.slane %v1097_v54, %v3855_v57 }
 0x4e0   : > { %v1478_v21 = vmul.f32 %v4012_v7, %v1468_v10  ;;  %v2730_v10 = vpop.eup %2729 }
 0x4e1   : > { %2675 = vset.pattern.permute.xlu0 %v3248_v23  ;;  %v1276_v23 = vmul.f32 1.442695, %v1228_v30 }
 0x4e2   : > { %v1480_v35 = vadd.f32 %v1478_v21, %v1464_v11  ;;  %1635 = vperm.xlu0 %2675, %v3833_v40   ;;  %v4047_v11 = vrot.slane %v3909_v33, %v4449_v48  ;;  %v1099_v21 = vcombine.high %v1097_v54, %v1097_v54  ;;  %v2732_v54 = vpop.eup %2731 }
 0x4e3   : > { %2733 = vpow2.f32 %v1276_v23  ;;  %v4060_v23 = vld [vmem:[#allocation2 + $0x8] sm:$0xff] }
 0x4e4   : > { %v1505_v50 = vpop.permute.xlu0 %1504  ;;  %v1501_v34 = vmul.f32 %v2728_v41, %v1480_v35  ;;  %v4033_v52 = vpop.permute.xlu1 %1705  ;;  %4493 = vst [vmem:[#allocation37_spill] sm:$0xff] %v4060_v23  ;;  %v4067_v59 = vmul.f32 %v3951_v28, %v4060_v23  ;;  %2735 = vpow2.f32 %v1280_v37 }
 0x4e5   : > { %v1515_v44 = vmul.f32 %v4030_v47, %v1505_v50 }
 0x4e6   : > { %2678 = vset.pattern.permute.xlu0 %v3243_v16 }
 0x4e7   : > { %v1517_v6 = vadd.f32 %v1515_v44, %v1501_v34  ;;  %1709 = vperm.xlu0 %2678, %v3833_v40   ;;  %v1232_v34 = vmul.f32 %v4041_v61, %v3875_v2  ;;  %v4057_v44 = vrot.slane %v1130_v60, %v3868_v62  ;;  %v4075_v60 = vrot.slane %v1113_v3, %v3868_v62 }
 0x4e9   : > { %v1542_v30 = vpop.permute.xlu0 %1541  ;;  %v1538_v16 = vmul.f32 %v2730_v10, %v1517_v6  ;;  %v1447_v31 = vpop.permute.xlu1 %1446  ;;  %v1127_v10 = vrot.slane %v1099_v21, %v3855_v57  ;;  %v1234_v28 = vmul.f32 %v4057_v44, %v3875_v2  ;;  %v1236_v57 = vmul.f32 %v4075_v60, %v3875_v2 }
 0x4ea   : > { %v1552_v41 = vmul.f32 %v4047_v11, %v1542_v30  ;;  %v4052_v50 = vmul.f32 %v1447_v31, %v1443_v4  ;;  %v4072_v4 = vrot.slane %v3909_v33, %v4448_v20  ;;  %v1284_v31 = vmul.f32 1.442695, %v1232_v34 }
 0x4eb   : > { %2681 = vset.pattern.permute.xlu0 %v3254_v29  ;;  %v1129_v33 = vcombine.high %v1113_v3, %v1113_v3  ;;  %v1288_v34 = vmul.f32 1.442695, %v1234_v28  ;;  %v4095_v20 = vrot.slane %v1127_v10, %v3868_v62  ;;  %v1292_v48 = vmul.f32 1.442695, %v1236_v57 }
 0x4ec   : > { %v4062_v0 = vadd.f32 %v1552_v41, %v1538_v16  ;;  %1878 = vperm.xlu0 %2681, %v3765_v18   ;;  %2737 = vpow2.f32 %v1284_v31  ;;  %v1131_v28 = vcombine.high %v1127_v10, %v1127_v10 }
 0x4ed   : > { %v2734_v21 = vpop.eup %2733  ;;  %v4103_v17 = vrot.slane %v1129_v33, %v3868_v62  ;;  %2739 = vpow2.f32 %v1288_v34  ;;  %v1238_v31 = vmul.f32 %v4095_v20, %v3875_v2 }
 0x4ee   : > { %v1579_v30 = vpop.permute.xlu0 %1578  ;;  %v1575_v16 = vmul.f32 %v2732_v54, %v4062_v0  ;;  %v4079_v18 = vpop.permute.xlu1 %1874  ;;  %v4092_v54 = vrot.slane %v4067_v59, %v3868_v62  ;;  %2741 = vpow2.f32 %v1292_v48 }
 0x4ef   : > { %v1589_v41 = vmul.f32 %v4072_v4, %v1579_v30  ;;  %v1240_v10 = vmul.f32 %v4103_v17, %v3875_v2  ;;  %v1296_v34 = vmul.f32 1.442695, %v1238_v31 }
 0x4f0   : > { %2684 = vset.pattern.permute.xlu0 %v3251_v26 }
 0x4f1   : > { %v4085_v37 = vadd.f32 %v1589_v41, %v1575_v16  ;;  %1524 = vperm.xlu0 %2684, %v3833_v40   ;;  %2743 = vpow2.f32 %v1296_v34 }
 0x4f3   : > { %v1616_v30 = vpop.permute.xlu0 %1615  ;;  %v1612_v26 = vmul.f32 %v2734_v21, %v4085_v37  ;;  %v1484_v3 = vpop.permute.xlu1 %1483 }
 0x4f4   : > { %v1626_v16 = vmul.f32 %v4092_v54, %v1616_v30  ;;  %v4099_v41 = vmul.f32 %v1484_v3, %v1480_v35  ;;  %v2736_v21 = vpop.eup %2735  ;;  %v4111_v35 = vrot.slane %v4067_v59, %v1365_v49  ;;  %v4123_v49 = vrot.slane %v1131_v28, %v3868_v62 }
 0x4f5   : > { %2687 = vset.pattern.permute.xlu0 %v3244_v19  ;;  %v1300_v62 = vmul.f32 1.442695, %v1240_v10 }
 0x4f6   : > { %v1628_v56 = vadd.f32 %v1626_v16, %v1612_v26  ;;  %1857 = vperm.xlu0 %2687, %v3833_v40   ;;  %v1242_v28 = vmul.f32 %v4123_v49, %v3875_v2  ;;  %v4496_v2 = vsub.s32 4, %v3847_v53 }
 0x4f7   : > { %2745 = vpow2.f32 %v1300_v62 }
 0x4f8   : > { %v4114_v19 = vmul.f32 %v3997_v55, %v1628_v56  ;;  %v1653_v57 = vpop.permute.xlu0 %1652  ;;  %v1649_v33 = vmul.f32 %v2736_v21, %v1628_v56  ;;  %v1521_v30 = vpop.permute.xlu1 %1520  ;;  %v4128_v55 = vrot.slane %v4067_v59, %v1402_v42  ;;  %v4141_v42 = vrot.slane %v4067_v59, %v1439_v36 }
 0x4f9   : > { %v1663_v26 = vmul.f32 %v4111_v35, %v1653_v57  ;;  %v4117_v40 = vmul.f32 %v1521_v30, %v1517_v6  ;;  %v2738_v6 = vpop.eup %2737  ;;  %v4150_v34 = vrot.slane %v4067_v59, %v4496_v2 }
 0x4fa   : > { %2689 = vset.pattern.permute.xlu0 %v3254_v29  ;;  %v1700_v29 = vmul.f32 %v4128_v55, %v3925_v27  ;;  %v2740_v21 = vpop.eup %2739 }
 0x4fb   : > { %4494 = vst [vmem:[#allocation38_spill] sm:$0xff] %v4117_v40  ;;  %v1665_v56 = vadd.f32 %v1663_v26, %v1649_v33  ;;  %1890 = vperm.xlu0 %2689, %v3771_v5   ;;  %v1304_v26 = vmul.f32 1.442695, %v1242_v28  ;;  %v2742_v36 = vpop.eup %2741 }
 0x4fc   : > { %v2744_v28 = vpop.eup %2743 }
 0x4fd   : > { %v4134_v48 = vmul.f32 %v4014_v12, %v1665_v56  ;;  %v1686_v3 = vmul.f32 %v2738_v6, %v1665_v56  ;;  %v1727_v16 = vpop.permute.xlu0 %1726  ;;  %v1817_v31 = vpop.permute.xlu1 %1816  ;;  %2747 = vpow2.f32 %v1304_v26 }
 0x4fe   : > { %v1737_v27 = vmul.f32 %v4141_v42, %v1727_v16 }
 0x4ff   : > { %v1702_v5 = vadd.f32 %v1700_v29, %v1686_v3  ;;  %v4497_v29 = vsub.s32 5, %v3847_v53 }
 0x501   : > { %v1723_v57 = vmul.f32 %v2740_v21, %v1702_v5  ;;  %v4145_v12 = vmul.f32 %v4033_v52, %v1702_v5  ;;  %v4156_v3 = vrot.slane %v4067_v59, %v4497_v29  ;;  %v2746_v2 = vpop.eup %2745 }
 0x502   : > { %v1764_v33 = vpop.permute.xlu0 %1763  ;;  %v1854_v30 = vpop.permute.xlu1 %1853 }
 0x503   : > { %4495 = vst [vmem:[#allocation39_spill] sm:$0xff] %v4145_v12  ;;  %v1739_v10 = vadd.f32 %v1737_v27, %v1723_v57  ;;  %v1774_v6 = vmul.f32 %v4150_v34, %v1764_v33  ;;  %v4498_v57 = vsub.s32 6, %v3847_v53 }
 0x505   : > { %v1760_v56 = vmul.f32 %v2742_v36, %v1739_v10  ;;  %v4164_v27 = vrot.slane %v4067_v59, %v4498_v57 }
 0x507   : > { %v1776_v52 = vadd.f32 %v1774_v6, %v1760_v56  ;;  %v1801_v16 = vpop.permute.xlu0 %1800  ;;  %v4158_v62 = vpop.permute.xlu1 %1594  ;;  %v1848_v26 = vmul.f32 %v4164_v27, %v3954_v9 }
 0x508   : > { %v1811_v5 = vmul.f32 %v4156_v3, %v1801_v16  ;;  %v4175_v16 = vld [vmem:[#allocation18 + $0x8] sm:$0xff] }
 0x509   : > { %v1797_v21 = vmul.f32 %v2744_v28, %v1776_v52  ;;  %v4499_v28 = vsub.s32 7, %v3847_v53 }
 0x50b   : > { %v1813_v33 = vadd.f32 %v1811_v5, %v1797_v21  ;;  %v4180_v57 = vrot.slane %v4067_v59, %v4499_v28  ;;  %v2748_v21 = vpop.eup %2747 }
 0x50c   : > { %v1373_v36 = vpop.permute.xlu0 %1372  ;;  %v4166_v23 = vpop.permute.xlu1 %1434 }
 0x50d   : > { %v4170_v56 = vmul.f32 %v1817_v31, %v1813_v33  ;;  %v1834_v6 = vmul.f32 %v2746_v2, %v1813_v33  ;;  %v4173_v29 = vmul.f32 %v1373_v36, %v3964_v15  ;;  %4500 = vst [vmem:[#allocation40_spill] sm:$0xff] %v4180_v57  ;;  %v1885_v40 = vmul.f32 %v4180_v57, %v4079_v18  ;;  %v2695_v2 = vld [vmem:[#allocation21] sm:$0xff]   ;;  %v2696_v36 = vld [vmem:[#allocation21 + $0x8] sm:$0xff]  }
 0x50e   : > { %v1213_v31 = vmul.f32 %v3871_v1, %v4175_v16  ;;  %2406 = vmatpush3.bf16.msra.mxu1 %v2695_v2 }
 0x50f   : > { %v1850_v5 = vadd.f32 %v1848_v26, %v1834_v6  ;;  %v4503_v26 = vmov 0.0  }
 0x510   : > { %2407 = vmatprep.subr.bf16.mxu1 %v4503_v26  ;;  %v1246_v18 = vmul.f32 1.442695, %v1213_v31  ;;  %v2699_v31 = vld [vmem:[#allocation23] sm:$0xff]  }
 0x511   : > { %v1410_v12 = vpop.permute.xlu0 %1409  ;;  %v4184_v9 = vpop.permute.xlu1 %1767  ;;  %v4188_v15 = vmul.f32 %v1854_v30, %v1850_v5  ;;  %v1871_v33 = vmul.f32 %v2748_v21, %v1850_v5  ;;  %v1215_v30 = vmul.f32 %v3885_v8, %v4175_v16  ;;  %v2698_v21 = vld [vmem:[#allocation21 + $0x18] sm:$0xff]   ;;  %2418 = vmatpush3.bf16.msra.mxu0 %v2699_v31 }
 0x512   : > { %v4191_v53 = vmul.f32 %v1410_v12, %v3987_v45  ;;  %2408 = vmatpush3.bf16.msra.mxu1 %v2696_v36  ;;  %v2697_v45 = vld [vmem:[#allocation21 + $0x10] sm:$0xff]   ;;  %2749 = vpow2.f32 %v1246_v18  ;;  %2419 = vmatprep.subr.bf16.mxu0 %v4503_v26 }
 0x513   : > { %4501 = vst [vmem:[#allocation41_spill] sm:$0xff] %v4188_v15  ;;  %v4193_v59 = vadd.f32 %v1885_v40, %v1871_v33  ;;  %2409 = vmatprep.subr.bf16.mxu1 %v4503_v26  ;;  %v1250_v5 = vmul.f32 1.442695, %v1215_v30  ;;  %v1311_v30 = vld [vmem:[#allocation5 + $0x8] sm:$0xff] }
 0x515   : > { %4502 = vst [vmem:[#allocation42_spill] sm:$0xff] %v4193_v59  ;;  %1908 = vst.msk [vmem:[#allocation5] sm:$0xff] %vm706_vm2, %v4193_v59  ;;  %2751 = vpow2.f32 %v1250_v5 }
 0x516   : > { %v1743_v6 = vpop.permute.xlu0 %1742  ;;  %v4200_v1 = vpop.permute.xlu1 %1804  ;;  %2410 = vmatpush3.bf16.msra.mxu1 %v2697_v45 }
 0x517   : > { %v4198_v28 = vmul.f32 %v1743_v6, %v1739_v10  ;;  %v1217_v10 = vmul.f32 %v3894_v13, %v4175_v16  ;;  %2411 = vmatprep.subr.bf16.mxu1 %v4503_v26  ;;  %v1221_v26 = vmul.f32 %v3916_v39, %v4175_v16 }
 0x519   : > { %v1254_v36 = vmul.f32 1.442695, %v1217_v10 }
 0x51a   : > { %2412 = vmatpush3.bf16.msra.mxu1 %v2698_v21 }
 0x51b   : > { %v1780_v40 = vpop.permute.xlu0 %1779  ;;  %v1340_v12 = vpop.permute.xlu1 %1339  ;;  %2753 = vpow2.f32 %v1254_v36 }
 0x51c   : > { %v4205_v33 = vmul.f32 %v1780_v40, %v1776_v52  ;;  %v1219_v52 = vmul.f32 %v3904_v22, %v4175_v16  ;;  %v2750_v6 = vpop.eup %2749  ;;  %v1223_v22 = vmul.f32 %v3940_v58, %v4175_v16 }
 0x51d   : > { %v1313_v5 = vmul.f32 %v2750_v6, %v1311_v30 }
 0x51e   : > { %v1258_v40 = vmul.f32 1.442695, %v1219_v52  ;;  %v1344_v52 = vsel %vm706_vm2, %v3978_v38, 0.0  ;;  %v1227_v38 = vmul.f32 %v3984_v43, %v4175_v16  ;;  %v1418_v43 = vsel %vm706_vm2, %v4191_v53, 0.0 }
 0x51f   : > { %v2752_v10 = vpop.eup %2751 }
 0x520   : > { %v1558_v8 = vpop.permute.xlu0 %1557  ;;  %v1377_v2 = vpop.permute.xlu1 %1376  ;;  %2755 = vpow2.f32 %v1258_v40 }
 0x521   : > { %v4212_v18 = vmul.f32 %v1558_v8, %v4062_v0  ;;  %v1262_v0 = vmul.f32 1.442695, %v1221_v26 }
 0x523   : > { %2757 = vpow2.f32 %v1262_v0 }
 0x525   : > { %v1322_v13 = vpop.permute.xlu0 %1321  ;;  %v4216_v45 = vpop.permute.xlu1 %1672 }
 0x526   : > { %v1329_v21 = vmul.f32 %v3923_v46, %v1322_v13  ;;  %v1225_v46 = vmul.f32 %v3962_v14, %v4175_v16  ;;  %v1266_v13 = vmul.f32 1.442695, %v1223_v22  ;;  %v2754_v40 = vpop.eup %2753 }
 0x528   : > { %v1331_v31 = vadd.f32 %v1329_v21, %v1313_v5  ;;  %2759 = vpow2.f32 %v1266_v13 }
 0x52a   : > { %v1343_v8 = vmul.f32 %v1340_v12, %v1331_v31  ;;  %v1361_v59 = vpop.permute.xlu0 %1360  ;;  %v1354_v36 = vmul.f32 %v2752_v10, %v1331_v31  ;;  %v1414_v15 = vpop.permute.xlu1 %1413  ;;  %v1381_v31 = vsel %vm706_vm2, %v4173_v29, 0.0  ;;  %v1274_v29 = vmul.f32 1.442695, %v1227_v38 }
 0x52b   : > { %v1368_v57 = vmul.f32 %v3949_v25, %v1361_v59  ;;  %v1270_v59 = vmul.f32 1.442695, %v1225_v46  ;;  %v2756_v22 = vpop.eup %2755 }
 0x52c   : > { %v1345_v39 = vsel %vm706_vm2, %v1343_v8, 0.0  ;;  %v1442_v8 = vmul.f32 %v3993_v51, %v4166_v23 }
 0x52d   : > { %v1346_v6 = vadd.f32 %v1345_v39, %v1344_v52  ;;  %v1370_v30 = vadd.f32 %v1368_v57, %v1354_v36  ;;  %2761 = vpow2.f32 %v1270_v59  ;;  %v2758_v51 = vpop.eup %2757 }
 0x52e   : > { %2763 = vpow2.f32 %v1274_v29 }
 0x52f   : > { %v1347_v58 = vrot.slane %v1346_v6, 4  ;;  %v1380_v12 = vmul.f32 %v1377_v2, %v1370_v30  ;;  %v1398_v26 = vpop.permute.xlu0 %1397  ;;  %v1391_v5 = vmul.f32 %v2754_v40, %v1370_v30  ;;  %v1451_v21 = vpop.permute.xlu1 %1450 }
 0x530   : > { %v1405_v25 = vmul.f32 %v3973_v24, %v1398_v26 }
 0x531   : > { %v1348_v14 = vadd.f32 %v1347_v58, %v1346_v6  ;;  %v1382_v57 = vsel %vm706_vm2, %v1380_v12, 0.0  ;;  %v1229_v6 = vmul.f32 %v4004_v63, %v4175_v16 }
 0x532   : > { %v1383_v10 = vadd.f32 %v1382_v57, %v1381_v31  ;;  %v1407_v0 = vadd.f32 %v1405_v25, %v1391_v5  ;;  %v1455_v25 = vsel %vm706_vm2, %v4052_v50, 0.0 }
 0x533   : > { %v1349_v2 = vrot.slane %v1348_v14, 2  ;;  %v1278_v31 = vmul.f32 1.442695, %v1229_v6 }
 0x534   : > { %v1384_v36 = vrot.slane %v1383_v10, 4  ;;  %v1417_v24 = vmul.f32 %v1414_v15, %v1407_v0  ;;  %v1428_v52 = vmul.f32 %v2756_v22, %v1407_v0  ;;  %v1472_v39 = vpop.permute.xlu0 %1471  ;;  %v4237_v46 = vpop.permute.xlu1 %1746  ;;  %v1231_v15 = vmul.f32 %v4024_v32, %v4175_v16 }
 0x535   : > { %v1350_v30 = vadd.f32 %v1349_v2, %v1348_v14  ;;  %v1479_v53 = vmul.f32 %v4012_v7, %v1472_v39  ;;  %v2760_v22 = vpop.eup %2759  ;;  %v1233_v7 = vmul.f32 %v4041_v61, %v4175_v16  ;;  %2765 = vpow2.f32 %v1278_v31 }
 0x536   : > { %v1385_v13 = vadd.f32 %v1384_v36, %v1383_v10  ;;  %v1419_v40 = vsel %vm706_vm2, %v1417_v24, 0.0  ;;  %v1444_v58 = vadd.f32 %v1442_v8, %v1428_v52  ;;  %v1492_v52 = vsel %vm706_vm2, %v4099_v41, 0.0 }
 0x537   : > { %v1420_v23 = vadd.f32 %v1419_v40, %v1418_v43  ;;  %v1351_v14 = vrot.slane %v1350_v30, 1  ;;  %v2762_v61 = vpop.eup %2761 }
 0x538   : > { %v1386_v12 = vrot.slane %v1385_v13, 2  ;;  %v1454_v26 = vmul.f32 %v1451_v21, %v1444_v58  ;;  %v1465_v5 = vmul.f32 %v2758_v51, %v1444_v58  ;;  %v1282_v21 = vmul.f32 1.442695, %v1231_v15 }
 0x539   : > { %v1421_v59 = vrot.slane %v1420_v23, 4  ;;  %v1509_v63 = vpop.permute.xlu0 %1508  ;;  %v1488_v38 = vpop.permute.xlu1 %1487  ;;  %v1352_v29 = vadd.f32 %v1351_v14, %v1350_v30 }
 0x53a   : > { %v1387_v57 = vadd.f32 %v1386_v12, %v1385_v13  ;;  %v1456_v10 = vsel %vm706_vm2, %v1454_v26, 0.0  ;;  %v1481_v0 = vadd.f32 %v1479_v53, %v1465_v5  ;;  %v1516_v50 = vmul.f32 %v4030_v47, %v1509_v63 }
 0x53b   : > { %v1422_v32 = vadd.f32 %v1421_v59, %v1420_v23  ;;  %v1457_v2 = vadd.f32 %v1456_v10, %v1455_v25  ;;  %2767 = vpow2.f32 %v1282_v21  ;;  %v2764_v59 = vpop.eup %2763  ;;  %v1286_v10 = vmul.f32 1.442695, %v1233_v7 }
 0x53c   : > { %v1388_v8 = vrot.slane %v1387_v57, 1  ;;  %v1502_v36 = vmul.f32 %v2760_v22, %v1481_v0  ;;  %v1491_v24 = vmul.f32 %v1488_v38, %v1481_v0  ;;  %v1235_v22 = vmul.f32 %v4057_v44, %v4175_v16 }
 0x53d   : > { %v1423_v39 = vrot.slane %v1422_v32, 2  ;;  %v1458_v43 = vrot.slane %v1457_v2, 4  ;;  %2769 = vpow2.f32 %v1286_v10  ;;  %v1237_v7 = vmul.f32 %v4075_v60, %v4175_v16 }
 0x53e   : > { %v1389_v6 = vadd.f32 %v1388_v8, %v1387_v57  ;;  %v4255_v13 = vadd.f32 %v1516_v50, %v1502_v36  ;;  %v1493_v40 = vsel %vm706_vm2, %v1491_v24, 0.0  ;;  %v1546_v58 = vpop.permute.xlu0 %1545  ;;  %v4258_v51 = vpop.permute.xlu1 %1783  ;;  %v1601_v60 = vmul.f32 %v4158_v62, %v4085_v37 }
 0x53f   : > { %v1424_v23 = vadd.f32 %v1423_v39, %v1422_v32  ;;  %v1459_v15 = vadd.f32 %v1458_v43, %v1457_v2  ;;  %v1494_v47 = vadd.f32 %v1493_v40, %v1492_v52  ;;  %v1553_v12 = vmul.f32 %v4047_v11, %v1546_v58  ;;  %v2766_v21 = vpop.eup %2765 }
 0x540   : > { %v1910_v41 = vsel %vm755_vm5, %v1352_v29, %v1389_v6  ;;  %v1539_v26 = vmul.f32 %v2762_v61, %v4255_v13  ;;  %v1290_v29 = vmul.f32 1.442695, %v1235_v22  ;;  %v1566_v58 = vsel %vm706_vm2, %v4212_v18, 0.0 }
 0x541   : > { %v1425_v5 = vrot.slane %v1424_v23, 1  ;;  %v1460_v30 = vrot.slane %v1459_v15, 2  ;;  %v1495_v53 = vrot.slane %v1494_v47, 4  ;;  %v1294_v18 = vmul.f32 1.442695, %v1237_v7 }
 0x542   : > { %v1555_v25 = vadd.f32 %v1553_v12, %v1539_v26  ;;  %2771 = vpow2.f32 %v1290_v29 }
 0x543   : > { %v1426_v63 = vadd.f32 %v1425_v5, %v1424_v23  ;;  %v1461_v38 = vadd.f32 %v1460_v30, %v1459_v15  ;;  %v1496_v31 = vadd.f32 %v1495_v53, %v1494_v47  ;;  %v1583_v14 = vpop.permute.xlu0 %1582  ;;  %v4263_v57 = vpop.permute.xlu1 %1820  ;;  %v1239_v30 = vmul.f32 %v4095_v20, %v4175_v16 }
 0x544   : > { %v1576_v0 = vmul.f32 %v2764_v59, %v1555_v25  ;;  %v1590_v11 = vmul.f32 %v4072_v4, %v1583_v14  ;;  %v1603_v59 = vsel %vm706_vm2, %v1601_v60, 0.0  ;;  %2773 = vpow2.f32 %v1294_v18 }
 0x545   : > { %v1911_v32 = vsel %vm736_vm4, %v1910_v41, %v1426_v63  ;;  %v1462_v2 = vrot.slane %v1461_v38, 1  ;;  %v1497_v8 = vrot.slane %v1496_v31, 2  ;;  %v2768_v47 = vpop.eup %2767  ;;  %v1241_v63 = vmul.f32 %v4103_v17, %v4175_v16 }
 0x546   : > { %v1592_v36 = vadd.f32 %v1590_v11, %v1576_v0  ;;  %v1298_v14 = vmul.f32 1.442695, %v1239_v30  ;;  %v1677_v11 = vsel %vm706_vm2, %v4134_v48, 0.0  ;;  %v1243_v17 = vmul.f32 %v4123_v49, %v4175_v16 }
 0x547   : > { %v1463_v50 = vadd.f32 %v1462_v2, %v1461_v38  ;;  %v1498_v24 = vadd.f32 %v1497_v8, %v1496_v31  ;;  %v2770_v38 = vpop.eup %2769  ;;  %v1640_v18 = vsel %vm706_vm2, %v4114_v19, 0.0 }
 0x548   : > { %v1620_v52 = vpop.permute.xlu0 %1619  ;;  %v1613_v39 = vmul.f32 %v2766_v21, %v1592_v36  ;;  %v1562_v43 = vpop.permute.xlu1 %1561  ;;  %2775 = vpow2.f32 %v1298_v14 }
 0x549   : > { %v1912_v4 = vsel %vm712_vm3, %v1911_v32, %v1463_v50  ;;  %v1499_v6 = vrot.slane %v1498_v24, 1  ;;  %v1627_v44 = vmul.f32 %v4092_v54, %v1620_v52  ;;  %v1565_v40 = vmul.f32 %v1562_v43, %v1555_v25  ;;  %v4303_v52 = vld [vmem:[#allocation3] sm:$0xff] }
 0x54a   : > { %v1302_v32 = vmul.f32 1.442695, %v1241_v63  ;;  %v902_v49 = vsub.f32 0.0, %v4303_v52 }
 0x54b   : > { %v1500_v61 = vadd.f32 %v1499_v6, %v1498_v24  ;;  %v4275_v23 = vadd.f32 %v1627_v44, %v1613_v39  ;;  %v1567_v15 = vsel %vm706_vm2, %v1565_v40, 0.0  ;;  %v1306_v24 = vmul.f32 1.442695, %v1243_v17 }
 0x54c   : > { %v4280_v12 = vadd.f32 %v1567_v15, %v1566_v58  ;;  %2777 = vpow2.f32 %v1302_v32  ;;  %v1775_v39 = vmul.f32 %v4150_v34, %v4184_v9  ;;  %v1812_v58 = vmul.f32 %v4156_v3, %v4200_v1 }
 0x54d   : > { %v4283_v41 = vsel %vm1913_vm9, %v1912_v4, %v1500_v61  ;;  %v1657_v54 = vpop.permute.xlu0 %1656  ;;  %v1650_v26 = vmul.f32 %v2768_v47, %v4275_v23  ;;  %v1599_v5 = vpop.permute.xlu1 %1598  ;;  %2779 = vpow2.f32 %v1306_v24  ;;  %v904_v15 = vmul.f32 1.442695, %v902_v49 }
 0x54e   : > { %v1664_v53 = vmul.f32 %v4111_v35, %v1657_v54  ;;  %v1602_v25 = vmul.f32 %v1599_v5, %v1592_v36  ;;  %v2772_v36 = vpop.eup %2771  ;;  %v1788_v47 = vsel %vm706_vm2, %v4205_v33, 0.0  ;;  %v1569_v24 = vrot.slane %v4280_v12, 4 }
 0x54f   : > { %v2774_v48 = vpop.eup %2773  ;;  %2781 = vpow2.f32 %v904_v15 }
 0x550   : > { %v1666_v37 = vadd.f32 %v1664_v53, %v1650_v26  ;;  %v1604_v62 = vsel %vm706_vm2, %v1602_v25, 0.0  ;;  %v4324_v53 = vld [vmem:[#allocation3 + $0x8] sm:$0xff] }
 0x551   : > { %v4293_v31 = vadd.f32 %v1604_v62, %v1603_v59 }
 0x552   : > { %v1676_v10 = vmul.f32 %v4216_v45, %v1666_v37  ;;  %v1694_v0 = vpop.permute.xlu0 %1693  ;;  %v1687_v20 = vmul.f32 %v2770_v38, %v1666_v37  ;;  %v2776_v44 = vpop.eup %2775 }
 0x553   : > { %v1701_v35 = vmul.f32 %v4128_v55, %v1694_v0 }
 0x554   : > { %v1678_v22 = vsel %vm706_vm2, %v1676_v10, 0.0 }
 0x555   : > { %v1679_v2 = vadd.f32 %v1678_v22, %v1677_v11  ;;  %v1703_v8 = vadd.f32 %v1701_v35, %v1687_v20 }
 0x556   : > { %v2778_v26 = vpop.eup %2777 }
 0x557   : > { %v1731_v21 = vpop.permute.xlu0 %1730  ;;  %v1724_v50 = vmul.f32 %v2772_v36, %v1703_v8  ;;  %v1680_v4 = vrot.slane %v1679_v2, 4  ;;  %v4504_v36 = vld [vmem:[#allocation39_spill] sm:$0xff] }
 0x558   : > { %v1738_v45 = vmul.f32 %v4141_v42, %v1731_v21  ;;  %v1751_v42 = vsel %vm706_vm2, %v4198_v28, 0.0  ;;  %v1714_v21 = vsel %vm706_vm2, %v4504_v36, 0.0 }
 0x55a   : > { %v1740_v55 = vadd.f32 %v1738_v45, %v1724_v50 }
 0x55c   : > { %v1750_v43 = vmul.f32 %v4237_v46, %v1740_v55  ;;  %v1761_v7 = vmul.f32 %v2774_v48, %v1740_v55  ;;  %v1842_v29 = vpop.permute.xlu0 %1841  ;;  %v1681_v46 = vadd.f32 %v1680_v4, %v1679_v2  ;;  %v1606_v55 = vrot.slane %v4293_v31, 4  ;;  %v4505_v48 = vld [vmem:[#allocation40_spill] sm:$0xff] }
 0x55e   : > { %v1752_v16 = vsel %vm706_vm2, %v1750_v43, 0.0  ;;  %v1777_v6 = vadd.f32 %v1775_v39, %v1761_v7  ;;  %v1682_v33 = vrot.slane %v1681_v46, 2 }
 0x55f   : > { %v1753_v40 = vadd.f32 %v1752_v16, %v1751_v42 }
 0x560   : > { %v1787_v34 = vmul.f32 %v4258_v51, %v1777_v6  ;;  %v1798_v9 = vmul.f32 %v2776_v44, %v1777_v6  ;;  %v1849_v51 = vmul.f32 %v4164_v27, %v1842_v29  ;;  %v903_v27 = vsub.f32 0.0, %v4324_v53 }
 0x561   : > { %v1636_v61 = vpop.permute.xlu0 %1635  ;;  %v1754_v25 = vrot.slane %v1753_v40, 4  ;;  %v1683_v20 = vadd.f32 %v1682_v33, %v1681_v46 }
 0x562   : > { %v1789_v60 = vsel %vm706_vm2, %v1787_v34, 0.0  ;;  %v1814_v28 = vadd.f32 %v1812_v58, %v1798_v9  ;;  %v1639_v54 = vmul.f32 %v1636_v61, %v4275_v23  ;;  %v1825_v23 = vsel %vm706_vm2, %v4170_v56, 0.0 }
 0x563   : > { %v1790_v5 = vadd.f32 %v1789_v60, %v1788_v47  ;;  %v1755_v35 = vadd.f32 %v1754_v25, %v1753_v40  ;;  %v906_v45 = vmul.f32 1.442695, %v903_v27  ;;  %v1684_v43 = vrot.slane %v1683_v20, 1  ;;  %v4506_v60 = vld [vmem:[#allocation38_spill] sm:$0xff] }
 0x564   : > { %v1824_v3 = vmul.f32 %v4263_v57, %v1814_v28  ;;  %v1835_v1 = vmul.f32 %v2778_v26, %v1814_v28  ;;  %v1641_v30 = vsel %vm706_vm2, %v1639_v54, 0.0  ;;  %v2780_v57 = vpop.eup %2779  ;;  %v1570_v40 = vadd.f32 %v1569_v24, %v4280_v12 }
 0x565   : > { %v1642_v59 = vadd.f32 %v1641_v30, %v1640_v18  ;;  %v1791_v37 = vrot.slane %v1790_v5, 4  ;;  %v1756_v7 = vrot.slane %v1755_v35, 2  ;;  %v2782_v16 = vpop.eup %2781  ;;  %2783 = vpow2.f32 %v906_v45  ;;  %v4508_v45 = vld [vmem:[#allocation42_spill] sm:$0xff] }
 0x566   : > { %v1826_v62 = vsel %vm706_vm2, %v1824_v3, 0.0  ;;  %v1851_v19 = vadd.f32 %v1849_v51, %v1835_v1  ;;  %v1710_v63 = vpop.permute.xlu0 %1709  ;;  %v1607_v58 = vadd.f32 %v1606_v55, %v4293_v31  ;;  %v1685_v46 = vadd.f32 %v1684_v43, %v1683_v20 }
 0x567   : > { %v1827_v38 = vadd.f32 %v1826_v62, %v1825_v23  ;;  %v1643_v14 = vrot.slane %v1642_v59, 4  ;;  %v1713_v10 = vmul.f32 %v1710_v63, %v1703_v8  ;;  %v1792_v32 = vadd.f32 %v1791_v37, %v1790_v5  ;;  %v4507_v63 = vld [vmem:[#allocation41_spill] sm:$0xff] }
 0x568   : > { %v1872_v0 = vmul.f32 %v2780_v57, %v1851_v19  ;;  %v1757_v61 = vadd.f32 %v1756_v7, %v1755_v35  ;;  %v1529_v28 = vsel %vm706_vm2, %v4506_v60, 0.0  ;;  %v908_v31 = vadd.f32 1.0, %v2782_v16 }
 0x569   : > { %v1828_v11 = vrot.slane %v1827_v38, 4  ;;  %v1644_v22 = vadd.f32 %v1643_v14, %v1642_v59  ;;  %v1715_v2 = vsel %vm706_vm2, %v1713_v10, 0.0  ;;  %v1793_v4 = vrot.slane %v1792_v32, 2  ;;  %v1895_v14 = vpop.permute.xlu1 %1894 }
 0x56a   : > { %v1716_v8 = vadd.f32 %v1715_v2, %v1714_v21  ;;  %v1571_v3 = vrot.slane %v1570_v40, 2  ;;  %v1608_v30 = vrot.slane %v1607_v58, 2  ;;  %v1758_v33 = vrot.slane %v1757_v61, 1 }
 0x56b   : > { %v1829_v56 = vadd.f32 %v1828_v11, %v1827_v38  ;;  %v1645_v17 = vrot.slane %v1644_v22, 2  ;;  %v1879_v50 = vpop.permute.xlu0 %1878  ;;  %v1794_v54 = vadd.f32 %v1793_v4, %v1792_v32  ;;  %v1862_v57 = vsel %vm706_vm2, %v4507_v63, 0.0 }
 0x56c   : > { %v1886_v39 = vmul.f32 %v4505_v48, %v1879_v50  ;;  %v1717_v49 = vrot.slane %v1716_v8, 4  ;;  %2785 = vrcp.f32 %v908_v31  ;;  %v1572_v38 = vadd.f32 %v1571_v3, %v1570_v40  ;;  %v2329_v40 = vld [vmem:[#allocation20] ss:$0 sm:$0xff] }
 0x56d   : > { %v1646_v29 = vadd.f32 %v1645_v17, %v1644_v22  ;;  %v1830_v6 = vrot.slane %v1829_v56, 2  ;;  %v1795_v59 = vrot.slane %v1794_v54, 1  ;;  %v1759_v35 = vadd.f32 %v1758_v33, %v1757_v61 }
 0x56e   : > { %v1888_v42 = vadd.f32 %v1886_v39, %v1872_v0  ;;  %v1718_v34 = vadd.f32 %v1717_v49, %v1716_v8  ;;  %v1609_v32 = vadd.f32 %v1608_v30, %v1607_v58  ;;  %v1573_v55 = vrot.slane %v1572_v38, 1 }
 0x56f   : > { %v1647_v44 = vrot.slane %v1646_v29, 1  ;;  %v1831_v5 = vadd.f32 %v1830_v6, %v1829_v56  ;;  %v2784_v20 = vpop.eup %2783  ;;  %v1796_v2 = vadd.f32 %v1795_v59, %v1794_v54  ;;  %v2789_v54 = vld [vmem:[#allocation2] sm:$0xff]  ;;  %v4509_v59 = vld [vmem:[#allocation37_spill] sm:$0xff] }
 0x570   : > { %1909 = vst.msk [vmem:[#allocation5 + $0x8] sm:$0xff] %vm706_vm2, %v1888_v42  ;;  %v1525_v9 = vpop.permute.xlu0 %1524  ;;  %v1719_v26 = vrot.slane %v1718_v34, 2  ;;  %v1898_v11 = vmul.f32 %v1895_v14, %v1888_v42  ;;  %v909_v39 = vadd.f32 1.0, %v2784_v20  ;;  %v1610_v49 = vrot.slane %v1609_v32, 1  ;;  %v2700_v14 = vld [vmem:[#allocation23 + $0x8] sm:$0xff]  }
 0x571   : > { %v1648_v15 = vadd.f32 %v1647_v44, %v1646_v29  ;;  %v1528_v47 = vmul.f32 %v1525_v9, %v4255_v13  ;;  %v1832_v62 = vrot.slane %v1831_v5, 1  ;;  %v1574_v9 = vadd.f32 %v1573_v55, %v1572_v38  ;;  %2420 = vmatpush3.bf16.msra.mxu0 %v2700_v14 }
 0x572   : > { %v1720_v1 = vadd.f32 %v1719_v26, %v1718_v34  ;;  %v1900_v4 = vsel %vm706_vm2, %v1898_v11, 0.0  ;;  %2787 = vrcp.f32 %v909_v39  ;;  %v1611_v61 = vadd.f32 %v1610_v49, %v1609_v32 }
 0x573   : > { %v1921_v18 = vsel %vm755_vm5, %v1648_v15, %v1685_v46  ;;  %v1530_v12 = vsel %vm706_vm2, %v1528_v47, 0.0  ;;  %v1833_v36 = vadd.f32 %v1832_v62, %v1831_v5  ;;  %v1934_v26 = vmul.f32 %v2789_v54, %v2329_v40 }
 0x574   : > { %v1531_v51 = vadd.f32 %v1530_v12, %v1529_v28  ;;  %v1721_v23 = vrot.slane %v1720_v1, 1 }
 0x575   : > { %v1858_v25 = vpop.permute.xlu0 %1857 }
 0x576   : > { %v1532_v13 = vrot.slane %v1531_v51, 4  ;;  %v1861_v37 = vmul.f32 %v1858_v25, %v1851_v19  ;;  %v1722_v27 = vadd.f32 %v1721_v23, %v1720_v1  ;;  %v2786_v34 = vpop.eup %2785  ;;  %v1935_v23 = vmul.f32 %v2329_v40, %v4509_v59 }
 0x577   : > { %v912_v31 = vmul.f32 %v2786_v34, %v4303_v52 }
 0x578   : > { %v1533_v10 = vadd.f32 %v1532_v13, %v1531_v51  ;;  %v1863_v0 = vsel %vm706_vm2, %v1861_v37, 0.0  ;;  %v1922_v19 = vsel %vm736_vm4, %v1921_v18, %v1722_v27 }
 0x579   : > { %v1864_v22 = vadd.f32 %v1863_v0, %v1862_v57  ;;  %v1923_v21 = vsel %vm712_vm3, %v1922_v19, %v1759_v35 }
 0x57a   : > { %v1534_v56 = vrot.slane %v1533_v10, 2  ;;  %v1891_v17 = vpop.permute.xlu0 %1890  ;;  %v1924_v48 = vsel %vm1913_vm9, %v1923_v21, %v1796_v2 }
 0x57b   : > { %v1865_v50 = vrot.slane %v1864_v22, 4  ;;  %v1897_v24 = vmul.f32 %v1891_v17, %v4508_v45  ;;  %v1925_v7 = vsel %vm1915_vm10, %v1924_v48, %v1833_v36 }
 0x57c   : > { %v1535_v8 = vadd.f32 %v1534_v56, %v1533_v10 }
 0x57d   : > { %v1866_v43 = vadd.f32 %v1865_v50, %v1864_v22  ;;  %v1899_v29 = vsel %vm706_vm2, %v1897_v24, 0.0 }
 0x57e   : > { %v1536_v42 = vrot.slane %v1535_v8, 1  ;;  %v1901_v16 = vadd.f32 %v1900_v4, %v1899_v29 }
 0x57f   : > { %v1867_v6 = vrot.slane %v1866_v43, 2 }
 0x580   : > { %v1537_v44 = vadd.f32 %v1536_v42, %v1535_v8  ;;  %v1902_v58 = vrot.slane %v1901_v16, 4 }
 0x581   : > { %v1868_v46 = vadd.f32 %v1867_v6, %v1866_v43 }
 0x582   : > { %v1916_v15 = vsel %vm1915_vm10, %v4283_v41, %v1537_v44  ;;  %v1903_v47 = vadd.f32 %v1902_v58, %v1901_v16  ;;  %v2788_v41 = vpop.eup %2787 }
 0x583   : > { %v1918_v60 = vsel %vm1917_vm11, %v1916_v15, %v1574_v9  ;;  %v1869_v28 = vrot.slane %v1868_v46, 1  ;;  %v913_v37 = vmul.f32 %v2788_v41, %v4324_v53  ;;  %v2335_v53 = vld [vmem:[#allocation24] ss:$0 sm:$0xff] }
 0x584   : > { %v1904_v5 = vrot.slane %v1903_v47, 2  ;;  %v1920_v18 = vsel %vm1919_vm12, %v1918_v60, %v1611_v61 }
 0x585   : > { %v1870_v12 = vadd.f32 %v1869_v28, %v1868_v46  ;;  %v1936_v3 = vadd.f32 %v1934_v26, %v1920_v18 }
 0x586   : > { %v1905_v1 = vadd.f32 %v1904_v5, %v1903_v47 }
 0x587   : > { %v1926_v51 = vsel %vm1917_vm11, %v1925_v7, %v1870_v12  ;;  %v1938_v30 = vmul.f32 %v1936_v3, %v912_v31 }
 0x588   : > { %v1906_v33 = vrot.slane %v1905_v1, 1 }
 0x589   : > { %1940 = vst.msk [vmem:[#allocation2] sm:$0xff] %vm706_vm2, %v1938_v30 }
 0x58a   : > { %v1907_v25 = vadd.f32 %v1906_v33, %v1905_v1 }
 0x58c   : > { %v1927_v13 = vsel %vm1919_vm12, %v1926_v51, %v1907_v25 }
 0x58d   : > { %v1937_v62 = vadd.f32 %v1935_v23, %v1927_v13 }
 0x58f   : > { %v1939_v63 = vmul.f32 %v1937_v62, %v913_v37 }
 0x590   : > { %v1942_v52 = vld [vmem:[#allocation2] sm:$0xff] }
 0x591   : > { %1941 = vst.msk [vmem:[#allocation2 + $0x8] sm:$0xff] %vm706_vm2, %v1939_v63 }
 0x598   : > { %v1943_v57 = vld [vmem:[#allocation2 + $0x8] sm:$0xff] }
 0x599   : > { %v1952_v38 = vpack.c.bf16 %v1943_v57, %v1942_v52 }
 0x59b   : > { %2414 = vmatmul.mubr.msk.bf16.vlgmr.msra.gmra.mrb[4].mxu1 %vm706_vm2, %v1952_v38 }
 0x66e   : > { %v2014_v27 = vpop.f32.mrb[4].mxu1 }
 0x66f   : > { %v2415_v10 = vpop.f32.mrb[5].mxu1 }
 0x670   : > { %v2017_v0 = vpop.f32.mrb[6].mxu1 }
 0x671   : > { %v2025_v20 = vpack.c.bf16 %v2017_v0, %v2014_v27  ;;  %v2416_v35 = vpop.f32.mrb[7].mxu1 }
 0x673   : > { %2422 = vmatmul.mubr.msk.bf16.vlgmr.msra.gmra.mrb[8].mxu0 %vm604_vm1, %v2025_v20 }
 0x746   : > { %v2082_v11 = vpop.f32.mrb[8].mxu0 }
 0x747   : > { %v2083_v22 = vadd.f32 %v2335_v53, %v2082_v11  ;;  %v2423_v32 = vpop.f32.mrb[9].mxu0 }
 0x748   : > { %v2085_v2 = vpop.f32.mrb[10].mxu0 }
 0x749   : > { %2090 = vst.msk [vmem:[%s583_s25] sm:$0xff] %vm2089_vm13, %v2083_v22  ;;  %v2086_v19 = vadd.f32 %v2335_v53, %v2085_v2  ;;  %v2424_v56 = vpop.f32.mrb[11].mxu0 }
 0x74b   : > { %2091 = vst.msk [vmem:[%s583_s25 + $0x8] sm:$0xff] %vm2089_vm13, %v2086_v19 }
 0x74c   : > { %3141 = shalt.err (!%p3138_p5)
}
 0x74d   : > { %s3142_s25 = scalar_lea.hbm %s4375_s29, 256  ;;  %s3146_s17 = scalar_lea.hbm %s4510_s3, 512 }
 0x74e   : > { %p3143_p2 = scmp.ne.s32.totalorder %s4375_s29, %s3142_s25  ;;  %p3147_p1 = scmp.lt.u32.totalorder %s4375_s29, %s4510_s3 }
 0x74f   : > { %p3148_p11 = scmp.lt.u32.totalorder %s3146_s17, %s3142_s25  ;;  %p3150_p13 = scmp.lt.u32.totalorder %s3142_s25, %s4375_s29 }
 0x750   : > { %p3144_p7 = pnand %p3143_p2, %p4511_p8 }
 0x751   : > { %p3149_p12 = por %p3148_p11, %p3147_p1 }
 0x752   : > { %p3145_p10 = pneg %p3144_p7 }
 0x753   : > { %p3151_p6 = por %p3150_p13, %p3149_p12 }
 0x755   : > { %p3152_p9 = pnand %p3151_p6, %p3145_p10 }
 0x757   : > { %3155 = shalt.err (!%p3152_p9)
}
 0x758   : > { %s3260_s28 = smov 128   ;;  %s3261_s27 = smov 8  }
 0x759   : > { %2487 = dma.vmem_to_hbm [thread:$0]  (%p4511_p8), %s4370_s1, 256, %s4375_s29, %s2093_s15, %s3260_s28, %s3260_s28, %s3261_s27  }
 0x75a PF: > { %s2121_s0 = sand.u32 1, %s3206_s21   ;;  %p4512_p4 = scmp.ne.s32.totalorder %s4472_s18, 0 }
 0x75b   : > { %p4513_p3 = scmp.ge.s32.totalorder %s3218_s24, 2  ;;  %s2122_s25 = scalar_lea.sflag [#allocation8], %s2121_s0 }
 0x75d   : > { %p2528_p0 = pnand %p4513_p3, %p4512_p4 }
 0x75f   : > { %3201 = dma.done.wait (!%p2528_p0), %s2122_s25, 256  }
 0x760   : > { %3203 = vsyncadd (!%p2528_p0), %s2122_s25, 4294967040  ;;  %p31_p5 = scmp.ge.s32.totalorder %s3607_s13, 4   ;;  %s4514_s21 = smov %s3210_s22 }
 0x761   : > { %s4515_s22 = smov %s3214_s23  ;;  %s4516_s23 = smov %s3619_s14 }
 0x762   : > { %s4517_s24 = smov %s3607_s13  ;;  %33 = sbr.rel (!%p31_p5) target bundleno = 16 (0x10), region = 160 }
 0x769   :  { %2127 = vsyncpa [#allocation7], 1 }
 0x76a   :  { %2129 = vsyncpa [#allocation7 + $0x1], 1 }
 0x76b   :  { %2130 = vsyncpa [#allocation10], 1 }
 0x76c   :  { %2131 = vsyncpa [#allocation13], 1 }
 0x76d   :  { %2132 = vsyncpa [#allocation16], 1 }
 0x76e   :  { %2133 = vsyncpa [#allocation19], 1 }
 0x76f   :  { %2134 = vsyncpa [#allocation22], 1 }
 0x770   :  { %2135 = vsyncpa [#allocation25], 1 }
 0x771   :  { %2136 = vsyncpa [#allocation8], 1 }
 0x772   :  { %2138 = vsyncpa [#allocation8 + $0x1], 1 }

// kernel: _lambda_.8
= control target key start
LH: loop header
LB: loop body
LE: loop exit
PB: predicated region body
PF: predicated region fallthrough
CT: control target
= control target key end

     0   :  { %s4419_s0 = inlined_call_operand.hbm [shape: f32[2,16,32], index: 0, kind: input, shape index: {}]   ;;  %s4420_s1 = inlined_call_operand.hbm [shape: bf16[32,64], index: 1, kind: input, shape index: {}]   ;;  %s4421_s2 = inlined_call_operand.hbm [shape: bf16[32,64], index: 2, kind: input, shape index: {}]   ;;  %s4422_s3 = inlined_call_operand.hbm [shape: f32[4,1,64], index: 3, kind: input, shape index: {}]   ;;  %s4423_s4 = inlined_call_operand.hbm [shape: f32[1,64], index: 4, kind: input, shape index: {}]   ;;  %s4424_s5 = inlined_call_operand.hbm [shape: f32[64,96], index: 5, kind: input, shape index: {}]   ;;  %s4425_s6 = inlined_call_operand.hbm [shape: f32[1,64], index: 6, kind: input, shape index: {}]   ;;  %s4426_s7 = inlined_call_operand.hbm [shape: f32[16,64], index: 7, kind: input, shape index: {}]   ;;  %s4427_s8 = inlined_call_operand.hbm [shape: f32[1,64], index: 8, kind: input, shape index: {}]   ;;  %s4428_s9 = inlined_call_operand.hbm [shape: bf16[64,32], index: 9, kind: input, shape index: {}]   ;;  %s4429_s10 = inlined_call_operand.hbm [shape: bf16[32,4], index: 10, kind: input, shape index: {}]   ;;  %s4430_s11 = inlined_call_operand.hbm [shape: f32[1,4], index: 11, kind: input, shape index: {}]   ;;  %s4431_s12 = inlined_call_operand.hbm [shape: f32[2,16,4], index: 12, kind: output, shape index: {}]  }
   0x1   :  { %4455 = sst [smem:[#allocation43_spill]] %s4419_s0 }
   0x2   :  { %4456 = sst [smem:[#allocation44_spill]] %s4420_s1 }
   0x3   :  { %4457 = sst [smem:[#allocation45_spill]] %s4422_s3 }
   0x4   :  { %4458 = sst [smem:[#allocation46_spill]] %s4431_s12 }
   0x5   :  { %17 = vsyncpa [#allocation7], 0 }
   0x6   :  { %19 = vsyncpa [#allocation7 + $0x1], 0 }
   0x7   :  { %20 = vsyncpa [#allocation10], 0 }
   0x8   :  { %21 = vsyncpa [#allocation13], 0 }
   0x9   :  { %22 = vsyncpa [#allocation16], 0 }
   0xa   :  { %23 = vsyncpa [#allocation19], 0 }
   0xb   :  { %24 = vsyncpa [#allocation22], 0 }
   0xc   :  { %25 = vsyncpa [#allocation25], 0 }
   0xd   :  { %26 = vsyncpa [#allocation8], 0 }
   0xe   :  { %28 = vsyncpa [#allocation8 + $0x1], 0  ;;  %s3327_s21 = smov 0   ;;  %s3329_s22 = smov 0  }
   0xf   :  { %s3331_s23 = smov 0   ;;  %s3333_s24 = smov 0  }
  0x10 LB: > { %s3220_s25 = smov [#allocation9]   ;;  %s3348_s27 = sadd.s32 4294967295, %s3218_s24   ;;  %s3218_s24 = sphi %s3333_s24, %s4517_s24   ;;  %s3214_s23 = sphi %s3331_s23, %s4516_s23   ;;  %s3210_s22 = sphi %s3329_s22, %s4515_s22   ;;  %s3206_s21 = sphi %s3327_s21, %s4514_s21  }
  0x11   : > { %s334_s26 = sshll.u32 %s3220_s25, 4  ;;  %4459 = sst [smem:[#allocation35_spill]] %s3348_s27  ;;  %s3353_s26 = int_to_ptr.vmem [resolvable:$true] %s334_s26 }
  0x12   : > { %p2285_p0 = scmp.ge.s32.totalorder %s3218_s24, 1  ;;  %p4440_p1 = scmp.eq.s32.totalorder %s3348_s27, 0 }
  0x13   : > { %p322_p2 = scmp.lt.s32.totalorder %s3218_s24, 3  ;;  %s3221_s29 = smov [#allocation12]  }
  0x14   : > { %s360_s30 = sshll.u32 %s3221_s29, 4  ;;  %s3222_s14 = smov [#allocation15]   ;;  %s3368_s30 = int_to_ptr.vmem [resolvable:$true] %s360_s30 }
  0x15   : > { %p3355_p3 = pnand %p2285_p0, %p322_p2  ;;  %s3370_s15 = sshll.u32 %s3222_s14, 4  ;;  %s385_s15 = int_to_ptr.vmem [resolvable:$true] %s3370_s15 }
  0x16   : > { %s4463_s1 = sld [smem:[#allocation44_spill]] }
  0x17   : > { %s4460_s28 = scalar_select %p3355_p3, 1, 0 }
  0x18   : > { %p2489_p5 = pneg %p3355_p3 }
  0x19   : > { %4461 = sst [smem:[#allocation36_spill]] %s4460_s28 }
  0x1a   : > { %p3364_p6 = pnand %p2489_p5, %p4440_p1 }
  0x1c   : > { %s2790_s18 = scalar_lea.hbm %s4463_s1, 256  ;;  %p3380_p8 = pneg %p3364_p6 }
  0x1d   : > { %p2791_p7 = scmp.ne.s32.totalorder %s4463_s1, %s2790_s18  ;;  %p2797_p11 = scmp.lt.u32.totalorder %s2790_s18, %s4463_s1 }
  0x1f   : > { %p2793_p9 = pnand %p3380_p8, %p2791_p7 }
  0x21   : > { %p2794_p10 = pneg %p2793_p9 }
  0x23   : > { %p2799_p12 = pnand %p2797_p11, %p2794_p10 }
  0x25   : > { %2802 = shalt.err (!%p2799_p12)
}
  0x26   : > { %s2803_s16 = scalar_lea.vmem %s3353_s26, 256  ;;  %p2811_p5 = scmp.lt.s32.totalorder %s3353_s26, %s3353_s26 }
  0x27   : > { %p2804_p13 = scmp.ne.s32.totalorder %s3353_s26, %s2803_s16  ;;  %p2812_p4 = scmp.lt.s32.totalorder %s2803_s16, %s2803_s16 }
  0x29   : > { %p2806_p0 = pnand %p2804_p13, %p3380_p8  ;;  %p2813_p7 = por %p2812_p4, %p2811_p5 }
  0x2b   : > { %p2807_p2 = pneg %p2806_p0 }
  0x2d   : > { %p2814_p9 = pnand %p2813_p7, %p2807_p2 }
  0x2f   : > { %2817 = shalt.err (!%p2814_p9)
}
  0x30   : > { %s4438_s17 = smov 64   ;;  %s4442_s18 = smov 4  }
  0x31   : > { %2492 = dma.hbm_to_vmem [thread:$0]  (!%p3364_p6), %s4463_s1, 256, %s3353_s26, [#allocation10], %s4438_s17, %s4438_s17, %s4442_s18  }
  0x32   : > { %s4465_s3 = sld [smem:[#allocation45_spill]] }
  0x38   : > { %s2818_s16 = scalar_lea.hbm %s4465_s3, 64 }
  0x39   : > { %p2819_p4 = scmp.ne.s32.totalorder %s4465_s3, %s2818_s16  ;;  %p2825_p12 = scmp.lt.u32.totalorder %s2818_s16, %s4465_s3 }
  0x3b   : > { %p2821_p10 = pnand %p2819_p4, %p3380_p8 }
  0x3d   : > { %p2822_p11 = pneg %p2821_p10 }
  0x3f   : > { %p2827_p13 = pnand %p2825_p12, %p2822_p11 }
  0x41   : > { %2830 = shalt.err (!%p2827_p13)
}
  0x42   : > { %s2831_s26 = scalar_lea.vmem %s3368_s30, 64  ;;  %p2839_p7 = scmp.lt.s32.totalorder %s3368_s30, %s3368_s30 }
  0x43   : > { %p2832_p0 = scmp.ne.s32.totalorder %s3368_s30, %s2831_s26  ;;  %p2840_p9 = scmp.lt.s32.totalorder %s2831_s26, %s2831_s26 }
  0x45   : > { %p2834_p2 = pnand %p2832_p0, %p3380_p8  ;;  %p2841_p4 = por %p2840_p9, %p2839_p7 }
  0x47   : > { %p2835_p5 = pneg %p2834_p2 }
  0x49   : > { %p2842_p10 = pnand %p2841_p4, %p2835_p5 }
  0x4b   : > { %2845 = shalt.err (!%p2842_p10)
}
  0x4c   : > { %s3225_s12 = smov 16   ;;  %s3226_s0 = smov 1  }
  0x4d   : > { %2498 = dma.hbm_to_vmem [thread:$0]  (!%p3364_p6), %s4465_s3, 64, %s3368_s30, [#allocation13], %s3225_s12, %s3225_s12, %s3226_s0  }
  0x4e   : > { %s2846_s29 = scalar_lea.hbm %s4424_s5, 1024 }
  0x4f   : > { %p2847_p11 = scmp.ne.s32.totalorder %s4424_s5, %s2846_s29  ;;  %p2853_p0 = scmp.lt.u32.totalorder %s2846_s29, %s4424_s5 }
  0x51   : > { %p2849_p12 = pnand %p2847_p11, %p3380_p8 }
  0x53   : > { %p2850_p13 = pneg %p2849_p12 }
  0x55   : > { %p2855_p2 = pnand %p2853_p0, %p2850_p13 }
  0x57   : > { %2858 = shalt.err (!%p2855_p2)
}
  0x58   : > { %s2859_s27 = scalar_lea.vmem %s385_s15, 1024  ;;  %p2867_p4 = scmp.lt.s32.totalorder %s385_s15, %s385_s15 }
  0x59   : > { %p2860_p5 = scmp.ne.s32.totalorder %s385_s15, %s2859_s27  ;;  %p2868_p10 = scmp.lt.s32.totalorder %s2859_s27, %s2859_s27 }
  0x5b   : > { %p2862_p7 = pnand %p2860_p5, %p3380_p8  ;;  %p2869_p1 = por %p2868_p10, %p2867_p4 }
  0x5d   : > { %p2863_p9 = pneg %p2862_p7 }
  0x5f   : > { %p2870_p3 = pnand %p2869_p1, %p2863_p9 }
  0x61   : > { %2873 = shalt.err (!%p2870_p3)
}
  0x62   : > { %s4444_s30 = smov 128   ;;  %s3228_s12 = smov 8  }
  0x63   : > { %2504 = dma.hbm_to_vmem [thread:$0]  (!%p3364_p6), %s4424_s5, 1024, %s385_s15, [#allocation16], %s4444_s30, %s4444_s30, %s3228_s12  }
  0x64   : > { %s3229_s28 = smov [#allocation18]   ;;  %s3230_s20 = smov [#allocation21]  }
  0x65   : > { %s408_s19 = sshll.u32 %s3229_s28, 4  ;;  %s432_s29 = sshll.u32 %s3230_s20, 4  ;;  %s409_s19 = int_to_ptr.vmem [resolvable:$true] %s408_s19  ;;  %s433_s29 = int_to_ptr.vmem [resolvable:$true] %s432_s29 }
  0x66   : > { %s2874_s26 = scalar_lea.hbm %s4426_s7, 256 }
  0x67   : > { %p2875_p1 = scmp.ne.s32.totalorder %s4426_s7, %s2874_s26  ;;  %p2881_p12 = scmp.lt.u32.totalorder %s2874_s26, %s4426_s7 }
  0x69   : > { %p2877_p3 = pnand %p2875_p1, %p3380_p8 }
  0x6b   : > { %p2878_p11 = pneg %p2877_p3 }
  0x6d   : > { %p2883_p13 = pnand %p2881_p12, %p2878_p11 }
  0x6f   : > { %2886 = shalt.err (!%p2883_p13)
}
  0x70   : > { %s2887_s15 = scalar_lea.vmem %s409_s19, 256  ;;  %p2895_p7 = scmp.lt.s32.totalorder %s409_s19, %s409_s19 }
  0x71   : > { %p2888_p0 = scmp.ne.s32.totalorder %s409_s19, %s2887_s15  ;;  %p2896_p9 = scmp.lt.s32.totalorder %s2887_s15, %s2887_s15 }
  0x73   : > { %p2890_p2 = pnand %p2888_p0, %p3380_p8  ;;  %p2897_p4 = por %p2896_p9, %p2895_p7 }
  0x75   : > { %p2891_p5 = pneg %p2890_p2 }
  0x77   : > { %p2898_p10 = pnand %p2897_p4, %p2891_p5 }
  0x79   : > { %2901 = shalt.err (!%p2898_p10)
}
  0x7a   : > { %2510 = dma.hbm_to_vmem [thread:$0]  (!%p3364_p6), %s4426_s7, 256, %s409_s19, [#allocation19], %s4444_s30, %s4444_s30, %s3228_s12  }
  0x7b   : > { %s2902_s0 = scalar_lea.hbm %s4428_s9, 512 }
  0x7c   : > { %p2903_p1 = scmp.ne.s32.totalorder %s4428_s9, %s2902_s0  ;;  %p2909_p12 = scmp.lt.u32.totalorder %s2902_s0, %s4428_s9 }
  0x7e   : > { %p2905_p3 = pnand %p2903_p1, %p3380_p8 }
  0x80   : > { %p2906_p11 = pneg %p2905_p3 }
  0x82   : > { %p2911_p13 = pnand %p2909_p12, %p2906_p11 }
  0x84   : > { %2914 = shalt.err (!%p2911_p13)
}
  0x85   : > { %s2915_s26 = scalar_lea.vmem %s433_s29, 512  ;;  %p2923_p7 = scmp.lt.s32.totalorder %s433_s29, %s433_s29 }
  0x86   : > { %p2916_p0 = scmp.ne.s32.totalorder %s433_s29, %s2915_s26  ;;  %p2924_p9 = scmp.lt.s32.totalorder %s2915_s26, %s2915_s26 }
  0x88   : > { %p2918_p2 = pnand %p2916_p0, %p3380_p8  ;;  %p2925_p4 = por %p2924_p9, %p2923_p7 }
  0x8a   : > { %p2919_p5 = pneg %p2918_p2 }
  0x8c   : > { %p2926_p10 = pnand %p2925_p4, %p2919_p5 }
  0x8e   : > { %2929 = shalt.err (!%p2926_p10)
}
  0x8f   : > { %s4466_s19 = smov 4   ;;  %s4467_s27 = smov 64  }
  0x90   : > { %2516 = dma.hbm_to_vmem [thread:$0]  (!%p3364_p6), %s4428_s9, 512, %s433_s29, [#allocation22], %s4467_s27, %s4467_s27, %s4466_s19  }
  0x91   : > { %s3231_s3 = smov [#allocation11]   ;;  %s3232_s17 = smov [#allocation14]  }
  0x92   : > { %s347_s18 = sshll.u32 %s3231_s3, 4  ;;  %s374_s0 = sshll.u32 %s3232_s17, 4  ;;  %s348_s18 = int_to_ptr.vmem [resolvable:$true] %s347_s18  ;;  %s375_s0 = int_to_ptr.vmem [resolvable:$true] %s374_s0 }
  0x93   : > { %s2930_s14 = scalar_lea.hbm %s4421_s2, 256 }
  0x94   : > { %p2931_p1 = scmp.ne.s32.totalorder %s4421_s2, %s2930_s14  ;;  %p2937_p12 = scmp.lt.u32.totalorder %s2930_s14, %s4421_s2 }
  0x96   : > { %p2933_p3 = pnand %p2931_p1, %p3380_p8 }
  0x98   : > { %p2934_p11 = pneg %p2933_p3 }
  0x9a   : > { %p2939_p13 = pnand %p2937_p12, %p2934_p11 }
  0x9c   : > { %2942 = shalt.err (!%p2939_p13)
}
  0x9d   : > { %s2943_s29 = scalar_lea.vmem %s348_s18, 256  ;;  %p2951_p7 = scmp.lt.s32.totalorder %s348_s18, %s348_s18 }
  0x9e   : > { %p2944_p0 = scmp.ne.s32.totalorder %s348_s18, %s2943_s29  ;;  %p2952_p9 = scmp.lt.s32.totalorder %s2943_s29, %s2943_s29 }
  0xa0   : > { %p2946_p2 = pnand %p2944_p0, %p3380_p8  ;;  %p2953_p4 = por %p2952_p9, %p2951_p7 }
  0xa2   : > { %p2947_p5 = pneg %p2946_p2 }
  0xa4   : > { %p2954_p10 = pnand %p2953_p4, %p2947_p5 }
  0xa6   : > { %2957 = shalt.err (!%p2954_p10)
}
  0xa7   : > { %2495 = dma.hbm_to_vmem [thread:$0]  (!%p3364_p6), %s4421_s2, 256, %s348_s18, [#allocation10], %s4467_s27, %s4467_s27, %s4466_s19  }
  0xa8   : > { %s2958_s28 = scalar_lea.hbm %s4423_s4, 16 }
  0xa9   : > { %p2959_p1 = scmp.ne.s32.totalorder %s4423_s4, %s2958_s28  ;;  %p2965_p12 = scmp.lt.u32.totalorder %s2958_s28, %s4423_s4 }
  0xab   : > { %p2961_p3 = pnand %p2959_p1, %p3380_p8 }
  0xad   : > { %p2962_p11 = pneg %p2961_p3 }
  0xaf   : > { %p2967_p13 = pnand %p2965_p12, %p2962_p11 }
  0xb1   : > { %2970 = shalt.err (!%p2967_p13)
}
  0xb2   : > { %s2971_s15 = scalar_lea.vmem %s375_s0, 16  ;;  %s2978_s18 = scalar_lea.vmem %s375_s0, 32 }
  0xb3   : > { %p2972_p0 = scmp.ne.s32.totalorder %s375_s0, %s2971_s15  ;;  %p2979_p7 = scmp.lt.s32.totalorder %s375_s0, %s375_s0 }
  0xb4   : > { %p2980_p9 = scmp.lt.s32.totalorder %s2978_s18, %s2971_s15 }
  0xb5   : > { %p2974_p2 = pnand %p2972_p0, %p3380_p8 }
  0xb6   : > { %p2981_p4 = por %p2980_p9, %p2979_p7 }
  0xb7   : > { %p2975_p5 = pneg %p2974_p2 }
  0xb9   : > { %p2982_p10 = pnand %p2981_p4, %p2975_p5 }
  0xbb   : > { %2985 = shalt.err (!%p2982_p10)
}
  0xbc   : > { %2501 = dma.hbm_to_vmem [thread:$0]  (!%p3364_p6), %s4423_s4, 16, %s375_s0, [#allocation13]  }
  0xbd   : > { %s3233_s1 = smov [#allocation17]   ;;  %s3234_s17 = smov [#allocation20]  }
  0xbe   : > { %s398_s3 = sshll.u32 %s3233_s1, 4  ;;  %s422_s28 = sshll.u32 %s3234_s17, 4  ;;  %s399_s3 = int_to_ptr.vmem [resolvable:$true] %s398_s3  ;;  %s423_s28 = int_to_ptr.vmem [resolvable:$true] %s422_s28 }
  0xbf   : > { %s2986_s16 = scalar_lea.hbm %s4425_s6, 16 }
  0xc0   : > { %p2987_p1 = scmp.ne.s32.totalorder %s4425_s6, %s2986_s16  ;;  %p2993_p12 = scmp.lt.u32.totalorder %s2986_s16, %s4425_s6 }
  0xc2   : > { %p2989_p3 = pnand %p2987_p1, %p3380_p8 }
  0xc4   : > { %p2990_p11 = pneg %p2989_p3 }
  0xc6   : > { %p2995_p13 = pnand %p2993_p12, %p2990_p11 }
  0xc8   : > { %2998 = shalt.err (!%p2995_p13)
}
  0xc9   : > { %s2999_s0 = scalar_lea.vmem %s399_s3, 16  ;;  %s3006_s30 = scalar_lea.vmem %s399_s3, 32 }
  0xca   : > { %p3000_p0 = scmp.ne.s32.totalorder %s399_s3, %s2999_s0  ;;  %p3007_p7 = scmp.lt.s32.totalorder %s399_s3, %s399_s3 }
  0xcb   : > { %p3008_p9 = scmp.lt.s32.totalorder %s3006_s30, %s2999_s0 }
  0xcc   : > { %p3002_p2 = pnand %p3000_p0, %p3380_p8 }
  0xcd   : > { %p3009_p4 = por %p3008_p9, %p3007_p7 }
  0xce   : > { %p3003_p5 = pneg %p3002_p2 }
  0xd0   : > { %p3010_p10 = pnand %p3009_p4, %p3003_p5 }
  0xd2   : > { %3013 = shalt.err (!%p3010_p10)
}
  0xd3   : > { %2507 = dma.hbm_to_vmem [thread:$0]  (!%p3364_p6), %s4425_s6, 16, %s399_s3, [#allocation16]  }
  0xd4   : > { %s3014_s16 = scalar_lea.hbm %s4427_s8, 16 }
  0xd5   : > { %p3015_p1 = scmp.ne.s32.totalorder %s4427_s8, %s3014_s16  ;;  %p3021_p12 = scmp.lt.u32.totalorder %s3014_s16, %s4427_s8 }
  0xd7   : > { %p3017_p3 = pnand %p3015_p1, %p3380_p8 }
  0xd9   : > { %p3018_p11 = pneg %p3017_p3 }
  0xdb   : > { %p3023_p13 = pnand %p3021_p12, %p3018_p11 }
  0xdd   : > { %3026 = shalt.err (!%p3023_p13)
}
  0xde   : > { %s3027_s0 = scalar_lea.vmem %s423_s28, 16  ;;  %s3034_s3 = scalar_lea.vmem %s423_s28, 32 }
  0xdf   : > { %p3028_p0 = scmp.ne.s32.totalorder %s423_s28, %s3027_s0  ;;  %p3035_p7 = scmp.lt.s32.totalorder %s423_s28, %s423_s28 }
  0xe0   : > { %p3036_p9 = scmp.lt.s32.totalorder %s3034_s3, %s3027_s0 }
  0xe1   : > { %p3030_p2 = pnand %p3028_p0, %p3380_p8 }
  0xe2   : > { %p3037_p4 = por %p3036_p9, %p3035_p7 }
  0xe3   : > { %p3031_p5 = pneg %p3030_p2 }
  0xe5   : > { %p3038_p10 = pnand %p3037_p4, %p3031_p5 }
  0xe7   : > { %3041 = shalt.err (!%p3038_p10)
}
  0xe8   : > { %2513 = dma.hbm_to_vmem [thread:$0]  (!%p3364_p6), %s4427_s8, 16, %s423_s28, [#allocation19]  }
  0xe9   : > { %s3235_s17 = smov [#allocation23]   ;;  %s3236_s14 = smov [#allocation24]  }
  0xea   : > { %s445_s20 = sshll.u32 %s3235_s17, 4  ;;  %s459_s16 = sshll.u32 %s3236_s14, 4  ;;  %s446_s20 = int_to_ptr.vmem [resolvable:$true] %s445_s20  ;;  %s460_s16 = int_to_ptr.vmem [resolvable:$true] %s459_s16 }
  0xeb   : > { %s3042_s18 = scalar_lea.hbm %s4429_s10, 256 }
  0xec   : > { %p3043_p1 = scmp.ne.s32.totalorder %s4429_s10, %s3042_s18  ;;  %p3049_p12 = scmp.lt.u32.totalorder %s3042_s18, %s4429_s10 }
  0xee   : > { %p3045_p3 = pnand %p3043_p1, %p3380_p8 }
  0xf0   : > { %p3046_p11 = pneg %p3045_p3 }
  0xf2   : > { %p3051_p13 = pnand %p3049_p12, %p3046_p11 }
  0xf4   : > { %3054 = shalt.err (!%p3051_p13)
}
  0xf5   : > { %s3055_s28 = scalar_lea.vmem %s446_s20, 256  ;;  %p3063_p7 = scmp.lt.s32.totalorder %s446_s20, %s446_s20 }
  0xf6   : > { %p3056_p0 = scmp.ne.s32.totalorder %s446_s20, %s3055_s28  ;;  %p3064_p9 = scmp.lt.s32.totalorder %s3055_s28, %s3055_s28 }
  0xf8   : > { %p3058_p2 = pnand %p3056_p0, %p3380_p8  ;;  %p3065_p4 = por %p3064_p9, %p3063_p7 }
  0xfa   : > { %p3059_p5 = pneg %p3058_p2 }
  0xfc   : > { %p3066_p10 = pnand %p3065_p4, %p3059_p5 }
  0xfe   : > { %3069 = shalt.err (!%p3066_p10)
}
  0xff   : > { %2519 = dma.hbm_to_vmem [thread:$0]  (!%p3364_p6), %s4429_s10, 256, %s446_s20, [#allocation22], %s4467_s27, %s4467_s27, %s4466_s19  }
 0x100   : > { %s3070_s15 = scalar_lea.hbm %s4430_s11, 16 }
 0x101   : > { %p3071_p1 = scmp.ne.s32.totalorder %s4430_s11, %s3070_s15  ;;  %p3077_p12 = scmp.lt.u32.totalorder %s3070_s15, %s4430_s11 }
 0x103   : > { %p3073_p3 = pnand %p3071_p1, %p3380_p8 }
 0x105   : > { %p3074_p11 = pneg %p3073_p3 }
 0x107   : > { %p3079_p13 = pnand %p3077_p12, %p3074_p11 }
 0x109   : > { %3082 = shalt.err (!%p3079_p13)
}
 0x10a   : > { %s3083_s30 = scalar_lea.vmem %s460_s16, 16  ;;  %s3090_s19 = scalar_lea.vmem %s460_s16, 32 }
 0x10b   : > { %p3084_p0 = scmp.ne.s32.totalorder %s460_s16, %s3083_s30  ;;  %p3091_p7 = scmp.lt.s32.totalorder %s460_s16, %s460_s16 }
 0x10c   : > { %p3092_p9 = scmp.lt.s32.totalorder %s3090_s19, %s3083_s30 }
 0x10d   : > { %p3086_p2 = pnand %p3084_p0, %p3380_p8 }
 0x10e   : > { %p3093_p4 = por %p3092_p9, %p3091_p7 }
 0x10f   : > { %p3087_p5 = pneg %p3086_p2 }
 0x111   : > { %p3094_p10 = pnand %p3093_p4, %p3087_p5 }
 0x113   : > { %3097 = shalt.err (!%p3094_p10)
}
 0x114   : > { %s4468_s25 = sld [smem:[#allocation35_spill]]  ;;  %s2284_s28 = sadd.s32 4294967294, %s3218_s24  }
 0x115   : > { %2522 = dma.hbm_to_vmem [thread:$0]  (!%p3364_p6), %s4430_s11, 16, %s460_s16, [#allocation25]  }
 0x116   : > { %s3607_s13 = sadd.s32 1, %s3218_s24   ;;  %s41_s1 = sadd.s32 1, %s3214_s23 }
 0x117   : > { %s38_s17 = ssub.s32 %s3218_s24, %s3607_s13  ;;  %p48_p8 = scmp.ne.s32.totalorder %s3214_s23, %s3210_s22 }
 0x118   : > { %p39_p1 = scmp.eq.s32.totalorder %s38_s17, 0  ;;  %p49_p3 = scmp.eq.s32.totalorder %s3218_s24, 0 }
 0x119   : > { %p54_p11 = scmp.ne.s32.totalorder %s3210_s22, %s3206_s21  ;;  %p315_p5 = scmp.eq.s32.totalorder %s2284_s28, 1 }
 0x11a   : > { %p309_p12 = scmp.eq.s32.totalorder %s4468_s25, 1  ;;  %p50_p13 = por %p49_p3, %p48_p8 }
 0x11b   : > { %s3619_s14 = scalar_select %p39_p1, %s3214_s23, %s41_s1  }
 0x11c   : > { %p4469_p0 = scmp.eq.s32.totalorder %s4468_s25, 0  ;;  %p3627_p6 = por %p309_p12, %p48_p8 }
 0x11d   : > { %p2542_p7 = scmp.lt.s32.totalorder %s3218_s24, 2  ;;  %s470_s15 = sand.u32 1, %s3214_s23  }
 0x11e   : > { %p3623_p2 = por %p4469_p0, %p54_p11  ;;  %p3633_p9 = por %p315_p5, %p54_p11 }
 0x11f   : > { %s4471_s16 = scalar_select %p3627_p6, 1, 0 }
 0x120   : > { %s4472_s18 = scalar_select %p3633_p9, 1, 0 }
 0x121   : > { %s2298_s29 = sshll.u32 %s470_s15, 4  ;;  %s2344_s0 = sshll.u32 %s3218_s24, 8 }
 0x122   : > { %s4473_s19 = sld [smem:[#allocation43_spill]]  ;;  %s474_s20 = scalar_lea.vmem [#allocation6], %s2298_s29 }
 0x123   : > { %s481_s25 = sshll.u32 %s474_s20, 4  ;;  %p3643_p4 = pnand %p2542_p7, %p50_p13  ;;  %s3647_s25 = int_to_ptr.vmem [resolvable:$true] %s481_s25 }
 0x124   : > { %s3649_s1 = scalar_lea.sflag [#allocation7], %s470_s15 }
 0x125   : > { %p3100_p8 = pneg %p3643_p4 }
 0x128   : > { %s3641_s27 = scalar_lea.hbm %s4473_s19, %s2344_s0  ;;  %s3103_s3 = scalar_lea.hbm %s4473_s19, 512 }
 0x129   : > { %s3098_s17 = scalar_lea.hbm %s3641_s27, 256  ;;  %p3104_p11 = scmp.lt.u32.totalorder %s3641_s27, %s4473_s19 }
 0x12a   : > { %p3099_p10 = scmp.ne.s32.totalorder %s3641_s27, %s3098_s17  ;;  %p3105_p12 = scmp.lt.u32.totalorder %s3103_s3, %s3098_s17 }
 0x12b   : > { %p3107_p0 = scmp.lt.u32.totalorder %s3098_s17, %s3641_s27 }
 0x12c   : > { %p3101_p1 = pnand %p3100_p8, %p3099_p10  ;;  %p3106_p13 = por %p3105_p12, %p3104_p11 }
 0x12e   : > { %p3102_p3 = pneg %p3101_p1  ;;  %p3108_p5 = por %p3107_p0, %p3106_p13 }
 0x130   : > { %p3109_p7 = pnand %p3108_p5, %p3102_p3 }
 0x132   : > { %3112 = shalt.err (!%p3109_p7)
}
 0x133   : > { %s3113_s15 = scalar_lea.vmem %s3647_s25, 256  ;;  %s3237_s29 = smov [#allocation6]  }
 0x134   : > { %p3114_p10 = scmp.ne.s32.totalorder %s3647_s25, %s3113_s15  ;;  %s3118_s0 = sshll.u32 %s3237_s29, 4  ;;  %s3119_s0 = int_to_ptr.vmem [resolvable:$false] %s3118_s0 }
 0x135   : > { %s3120_s30 = scalar_lea.vmem %s3119_s0, 512  ;;  %p3121_p6 = scmp.lt.s32.totalorder %s3647_s25, %s3119_s0 }
 0x136   : > { %p3116_p1 = pnand %p3114_p10, %p3100_p8  ;;  %p3122_p11 = scmp.lt.s32.totalorder %s3120_s30, %s3113_s15 }
 0x138   : > { %p3117_p9 = pneg %p3116_p1  ;;  %p3123_p12 = por %p3122_p11, %p3121_p6 }
 0x13a   : > { %p3124_p13 = pnand %p3123_p12, %p3117_p9 }
 0x13c   : > { %3127 = shalt.err (!%p3124_p13)
}
 0x13d   : > { %s4475_s17 = smov 128   ;;  %s4476_s3 = sld [smem:[#allocation36_spill]] }
 0x13e   : > { %2526 = dma.hbm_to_vmem [thread:$0]  (!%p3643_p4), %s3641_s27, 256, %s3647_s25, %s3649_s1, %s4475_s17, %s4475_s17, %s3228_s12  }
 0x143   : > { %p4477_p8 = scmp.ne.s32.totalorder %s4476_s3, 0 }
 0x145   : > { %493 = sbr.rel (%p4477_p8) target bundleno = 1882 (0x75a), region = 68 }
 0x14c   : > { %s3683_s20 = sand.u32 1, %s3210_s22  }
 0x14d   : > { %s2302_s15 = sshll.u32 %s3683_s20, 4  ;;  %s496_s29 = scalar_lea.sflag [#allocation7], %s3683_s20 }
 0x14e   : > { %s499_s28 = scalar_lea.vmem [#allocation6], %s2302_s15 }
 0x14f   : > { %3173 = dma.done.wait (%p3623_p2), %s496_s29, 256  }
 0x150   : > { %3175 = vsyncadd (%p3623_p2), %s496_s29, 4294967040  ;;  %s4478_s12 = sld [smem:[#allocation35_spill]] }
 0x156   : > { %p4479_p6 = scmp.eq.s32.totalorder %s4478_s12, 0 }
 0x158   : > { %3177 = dma.done.wait (%p4479_p6), [#allocation10], 512   ;;  %p4480_p9 = pmov %p4479_p6 }
 0x159   : > { %p4481_p4 = pmov %p4479_p6 }
 0x15a   : > { %3179 = vsyncadd (%p4480_p9), [#allocation10], 4294966784 }
 0x15b   : > { %3181 = dma.done.wait (%p4481_p4), [#allocation13], 80   ;;  %p4482_p3 = pmov %p4481_p4 }
 0x15d   : > { %3183 = vsyncadd (%p4482_p3), [#allocation13], 4294967216  ;;  %p4483_p0 = pmov %p4482_p3 }
 0x15f   : > { %3185 = dma.done.wait (%p4483_p0), [#allocation16], 1040   ;;  %p4484_p5 = pmov %p4483_p0 }
 0x160   : > { %p4485_p2 = pmov %p4483_p0 }
 0x161   : > { %3187 = vsyncadd (%p4484_p5), [#allocation16], 4294966256 }
 0x162   : > { %3189 = dma.done.wait (%p4485_p2), [#allocation19], 272   ;;  %p4486_p7 = pmov %p4483_p0 }
 0x163   : > { %p4487_p10 = pmov %p4483_p0 }
 0x164   : > { %3191 = vsyncadd (%p4486_p7), [#allocation19], 4294967024 }
 0x165   : > { %3193 = dma.done.wait (%p4487_p10), [#allocation22], 768   ;;  %p4488_p1 = pmov %p4483_p0 }
 0x166   : > { %p4489_p11 = pmov %p4483_p0 }
 0x167   : > { %3195 = vsyncadd (%p4488_p1), [#allocation22], 4294966528 }
 0x168   : > { %3197 = dma.done.wait (%p4489_p11), [#allocation25], 16   ;;  %p4490_p12 = pmov %p4483_p0 }
 0x169   : > { %v4446_v0 = vmov 0.0   ;;  %vm3239_vm0 = vmmov 0   ;;  %v2691_v1 = vld [vmem:[#allocation9] sm:$0xff]   ;;  %v2692_v2 = vld [vmem:[#allocation9 + $0x8] sm:$0xff]   ;;  %vm604_vm1 = vcmask 261120   ;;  %vm706_vm2 = vcmask 523264  }
 0x16a   : > { %3199 = vsyncadd (%p4490_p12), [#allocation25], 4294967280  ;;  %2370 = vmatprep.subr.bf16.mxu0 %v4446_v0  ;;  %2374 = vmatprep.mubr.msk.bf16.mxu0 %vm3239_vm0, %v4446_v0  ;;  %v585_v3 = vld [vmem:[%s499_s28] sm:$0xff]  ;;  %v586_v4 = vld [vmem:[%s499_s28 + $0x8] sm:$0xff]  ;;  %892 = vst.msk [vmem:[#allocation5] sm:$0xff] %vm706_vm2, %v4446_v0  ;;  %vm712_vm3 = vcmask 1042432  }
 0x16b   : > { %2378 = vmatprep.subr.bf16.mxu1 %v4446_v0  ;;  %2382 = vmatprep.mubr.msk.bf16.mxu1 %vm3239_vm0, %v4446_v0  ;;  %v3724_v5 = vpack.c.bf16 %v586_v4, %v585_v3  ;;  %v800_v6 = vld [vmem:[#allocation15] sm:$0xff]  ;;  %v801_v7 = vld [vmem:[#allocation15 + $0x8] sm:$0xff]  ;;  %893 = vst.msk [vmem:[#allocation5 + $0x8] sm:$0xff] %vm706_vm2, %v4446_v0  ;;  %v802_v9 = vld [vmem:[#allocation15 + $0x10] sm:$0xff]  ;;  %vm736_vm4 = vcmask 1041408   ;;  %vm755_vm5 = vcmask 1040384  }
 0x16c   : > { %2371 = vmatpush3.bf16.msra.mxu0 %v2691_v1  ;;  %v2425_v8 = vpack.c.bf16 %v801_v7, %v800_v6  ;;  %v803_v10 = vld [vmem:[#allocation15 + $0x18] sm:$0xff]  ;;  %v804_v12 = vld [vmem:[#allocation15 + $0x20] sm:$0xff]  ;;  %v805_v13 = vld [vmem:[#allocation15 + $0x28] sm:$0xff]  ;;  %vm889_vm6 = vcmask 785408   ;;  %s3240_s26 = smov 64   ;;  %s3241_s27 = smov 48  }
 0x16d   : > { %2372 = vmatprep.subr.bf16.mxu0 %v4446_v0  ;;  %v2429_v11 = vpack.c.bf16 %v803_v10, %v802_v9  ;;  %v2433_v14 = vpack.c.bf16 %v805_v13, %v804_v12  ;;  %v806_v15 = vld [vmem:[#allocation15 + $0x30] sm:$0xff]  ;;  %v807_v16 = vld [vmem:[#allocation15 + $0x38] sm:$0xff]  ;;  %v3242_v9 = vmov 0   ;;  %vm1913_vm9 = vcmask 1043456   ;;  %s583_s25 = scalar_lea.vmem [#allocation26], %s2302_s15  ;;  %s2345_s0 = sshll.u32 %s4478_s12, 8 }
 0x16e   : > { %v2437_v17 = vpack.c.bf16 %v807_v16, %v806_v15  ;;  %v2321_v20 = vld [vmem:[#allocation12] ss:$0 sm:$0xff]  ;;  %v2322_v24 = vld [vmem:[#allocation14] ss:$0 sm:$0xff]  ;;  %v2323_v28 = vld [vmem:[#allocation12 + $0x1] ss:$0 sm:$0xff]  ;;  %2627 = vset.pattern.permute.xlu0 %v3242_v9 }
 0x16f   : > { %v2324_v34 = vld [vmem:[#allocation12 + $0x2] ss:$0 sm:$0xff]  ;;  %v2325_v41 = vld [vmem:[#allocation12 + $0x3] ss:$0 sm:$0xff]  ;;  %v2694_v15 = vld [vmem:[#allocation11 + $0x8] sm:$0xff]   ;;  %v3243_v16 = vmov 10  }
 0x170   : > { %2373 = vmatpush3.bf16.msra.mxu0 %v2692_v2  ;;  %vm1915_vm10 = vcmask 1044480   ;;  %vm1917_vm11 = vcmask 1045504   ;;  %vm1919_vm12 = vcmask 1046528   ;;  %s2106_s1 = sshll.u32 %s583_s25, 4  ;;  %vm2089_vm13 = vcmask 31744   ;;  %s4510_s3 = sld [smem:[#allocation46_spill]]  ;;  %s4370_s1 = int_to_ptr.vmem [resolvable:$true] %s2106_s1 }
 0x171   : > { %2426 = vmatprep.subr.bf16.mxu0 %v2425_v8  ;;  %s2093_s15 = scalar_lea.sflag [#allocation8], %s3683_s20  ;;  %s3128_s28 = scalar_lea.vmem %s4370_s1, 256 }
 0x172   : > { %p3129_p13 = scmp.ne.s32.totalorder %s4370_s1, %s3128_s28  ;;  %p4511_p8 = scmp.ne.s32.totalorder %s4471_s16, 0 }
 0x173   : > { %2375 = vmatmul.mubr.msk.bf16.vlgmr.msra.gmra.mrb[0].mxu0 %vm604_vm1, %v3724_v5  ;;  %s3259_s12 = smov [#allocation26]  }
 0x174   : > { %2428 = vmatpush3.bf16.msra.mxu0 %v2425_v8  ;;  %p3130_p6 = pnand %p3129_p13, %p4511_p8 }
 0x175   : > { %2430 = vmatprep.subr.bf16.mxu0 %v2429_v11 }
 0x176   : > { %s4375_s29 = scalar_lea.hbm %s4510_s3, %s2345_s0  ;;  %p3131_p9 = pneg %p3130_p6 }
 0x178   : > { %2432 = vmatpush3.bf16.msra.mxu0 %v2429_v11 }
 0x179   : > { %2434 = vmatprep.subr.bf16.mxu0 %v2433_v14 }
 0x17c   : > { %2436 = vmatpush3.bf16.msra.mxu0 %v2433_v14  ;;  %v2693_v14 = vld [vmem:[#allocation11] sm:$0xff]  }
 0x17d   : > { %2438 = vmatprep.subr.bf16.mxu0 %v2437_v17  ;;  %2379 = vmatpush3.bf16.msra.mxu1 %v2693_v14 }
 0x17e   : > { %2380 = vmatprep.subr.bf16.mxu1 %v4446_v0 }
 0x180   : > { %2440 = vmatpush3.bf16.msra.mxu0 %v2437_v17 }
 0x181   : > { %2417 = vmatprep.subr.bf16.mxu0 %v4446_v0  ;;  %2381 = vmatpush3.bf16.msra.mxu1 %v2694_v15 }
 0x182   : > { %2405 = vmatprep.subr.bf16.mxu1 %v4446_v0 }
 0x184   : > { %2383 = vmatmul.mubr.msk.bf16.vlgmr.msra.gmra.mrb[0].mxu1 %vm604_vm1, %v3724_v5 }
 0x185   : > { %2413 = vmatprep.mubr.msk.bf16.mxu1 %vm3239_vm0, %v4446_v0 }
 0x246   : > { %v642_v18 = vpop.f32.mrb[0].mxu0 }
 0x247   : > { %v713_v19 = vrot.slane %v642_v18, 5  ;;  %v737_v21 = vrot.slane %v642_v18, 6  ;;  %v756_v22 = vrot.slane %v642_v18, 7  ;;  %v2376_v23 = vpop.f32.mrb[1].mxu0  ;;  %v782_v48 = vmul.f32 %v2325_v41, %v642_v18 }
 0x248   : > { %v645_v25 = vpop.f32.mrb[2].mxu0  ;;  %v3248_v23 = vmov 8  }
 0x249   : > { %v718_v26 = vsel %vm712_vm3, 0.0, %v713_v19  ;;  %v742_v27 = vsel %vm736_vm4, 0.0, %v737_v21  ;;  %v714_v29 = vrot.slane %v645_v25, 5  ;;  %v2377_v30 = vpop.f32.mrb[3].mxu0  ;;  %v738_v32 = vrot.slane %v645_v25, 6 }
 0x24a   : > { %v726_v31 = vmul.f32 %v2321_v20, %v718_v26  ;;  %v761_v33 = vsel %vm755_vm5, 0.0, %v756_v22  ;;  %v757_v36 = vrot.slane %v645_v25, 7  ;;  %v751_v38 = vmul.f32 %v2323_v28, %v742_v27  ;;  %v2328_v30 = vld [vmem:[#allocation17] ss:$0 sm:$0xff] }
 0x24b   : > { %v715_v35 = vsel %vm712_vm3, %v713_v19, %v714_v29  ;;  %v739_v40 = vsel %vm736_vm4, %v737_v21, %v738_v32  ;;  %v770_v44 = vmul.f32 %v2324_v34, %v761_v33  ;;  %v783_v53 = vmul.f32 %v2325_v41, %v645_v25 }
 0x24c   : > { %v734_v37 = vadd.f32 %v2322_v24, %v726_v31  ;;  %v727_v39 = vmul.f32 %v2321_v20, %v715_v35  ;;  %v758_v42 = vsel %vm755_vm5, %v756_v22, %v757_v36  ;;  %v752_v46 = vmul.f32 %v2323_v28, %v739_v40 }
 0x24d   : > { %v771_v50 = vmul.f32 %v2324_v34, %v758_v42  ;;  %v3244_v19 = vmov 14   ;;  %v3245_v20 = vmov 1   ;;  %v3246_v21 = vmov 2  }
 0x24e   : > { %v753_v43 = vadd.f32 %v751_v38, %v734_v37  ;;  %v735_v45 = vadd.f32 %v2322_v24, %v727_v39  ;;  %v3247_v22 = vmov 3   ;;  %v3249_v24 = vmov 4  }
 0x24f   : > { %v3250_v25 = vmov 9   ;;  %v3251_v26 = vmov 5   ;;  %v3252_v27 = vmov 6   ;;  %v3253_v28 = vmov 7  }
 0x250   : > { %v772_v47 = vadd.f32 %v770_v44, %v753_v43  ;;  %v754_v49 = vadd.f32 %v752_v46, %v735_v45  ;;  %v3254_v29 = vmov 15   ;;  %v3255_v34 = vmov 11  }
 0x251   : > { %v3256_v35 = vmov 13   ;;  %v3257_v37 = vmov 12   ;;  %v3258_v45 = vmov 1966171168  }
 0x252   : > { %v784_v51 = vadd.f32 %v782_v48, %v772_v47  ;;  %v773_v52 = vadd.f32 %v771_v50, %v754_v49  ;;  %v1036_v46 = vunpack.c.l.s4 %v3258_v45  ;;  %v1038_v47 = vlaneseq  ;;  %v1310_v45 = vld [vmem:[#allocation5] sm:$0xff] }
 0x254   : > { %v786_v54 = vsub.f32 0.0, %v784_v51  ;;  %v785_v55 = vadd.f32 %v783_v53, %v773_v52  ;;  %v1037_v52 = vunpack.c.0.s8 %v1036_v46  ;;  %v3847_v53 = vshrl.u32 %v1038_v47, 7 }
 0x256   : > { %v788_v56 = vmul.f32 1.442695, %v786_v54  ;;  %v787_v57 = vsub.f32 0.0, %v785_v55 }
 0x258   : > { %2701 = vpow2.f32 %v788_v56  ;;  %v790_v58 = vmul.f32 1.442695, %v787_v57  ;;  %v3855_v57 = vsub.s32 %v1037_v52, %v3847_v53 }
 0x25a   : > { %2703 = vpow2.f32 %v790_v58 }
 0x262   : > { %v2702_v59 = vpop.eup %2701 }
 0x263   : > { %v792_v60 = vadd.f32 1.0, %v2702_v59 }
 0x264   : > { %v2704_v61 = vpop.eup %2703 }
 0x265   : > { %2705 = vrcp.f32 %v792_v60  ;;  %v793_v62 = vadd.f32 1.0, %v2704_v61 }
 0x267   : > { %2707 = vrcp.f32 %v793_v62  ;;  %v3868_v62 = vsub.s32 0, %v3847_v53 }
 0x26f   : > { %v2706_v63 = vpop.eup %2705 }
 0x270   : > { %v796_v1 = vmul.f32 %v2706_v63, %v784_v51 }
 0x271   : > { %v2708_v2 = vpop.eup %2707 }
 0x272   : > { %v797_v3 = vmul.f32 %v2708_v2, %v785_v55  ;;  %798 = vst.msk [vmem:[#allocation2] sm:$0xff] %vm706_vm2, %v796_v1  ;;  %2402 = vmatprep.mubr.msk.f32.mxu0 %vm706_vm2, %v796_v1  ;;  %v3875_v2 = vld [vmem:[#allocation18] sm:$0xff] }
 0x274   : > { %799 = vst.msk [vmem:[#allocation2 + $0x8] sm:$0xff] %vm706_vm2, %v797_v3  ;;  %2403 = vmatmul.mubr.msk.f32.vlgmr.msra.gmra.mrb[4].mxu0 %vm706_vm2, %v797_v3 }
 0x275   : > { %2421 = vmatprep.mubr.msk.bf16.mxu0 %vm3239_vm0, %v4446_v0 }
 0x347   : > { %v2404_v4 = vpop.f32.mrb[4].mxu0 }
 0x348   : > { %891 = vst.msk [vmem:[#allocation4 + $0x8] sm:$0xff] %vm889_vm6, %v2404_v4  ;;  %v880_v6 = vpop.f32.mrb[5].mxu0 }
 0x349   : > { %890 = vst.msk [vmem:[#allocation4] sm:$0xff] %vm889_vm6, %v880_v6 }
 0x34f   : > { %v3745_v7 = vld [vmem:[#allocation4 + $0x8] sm:$0xff] }
 0x350   : > { %958 = vrot.lane.b32.xlu0 %v3745_v7, %s3240_s26  ;;  %v3748_v8 = vld [vmem:[#allocation4] sm:$0xff]  ;;  %v3836_v42 = vadd.f32 %v2328_v30, %v3745_v7 }
 0x351   : > { %994 = vrot.lane.b32.xlu1 %v3748_v8, %s3241_s27  ;;  %v3798_v31 = vadd.f32 %v2328_v30, %v3748_v8  ;;  %v898_v30 = vld [vmem:[#allocation2] sm:$0xff] }
 0x352   : > { %v927_v48 = vand.u32 2147483647, %v3836_v42 }
 0x353   : > { %v926_v32 = vand.u32 2147483647, %v3798_v31  ;;  %v924_v56 = vmax.f32 %v3798_v31, 0.0 }
 0x354   : > { %996 = vrot.lane.b32.xlu0 %v3745_v7, %s3241_s27  ;;  %v929_v54 = vsub.f32 0.0, %v927_v48 }
 0x355   : > { %v928_v33 = vsub.f32 0.0, %v926_v32 }
 0x356   : > { %v932_v58 = vmul.f32 1.442695, %v929_v54 }
 0x357   : > { %v930_v36 = vmul.f32 1.442695, %v928_v33 }
 0x358   : > { %956 = vrot.lane.b32.xlu0 %v3748_v8, %s3240_s26  ;;  %s3132_s26 = sshll.u32 %s3259_s12, 4  ;;  %s3133_s26 = int_to_ptr.vmem [resolvable:$false] %s3132_s26 }
 0x359   : > { %2709 = vpow2.f32 %v930_v36  ;;  %s3134_s27 = scalar_lea.vmem %s3133_s26, 512  ;;  %p3135_p4 = scmp.lt.s32.totalorder %s4370_s1, %s3133_s26 }
 0x35a   : > { %p3136_p3 = scmp.lt.s32.totalorder %s3134_s27, %s3128_s28 }
 0x35c   : > { %p3137_p0 = por %p3136_p3, %p3135_p4 }
 0x35e   : > { %p3138_p5 = pnand %p3137_p0, %p3131_p9 }
 0x363   : > { %v2710_v38 = vpop.eup %2709 }
 0x364   : > { %v934_v39 = vadd.f32 1.0, %v2710_v38  ;;  %v937_v41 = vmul.f32 -0.5, %v2710_v38  ;;  %v940_v49 = vand.u32 2147483647, %v2710_v38 }
 0x366   : > { %2711 = vlog2.f32 %v934_v39  ;;  %v938_v44 = vadd.f32 1.0, %v937_v41  ;;  %vm941_vm7 = vcmp.lt.f32.partialorder %v940_v49, 0.0004427343  ;;  %v1365_v49 = vsub.s32 1, %v3847_v53 }
 0x367   : > { %2713 = vpow2.f32 %v932_v58 }
 0x368   : > { %v939_v51 = vmul.f32 %v2710_v38, %v938_v44 }
 0x370   : > { %v2712_v43 = vpop.eup %2711 }
 0x371   : > { %v936_v50 = vmul.f32 0.6931472, %v2712_v43  ;;  %v2714_v3 = vpop.eup %2713 }
 0x372   : > { %v943_v7 = vadd.f32 1.0, %v2714_v3  ;;  %v949_v38 = vand.u32 2147483647, %v2714_v3 }
 0x373   : > { %v942_v55 = vsel %vm941_vm7, %v939_v51, %v936_v50 }
 0x374   : > { %v952_v59 = vadd.f32 %v942_v55, %v924_v56  ;;  %2715 = vlog2.f32 %v943_v7  ;;  %vm3928_vm8 = vcmp.lt.f32.partialorder %v949_v38, 0.0004427343 }
 0x376   : > { %v1041_v60 = vrot.slane %v952_v59, %v3855_v57  ;;  %v3909_v33 = vmul.f32 %v952_v59, %v898_v30 }
 0x378   : > { %v1057_v61 = vrot.slane %v1041_v60, %v3855_v57  ;;  %v1049_v63 = vcombine.high %v1041_v60, %v1041_v60  ;;  %v3923_v46 = vrot.slane %v3909_v33, %v3868_v62  ;;  %v925_v60 = vmax.f32 %v3836_v42, 0.0 }
 0x379   : > { %v1402_v42 = vsub.s32 2, %v3847_v53 }
 0x37a   : > { %v3871_v1 = vrot.slane %v1057_v61, %v3868_v62  ;;  %v1071_v4 = vrot.slane %v1049_v63, %v3855_v57 }
 0x37c   : > { %v1212_v6 = vmul.f32 %v3871_v1, %v3875_v2  ;;  %v3885_v8 = vrot.slane %v1071_v4, %v3868_v62  ;;  %v1081_v14 = vcombine.high %v1071_v4, %v1071_v4 }
 0x37e   : > { %v2716_v32 = vpop.eup %2715 }
 0x37f   : > { %v945_v43 = vmul.f32 0.6931472, %v2716_v32 }
 0x3c2   : > { %v959_v10 = vpop.permute.xlu0 %958 }
 0x3c3   : > { %v995_v13 = vpop.permute.xlu1 %994 }
 0x3c6   : > { %v997_v11 = vpop.permute.xlu0 %996 }
 0x3ca   : > { %v957_v12 = vpop.permute.xlu0 %956 }
 0x3cb   : > { %962 = vxpose.xlu1.b32.start [1/2] (short) (narrow) %v957_v12, 16  ;;  %v1214_v12 = vmul.f32 %v3885_v8, %v3875_v2 }
 0x3cf   : > { %963 = vxpose.xlu1.b32.end [2/2] (short) (narrow) %v959_v10, 16  ;;  %v1244_v10 = vmul.f32 1.442695, %v1212_v6 }
 0x3d1   : > { %2717 = vpow2.f32 %v1244_v10 }
 0x3d3   : > { %1000 = vxpose.xlu1.b32.start [1/2] (short) (narrow) %v995_v13, 16 }
 0x3d7   : > { %1001 = vxpose.xlu1.b32.end [2/2] (short) (narrow) %v997_v11, 16  ;;  %v1034_v11 = vcombine.high %v952_v59, %v952_v59  ;;  %v699_v59 = vpop.f32.mrb[0].mxu1 }
 0x3d8   : > { %707 = vst.msk [vmem:[#allocation3] sm:$0xff] %vm706_vm2, %v699_v59 }
 0x3d9   : > { %v1048_v15 = vrot.slane %v1034_v11, %v3855_v57 }
 0x3db   : > { %v1050_v31 = vcombine.high %v1048_v15, %v1048_v15  ;;  %v2718_v41 = vpop.eup %2717 }
 0x3dc   : > { %v1312_v52 = vmul.f32 %v2718_v41, %v1310_v45 }
 0x3dd   : > { %v1078_v44 = vrot.slane %v1050_v31, %v3855_v57 }
 0x3df   : > { %v3940_v58 = vrot.slane %v1078_v44, %v3868_v62 }
 0x3f5   : > { %2637 = vset.pattern.permute.xlu1 %v3243_v16 }
 0x44b   : > { %v3761_v17 = vpop.trf.xlu1 }
 0x44c   : > { %1689 = vperm.xlu1 %2637, %v3761_v17   ;;  %1316 = vperm.xlu0 %2627, %v3761_v17  }
 0x44f   : > { %v3765_v18 = vpop.trf.xlu1 }
 0x450   : > { %2641 = vset.pattern.permute.xlu1 %v3244_v19  ;;  %2628 = vset.pattern.permute.xlu0 %v3245_v20 }
 0x451   : > { %1837 = vperm.xlu1 %2641, %v3761_v17   ;;  %1356 = vperm.xlu0 %2628, %v3761_v17  }
 0x453   : > { %v3771_v5 = vpop.trf.xlu1 }
 0x455   : > { %2642 = vset.pattern.permute.xlu1 %v3242_v9  ;;  %2629 = vset.pattern.permute.xlu0 %v3246_v21 }
 0x456   : > { %1393 = vperm.xlu0 %2629, %v3761_v17   ;;  %1334 = vperm.xlu1 %2642, %v3771_v5  }
 0x457   : > { %v3833_v40 = vpop.trf.xlu1 }
 0x45a   : > { %2630 = vset.pattern.permute.xlu0 %v3247_v22  ;;  %2644 = vset.pattern.permute.xlu1 %v3248_v23 }
 0x45b   : > { %1430 = vperm.xlu0 %2630, %v3761_v17   ;;  %1631 = vperm.xlu1 %2644, %v3771_v5  }
 0x45f   : > { %2631 = vset.pattern.permute.xlu0 %v3249_v24  ;;  %2645 = vset.pattern.permute.xlu1 %v3250_v25 }
 0x460   : > { %1467 = vperm.xlu0 %2631, %v3761_v17   ;;  %1668 = vperm.xlu1 %2645, %v3771_v5  }
 0x464   : > { %2632 = vset.pattern.permute.xlu0 %v3251_v26  ;;  %2647 = vset.pattern.permute.xlu1 %v3243_v16 }
 0x465   : > { %1504 = vperm.xlu0 %2632, %v3761_v17   ;;  %1705 = vperm.xlu1 %2647, %v3771_v5  }
 0x469   : > { %2633 = vset.pattern.permute.xlu0 %v3252_v27  ;;  %2648 = vset.pattern.permute.xlu1 %v3247_v22 }
 0x46a   : > { %1541 = vperm.xlu0 %2633, %v3761_v17   ;;  %1446 = vperm.xlu1 %2648, %v3771_v5  }
 0x46e   : > { %2634 = vset.pattern.permute.xlu0 %v3253_v28  ;;  %2650 = vset.pattern.permute.xlu1 %v3254_v29 }
 0x46f   : > { %1578 = vperm.xlu0 %2634, %v3761_v17   ;;  %1874 = vperm.xlu1 %2650, %v3761_v17  }
 0x473   : > { %2635 = vset.pattern.permute.xlu0 %v3248_v23  ;;  %2651 = vset.pattern.permute.xlu1 %v3249_v24 }
 0x474   : > { %1615 = vperm.xlu0 %2635, %v3761_v17   ;;  %1483 = vperm.xlu1 %2651, %v3771_v5  }
 0x478   : > { %2636 = vset.pattern.permute.xlu0 %v3250_v25  ;;  %2653 = vset.pattern.permute.xlu1 %v3251_v26 }
 0x479   : > { %1652 = vperm.xlu0 %2636, %v3761_v17   ;;  %1520 = vperm.xlu1 %2653, %v3771_v5  }
 0x47d   : > { %2638 = vset.pattern.permute.xlu0 %v3255_v34  ;;  %2654 = vset.pattern.permute.xlu1 %v3256_v35 }
 0x47e   : > { %1726 = vperm.xlu0 %2638, %v3761_v17   ;;  %1816 = vperm.xlu1 %2654, %v3771_v5  }
 0x482   : > { %2639 = vset.pattern.permute.xlu0 %v3257_v37  ;;  %2656 = vset.pattern.permute.xlu1 %v3244_v19 }
 0x483   : > { %1763 = vperm.xlu0 %2639, %v3761_v17   ;;  %1853 = vperm.xlu1 %2656, %v3771_v5  }
 0x487   : > { %2640 = vset.pattern.permute.xlu0 %v3256_v35  ;;  %2657 = vset.pattern.permute.xlu1 %v3253_v28 }
 0x488   : > { %1800 = vperm.xlu0 %2640, %v3761_v17   ;;  %1594 = vperm.xlu1 %2657, %v3771_v5   ;;  %v1248_v17 = vmul.f32 1.442695, %v1214_v12  ;;  %v1222_v12 = vmul.f32 %v3940_v58, %v3875_v2 }
 0x48a   : > { %2719 = vpow2.f32 %v1248_v17  ;;  %v1082_v17 = vcombine.high %v1078_v44, %v1078_v44 }
 0x48c   : > { %2643 = vset.pattern.permute.xlu0 %v3245_v20  ;;  %2661 = vset.pattern.permute.xlu1 %v3247_v22 }
 0x48d   : > { %1372 = vperm.xlu0 %2643, %v3771_v5   ;;  %1434 = vperm.xlu1 %2661, %v3765_v18  }
 0x491   : > { %2646 = vset.pattern.permute.xlu0 %v3246_v21  ;;  %2670 = vset.pattern.permute.xlu1 %v3257_v37 }
 0x492   : > { %1409 = vperm.xlu0 %2646, %v3771_v5   ;;  %1767 = vperm.xlu1 %2670, %v3765_v18  }
 0x494   : > { %v2720_v4 = vpop.eup %2719 }
 0x496   : > { %2649 = vset.pattern.permute.xlu0 %v3255_v34  ;;  %2671 = vset.pattern.permute.xlu1 %v3256_v35 }
 0x497   : > { %1742 = vperm.xlu0 %2649, %v3771_v5   ;;  %1804 = vperm.xlu1 %2671, %v3765_v18  }
 0x49b   : > { %2652 = vset.pattern.permute.xlu0 %v3257_v37  ;;  %2673 = vset.pattern.permute.xlu1 %v3242_v9 }
 0x49c   : > { %1779 = vperm.xlu0 %2652, %v3771_v5   ;;  %1339 = vperm.xlu1 %2673, %v3833_v40  }
 0x4a0   : > { %2655 = vset.pattern.permute.xlu0 %v3252_v27  ;;  %2674 = vset.pattern.permute.xlu1 %v3245_v20 }
 0x4a1   : > { %1557 = vperm.xlu0 %2655, %v3771_v5   ;;  %1376 = vperm.xlu1 %2674, %v3833_v40  }
 0x4a5   : > { %2658 = vset.pattern.permute.xlu0 %v3242_v9  ;;  %2676 = vset.pattern.permute.xlu1 %v3250_v25  ;;  %v1079_v9 = vcombine.high %v1057_v61, %v1057_v61 }
 0x4a6   : > { %1321 = vperm.xlu0 %2658, %v3765_v18   ;;  %1672 = vperm.xlu1 %2676, %v3833_v40  }
 0x4a7   : > { %v3894_v13 = vrot.slane %v1079_v9, %v3868_v62 }
 0x4aa   : > { %2659 = vset.pattern.permute.xlu0 %v3245_v20  ;;  %2677 = vset.pattern.permute.xlu1 %v3246_v21  ;;  %v1216_v20 = vmul.f32 %v3894_v13, %v3875_v2 }
 0x4ab   : > { %1360 = vperm.xlu0 %2659, %v3765_v18   ;;  %1413 = vperm.xlu1 %2677, %v3833_v40  }
 0x4ac   : > { %v1252_v36 = vmul.f32 1.442695, %v1216_v20 }
 0x4ae   : > { %2721 = vpow2.f32 %v1252_v36  ;;  %v1439_v36 = vsub.s32 3, %v3847_v53 }
 0x4af   : > { %2660 = vset.pattern.permute.xlu0 %v3246_v21  ;;  %2679 = vset.pattern.permute.xlu1 %v3247_v22  ;;  %v946_v21 = vmul.f32 -0.5, %v2714_v3  ;;  %v3904_v22 = vrot.slane %v1081_v14, %v3868_v62 }
 0x4b0   : > { %1397 = vperm.xlu0 %2660, %v3765_v18   ;;  %1450 = vperm.xlu1 %2679, %v3833_v40   ;;  %v3993_v51 = vrot.slane %v3909_v33, %v1439_v36 }
 0x4b4   : > { %2662 = vset.pattern.permute.xlu0 %v3249_v24  ;;  %2680 = vset.pattern.permute.xlu1 %v3255_v34 }
 0x4b5   : > { %1471 = vperm.xlu0 %2662, %v3765_v18   ;;  %1746 = vperm.xlu1 %2680, %v3833_v40  }
 0x4b8   : > { %v2722_v20 = vpop.eup %2721 }
 0x4b9   : > { %2663 = vset.pattern.permute.xlu0 %v3251_v26  ;;  %2682 = vset.pattern.permute.xlu1 %v3249_v24  ;;  %v1064_v24 = vrot.slane %v1048_v15, %v3855_v57 }
 0x4ba   : > { %1508 = vperm.xlu0 %2663, %v3765_v18   ;;  %1487 = vperm.xlu1 %2682, %v3833_v40  }
 0x4bb   : > { %v3916_v39 = vrot.slane %v1064_v24, %v3868_v62  ;;  %v1080_v61 = vcombine.high %v1064_v24, %v1064_v24  ;;  %v3973_v24 = vrot.slane %v3909_v33, %v1402_v42 }
 0x4bd   : > { %v1220_v55 = vmul.f32 %v3916_v39, %v3875_v2  ;;  %v3962_v14 = vrot.slane %v1080_v61, %v3868_v62 }
 0x4be   : > { %2664 = vset.pattern.permute.xlu0 %v3252_v27  ;;  %2683 = vset.pattern.permute.xlu1 %v3257_v37  ;;  %v947_v37 = vadd.f32 1.0, %v946_v21 }
 0x4bf   : > { %1545 = vperm.xlu0 %2664, %v3765_v18   ;;  %1783 = vperm.xlu1 %2683, %v3833_v40   ;;  %v1260_v10 = vmul.f32 1.442695, %v1220_v55  ;;  %v1224_v41 = vmul.f32 %v3962_v14, %v3875_v2 }
 0x4c0   : > { %v948_v47 = vmul.f32 %v2714_v3, %v947_v37  ;;  %v2384_v3 = vpop.f32.mrb[1].mxu1  ;;  %v1264_v37 = vmul.f32 1.442695, %v1222_v12 }
 0x4c1   : > { %v1268_v59 = vmul.f32 1.442695, %v1224_v41 }
 0x4c2   : > { %v951_v56 = vsel %vm3928_vm8, %v948_v47, %v945_v43  ;;  %v3984_v43 = vrot.slane %v1082_v17, %v3868_v62  ;;  %v702_v47 = vpop.f32.mrb[2].mxu1  ;;  %v4450_v17 = vsub.s32 5, %v3847_v53 }
 0x4c3   : > { %2665 = vset.pattern.permute.xlu0 %v3253_v28  ;;  %2685 = vset.pattern.permute.xlu1 %v3256_v35  ;;  %v1218_v35 = vmul.f32 %v3904_v22, %v3875_v2  ;;  %708 = vst.msk [vmem:[#allocation3 + $0x8] sm:$0xff] %vm706_vm2, %v702_v47 }
 0x4c4   : > { %1582 = vperm.xlu0 %2665, %v3765_v18   ;;  %1820 = vperm.xlu1 %2685, %v3833_v40   ;;  %v1226_v61 = vmul.f32 %v3984_v43, %v3875_v2  ;;  %v4030_v47 = vrot.slane %v3909_v33, %v4450_v17 }
 0x4c5   : > { %v1256_v50 = vmul.f32 1.442695, %v1218_v35 }
 0x4c7   : > { %2723 = vpow2.f32 %v1256_v50 }
 0x4c8   : > { %2666 = vset.pattern.permute.xlu0 %v3248_v23  ;;  %2686 = vset.pattern.permute.xlu1 %v3252_v27  ;;  %2725 = vpow2.f32 %v1260_v10 }
 0x4c9   : > { %1619 = vperm.xlu0 %2666, %v3765_v18   ;;  %1561 = vperm.xlu1 %2686, %v3833_v40   ;;  %2727 = vpow2.f32 %v1264_v37 }
 0x4ca   : > { %2729 = vpow2.f32 %v1268_v59 }
 0x4cb   : > { %v1317_v48 = vpop.permute.xlu0 %1316  ;;  %v3925_v27 = vpop.permute.xlu1 %1689 }
 0x4cc   : > { %v1328_v54 = vmul.f32 %v3923_v46, %v1317_v48 }
 0x4cd   : > { %2667 = vset.pattern.permute.xlu0 %v3250_v25  ;;  %2688 = vset.pattern.permute.xlu1 %v3253_v28  ;;  %v3949_v25 = vrot.slane %v3909_v33, %v1365_v49  ;;  %v3951_v28 = vadd.f32 %v951_v56, %v925_v60  ;;  %v4451_v56 = vsub.s32 4, %v3847_v53 }
 0x4ce   : > { %v1330_v63 = vadd.f32 %v1328_v54, %v1312_v52  ;;  %1656 = vperm.xlu0 %2667, %v3765_v18   ;;  %1598 = vperm.xlu1 %2688, %v3833_v40  }
 0x4cf   : > { %v1090_v21 = vrot.slane %v3951_v28, %v3855_v57 }
 0x4d0   : > { %v1357_v6 = vpop.permute.xlu0 %1356  ;;  %v1353_v7 = vmul.f32 %v2720_v4, %v1330_v63  ;;  %v3954_v9 = vpop.permute.xlu1 %1837 }
 0x4d1   : > { %v1367_v11 = vmul.f32 %v3949_v25, %v1357_v6  ;;  %v1106_v44 = vrot.slane %v1090_v21, %v3855_v57  ;;  %v2724_v48 = vpop.eup %2723  ;;  %v1098_v50 = vcombine.high %v1090_v21, %v1090_v21 }
 0x4d2   : > { %2668 = vset.pattern.permute.xlu0 %v3243_v16  ;;  %2690 = vset.pattern.permute.xlu1 %v3254_v29  ;;  %v2726_v6 = vpop.eup %2725 }
 0x4d3   : > { %v3964_v15 = vadd.f32 %v1367_v11, %v1353_v7  ;;  %1693 = vperm.xlu0 %2668, %v3765_v18   ;;  %1894 = vperm.xlu1 %2690, %v3833_v40   ;;  %v1120_v3 = vrot.slane %v1098_v50, %v3855_v57  ;;  %v4012_v7 = vrot.slane %v3909_v33, %v4451_v56  ;;  %v2728_v41 = vpop.eup %2727 }
 0x4d4   : > { %v1128_v37 = vcombine.high %v1106_v44, %v1106_v44 }
 0x4d5   : > { %v1394_v30 = vpop.permute.xlu0 %1393  ;;  %v1390_v31 = vmul.f32 %v2722_v20, %v3964_v15  ;;  %v1335_v32 = vpop.permute.xlu1 %1334  ;;  %v1272_v20 = vmul.f32 1.442695, %v1226_v61 }
 0x4d6   : > { %v1404_v35 = vmul.f32 %v3973_v24, %v1394_v30  ;;  %v3978_v38 = vmul.f32 %v1335_v32, %v1330_v63  ;;  %v4004_v63 = vrot.slane %v1106_v44, %v3868_v62  ;;  %v4024_v32 = vrot.slane %v1120_v3, %v3868_v62 }
 0x4d7   : > { %2669 = vset.pattern.permute.xlu0 %v3255_v34  ;;  %v2385_v34 = vpop.f32.mrb[3].mxu1  ;;  %2731 = vpow2.f32 %v1272_v20  ;;  %v4041_v61 = vrot.slane %v1128_v37, %v3868_v62  ;;  %v4448_v20 = vsub.s32 7, %v3847_v53 }
 0x4d8   : > { %v3987_v45 = vadd.f32 %v1404_v35, %v1390_v31  ;;  %1730 = vperm.xlu0 %2669, %v3765_v18   ;;  %v1228_v30 = vmul.f32 %v4004_v63, %v3875_v2  ;;  %v1083_v31 = vcombine.high %v3951_v28, %v3951_v28  ;;  %v1230_v59 = vmul.f32 %v4024_v32, %v3875_v2 }
 0x4da   : > { %v1431_v52 = vpop.permute.xlu0 %1430  ;;  %v1427_v54 = vmul.f32 %v2724_v48, %v3987_v45  ;;  %v3997_v55 = vpop.permute.xlu1 %1631  ;;  %v4449_v48 = vsub.s32 6, %v3847_v53  ;;  %v1280_v37 = vmul.f32 1.442695, %v1230_v59 }
 0x4db   : > { %v1441_v60 = vmul.f32 %v3993_v51, %v1431_v52 }
 0x4dc   : > { %2672 = vset.pattern.permute.xlu0 %v3244_v19 }
 0x4dd   : > { %v1443_v4 = vadd.f32 %v1441_v60, %v1427_v54  ;;  %1841 = vperm.xlu0 %2672, %v3765_v18   ;;  %v1097_v54 = vrot.slane %v1083_v31, %v3855_v57  ;;  %v1130_v60 = vcombine.high %v1120_v3, %v1120_v3 }
 0x4df   : > { %v1468_v10 = vpop.permute.xlu0 %1467  ;;  %v1464_v11 = vmul.f32 %v2726_v6, %v1443_v4  ;;  %v4014_v12 = vpop.permute.xlu1 %1668  ;;  %v1113_v3 = vrot.slane %v1097_v54, %v3855_v57 }
 0x4e0   : > { %v1478_v21 = vmul.f32 %v4012_v7, %v1468_v10  ;;  %v2730_v10 = vpop.eup %2729 }
 0x4e1   : > { %2675 = vset.pattern.permute.xlu0 %v3248_v23  ;;  %v1276_v23 = vmul.f32 1.442695, %v1228_v30 }
 0x4e2   : > { %v1480_v35 = vadd.f32 %v1478_v21, %v1464_v11  ;;  %1635 = vperm.xlu0 %2675, %v3833_v40   ;;  %v4047_v11 = vrot.slane %v3909_v33, %v4449_v48  ;;  %v1099_v21 = vcombine.high %v1097_v54, %v1097_v54  ;;  %v2732_v54 = vpop.eup %2731 }
 0x4e3   : > { %2733 = vpow2.f32 %v1276_v23  ;;  %v4060_v23 = vld [vmem:[#allocation2 + $0x8] sm:$0xff] }
 0x4e4   : > { %v1505_v50 = vpop.permute.xlu0 %1504  ;;  %v1501_v34 = vmul.f32 %v2728_v41, %v1480_v35  ;;  %v4033_v52 = vpop.permute.xlu1 %1705  ;;  %4493 = vst [vmem:[#allocation37_spill] sm:$0xff] %v4060_v23  ;;  %v4067_v59 = vmul.f32 %v3951_v28, %v4060_v23  ;;  %2735 = vpow2.f32 %v1280_v37 }
 0x4e5   : > { %v1515_v44 = vmul.f32 %v4030_v47, %v1505_v50 }
 0x4e6   : > { %2678 = vset.pattern.permute.xlu0 %v3243_v16 }
 0x4e7   : > { %v1517_v6 = vadd.f32 %v1515_v44, %v1501_v34  ;;  %1709 = vperm.xlu0 %2678, %v3833_v40   ;;  %v1232_v34 = vmul.f32 %v4041_v61, %v3875_v2  ;;  %v4057_v44 = vrot.slane %v1130_v60, %v3868_v62  ;;  %v4075_v60 = vrot.slane %v1113_v3, %v3868_v62 }
 0x4e9   : > { %v1542_v30 = vpop.permute.xlu0 %1541  ;;  %v1538_v16 = vmul.f32 %v2730_v10, %v1517_v6  ;;  %v1447_v31 = vpop.permute.xlu1 %1446  ;;  %v1127_v10 = vrot.slane %v1099_v21, %v3855_v57  ;;  %v1234_v28 = vmul.f32 %v4057_v44, %v3875_v2  ;;  %v1236_v57 = vmul.f32 %v4075_v60, %v3875_v2 }
 0x4ea   : > { %v1552_v41 = vmul.f32 %v4047_v11, %v1542_v30  ;;  %v4052_v50 = vmul.f32 %v1447_v31, %v1443_v4  ;;  %v4072_v4 = vrot.slane %v3909_v33, %v4448_v20  ;;  %v1284_v31 = vmul.f32 1.442695, %v1232_v34 }
 0x4eb   : > { %2681 = vset.pattern.permute.xlu0 %v3254_v29  ;;  %v1129_v33 = vcombine.high %v1113_v3, %v1113_v3  ;;  %v1288_v34 = vmul.f32 1.442695, %v1234_v28  ;;  %v4095_v20 = vrot.slane %v1127_v10, %v3868_v62  ;;  %v1292_v48 = vmul.f32 1.442695, %v1236_v57 }
 0x4ec   : > { %v4062_v0 = vadd.f32 %v1552_v41, %v1538_v16  ;;  %1878 = vperm.xlu0 %2681, %v3765_v18   ;;  %2737 = vpow2.f32 %v1284_v31  ;;  %v1131_v28 = vcombine.high %v1127_v10, %v1127_v10 }
 0x4ed   : > { %v2734_v21 = vpop.eup %2733  ;;  %v4103_v17 = vrot.slane %v1129_v33, %v3868_v62  ;;  %2739 = vpow2.f32 %v1288_v34  ;;  %v1238_v31 = vmul.f32 %v4095_v20, %v3875_v2 }
 0x4ee   : > { %v1579_v30 = vpop.permute.xlu0 %1578  ;;  %v1575_v16 = vmul.f32 %v2732_v54, %v4062_v0  ;;  %v4079_v18 = vpop.permute.xlu1 %1874  ;;  %v4092_v54 = vrot.slane %v4067_v59, %v3868_v62  ;;  %2741 = vpow2.f32 %v1292_v48 }
 0x4ef   : > { %v1589_v41 = vmul.f32 %v4072_v4, %v1579_v30  ;;  %v1240_v10 = vmul.f32 %v4103_v17, %v3875_v2  ;;  %v1296_v34 = vmul.f32 1.442695, %v1238_v31 }
 0x4f0   : > { %2684 = vset.pattern.permute.xlu0 %v3251_v26 }
 0x4f1   : > { %v4085_v37 = vadd.f32 %v1589_v41, %v1575_v16  ;;  %1524 = vperm.xlu0 %2684, %v3833_v40   ;;  %2743 = vpow2.f32 %v1296_v34 }
 0x4f3   : > { %v1616_v30 = vpop.permute.xlu0 %1615  ;;  %v1612_v26 = vmul.f32 %v2734_v21, %v4085_v37  ;;  %v1484_v3 = vpop.permute.xlu1 %1483 }
 0x4f4   : > { %v1626_v16 = vmul.f32 %v4092_v54, %v1616_v30  ;;  %v4099_v41 = vmul.f32 %v1484_v3, %v1480_v35  ;;  %v2736_v21 = vpop.eup %2735  ;;  %v4111_v35 = vrot.slane %v4067_v59, %v1365_v49  ;;  %v4123_v49 = vrot.slane %v1131_v28, %v3868_v62 }
 0x4f5   : > { %2687 = vset.pattern.permute.xlu0 %v3244_v19  ;;  %v1300_v62 = vmul.f32 1.442695, %v1240_v10 }
 0x4f6   : > { %v1628_v56 = vadd.f32 %v1626_v16, %v1612_v26  ;;  %1857 = vperm.xlu0 %2687, %v3833_v40   ;;  %v1242_v28 = vmul.f32 %v4123_v49, %v3875_v2  ;;  %v4496_v2 = vsub.s32 4, %v3847_v53 }
 0x4f7   : > { %2745 = vpow2.f32 %v1300_v62 }
 0x4f8   : > { %v4114_v19 = vmul.f32 %v3997_v55, %v1628_v56  ;;  %v1653_v57 = vpop.permute.xlu0 %1652  ;;  %v1649_v33 = vmul.f32 %v2736_v21, %v1628_v56  ;;  %v1521_v30 = vpop.permute.xlu1 %1520  ;;  %v4128_v55 = vrot.slane %v4067_v59, %v1402_v42  ;;  %v4141_v42 = vrot.slane %v4067_v59, %v1439_v36 }
 0x4f9   : > { %v1663_v26 = vmul.f32 %v4111_v35, %v1653_v57  ;;  %v4117_v40 = vmul.f32 %v1521_v30, %v1517_v6  ;;  %v2738_v6 = vpop.eup %2737  ;;  %v4150_v34 = vrot.slane %v4067_v59, %v4496_v2 }
 0x4fa   : > { %2689 = vset.pattern.permute.xlu0 %v3254_v29  ;;  %v1700_v29 = vmul.f32 %v4128_v55, %v3925_v27  ;;  %v2740_v21 = vpop.eup %2739 }
 0x4fb   : > { %4494 = vst [vmem:[#allocation38_spill] sm:$0xff] %v4117_v40  ;;  %v1665_v56 = vadd.f32 %v1663_v26, %v1649_v33  ;;  %1890 = vperm.xlu0 %2689, %v3771_v5   ;;  %v1304_v26 = vmul.f32 1.442695, %v1242_v28  ;;  %v2742_v36 = vpop.eup %2741 }
 0x4fc   : > { %v2744_v28 = vpop.eup %2743 }
 0x4fd   : > { %v4134_v48 = vmul.f32 %v4014_v12, %v1665_v56  ;;  %v1686_v3 = vmul.f32 %v2738_v6, %v1665_v56  ;;  %v1727_v16 = vpop.permute.xlu0 %1726  ;;  %v1817_v31 = vpop.permute.xlu1 %1816  ;;  %2747 = vpow2.f32 %v1304_v26 }
 0x4fe   : > { %v1737_v27 = vmul.f32 %v4141_v42, %v1727_v16 }
 0x4ff   : > { %v1702_v5 = vadd.f32 %v1700_v29, %v1686_v3  ;;  %v4497_v29 = vsub.s32 5, %v3847_v53 }
 0x501   : > { %v1723_v57 = vmul.f32 %v2740_v21, %v1702_v5  ;;  %v4145_v12 = vmul.f32 %v4033_v52, %v1702_v5  ;;  %v4156_v3 = vrot.slane %v4067_v59, %v4497_v29  ;;  %v2746_v2 = vpop.eup %2745 }
 0x502   : > { %v1764_v33 = vpop.permute.xlu0 %1763  ;;  %v1854_v30 = vpop.permute.xlu1 %1853 }
 0x503   : > { %4495 = vst [vmem:[#allocation39_spill] sm:$0xff] %v4145_v12  ;;  %v1739_v10 = vadd.f32 %v1737_v27, %v1723_v57  ;;  %v1774_v6 = vmul.f32 %v4150_v34, %v1764_v33  ;;  %v4498_v57 = vsub.s32 6, %v3847_v53 }
 0x505   : > { %v1760_v56 = vmul.f32 %v2742_v36, %v1739_v10  ;;  %v4164_v27 = vrot.slane %v4067_v59, %v4498_v57 }
 0x507   : > { %v1776_v52 = vadd.f32 %v1774_v6, %v1760_v56  ;;  %v1801_v16 = vpop.permute.xlu0 %1800  ;;  %v4158_v62 = vpop.permute.xlu1 %1594  ;;  %v1848_v26 = vmul.f32 %v4164_v27, %v3954_v9 }
 0x508   : > { %v1811_v5 = vmul.f32 %v4156_v3, %v1801_v16  ;;  %v4175_v16 = vld [vmem:[#allocation18 + $0x8] sm:$0xff] }
 0x509   : > { %v1797_v21 = vmul.f32 %v2744_v28, %v1776_v52  ;;  %v4499_v28 = vsub.s32 7, %v3847_v53 }
 0x50b   : > { %v1813_v33 = vadd.f32 %v1811_v5, %v1797_v21  ;;  %v4180_v57 = vrot.slane %v4067_v59, %v4499_v28  ;;  %v2748_v21 = vpop.eup %2747 }
 0x50c   : > { %v1373_v36 = vpop.permute.xlu0 %1372  ;;  %v4166_v23 = vpop.permute.xlu1 %1434 }
 0x50d   : > { %v4170_v56 = vmul.f32 %v1817_v31, %v1813_v33  ;;  %v1834_v6 = vmul.f32 %v2746_v2, %v1813_v33  ;;  %v4173_v29 = vmul.f32 %v1373_v36, %v3964_v15  ;;  %4500 = vst [vmem:[#allocation40_spill] sm:$0xff] %v4180_v57  ;;  %v1885_v40 = vmul.f32 %v4180_v57, %v4079_v18  ;;  %v2695_v2 = vld [vmem:[#allocation21] sm:$0xff]   ;;  %v2696_v36 = vld [vmem:[#allocation21 + $0x8] sm:$0xff]  }
 0x50e   : > { %v1213_v31 = vmul.f32 %v3871_v1, %v4175_v16  ;;  %2406 = vmatpush3.bf16.msra.mxu1 %v2695_v2 }
 0x50f   : > { %v1850_v5 = vadd.f32 %v1848_v26, %v1834_v6  ;;  %v4503_v26 = vmov 0.0  }
 0x510   : > { %2407 = vmatprep.subr.bf16.mxu1 %v4503_v26  ;;  %v1246_v18 = vmul.f32 1.442695, %v1213_v31  ;;  %v2699_v31 = vld [vmem:[#allocation23] sm:$0xff]  }
 0x511   : > { %v1410_v12 = vpop.permute.xlu0 %1409  ;;  %v4184_v9 = vpop.permute.xlu1 %1767  ;;  %v4188_v15 = vmul.f32 %v1854_v30, %v1850_v5  ;;  %v1871_v33 = vmul.f32 %v2748_v21, %v1850_v5  ;;  %v1215_v30 = vmul.f32 %v3885_v8, %v4175_v16  ;;  %v2698_v21 = vld [vmem:[#allocation21 + $0x18] sm:$0xff]   ;;  %2418 = vmatpush3.bf16.msra.mxu0 %v2699_v31 }
 0x512   : > { %v4191_v53 = vmul.f32 %v1410_v12, %v3987_v45  ;;  %2408 = vmatpush3.bf16.msra.mxu1 %v2696_v36  ;;  %v2697_v45 = vld [vmem:[#allocation21 + $0x10] sm:$0xff]   ;;  %2749 = vpow2.f32 %v1246_v18  ;;  %2419 = vmatprep.subr.bf16.mxu0 %v4503_v26 }
 0x513   : > { %4501 = vst [vmem:[#allocation41_spill] sm:$0xff] %v4188_v15  ;;  %v4193_v59 = vadd.f32 %v1885_v40, %v1871_v33  ;;  %2409 = vmatprep.subr.bf16.mxu1 %v4503_v26  ;;  %v1250_v5 = vmul.f32 1.442695, %v1215_v30  ;;  %v1311_v30 = vld [vmem:[#allocation5 + $0x8] sm:$0xff] }
 0x515   : > { %4502 = vst [vmem:[#allocation42_spill] sm:$0xff] %v4193_v59  ;;  %1908 = vst.msk [vmem:[#allocation5] sm:$0xff] %vm706_vm2, %v4193_v59  ;;  %2751 = vpow2.f32 %v1250_v5 }
 0x516   : > { %v1743_v6 = vpop.permute.xlu0 %1742  ;;  %v4200_v1 = vpop.permute.xlu1 %1804  ;;  %2410 = vmatpush3.bf16.msra.mxu1 %v2697_v45 }
 0x517   : > { %v4198_v28 = vmul.f32 %v1743_v6, %v1739_v10  ;;  %v1217_v10 = vmul.f32 %v3894_v13, %v4175_v16  ;;  %2411 = vmatprep.subr.bf16.mxu1 %v4503_v26  ;;  %v1221_v26 = vmul.f32 %v3916_v39, %v4175_v16 }
 0x519   : > { %v1254_v36 = vmul.f32 1.442695, %v1217_v10 }
 0x51a   : > { %2412 = vmatpush3.bf16.msra.mxu1 %v2698_v21 }
 0x51b   : > { %v1780_v40 = vpop.permute.xlu0 %1779  ;;  %v1340_v12 = vpop.permute.xlu1 %1339  ;;  %2753 = vpow2.f32 %v1254_v36 }
 0x51c   : > { %v4205_v33 = vmul.f32 %v1780_v40, %v1776_v52  ;;  %v1219_v52 = vmul.f32 %v3904_v22, %v4175_v16  ;;  %v2750_v6 = vpop.eup %2749  ;;  %v1223_v22 = vmul.f32 %v3940_v58, %v4175_v16 }
 0x51d   : > { %v1313_v5 = vmul.f32 %v2750_v6, %v1311_v30 }
 0x51e   : > { %v1258_v40 = vmul.f32 1.442695, %v1219_v52  ;;  %v1344_v52 = vsel %vm706_vm2, %v3978_v38, 0.0  ;;  %v1227_v38 = vmul.f32 %v3984_v43, %v4175_v16  ;;  %v1418_v43 = vsel %vm706_vm2, %v4191_v53, 0.0 }
 0x51f   : > { %v2752_v10 = vpop.eup %2751 }
 0x520   : > { %v1558_v8 = vpop.permute.xlu0 %1557  ;;  %v1377_v2 = vpop.permute.xlu1 %1376  ;;  %2755 = vpow2.f32 %v1258_v40 }
 0x521   : > { %v4212_v18 = vmul.f32 %v1558_v8, %v4062_v0  ;;  %v1262_v0 = vmul.f32 1.442695, %v1221_v26 }
 0x523   : > { %2757 = vpow2.f32 %v1262_v0 }
 0x525   : > { %v1322_v13 = vpop.permute.xlu0 %1321  ;;  %v4216_v45 = vpop.permute.xlu1 %1672 }
 0x526   : > { %v1329_v21 = vmul.f32 %v3923_v46, %v1322_v13  ;;  %v1225_v46 = vmul.f32 %v3962_v14, %v4175_v16  ;;  %v1266_v13 = vmul.f32 1.442695, %v1223_v22  ;;  %v2754_v40 = vpop.eup %2753 }
 0x528   : > { %v1331_v31 = vadd.f32 %v1329_v21, %v1313_v5  ;;  %2759 = vpow2.f32 %v1266_v13 }
 0x52a   : > { %v1343_v8 = vmul.f32 %v1340_v12, %v1331_v31  ;;  %v1361_v59 = vpop.permute.xlu0 %1360  ;;  %v1354_v36 = vmul.f32 %v2752_v10, %v1331_v31  ;;  %v1414_v15 = vpop.permute.xlu1 %1413  ;;  %v1381_v31 = vsel %vm706_vm2, %v4173_v29, 0.0  ;;  %v1274_v29 = vmul.f32 1.442695, %v1227_v38 }
 0x52b   : > { %v1368_v57 = vmul.f32 %v3949_v25, %v1361_v59  ;;  %v1270_v59 = vmul.f32 1.442695, %v1225_v46  ;;  %v2756_v22 = vpop.eup %2755 }
 0x52c   : > { %v1345_v39 = vsel %vm706_vm2, %v1343_v8, 0.0  ;;  %v1442_v8 = vmul.f32 %v3993_v51, %v4166_v23 }
 0x52d   : > { %v1346_v6 = vadd.f32 %v1345_v39, %v1344_v52  ;;  %v1370_v30 = vadd.f32 %v1368_v57, %v1354_v36  ;;  %2761 = vpow2.f32 %v1270_v59  ;;  %v2758_v51 = vpop.eup %2757 }
 0x52e   : > { %2763 = vpow2.f32 %v1274_v29 }
 0x52f   : > { %v1347_v58 = vrot.slane %v1346_v6, 4  ;;  %v1380_v12 = vmul.f32 %v1377_v2, %v1370_v30  ;;  %v1398_v26 = vpop.permute.xlu0 %1397  ;;  %v1391_v5 = vmul.f32 %v2754_v40, %v1370_v30  ;;  %v1451_v21 = vpop.permute.xlu1 %1450 }
 0x530   : > { %v1405_v25 = vmul.f32 %v3973_v24, %v1398_v26 }
 0x531   : > { %v1348_v14 = vadd.f32 %v1347_v58, %v1346_v6  ;;  %v1382_v57 = vsel %vm706_vm2, %v1380_v12, 0.0  ;;  %v1229_v6 = vmul.f32 %v4004_v63, %v4175_v16 }
 0x532   : > { %v1383_v10 = vadd.f32 %v1382_v57, %v1381_v31  ;;  %v1407_v0 = vadd.f32 %v1405_v25, %v1391_v5  ;;  %v1455_v25 = vsel %vm706_vm2, %v4052_v50, 0.0 }
 0x533   : > { %v1349_v2 = vrot.slane %v1348_v14, 2  ;;  %v1278_v31 = vmul.f32 1.442695, %v1229_v6 }
 0x534   : > { %v1384_v36 = vrot.slane %v1383_v10, 4  ;;  %v1417_v24 = vmul.f32 %v1414_v15, %v1407_v0  ;;  %v1428_v52 = vmul.f32 %v2756_v22, %v1407_v0  ;;  %v1472_v39 = vpop.permute.xlu0 %1471  ;;  %v4237_v46 = vpop.permute.xlu1 %1746  ;;  %v1231_v15 = vmul.f32 %v4024_v32, %v4175_v16 }
 0x535   : > { %v1350_v30 = vadd.f32 %v1349_v2, %v1348_v14  ;;  %v1479_v53 = vmul.f32 %v4012_v7, %v1472_v39  ;;  %v2760_v22 = vpop.eup %2759  ;;  %v1233_v7 = vmul.f32 %v4041_v61, %v4175_v16  ;;  %2765 = vpow2.f32 %v1278_v31 }
 0x536   : > { %v1385_v13 = vadd.f32 %v1384_v36, %v1383_v10  ;;  %v1419_v40 = vsel %vm706_vm2, %v1417_v24, 0.0  ;;  %v1444_v58 = vadd.f32 %v1442_v8, %v1428_v52  ;;  %v1492_v52 = vsel %vm706_vm2, %v4099_v41, 0.0 }
 0x537   : > { %v1420_v23 = vadd.f32 %v1419_v40, %v1418_v43  ;;  %v1351_v14 = vrot.slane %v1350_v30, 1  ;;  %v2762_v61 = vpop.eup %2761 }
 0x538   : > { %v1386_v12 = vrot.slane %v1385_v13, 2  ;;  %v1454_v26 = vmul.f32 %v1451_v21, %v1444_v58  ;;  %v1465_v5 = vmul.f32 %v2758_v51, %v1444_v58  ;;  %v1282_v21 = vmul.f32 1.442695, %v1231_v15 }
 0x539   : > { %v1421_v59 = vrot.slane %v1420_v23, 4  ;;  %v1509_v63 = vpop.permute.xlu0 %1508  ;;  %v1488_v38 = vpop.permute.xlu1 %1487  ;;  %v1352_v29 = vadd.f32 %v1351_v14, %v1350_v30 }
 0x53a   : > { %v1387_v57 = vadd.f32 %v1386_v12, %v1385_v13  ;;  %v1456_v10 = vsel %vm706_vm2, %v1454_v26, 0.0  ;;  %v1481_v0 = vadd.f32 %v1479_v53, %v1465_v5  ;;  %v1516_v50 = vmul.f32 %v4030_v47, %v1509_v63 }
 0x53b   : > { %v1422_v32 = vadd.f32 %v1421_v59, %v1420_v23  ;;  %v1457_v2 = vadd.f32 %v1456_v10, %v1455_v25  ;;  %2767 = vpow2.f32 %v1282_v21  ;;  %v2764_v59 = vpop.eup %2763  ;;  %v1286_v10 = vmul.f32 1.442695, %v1233_v7 }
 0x53c   : > { %v1388_v8 = vrot.slane %v1387_v57, 1  ;;  %v1502_v36 = vmul.f32 %v2760_v22, %v1481_v0  ;;  %v1491_v24 = vmul.f32 %v1488_v38, %v1481_v0  ;;  %v1235_v22 = vmul.f32 %v4057_v44, %v4175_v16 }
 0x53d   : > { %v1423_v39 = vrot.slane %v1422_v32, 2  ;;  %v1458_v43 = vrot.slane %v1457_v2, 4  ;;  %2769 = vpow2.f32 %v1286_v10  ;;  %v1237_v7 = vmul.f32 %v4075_v60, %v4175_v16 }
 0x53e   : > { %v1389_v6 = vadd.f32 %v1388_v8, %v1387_v57  ;;  %v4255_v13 = vadd.f32 %v1516_v50, %v1502_v36  ;;  %v1493_v40 = vsel %vm706_vm2, %v1491_v24, 0.0  ;;  %v1546_v58 = vpop.permute.xlu0 %1545  ;;  %v4258_v51 = vpop.permute.xlu1 %1783  ;;  %v1601_v60 = vmul.f32 %v4158_v62, %v4085_v37 }
 0x53f   : > { %v1424_v23 = vadd.f32 %v1423_v39, %v1422_v32  ;;  %v1459_v15 = vadd.f32 %v1458_v43, %v1457_v2  ;;  %v1494_v47 = vadd.f32 %v1493_v40, %v1492_v52  ;;  %v1553_v12 = vmul.f32 %v4047_v11, %v1546_v58  ;;  %v2766_v21 = vpop.eup %2765 }
 0x540   : > { %v1910_v41 = vsel %vm755_vm5, %v1352_v29, %v1389_v6  ;;  %v1539_v26 = vmul.f32 %v2762_v61, %v4255_v13  ;;  %v1290_v29 = vmul.f32 1.442695, %v1235_v22  ;;  %v1566_v58 = vsel %vm706_vm2, %v4212_v18, 0.0 }
 0x541   : > { %v1425_v5 = vrot.slane %v1424_v23, 1  ;;  %v1460_v30 = vrot.slane %v1459_v15, 2  ;;  %v1495_v53 = vrot.slane %v1494_v47, 4  ;;  %v1294_v18 = vmul.f32 1.442695, %v1237_v7 }
 0x542   : > { %v1555_v25 = vadd.f32 %v1553_v12, %v1539_v26  ;;  %2771 = vpow2.f32 %v1290_v29 }
 0x543   : > { %v1426_v63 = vadd.f32 %v1425_v5, %v1424_v23  ;;  %v1461_v38 = vadd.f32 %v1460_v30, %v1459_v15  ;;  %v1496_v31 = vadd.f32 %v1495_v53, %v1494_v47  ;;  %v1583_v14 = vpop.permute.xlu0 %1582  ;;  %v4263_v57 = vpop.permute.xlu1 %1820  ;;  %v1239_v30 = vmul.f32 %v4095_v20, %v4175_v16 }
 0x544   : > { %v1576_v0 = vmul.f32 %v2764_v59, %v1555_v25  ;;  %v1590_v11 = vmul.f32 %v4072_v4, %v1583_v14  ;;  %v1603_v59 = vsel %vm706_vm2, %v1601_v60, 0.0  ;;  %2773 = vpow2.f32 %v1294_v18 }
 0x545   : > { %v1911_v32 = vsel %vm736_vm4, %v1910_v41, %v1426_v63  ;;  %v1462_v2 = vrot.slane %v1461_v38, 1  ;;  %v1497_v8 = vrot.slane %v1496_v31, 2  ;;  %v2768_v47 = vpop.eup %2767  ;;  %v1241_v63 = vmul.f32 %v4103_v17, %v4175_v16 }
 0x546   : > { %v1592_v36 = vadd.f32 %v1590_v11, %v1576_v0  ;;  %v1298_v14 = vmul.f32 1.442695, %v1239_v30  ;;  %v1677_v11 = vsel %vm706_vm2, %v4134_v48, 0.0  ;;  %v1243_v17 = vmul.f32 %v4123_v49, %v4175_v16 }
 0x547   : > { %v1463_v50 = vadd.f32 %v1462_v2, %v1461_v38  ;;  %v1498_v24 = vadd.f32 %v1497_v8, %v1496_v31  ;;  %v2770_v38 = vpop.eup %2769  ;;  %v1640_v18 = vsel %vm706_vm2, %v4114_v19, 0.0 }
 0x548   : > { %v1620_v52 = vpop.permute.xlu0 %1619  ;;  %v1613_v39 = vmul.f32 %v2766_v21, %v1592_v36  ;;  %v1562_v43 = vpop.permute.xlu1 %1561  ;;  %2775 = vpow2.f32 %v1298_v14 }
 0x549   : > { %v1912_v4 = vsel %vm712_vm3, %v1911_v32, %v1463_v50  ;;  %v1499_v6 = vrot.slane %v1498_v24, 1  ;;  %v1627_v44 = vmul.f32 %v4092_v54, %v1620_v52  ;;  %v1565_v40 = vmul.f32 %v1562_v43, %v1555_v25  ;;  %v4303_v52 = vld [vmem:[#allocation3] sm:$0xff] }
 0x54a   : > { %v1302_v32 = vmul.f32 1.442695, %v1241_v63  ;;  %v902_v49 = vsub.f32 0.0, %v4303_v52 }
 0x54b   : > { %v1500_v61 = vadd.f32 %v1499_v6, %v1498_v24  ;;  %v4275_v23 = vadd.f32 %v1627_v44, %v1613_v39  ;;  %v1567_v15 = vsel %vm706_vm2, %v1565_v40, 0.0  ;;  %v1306_v24 = vmul.f32 1.442695, %v1243_v17 }
 0x54c   : > { %v4280_v12 = vadd.f32 %v1567_v15, %v1566_v58  ;;  %2777 = vpow2.f32 %v1302_v32  ;;  %v1775_v39 = vmul.f32 %v4150_v34, %v4184_v9  ;;  %v1812_v58 = vmul.f32 %v4156_v3, %v4200_v1 }
 0x54d   : > { %v4283_v41 = vsel %vm1913_vm9, %v1912_v4, %v1500_v61  ;;  %v1657_v54 = vpop.permute.xlu0 %1656  ;;  %v1650_v26 = vmul.f32 %v2768_v47, %v4275_v23  ;;  %v1599_v5 = vpop.permute.xlu1 %1598  ;;  %2779 = vpow2.f32 %v1306_v24  ;;  %v904_v15 = vmul.f32 1.442695, %v902_v49 }
 0x54e   : > { %v1664_v53 = vmul.f32 %v4111_v35, %v1657_v54  ;;  %v1602_v25 = vmul.f32 %v1599_v5, %v1592_v36  ;;  %v2772_v36 = vpop.eup %2771  ;;  %v1788_v47 = vsel %vm706_vm2, %v4205_v33, 0.0  ;;  %v1569_v24 = vrot.slane %v4280_v12, 4 }
 0x54f   : > { %v2774_v48 = vpop.eup %2773  ;;  %2781 = vpow2.f32 %v904_v15 }
 0x550   : > { %v1666_v37 = vadd.f32 %v1664_v53, %v1650_v26  ;;  %v1604_v62 = vsel %vm706_vm2, %v1602_v25, 0.0  ;;  %v4324_v53 = vld [vmem:[#allocation3 + $0x8] sm:$0xff] }
 0x551   : > { %v4293_v31 = vadd.f32 %v1604_v62, %v1603_v59 }
 0x552   : > { %v1676_v10 = vmul.f32 %v4216_v45, %v1666_v37  ;;  %v1694_v0 = vpop.permute.xlu0 %1693  ;;  %v1687_v20 = vmul.f32 %v2770_v38, %v1666_v37  ;;  %v2776_v44 = vpop.eup %2775 }
 0x553   : > { %v1701_v35 = vmul.f32 %v4128_v55, %v1694_v0 }
 0x554   : > { %v1678_v22 = vsel %vm706_vm2, %v1676_v10, 0.0 }
 0x555   : > { %v1679_v2 = vadd.f32 %v1678_v22, %v1677_v11  ;;  %v1703_v8 = vadd.f32 %v1701_v35, %v1687_v20 }
 0x556   : > { %v2778_v26 = vpop.eup %2777 }
 0x557   : > { %v1731_v21 = vpop.permute.xlu0 %1730  ;;  %v1724_v50 = vmul.f32 %v2772_v36, %v1703_v8  ;;  %v1680_v4 = vrot.slane %v1679_v2, 4  ;;  %v4504_v36 = vld [vmem:[#allocation39_spill] sm:$0xff] }
 0x558   : > { %v1738_v45 = vmul.f32 %v4141_v42, %v1731_v21  ;;  %v1751_v42 = vsel %vm706_vm2, %v4198_v28, 0.0  ;;  %v1714_v21 = vsel %vm706_vm2, %v4504_v36, 0.0 }
 0x55a   : > { %v1740_v55 = vadd.f32 %v1738_v45, %v1724_v50 }
 0x55c   : > { %v1750_v43 = vmul.f32 %v4237_v46, %v1740_v55  ;;  %v1761_v7 = vmul.f32 %v2774_v48, %v1740_v55  ;;  %v1842_v29 = vpop.permute.xlu0 %1841  ;;  %v1681_v46 = vadd.f32 %v1680_v4, %v1679_v2  ;;  %v1606_v55 = vrot.slane %v4293_v31, 4  ;;  %v4505_v48 = vld [vmem:[#allocation40_spill] sm:$0xff] }
 0x55e   : > { %v1752_v16 = vsel %vm706_vm2, %v1750_v43, 0.0  ;;  %v1777_v6 = vadd.f32 %v1775_v39, %v1761_v7  ;;  %v1682_v33 = vrot.slane %v1681_v46, 2 }
 0x55f   : > { %v1753_v40 = vadd.f32 %v1752_v16, %v1751_v42 }
 0x560   : > { %v1787_v34 = vmul.f32 %v4258_v51, %v1777_v6  ;;  %v1798_v9 = vmul.f32 %v2776_v44, %v1777_v6  ;;  %v1849_v51 = vmul.f32 %v4164_v27, %v1842_v29  ;;  %v903_v27 = vsub.f32 0.0, %v4324_v53 }
 0x561   : > { %v1636_v61 = vpop.permute.xlu0 %1635  ;;  %v1754_v25 = vrot.slane %v1753_v40, 4  ;;  %v1683_v20 = vadd.f32 %v1682_v33, %v1681_v46 }
 0x562   : > { %v1789_v60 = vsel %vm706_vm2, %v1787_v34, 0.0  ;;  %v1814_v28 = vadd.f32 %v1812_v58, %v1798_v9  ;;  %v1639_v54 = vmul.f32 %v1636_v61, %v4275_v23  ;;  %v1825_v23 = vsel %vm706_vm2, %v4170_v56, 0.0 }
 0x563   : > { %v1790_v5 = vadd.f32 %v1789_v60, %v1788_v47  ;;  %v1755_v35 = vadd.f32 %v1754_v25, %v1753_v40  ;;  %v906_v45 = vmul.f32 1.442695, %v903_v27  ;;  %v1684_v43 = vrot.slane %v1683_v20, 1  ;;  %v4506_v60 = vld [vmem:[#allocation38_spill] sm:$0xff] }
 0x564   : > { %v1824_v3 = vmul.f32 %v4263_v57, %v1814_v28  ;;  %v1835_v1 = vmul.f32 %v2778_v26, %v1814_v28  ;;  %v1641_v30 = vsel %vm706_vm2, %v1639_v54, 0.0  ;;  %v2780_v57 = vpop.eup %2779  ;;  %v1570_v40 = vadd.f32 %v1569_v24, %v4280_v12 }
 0x565   : > { %v1642_v59 = vadd.f32 %v1641_v30, %v1640_v18  ;;  %v1791_v37 = vrot.slane %v1790_v5, 4  ;;  %v1756_v7 = vrot.slane %v1755_v35, 2  ;;  %v2782_v16 = vpop.eup %2781  ;;  %2783 = vpow2.f32 %v906_v45  ;;  %v4508_v45 = vld [vmem:[#allocation42_spill] sm:$0xff] }
 0x566   : > { %v1826_v62 = vsel %vm706_vm2, %v1824_v3, 0.0  ;;  %v1851_v19 = vadd.f32 %v1849_v51, %v1835_v1  ;;  %v1710_v63 = vpop.permute.xlu0 %1709  ;;  %v1607_v58 = vadd.f32 %v1606_v55, %v4293_v31  ;;  %v1685_v46 = vadd.f32 %v1684_v43, %v1683_v20 }
 0x567   : > { %v1827_v38 = vadd.f32 %v1826_v62, %v1825_v23  ;;  %v1643_v14 = vrot.slane %v1642_v59, 4  ;;  %v1713_v10 = vmul.f32 %v1710_v63, %v1703_v8  ;;  %v1792_v32 = vadd.f32 %v1791_v37, %v1790_v5  ;;  %v4507_v63 = vld [vmem:[#allocation41_spill] sm:$0xff] }
 0x568   : > { %v1872_v0 = vmul.f32 %v2780_v57, %v1851_v19  ;;  %v1757_v61 = vadd.f32 %v1756_v7, %v1755_v35  ;;  %v1529_v28 = vsel %vm706_vm2, %v4506_v60, 0.0  ;;  %v908_v31 = vadd.f32 1.0, %v2782_v16 }
 0x569   : > { %v1828_v11 = vrot.slane %v1827_v38, 4  ;;  %v1644_v22 = vadd.f32 %v1643_v14, %v1642_v59  ;;  %v1715_v2 = vsel %vm706_vm2, %v1713_v10, 0.0  ;;  %v1793_v4 = vrot.slane %v1792_v32, 2  ;;  %v1895_v14 = vpop.permute.xlu1 %1894 }
 0x56a   : > { %v1716_v8 = vadd.f32 %v1715_v2, %v1714_v21  ;;  %v1571_v3 = vrot.slane %v1570_v40, 2  ;;  %v1608_v30 = vrot.slane %v1607_v58, 2  ;;  %v1758_v33 = vrot.slane %v1757_v61, 1 }
 0x56b   : > { %v1829_v56 = vadd.f32 %v1828_v11, %v1827_v38  ;;  %v1645_v17 = vrot.slane %v1644_v22, 2  ;;  %v1879_v50 = vpop.permute.xlu0 %1878  ;;  %v1794_v54 = vadd.f32 %v1793_v4, %v1792_v32  ;;  %v1862_v57 = vsel %vm706_vm2, %v4507_v63, 0.0 }
 0x56c   : > { %v1886_v39 = vmul.f32 %v4505_v48, %v1879_v50  ;;  %v1717_v49 = vrot.slane %v1716_v8, 4  ;;  %2785 = vrcp.f32 %v908_v31  ;;  %v1572_v38 = vadd.f32 %v1571_v3, %v1570_v40  ;;  %v2329_v40 = vld [vmem:[#allocation20] ss:$0 sm:$0xff] }
 0x56d   : > { %v1646_v29 = vadd.f32 %v1645_v17, %v1644_v22  ;;  %v1830_v6 = vrot.slane %v1829_v56, 2  ;;  %v1795_v59 = vrot.slane %v1794_v54, 1  ;;  %v1759_v35 = vadd.f32 %v1758_v33, %v1757_v61 }
 0x56e   : > { %v1888_v42 = vadd.f32 %v1886_v39, %v1872_v0  ;;  %v1718_v34 = vadd.f32 %v1717_v49, %v1716_v8  ;;  %v1609_v32 = vadd.f32 %v1608_v30, %v1607_v58  ;;  %v1573_v55 = vrot.slane %v1572_v38, 1 }
 0x56f   : > { %v1647_v44 = vrot.slane %v1646_v29, 1  ;;  %v1831_v5 = vadd.f32 %v1830_v6, %v1829_v56  ;;  %v2784_v20 = vpop.eup %2783  ;;  %v1796_v2 = vadd.f32 %v1795_v59, %v1794_v54  ;;  %v2789_v54 = vld [vmem:[#allocation2] sm:$0xff]  ;;  %v4509_v59 = vld [vmem:[#allocation37_spill] sm:$0xff] }
 0x570   : > { %1909 = vst.msk [vmem:[#allocation5 + $0x8] sm:$0xff] %vm706_vm2, %v1888_v42  ;;  %v1525_v9 = vpop.permute.xlu0 %1524  ;;  %v1719_v26 = vrot.slane %v1718_v34, 2  ;;  %v1898_v11 = vmul.f32 %v1895_v14, %v1888_v42  ;;  %v909_v39 = vadd.f32 1.0, %v2784_v20  ;;  %v1610_v49 = vrot.slane %v1609_v32, 1  ;;  %v2700_v14 = vld [vmem:[#allocation23 + $0x8] sm:$0xff]  }
 0x571   : > { %v1648_v15 = vadd.f32 %v1647_v44, %v1646_v29  ;;  %v1528_v47 = vmul.f32 %v1525_v9, %v4255_v13  ;;  %v1832_v62 = vrot.slane %v1831_v5, 1  ;;  %v1574_v9 = vadd.f32 %v1573_v55, %v1572_v38  ;;  %2420 = vmatpush3.bf16.msra.mxu0 %v2700_v14 }
 0x572   : > { %v1720_v1 = vadd.f32 %v1719_v26, %v1718_v34  ;;  %v1900_v4 = vsel %vm706_vm2, %v1898_v11, 0.0  ;;  %2787 = vrcp.f32 %v909_v39  ;;  %v1611_v61 = vadd.f32 %v1610_v49, %v1609_v32 }
 0x573   : > { %v1921_v18 = vsel %vm755_vm5, %v1648_v15, %v1685_v46  ;;  %v1530_v12 = vsel %vm706_vm2, %v1528_v47, 0.0  ;;  %v1833_v36 = vadd.f32 %v1832_v62, %v1831_v5  ;;  %v1934_v26 = vmul.f32 %v2789_v54, %v2329_v40 }
 0x574   : > { %v1531_v51 = vadd.f32 %v1530_v12, %v1529_v28  ;;  %v1721_v23 = vrot.slane %v1720_v1, 1 }
 0x575   : > { %v1858_v25 = vpop.permute.xlu0 %1857 }
 0x576   : > { %v1532_v13 = vrot.slane %v1531_v51, 4  ;;  %v1861_v37 = vmul.f32 %v1858_v25, %v1851_v19  ;;  %v1722_v27 = vadd.f32 %v1721_v23, %v1720_v1  ;;  %v2786_v34 = vpop.eup %2785  ;;  %v1935_v23 = vmul.f32 %v2329_v40, %v4509_v59 }
 0x577   : > { %v912_v31 = vmul.f32 %v2786_v34, %v4303_v52 }
 0x578   : > { %v1533_v10 = vadd.f32 %v1532_v13, %v1531_v51  ;;  %v1863_v0 = vsel %vm706_vm2, %v1861_v37, 0.0  ;;  %v1922_v19 = vsel %vm736_vm4, %v1921_v18, %v1722_v27 }
 0x579   : > { %v1864_v22 = vadd.f32 %v1863_v0, %v1862_v57  ;;  %v1923_v21 = vsel %vm712_vm3, %v1922_v19, %v1759_v35 }
 0x57a   : > { %v1534_v56 = vrot.slane %v1533_v10, 2  ;;  %v1891_v17 = vpop.permute.xlu0 %1890  ;;  %v1924_v48 = vsel %vm1913_vm9, %v1923_v21, %v1796_v2 }
 0x57b   : > { %v1865_v50 = vrot.slane %v1864_v22, 4  ;;  %v1897_v24 = vmul.f32 %v1891_v17, %v4508_v45  ;;  %v1925_v7 = vsel %vm1915_vm10, %v1924_v48, %v1833_v36 }
 0x57c   : > { %v1535_v8 = vadd.f32 %v1534_v56, %v1533_v10 }
 0x57d   : > { %v1866_v43 = vadd.f32 %v1865_v50, %v1864_v22  ;;  %v1899_v29 = vsel %vm706_vm2, %v1897_v24, 0.0 }
 0x57e   : > { %v1536_v42 = vrot.slane %v1535_v8, 1  ;;  %v1901_v16 = vadd.f32 %v1900_v4, %v1899_v29 }
 0x57f   : > { %v1867_v6 = vrot.slane %v1866_v43, 2 }
 0x580   : > { %v1537_v44 = vadd.f32 %v1536_v42, %v1535_v8  ;;  %v1902_v58 = vrot.slane %v1901_v16, 4 }
 0x581   : > { %v1868_v46 = vadd.f32 %v1867_v6, %v1866_v43 }
 0x582   : > { %v1916_v15 = vsel %vm1915_vm10, %v4283_v41, %v1537_v44  ;;  %v1903_v47 = vadd.f32 %v1902_v58, %v1901_v16  ;;  %v2788_v41 = vpop.eup %2787 }
 0x583   : > { %v1918_v60 = vsel %vm1917_vm11, %v1916_v15, %v1574_v9  ;;  %v1869_v28 = vrot.slane %v1868_v46, 1  ;;  %v913_v37 = vmul.f32 %v2788_v41, %v4324_v53  ;;  %v2335_v53 = vld [vmem:[#allocation24] ss:$0 sm:$0xff] }
 0x584   : > { %v1904_v5 = vrot.slane %v1903_v47, 2  ;;  %v1920_v18 = vsel %vm1919_vm12, %v1918_v60, %v1611_v61 }
 0x585   : > { %v1870_v12 = vadd.f32 %v1869_v28, %v1868_v46  ;;  %v1936_v3 = vadd.f32 %v1934_v26, %v1920_v18 }
 0x586   : > { %v1905_v1 = vadd.f32 %v1904_v5, %v1903_v47 }
 0x587   : > { %v1926_v51 = vsel %vm1917_vm11, %v1925_v7, %v1870_v12  ;;  %v1938_v30 = vmul.f32 %v1936_v3, %v912_v31 }
 0x588   : > { %v1906_v33 = vrot.slane %v1905_v1, 1 }
 0x589   : > { %1940 = vst.msk [vmem:[#allocation2] sm:$0xff] %vm706_vm2, %v1938_v30 }
 0x58a   : > { %v1907_v25 = vadd.f32 %v1906_v33, %v1905_v1 }
 0x58c   : > { %v1927_v13 = vsel %vm1919_vm12, %v1926_v51, %v1907_v25 }
 0x58d   : > { %v1937_v62 = vadd.f32 %v1935_v23, %v1927_v13 }
 0x58f   : > { %v1939_v63 = vmul.f32 %v1937_v62, %v913_v37 }
 0x590   : > { %v1942_v52 = vld [vmem:[#allocation2] sm:$0xff] }
 0x591   : > { %1941 = vst.msk [vmem:[#allocation2 + $0x8] sm:$0xff] %vm706_vm2, %v1939_v63 }
 0x598   : > { %v1943_v57 = vld [vmem:[#allocation2 + $0x8] sm:$0xff] }
 0x599   : > { %v1952_v38 = vpack.c.bf16 %v1943_v57, %v1942_v52 }
 0x59b   : > { %2414 = vmatmul.mubr.msk.bf16.vlgmr.msra.gmra.mrb[4].mxu1 %vm706_vm2, %v1952_v38 }
 0x66e   : > { %v2014_v27 = vpop.f32.mrb[4].mxu1 }
 0x66f   : > { %v2415_v10 = vpop.f32.mrb[5].mxu1 }
 0x670   : > { %v2017_v0 = vpop.f32.mrb[6].mxu1 }
 0x671   : > { %v2025_v20 = vpack.c.bf16 %v2017_v0, %v2014_v27  ;;  %v2416_v35 = vpop.f32.mrb[7].mxu1 }
 0x673   : > { %2422 = vmatmul.mubr.msk.bf16.vlgmr.msra.gmra.mrb[8].mxu0 %vm604_vm1, %v2025_v20 }
 0x746   : > { %v2082_v11 = vpop.f32.mrb[8].mxu0 }
 0x747   : > { %v2083_v22 = vadd.f32 %v2335_v53, %v2082_v11  ;;  %v2423_v32 = vpop.f32.mrb[9].mxu0 }
 0x748   : > { %v2085_v2 = vpop.f32.mrb[10].mxu0 }
 0x749   : > { %2090 = vst.msk [vmem:[%s583_s25] sm:$0xff] %vm2089_vm13, %v2083_v22  ;;  %v2086_v19 = vadd.f32 %v2335_v53, %v2085_v2  ;;  %v2424_v56 = vpop.f32.mrb[11].mxu0 }
 0x74b   : > { %2091 = vst.msk [vmem:[%s583_s25 + $0x8] sm:$0xff] %vm2089_vm13, %v2086_v19 }
 0x74c   : > { %3141 = shalt.err (!%p3138_p5)
}
 0x74d   : > { %s3142_s25 = scalar_lea.hbm %s4375_s29, 256  ;;  %s3146_s17 = scalar_lea.hbm %s4510_s3, 512 }
 0x74e   : > { %p3143_p2 = scmp.ne.s32.totalorder %s4375_s29, %s3142_s25  ;;  %p3147_p1 = scmp.lt.u32.totalorder %s4375_s29, %s4510_s3 }
 0x74f   : > { %p3148_p11 = scmp.lt.u32.totalorder %s3146_s17, %s3142_s25  ;;  %p3150_p13 = scmp.lt.u32.totalorder %s3142_s25, %s4375_s29 }
 0x750   : > { %p3144_p7 = pnand %p3143_p2, %p4511_p8 }
 0x751   : > { %p3149_p12 = por %p3148_p11, %p3147_p1 }
 0x752   : > { %p3145_p10 = pneg %p3144_p7 }
 0x753   : > { %p3151_p6 = por %p3150_p13, %p3149_p12 }
 0x755   : > { %p3152_p9 = pnand %p3151_p6, %p3145_p10 }
 0x757   : > { %3155 = shalt.err (!%p3152_p9)
}
 0x758   : > { %s3260_s28 = smov 128   ;;  %s3261_s27 = smov 8  }
 0x759   : > { %2487 = dma.vmem_to_hbm [thread:$0]  (%p4511_p8), %s4370_s1, 256, %s4375_s29, %s2093_s15, %s3260_s28, %s3260_s28, %s3261_s27  }
 0x75a PF: > { %s2121_s0 = sand.u32 1, %s3206_s21   ;;  %p4512_p4 = scmp.ne.s32.totalorder %s4472_s18, 0 }
 0x75b   : > { %p4513_p3 = scmp.ge.s32.totalorder %s3218_s24, 2  ;;  %s2122_s25 = scalar_lea.sflag [#allocation8], %s2121_s0 }
 0x75d   : > { %p2528_p0 = pnand %p4513_p3, %p4512_p4 }
 0x75f   : > { %3201 = dma.done.wait (!%p2528_p0), %s2122_s25, 256  }
 0x760   : > { %3203 = vsyncadd (!%p2528_p0), %s2122_s25, 4294967040  ;;  %p31_p5 = scmp.ge.s32.totalorder %s3607_s13, 4   ;;  %s4514_s21 = smov %s3210_s22 }
 0x761   : > { %s4515_s22 = smov %s3214_s23  ;;  %s4516_s23 = smov %s3619_s14 }
 0x762   : > { %s4517_s24 = smov %s3607_s13  ;;  %33 = sbr.rel (!%p31_p5) target bundleno = 16 (0x10), region = 160 }
 0x769   :  { %2127 = vsyncpa [#allocation7], 1 }
 0x76a   :  { %2129 = vsyncpa [#allocation7 + $0x1], 1 }
 0x76b   :  { %2130 = vsyncpa [#allocation10], 1 }
 0x76c   :  { %2131 = vsyncpa [#allocation13], 1 }
 0x76d   :  { %2132 = vsyncpa [#allocation16], 1 }
 0x76e   :  { %2133 = vsyncpa [#allocation19], 1 }
 0x76f   :  { %2134 = vsyncpa [#allocation22], 1 }
 0x770   :  { %2135 = vsyncpa [#allocation25], 1 }
 0x771   :  { %2136 = vsyncpa [#allocation8], 1 }
 0x772   :  { %2138 = vsyncpa [#allocation8 + $0x1], 1 }

// kernel: _lambda_.9
= control target key start
LH: loop header
LB: loop body
LE: loop exit
PB: predicated region body
PF: predicated region fallthrough
CT: control target
= control target key end

     0   :  { %8 = vsyncpa [#allocation3], 0  ;;  %s894_s0 = inlined_call_operand.hbm [shape: f32[2,16,4], index: 0, kind: input, shape index: {}]   ;;  %s895_s1 = inlined_call_operand.hbm [shape: bf16[4,4], index: 1, kind: input, shape index: {}]   ;;  %s896_s2 = inlined_call_operand.hbm [shape: f32[4,1], index: 2, kind: input, shape index: {}]   ;;  %s897_s3 = inlined_call_operand.hbm [shape: f32[2,4,16], index: 3, kind: output, shape index: {}]  }
   0x1   :  { %10 = vsyncpa [#allocation3 + $0x1], 0 }
   0x2   :  { %11 = vsyncpa [#allocation6], 0 }
   0x3   :  { %12 = vsyncpa [#allocation4], 0 }
   0x4   :  { %14 = vsyncpa [#allocation4 + $0x1], 0  ;;  %s664_s12 = smov 0   ;;  %s666_s13 = smov 0  }
   0x5   :  { %s668_s14 = smov 0   ;;  %s670_s15 = smov 0  }
   0x6 LB: > { %s685_s16 = sadd.s32 4294967295, %s633_s15   ;;  %s377_s17 = sadd.s32 4294967294, %s633_s15   ;;  %s633_s15 = sphi %s670_s15, %s922_s15   ;;  %s629_s14 = sphi %s668_s14, %s921_s14   ;;  %s625_s13 = sphi %s666_s13, %s920_s13   ;;  %s621_s12 = sphi %s664_s12, %s919_s12  }
   0x7   : > { %s689_s18 = sadd.s32 1, %s633_s15   ;;  %s27_s19 = sadd.s32 1, %s629_s14 }
   0x8   : > { %s24_s20 = ssub.s32 %s633_s15, %s689_s18  ;;  %p34_p0 = scmp.ne.s32.totalorder %s629_s14, %s625_s13 }
   0x9   : > { %p25_p1 = scmp.eq.s32.totalorder %s24_s20, 0  ;;  %p35_p2 = scmp.eq.s32.totalorder %s633_s15, 0 }
   0xa   : > { %p40_p3 = scmp.ne.s32.totalorder %s625_s13, %s621_s12  ;;  %p898_p4 = scmp.eq.s32.totalorder %s685_s16, 0 }
   0xb   : > { %s701_s21 = scalar_select %p25_p1, %s629_s14, %s27_s19  }
   0xc   : > { %p703_p5 = por %p35_p2, %p34_p0  ;;  %p709_p6 = por %p898_p4, %p40_p3 }
   0xd   : > { %p106_p7 = scmp.eq.s32.totalorder %s685_s16, 1  ;;  %p112_p8 = scmp.eq.s32.totalorder %s377_s17, 1 }
   0xe   : > { %s904_s23 = scalar_select %p709_p6, 1, 0 }
   0xf   : > { %p378_p9 = scmp.ge.s32.totalorder %s633_s15, 1  ;;  %p119_p10 = scmp.lt.s32.totalorder %s633_s15, 3 }
  0x10   : > { %p716_p11 = por %p106_p7, %p34_p0  ;;  %p720_p12 = por %p112_p8, %p40_p3 }
  0x11   : > { %p724_p13 = pnand %p378_p9, %p119_p10  ;;  %s635_s27 = smov [#allocation5]  }
  0x12   : > { %s905_s24 = scalar_select %p716_p11, 1, 0 }
  0x13   : > { %s906_s25 = scalar_select %p720_p12, 1, 0 }
  0x14   : > { %s907_s26 = scalar_select %p724_p13, 1, 0 }
  0x15   : > { %p416_p2 = pneg %p724_p13  ;;  %s132_s28 = sshll.u32 %s635_s27, 4  ;;  %s133_s28 = int_to_ptr.vmem [resolvable:$true] %s132_s28 }
  0x16   : > { %p433_p4 = scmp.lt.s32.totalorder %s633_s15, 2  ;;  %p908_p0 = scmp.eq.s32.totalorder %s685_s16, 0 }
  0x17   : > { %s636_s4 = smov [#allocation7]   ;;  %s477_s8 = scalar_lea.hbm %s895_s1, 32 }
  0x18   : > { %p734_p7 = pnand %p416_p2, %p908_p0  ;;  %p740_p3 = pnand %p433_p4, %p703_p5 }
  0x19   : > { %s143_s5 = sshll.u32 %s636_s4, 4  ;;  %p478_p8 = scmp.ne.s32.totalorder %s895_s1, %s477_s8  ;;  %s744_s5 = int_to_ptr.vmem [resolvable:$true] %s143_s5 }
  0x1a   : > { %s910_s30 = scalar_select %p740_p3, 1, 0 }
  0x1b   : > { %p479_p9 = pneg %p734_p7  ;;  %p484_p10 = scmp.lt.u32.totalorder %s477_s8, %s895_s1 }
  0x1d   : > { %p480_p4 = pnand %p479_p9, %p478_p8 }
  0x1f   : > { %p481_p5 = pneg %p480_p4 }
  0x21   : > { %p486_p2 = pnand %p484_p10, %p481_p5 }
  0x23   : > { %489 = shalt.err (!%p486_p2)
}
  0x24   : > { %s490_s19 = scalar_lea.vmem %s133_s28, 32  ;;  %p498_p11 = scmp.lt.s32.totalorder %s133_s28, %s133_s28 }
  0x25   : > { %p491_p0 = scmp.ne.s32.totalorder %s133_s28, %s490_s19  ;;  %p499_p6 = scmp.lt.s32.totalorder %s490_s19, %s490_s19 }
  0x27   : > { %p493_p1 = pnand %p491_p0, %p479_p9  ;;  %p500_p13 = por %p499_p6, %p498_p11 }
  0x29   : > { %p494_p12 = pneg %p493_p1 }
  0x2b   : > { %p501_p3 = pnand %p500_p13, %p494_p12 }
  0x2d   : > { %504 = shalt.err (!%p501_p3)
}
  0x2e   : > { %419 = dma.hbm_to_vmem [thread:$0]  (!%p734_p7), %s895_s1, 32, %s133_s28, [#allocation6]  }
  0x2f   : > { %s154_s27 = sand.u32 1, %s629_s14   ;;  %s505_s7 = scalar_lea.hbm %s896_s2, 64 }
  0x30   : > { %p506_p1 = scmp.ne.s32.totalorder %s896_s2, %s505_s7  ;;  %p512_p12 = scmp.lt.u32.totalorder %s505_s7, %s896_s2 }
  0x32   : > { %p508_p6 = pnand %p506_p1, %p479_p9 }
  0x34   : > { %p509_p11 = pneg %p508_p6 }
  0x36   : > { %p514_p13 = pnand %p512_p12, %p509_p11 }
  0x38   : > { %517 = shalt.err (!%p514_p13)
}
  0x39   : > { %s518_s28 = scalar_lea.vmem %s744_s5, 64  ;;  %p526_p5 = scmp.lt.s32.totalorder %s744_s5, %s744_s5 }
  0x3a   : > { %p519_p3 = scmp.ne.s32.totalorder %s744_s5, %s518_s28  ;;  %p527_p10 = scmp.lt.s32.totalorder %s518_s28, %s518_s28 }
  0x3c   : > { %p521_p8 = pnand %p519_p3, %p479_p9  ;;  %p528_p2 = por %p527_p10, %p526_p5 }
  0x3e   : > { %p522_p4 = pneg %p521_p8 }
  0x40   : > { %p529_p0 = pnand %p528_p2, %p522_p4 }
  0x42   : > { %532 = shalt.err (!%p529_p0)
}
  0x43   : > { %422 = dma.hbm_to_vmem [thread:$0]  (!%p734_p7), %s896_s2, 64, %s744_s5, [#allocation6]  }
  0x44   : > { %s382_s20 = sshll.u32 %s154_s27, 4  ;;  %s395_s22 = sshll.u32 %s633_s15, 8 }
  0x45   : > { %s798_s7 = scalar_lea.hbm %s894_s0, %s395_s22  ;;  %s158_s29 = scalar_lea.vmem [#allocation2], %s382_s20 }
  0x46   : > { %s165_s8 = sshll.u32 %s158_s29, 4  ;;  %s802_s9 = scalar_lea.sflag [#allocation3], %s154_s27  ;;  %s800_s8 = int_to_ptr.vmem [resolvable:$true] %s165_s8 }
  0x47   : > { %s533_s10 = scalar_lea.hbm %s798_s7, 256  ;;  %p911_p7 = scmp.ne.s32.totalorder %s910_s30, 0 }
  0x48   : > { %p534_p9 = scmp.ne.s32.totalorder %s798_s7, %s533_s10  ;;  %s538_s28 = scalar_lea.hbm %s894_s0, 512 }
  0x49   : > { %p535_p1 = pneg %p911_p7  ;;  %p539_p12 = scmp.lt.u32.totalorder %s798_s7, %s894_s0 }
  0x4a   : > { %p540_p13 = scmp.lt.u32.totalorder %s538_s28, %s533_s10  ;;  %p542_p8 = scmp.lt.u32.totalorder %s533_s10, %s798_s7 }
  0x4b   : > { %p536_p6 = pnand %p535_p1, %p534_p9 }
  0x4c   : > { %p541_p3 = por %p540_p13, %p539_p12 }
  0x4d   : > { %p537_p11 = pneg %p536_p6 }
  0x4e   : > { %p543_p4 = por %p542_p8, %p541_p3 }
  0x50   : > { %p544_p5 = pnand %p543_p4, %p537_p11 }
  0x52   : > { %547 = shalt.err (!%p544_p5)
}
  0x53   : > { %s548_s27 = scalar_lea.vmem %s800_s8, 256  ;;  %s637_s20 = smov [#allocation2]  }
  0x54   : > { %p549_p10 = scmp.ne.s32.totalorder %s800_s8, %s548_s27  ;;  %s553_s22 = sshll.u32 %s637_s20, 4  ;;  %s554_s22 = int_to_ptr.vmem [resolvable:$false] %s553_s22 }
  0x55   : > { %s555_s4 = scalar_lea.vmem %s554_s22, 512  ;;  %p556_p9 = scmp.lt.s32.totalorder %s800_s8, %s554_s22 }
  0x56   : > { %p551_p2 = pnand %p549_p10, %p535_p1  ;;  %p557_p6 = scmp.lt.s32.totalorder %s555_s4, %s548_s27 }
  0x58   : > { %p552_p0 = pneg %p551_p2  ;;  %p558_p12 = por %p557_p6, %p556_p9 }
  0x5a   : > { %p559_p13 = pnand %p558_p12, %p552_p0 }
  0x5c   : > { %562 = shalt.err (!%p559_p13)
}
  0x5d   : > { %s638_s6 = smov 128   ;;  %s639_s29 = smov 8  }
  0x5e   : > { %426 = dma.hbm_to_vmem [thread:$0]  (!%p911_p7), %s798_s7, 256, %s800_s8, %s802_s9, %s638_s6, %s638_s6, %s639_s29  }
  0x5f   : > { %p912_p1 = scmp.ne.s32.totalorder %s907_s26, 0 }
  0x60   : > { %s833_s10 = sand.u32 (!%p912_p1), 1, %s625_s13   ;;  %p913_p11 = scmp.ne.s32.totalorder (!%p912_p1), %s904_s23, 0 }
  0x61   : > { %177 = sbr.rel (%p912_p1) target bundleno = 347 (0x15b), region = 32  ;;  %s386_s5 = sshll.u32 (!%p912_p1), %s833_s10, 4 }
  0x62   : > { %s180_s11 = scalar_lea.sflag (!%p912_p1), [#allocation3], %s833_s10  ;;  %s183_s28 = scalar_lea.vmem (!%p912_p1), [#allocation2], %s386_s5 }
  0x68   : > { %608 = dma.done.wait (%p913_p11), %s180_s11, 256  }
  0x69   : > { %610 = vsyncadd (%p913_p11), %s180_s11, 4294967040  ;;  %p914_p3 = scmp.eq.s32.totalorder %s685_s16, 0 }
  0x6b   : > { %612 = dma.done.wait (%p914_p3), [#allocation6], 96   ;;  %p915_p7 = pmov %p914_p3 }
  0x6c   : > { %v640_v0 = vmov 0.0   ;;  %vm641_vm0 = vmmov 0   ;;  %v642_v1 = vmov 0   ;;  %v216_v2 = vld [vmem:[%s183_s28] sm:$0xff]  ;;  %v217_v3 = vld [vmem:[%s183_s28 + $0x8] sm:$0xff]  ;;  %vm225_vm1 = vcmask 31744  }
  0x6d   : > { %614 = vsyncadd (%p915_p7), [#allocation6], 4294967200  ;;  %398 = vmatprep.subr.bf16.mxu0 %v640_v0  ;;  %400 = vmatprep.mubr.msk.bf16.mxu0 %vm641_vm0, %v640_v0  ;;  %v218_v4 = vpack.c.bf16 %v217_v3, %v216_v2  ;;  %v219_v5 = vld [vmem:[#allocation7] sm:$0xf]  ;;  %v215_v7 = vld [vmem:[#allocation5] sm:$0x3] }
  0x6e   : > { %476 = vset.pattern.permute.xlu0 %v642_v1  ;;  %s389_s23 = sshll.u32 %s833_s10, 2  ;;  %s392_s26 = sshll.u32 %s685_s16, 6  ;;  %vm272_vm2 = vcmask 125952  }
  0x6f   : > { %222 = vperm.xlu0 %476, %v219_v5   ;;  %v230_v6 = vsel %vm225_vm1, %v218_v4, 0  ;;  %s213_s30 = scalar_lea.vmem [#allocation8], %s389_s23  ;;  %s850_s17 = scalar_lea.hbm %s897_s3, %s392_s26 }
  0x70   : > { %399 = vmatpush3.bf16.xpose.msra.mxu0 %v230_v6  ;;  %s288_s7 = sshll.u32 %s213_s30, 4  ;;  %s275_s16 = scalar_lea.sflag [#allocation4], %s833_s10  ;;  %s852_s7 = int_to_ptr.vmem [resolvable:$true] %s288_s7 }
  0x71   : > { %s563_s19 = scalar_lea.vmem %s852_s7, 64  ;;  %p916_p4 = scmp.ne.s32.totalorder %s905_s24, 0 }
  0x72   : > { %p564_p8 = scmp.ne.s32.totalorder %s852_s7, %s563_s19  ;;  %s643_s27 = smov [#allocation8]  }
  0x73   : > { %s567_s20 = sshll.u32 %s643_s27, 4  ;;  %s568_s20 = int_to_ptr.vmem [resolvable:$false] %s567_s20 }
  0x74   : > { %p565_p5 = pnand %p564_p8, %p916_p4  ;;  %s569_s22 = scalar_lea.vmem %s568_s20, 128 }
  0x75   : > { %p570_p2 = scmp.lt.s32.totalorder %s852_s7, %s568_s20  ;;  %p571_p0 = scmp.lt.s32.totalorder %s569_s22, %s563_s19 }
  0x76   : > { %p566_p10 = pneg %p565_p5 }
  0x77   : > { %401 = vmatmul.mubr.msk.bf16.vlgmr.msra.gmra.mrb[0].mxu0 %vm225_vm1, %v215_v7  ;;  %p572_p9 = por %p571_p0, %p570_p2 }
  0x79   : > { %p573_p6 = pnand %p572_p9, %p566_p10 }
  0xee   : > { %v223_v8 = vpop.permute.xlu0 %222 }
 0x14a   : > { %v266_v9 = vpop.f32.mrb[0].mxu0 }
 0x14b   : > { %v267_v10 = vadd.f32 %v266_v9, %v223_v8  ;;  %v402_v11 = vpop.f32.mrb[1].mxu0 }
 0x14c   : > { %v269_v12 = vpop.f32.mrb[2].mxu0 }
 0x14d   : > { %v403_v13 = vpop.f32.mrb[3].mxu0  ;;  %273 = vst.msk [vmem:[%s213_s30] sm:$0xf] %vm272_vm2, %v267_v10 }
 0x14e   : > { %576 = shalt.err (!%p573_p6)
}
 0x14f   : > { %s577_s4 = scalar_lea.hbm %s850_s17, 64  ;;  %s581_s10 = scalar_lea.hbm %s897_s3, 128 }
 0x150   : > { %p578_p12 = scmp.ne.s32.totalorder %s850_s17, %s577_s4  ;;  %p582_p11 = scmp.lt.u32.totalorder %s850_s17, %s897_s3 }
 0x151   : > { %p583_p3 = scmp.lt.u32.totalorder %s581_s10, %s577_s4  ;;  %p585_p8 = scmp.lt.u32.totalorder %s577_s4, %s850_s17 }
 0x152   : > { %p579_p13 = pnand %p578_p12, %p916_p4 }
 0x153   : > { %p584_p7 = por %p583_p3, %p582_p11 }
 0x154   : > { %p580_p1 = pneg %p579_p13 }
 0x155   : > { %p586_p5 = por %p585_p8, %p584_p7 }
 0x157   : > { %p587_p10 = pnand %p586_p5, %p580_p1 }
 0x159   : > { %590 = shalt.err (!%p587_p10)
}
 0x15a   : > { %414 = dma.vmem_to_hbm [thread:$0]  (%p916_p4), %s852_s7, 64, %s850_s17, %s275_s16  }
 0x15b PF: > { %s300_s28 = sand.u32 1, %s621_s12   ;;  %p917_p2 = scmp.ne.s32.totalorder %s906_s25, 0 }
 0x15c   : > { %p918_p0 = scmp.ge.s32.totalorder %s633_s15, 2  ;;  %s301_s23 = scalar_lea.sflag [#allocation4], %s300_s28 }
 0x15e   : > { %p428_p9 = pnand %p918_p0, %p917_p2 }
 0x160   : > { %616 = dma.done.wait (!%p428_p9), %s301_s23, 64  }
 0x161   : > { %618 = vsyncadd (!%p428_p9), %s301_s23, 4294967232  ;;  %p17_p6 = scmp.ge.s32.totalorder %s689_s18, 4   ;;  %s919_s12 = smov %s625_s13 }
 0x162   : > { %s920_s13 = smov %s629_s14  ;;  %s921_s14 = smov %s701_s21 }
 0x163   : > { %s922_s15 = smov %s689_s18  ;;  %19 = sbr.rel (!%p17_p6) target bundleno = 6 (0x6), region = 85 }
 0x16a   :  { %306 = vsyncpa [#allocation3], 1 }
 0x16b   :  { %308 = vsyncpa [#allocation3 + $0x1], 1 }
 0x16c   :  { %309 = vsyncpa [#allocation6], 1 }
 0x16d   :  { %310 = vsyncpa [#allocation4], 1 }
 0x16e   :  { %312 = vsyncpa [#allocation4 + $0x1], 1 }

</bundles_post_ra>
